<compile_context>
chip_gen: v5e
topology: v5e:2x2
jax: 0.10.0
libtpu: 0.0.40
codegen_flags: <defaults>
</compile_context>

<pallas_src>
import functools
import math

import jax
import jax.numpy as jnp
from jax.experimental import pallas as pl
from jax.experimental.pallas import tpu as pltpu


def _round_up(x, m):
    return ((x + m - 1) // m) * m


def _pad_gate_cols(w, H, H_pad):
    """(rows, 4H) -> (rows, 4H_pad), zero-padding each of the 4 gate blocks to H_pad."""
    rows = w.shape[0]
    w4 = w.reshape(rows, 4, H)
    out = jnp.zeros((rows, 4, H_pad), w.dtype).at[:, :, :H].set(w4)
    return out.reshape(rows, 4 * H_pad)


def _pad_rows(w, rows_pad):
    if w.shape[0] == rows_pad:
        return w
    out = jnp.zeros((rows_pad,) + w.shape[1:], w.dtype)
    return out.at[: w.shape[0]].set(w)


def _lm_kernel(num_layers, hidden_pad, t_block, b_block, seq_len, mask_tail, unroll,
               emb_ref, tgt_ref, *rest):
    """grid = (batch_block, time_block). h/c persist in scratch across time blocks."""
    layer_refs = rest[: 3 * num_layers]
    (wout_ref, bout_ref, out_ref,
     gates_sc, xseq_sc, h_sc, c_sc) = rest[3 * num_layers:]

    H = hidden_pad
    t_idx = pl.program_id(1)
    nt = pl.num_programs(1)
    t0 = t_idx * t_block

    @pl.when(t_idx == 0)
    def _init():
        h_sc[...] = jnp.zeros_like(h_sc)
        c_sc[...] = jnp.zeros_like(c_sc)

    for l in range(num_layers):
        wih = layer_refs[3 * l][...]        # (in_dim, 4H_pad)
        whh = layer_refs[3 * l + 1][...]    # (H_pad, 4H_pad)
        bias = layer_refs[3 * l + 2][...]   # (1, 4H_pad)

        # Hoisted input projection for the whole time block: one big MXU matmul.
        src = emb_ref[0] if l == 0 else xseq_sc[...]   # (Tt*B, in_dim)
        gates_sc[...] = (jnp.dot(src, wih, preferred_element_type=jnp.float32)
                         + bias)                       # (Tt*B, 4H_pad)

        def step(s, carry, l=l, whh=whh):
            h_prev = h_sc[l]                            # (B, H_pad)
            c_prev = c_sc[l]
            row = pl.multiple_of(s * b_block, b_block)
            gates = (gates_sc[pl.ds(row, b_block), :]
                     + jnp.dot(h_prev, whh, preferred_element_type=jnp.float32))

            i = jax.nn.sigmoid(gates[:, 0 * H:1 * H])
            f = jax.nn.sigmoid(gates[:, 1 * H:2 * H])
            g = jnp.tanh(gates[:, 2 * H:3 * H])
            o = jax.nn.sigmoid(gates[:, 3 * H:4 * H])

            c_new = f * c_prev + i * g
            h_new = o * jnp.tanh(c_new)

            if mask_tail:  # padded tail time steps must not advance the state
                valid = (t0 + s) < seq_len
                h_new = jnp.where(valid, h_new, h_prev)
                c_new = jnp.where(valid, c_new, c_prev)

            h_sc[l] = h_new
            c_sc[l] = c_new
            if l + 1 < num_layers:
                xseq_sc[pl.ds(row, b_block), :] = h_new
            return carry

        jax.lax.fori_loop(0, t_block, step, 0, unroll=unroll)

    @pl.when(t_idx == nt - 1)
    def _finalize():
        h_top = h_sc[num_layers - 1]                    # (B, H_pad)
        logits = (jnp.dot(h_top, wout_ref[...], preferred_element_type=jnp.float32)
                  + bout_ref[...])                      # (B, V_pad)
        m = jnp.max(logits, axis=-1, keepdims=True)
        lse = jnp.log(jnp.sum(jnp.exp(logits - m), axis=-1, keepdims=True))
        tgt = tgt_ref[...]                              # (B, 1) int32
        iota = jax.lax.broadcasted_iota(jnp.int32, logits.shape, 1)
        tgt_logit = jnp.max(jnp.where(iota == tgt, logits, -jnp.inf),
                            axis=-1, keepdims=True)
        nll = (m + lse) - tgt_logit                     # -log p(target)
        out_ref[...] = jnp.where(tgt == 0, jnp.zeros_like(nll), nll)  # ignore_index=0


def language_model_forward(numeric, params, *, hidden_dim, num_layers, time_block=64):
    """numeric: (T, B) int32 token ids. Returns lastTokenSurprisal, shape (B,) float32."""
    T_real, B_real = numeric.shape
    embedding = params["embedding"]
    emb_dim = embedding.shape[1]
    vocab = params["w_out"].shape[1]

    H = hidden_dim
    H_pad = _round_up(H, 128)
    V_pad = _round_up(vocab, 128)

    # --- torch-forward glue: prepend zero "beginning" row, split input/target ---
    numeric_full = jnp.concatenate(
        [jnp.zeros((1, B_real), dtype=numeric.dtype), numeric], axis=0)   # (T+1, B)
    input_tensor = numeric_full[:-1]
    target_tensor = numeric_full[1:]
    embedded = jnp.take(embedding, input_tensor, axis=0).astype(jnp.float32)  # (T,B,2E)
    tgt_last = target_tensor[-1].astype(jnp.int32)                            # (B,)

    # --- padding / blocking ---
    B_pad = _round_up(B_real, 8)
    nb = 2 if (B_pad % 16 == 0) else 1        # batch blocks (v7x: one per TensorCore)
    B_block = B_pad // nb
    Tt = min(time_block, T_real)
    nt = pl.cdiv(T_real, Tt)
    T_pad = nt * Tt
    mask_tail = (T_pad != T_real)

    emb_p = jnp.zeros((T_pad, B_pad, emb_dim), jnp.float32)
    emb_p = emb_p.at[:T_real, :B_real].set(embedded)
    # (nb, T_pad*B_block, 2E): batch-block major; inside a block rows are (t, b_local).
    emb_arr = (emb_p.reshape(T_pad, nb, B_block, emb_dim)
               .transpose(1, 0, 2, 3)
               .reshape(nb, T_pad * B_block, emb_dim))

    tgt_pad = jnp.zeros((B_pad, 1), jnp.int32).at[:B_real, 0].set(tgt_last)

    # --- lane-aligned, gate-blocked weight padding (zeros; exact math preserved) ---
    layers_p = []
    for li, (wih, whh, b) in enumerate(params["layers"]):
        in_dim = wih.shape[0]
        in_pad = in_dim if li == 0 else H_pad
        wih_p = _pad_rows(_pad_gate_cols(wih, H, H_pad), in_pad)
        whh_p = _pad_rows(_pad_gate_cols(whh, H, H_pad), H_pad)
        b_p = _pad_gate_cols(b, H, H_pad)
        layers_p.append((wih_p, whh_p, b_p))
    w_out_p = jnp.zeros((H_pad, V_pad), jnp.float32).at[:H, :vocab].set(params["w_out"])
    b_out_p = jnp.full((1, V_pad), -1e30, jnp.float32).at[:, :vocab].set(params["b_out"])

    flat_weights = []
    in_specs = [
        pl.BlockSpec((1, Tt * B_block, emb_dim), lambda bb, tt: (bb, tt, 0)),
        pl.BlockSpec((B_block, 1), lambda bb, tt: (bb, 0)),
    ]
    for (wih, whh, b) in layers_p:
        for w in (wih, whh, b):
            flat_weights.append(w)
            in_specs.append(pl.BlockSpec(w.shape, lambda bb, tt: (0, 0)))
    for w in (w_out_p, b_out_p):
        flat_weights.append(w)
        in_specs.append(pl.BlockSpec(w.shape, lambda bb, tt: (0, 0)))

    unroll = Tt if Tt <= 16 else 8
    kernel = functools.partial(
        _lm_kernel, num_layers, H_pad, Tt, B_block, T_real, mask_tail, unroll)

    # VMEM budget: double-buffered inputs + scratch, with headroom.
    f32b = 4
    weight_bytes = sum(int(w.size) * f32b for w in flat_weights)
    block_bytes = (2 * Tt * B_block * emb_dim * f32b
                   + Tt * B_block * 4 * H_pad * f32b
                   + Tt * B_block * H_pad * f32b
                   + 2 * num_layers * B_block * H_pad * f32b
                   + 2 * weight_bytes)
    vmem_limit = int(min(max(2 * block_bytes, 32 * 1024 * 1024), 56 * 1024 * 1024))

    out = pl.pallas_call(
        kernel,
        out_shape=jax.ShapeDtypeStruct((B_pad, 1), jnp.float32),
        grid_spec=pltpu.PrefetchScalarGridSpec(
            num_scalar_prefetch=0,
            grid=(nb, nt),
            in_specs=in_specs,
            out_specs=pl.BlockSpec((B_block, 1), lambda bb, tt: (bb, 0)),
            scratch_shapes=[
                pltpu.VMEM((Tt * B_block, 4 * H_pad), jnp.float32),      # gate pre-acts
                pltpu.VMEM((Tt * B_block, H_pad), jnp.float32),          # layer out seq
                pltpu.VMEM((num_layers, B_block, H_pad), jnp.float32),   # h per layer
                pltpu.VMEM((num_layers, B_block, H_pad), jnp.float32),   # c per layer
            ],
        ),
        compiler_params=pltpu.CompilerParams(
            dimension_semantics=("parallel", "arbitrary"),   # batch parallel, time seq
            vmem_limit_bytes=vmem_limit),
    )(emb_arr, tgt_pad, *flat_weights)

    return out[:B_real, 0]


def init_params(key, vocab, emb_dim, hidden_dim, num_layers):
    keys = iter(jax.random.split(key, 4 + 4 * num_layers))
    k = 1.0 / math.sqrt(hidden_dim)
    embedding = jax.random.normal(next(keys), (vocab, emb_dim), dtype=jnp.float32)
    layers = []
    in_dim = emb_dim
    for _ in range(num_layers):
        wih = jax.random.uniform(next(keys), (in_dim, 4 * hidden_dim), jnp.float32, -k, k)
        whh = jax.random.uniform(next(keys), (hidden_dim, 4 * hidden_dim), jnp.float32, -k, k)
        b_ih = jax.random.uniform(next(keys), (1, 4 * hidden_dim), jnp.float32, -k, k)
        b_hh = jax.random.uniform(next(keys), (1, 4 * hidden_dim), jnp.float32, -k, k)
        layers.append((wih, whh, b_ih + b_hh))
        in_dim = hidden_dim
    w_out = jax.random.uniform(next(keys), (hidden_dim, vocab), jnp.float32, -k, k)
    b_out = jax.random.uniform(next(keys), (1, vocab), jnp.float32, -k, k)
    return {"embedding": embedding, "layers": layers, "w_out": w_out, "b_out": b_out}


def reference_forward(numeric, params, *, hidden_dim, num_layers):
    """Pure-JAX reference of the same forward pass (for validation)."""
    T, B = numeric.shape
    H = hidden_dim
    numeric_full = jnp.concatenate(
        [jnp.zeros((1, B), dtype=numeric.dtype), numeric], axis=0)
    inp, tgt = numeric_full[:-1], numeric_full[1:]
    x = jnp.take(params["embedding"], inp, axis=0).astype(jnp.float32)  # (T, B, 2E)

    for (wih, whh, b) in params["layers"]:
        def cell(carry, xt):
            h, c = carry
            gates = xt @ wih + h @ whh + b
            i = jax.nn.sigmoid(gates[:, 0 * H:1 * H])
            f = jax.nn.sigmoid(gates[:, 1 * H:2 * H])
            g = jnp.tanh(gates[:, 2 * H:3 * H])
            o = jax.nn.sigmoid(gates[:, 3 * H:4 * H])
            c_new = f * c + i * g
            h_new = o * jnp.tanh(c_new)
            return (h_new, c_new), h_new
        init = (jnp.zeros((B, H), jnp.float32), jnp.zeros((B, H), jnp.float32))
        _, x = jax.lax.scan(cell, init, x)

    logits = x[-1] @ params["w_out"] + params["b_out"]          # (B, V)
    log_probs = jax.nn.log_softmax(logits, axis=-1)
    tl = tgt[-1]
    nll = -jnp.take_along_axis(log_probs, tl[:, None].astype(jnp.int32), axis=1)[:, 0]
    return jnp.where(tl == 0, 0.0, nll)


if __name__ == "__main__":
    # Small synthetic config (stands in for args.*):
    word_embedding_size = 16          # 2E = 32
    emb_dim = 2 * word_embedding_size
    hidden_dim_lm = 32
    layer_num = 2
    vocab = 64                        # len(itos) + 3

    key = jax.random.PRNGKey(0)
    k_params, k_data1, k_data2 = jax.random.split(key, 3)
    params = init_params(k_params, vocab, emb_dim, hidden_dim_lm, layer_num)

    # Config 1: batchSize*SAMPLES_PER_BATCH = 8, T = 8 (single time/batch block).
    B1, T1 = 8, 8
    numeric1 = jax.random.randint(k_data1, (T1, B1), 0, vocab, dtype=jnp.int32)
    surprisal1 = jax.block_until_ready(language_model_forward(
        numeric1, params, hidden_dim=hidden_dim_lm, num_layers=layer_num))
    ref1 = jax.block_until_ready(reference_forward(
        numeric1, params, hidden_dim=hidden_dim_lm, num_layers=layer_num))
    assert surprisal1.shape == (B1,)
    assert jnp.allclose(surprisal1, ref1, atol=1e-3, rtol=1e-3), (surprisal1, ref1)

    # Config 2: exercises multi time block + tail masking + 2 batch blocks.
    B2, T2 = 16, 20
    numeric2 = jax.random.randint(k_data2, (T2, B2), 0, vocab, dtype=jnp.int32)
    surprisal2 = jax.block_until_ready(language_model_forward(
        numeric2, params, hidden_dim=hidden_dim_lm, num_layers=layer_num,
        time_block=8))
    ref2 = jax.block_until_ready(reference_forward(
        numeric2, params, hidden_dim=hidden_dim_lm, num_layers=layer_num))
    assert surprisal2.shape == (B2,)
    assert jnp.allclose(surprisal2, ref2, atol=1e-3, rtol=1e-3), (surprisal2, ref2)

    print("KERNEL_OK")
</pallas_src>

<mosaic_0001>
module attributes {stable_mosaic.version = 11 : i64} {
  func.func @_lm_kernel(%arg0: i32, %arg1: i32, %arg2: memref<1x64x32xf32, #tpu.memory_space<vmem>>, %arg3: memref<8x1xi32, #tpu.memory_space<vmem>>, %arg4: memref<32x512xf32, #tpu.memory_space<vmem>>, %arg5: memref<128x512xf32, #tpu.memory_space<vmem>>, %arg6: memref<1x512xf32, #tpu.memory_space<vmem>>, %arg7: memref<128x512xf32, #tpu.memory_space<vmem>>, %arg8: memref<128x512xf32, #tpu.memory_space<vmem>>, %arg9: memref<1x512xf32, #tpu.memory_space<vmem>>, %arg10: memref<128x128xf32, #tpu.memory_space<vmem>>, %arg11: memref<1x128xf32, #tpu.memory_space<vmem>>, %arg12: memref<8x1xf32, #tpu.memory_space<vmem>>, %arg13: memref<64x512xf32, #tpu.memory_space<vmem>>, %arg14: memref<64x128xf32, #tpu.memory_space<vmem>>, %arg15: memref<2x8x128xf32, #tpu.memory_space<vmem>>, %arg16: memref<2x8x128xf32, #tpu.memory_space<vmem>>) attributes {dimension_semantics = [#tpu.dimension_semantics<parallel>, #tpu.dimension_semantics<arbitrary>], iteration_bounds = array<i64: 1, 1>, scalar_prefetch = 0 : i64, scratch_operands = 4 : i64, tpu.core_type = #tpu.core_type<tc>, window_params = [{transform_indices = @transform_0, window_bounds = array<i64: 1, 64, 32>}, {transform_indices = @transform_1, window_bounds = array<i64: 8, 1>}, {pipeline_mode = #tpu.pipeline_mode<synchronous>, transform_indices = @transform_2, window_bounds = array<i64: 32, 512>}, {pipeline_mode = #tpu.pipeline_mode<synchronous>, transform_indices = @transform_3, window_bounds = array<i64: 128, 512>}, {pipeline_mode = #tpu.pipeline_mode<synchronous>, transform_indices = @transform_4, window_bounds = array<i64: 1, 512>}, {pipeline_mode = #tpu.pipeline_mode<synchronous>, transform_indices = @transform_5, window_bounds = array<i64: 128, 512>}, {pipeline_mode = #tpu.pipeline_mode<synchronous>, transform_indices = @transform_6, window_bounds = array<i64: 128, 512>}, {pipeline_mode = #tpu.pipeline_mode<synchronous>, transform_indices = @transform_7, window_bounds = array<i64: 1, 512>}, {pipeline_mode = #tpu.pipeline_mode<synchronous>, transform_indices = @transform_8, window_bounds = array<i64: 128, 128>}, {pipeline_mode = #tpu.pipeline_mode<synchronous>, transform_indices = @transform_9, window_bounds = array<i64: 1, 128>}, {transform_indices = @transform_10, window_bounds = array<i64: 8, 1>}]} {
    %c0_i32 = arith.constant 0 : i32
    %0 = arith.cmpi eq, %arg1, %c0_i32 : i32
    %1 = arith.extui %0 : i1 to i32
    %c0_i32_0 = arith.constant 0 : i32
    %2 = arith.cmpi ne, %1, %c0_i32_0 : i32
    scf.if %2 {
      %cst_329 = arith.constant 0.000000e+00 : f32
      %695 = vector.broadcast %cst_329 : f32 to vector<2x8x128xf32>
      %c0_330 = arith.constant 0 : index
      %c0_331 = arith.constant 0 : index
      %c0_332 = arith.constant 0 : index
      %696 = vector.load %arg15[%c0_330, %c0_331, %c0_332] : memref<2x8x128xf32, #tpu.memory_space<vmem>>, vector<2x8x128xf32>
      tpu.vector_store %arg15[%c0_330, %c0_331, %c0_332], %695 {strides = array<i32>} : memref<2x8x128xf32, #tpu.memory_space<vmem>>, vector<2x8x128xf32>,
      %cst_333 = arith.constant 0.000000e+00 : f32
      %697 = vector.broadcast %cst_333 : f32 to vector<2x8x128xf32>
      %c0_334 = arith.constant 0 : index
      %c0_335 = arith.constant 0 : index
      %c0_336 = arith.constant 0 : index
      %698 = vector.load %arg16[%c0_334, %c0_335, %c0_336] : memref<2x8x128xf32, #tpu.memory_space<vmem>>, vector<2x8x128xf32>
      tpu.vector_store %arg16[%c0_334, %c0_335, %c0_336], %697 {strides = array<i32>} : memref<2x8x128xf32, #tpu.memory_space<vmem>>, vector<2x8x128xf32>,
    } else {
    }
    %c0 = arith.constant 0 : index
    %c0_1 = arith.constant 0 : index
    %3 = vector.load %arg4[%c0, %c0_1] : memref<32x512xf32, #tpu.memory_space<vmem>>, vector<32x512xf32>
    %c0_2 = arith.constant 0 : index
    %c0_3 = arith.constant 0 : index
    %4 = vector.load %arg5[%c0_2, %c0_3] : memref<128x512xf32, #tpu.memory_space<vmem>>, vector<128x512xf32>
    %c0_4 = arith.constant 0 : index
    %c0_5 = arith.constant 0 : index
    %5 = vector.load %arg6[%c0_4, %c0_5] : memref<1x512xf32, #tpu.memory_space<vmem>>, vector<1x512xf32>
    %c0_6 = arith.constant 0 : index
    %c0_7 = arith.constant 0 : index
    %c0_8 = arith.constant 0 : index
    %6 = vector.load %arg2[%c0_6, %c0_7, %c0_8] : memref<1x64x32xf32, #tpu.memory_space<vmem>>, vector<1x64x32xf32>
    %7 = vector.shape_cast %6 : vector<1x64x32xf32> to vector<64x32xf32>
    %cst = arith.constant dense<0.000000e+00> : vector<64x512xf32>
    %8 = tpu.matmul %7, %3, %cst {dimension_numbers = #tpu.dot_dimension_numbers<[1], [0], [0], [1], [0, 0, 1, 1], [], []>} : vector<64x32xf32>, vector<32x512xf32>, vector<64x512xf32> -> vector<64x512xf32>
    %9 = vector.broadcast %5 : vector<1x512xf32> to vector<64x512xf32>
    %10 = arith.addf %8, %9 : vector<64x512xf32>
    %c0_9 = arith.constant 0 : index
    %c0_10 = arith.constant 0 : index
    %11 = vector.load %arg13[%c0_9, %c0_10] : memref<64x512xf32, #tpu.memory_space<vmem>>, vector<64x512xf32>
    tpu.vector_store %arg13[%c0_9, %c0_10], %10 {strides = array<i32>} : memref<64x512xf32, #tpu.memory_space<vmem>>, vector<64x512xf32>,
    %c0_i32_11 = arith.constant 0 : i32
    %c0_12 = arith.constant 0 : index
    %c0_13 = arith.constant 0 : index
    %c0_14 = arith.constant 0 : index
    %12 = vector.load %arg15[%c0_12, %c0_13, %c0_14] : memref<2x8x128xf32, #tpu.memory_space<vmem>>, vector<1x8x128xf32>
    %13 = vector.shape_cast %12 : vector<1x8x128xf32> to vector<8x128xf32>
    %c0_15 = arith.constant 0 : index
    %c0_16 = arith.constant 0 : index
    %c0_17 = arith.constant 0 : index
    %14 = vector.load %arg16[%c0_15, %c0_16, %c0_17] : memref<2x8x128xf32, #tpu.memory_space<vmem>>, vector<1x8x128xf32>
    %15 = vector.shape_cast %14 : vector<1x8x128xf32> to vector<8x128xf32>
    %c8_i32 = arith.constant 8 : i32
    %16 = arith.muli %c0_i32_11, %c8_i32 : i32
    %17 = tpu.assume_multiple %16, 8 : i32
    %18 = arith.index_cast %17 : i32 to index
    %c0_18 = arith.constant 0 : index
    %19 = vector.load %arg13[%18, %c0_18] : memref<64x512xf32, #tpu.memory_space<vmem>>, vector<8x512xf32>
    %cst_19 = arith.constant dense<0.000000e+00> : vector<8x512xf32>
    %20 = tpu.matmul %13, %4, %cst_19 {dimension_numbers = #tpu.dot_dimension_numbers<[1], [0], [0], [1], [0, 0, 1, 1], [], []>} : vector<8x128xf32>, vector<128x512xf32>, vector<8x512xf32> -> vector<8x512xf32>
    %21 = arith.addf %19, %20 : vector<8x512xf32>
    %22 = vector.extract_strided_slice %21 {offsets = [0, 0], sizes = [8, 128], strides = [1, 1]} : vector<8x512xf32> to vector<8x128xf32>
    %23 = arith.negf %22 : vector<8x128xf32>
    %24 = math.exp %23 : vector<8x128xf32>
    %cst_20 = arith.constant 1.000000e+00 : f32
    %25 = vector.broadcast %cst_20 : f32 to vector<8x128xf32>
    %26 = arith.addf %25, %24 : vector<8x128xf32>
    %27 = arith.divf %25, %26 : vector<8x128xf32>
    %28 = vector.extract_strided_slice %21 {offsets = [0, 128], sizes = [8, 128], strides = [1, 1]} : vector<8x512xf32> to vector<8x128xf32>
    %29 = arith.negf %28 : vector<8x128xf32>
    %30 = math.exp %29 : vector<8x128xf32>
    %cst_21 = arith.constant 1.000000e+00 : f32
    %31 = vector.broadcast %cst_21 : f32 to vector<8x128xf32>
    %32 = arith.addf %31, %30 : vector<8x128xf32>
    %33 = arith.divf %31, %32 : vector<8x128xf32>
    %34 = vector.extract_strided_slice %21 {offsets = [0, 256], sizes = [8, 128], strides = [1, 1]} : vector<8x512xf32> to vector<8x128xf32>
    %35 = math.tanh %34 : vector<8x128xf32>
    %36 = vector.extract_strided_slice %21 {offsets = [0, 384], sizes = [8, 128], strides = [1, 1]} : vector<8x512xf32> to vector<8x128xf32>
    %37 = arith.negf %36 : vector<8x128xf32>
    %38 = math.exp %37 : vector<8x128xf32>
    %cst_22 = arith.constant 1.000000e+00 : f32
    %39 = vector.broadcast %cst_22 : f32 to vector<8x128xf32>
    %40 = arith.addf %39, %38 : vector<8x128xf32>
    %41 = arith.divf %39, %40 : vector<8x128xf32>
    %42 = arith.mulf %33, %15 : vector<8x128xf32>
    %43 = arith.mulf %27, %35 : vector<8x128xf32>
    %44 = arith.addf %42, %43 : vector<8x128xf32>
    %45 = math.tanh %44 : vector<8x128xf32>
    %46 = arith.mulf %41, %45 : vector<8x128xf32>
    %c0_23 = arith.constant 0 : index
    %c0_24 = arith.constant 0 : index
    %c0_25 = arith.constant 0 : index
    %47 = vector.load %arg15[%c0_23, %c0_24, %c0_25] : memref<2x8x128xf32, #tpu.memory_space<vmem>>, vector<1x8x128xf32>
    %48 = vector.shape_cast %47 : vector<1x8x128xf32> to vector<8x128xf32>
    %49 = vector.shape_cast %46 : vector<8x128xf32> to vector<1x8x128xf32>
    tpu.vector_store %arg15[%c0_23, %c0_24, %c0_25], %49 {strides = array<i32>} : memref<2x8x128xf32, #tpu.memory_space<vmem>>, vector<1x8x128xf32>,
    %c0_26 = arith.constant 0 : index
    %c0_27 = arith.constant 0 : index
    %c0_28 = arith.constant 0 : index
    %50 = vector.load %arg16[%c0_26, %c0_27, %c0_28] : memref<2x8x128xf32, #tpu.memory_space<vmem>>, vector<1x8x128xf32>
    %51 = vector.shape_cast %50 : vector<1x8x128xf32> to vector<8x128xf32>
    %52 = vector.shape_cast %44 : vector<8x128xf32> to vector<1x8x128xf32>
    tpu.vector_store %arg16[%c0_26, %c0_27, %c0_28], %52 {strides = array<i32>} : memref<2x8x128xf32, #tpu.memory_space<vmem>>, vector<1x8x128xf32>,
    %53 = arith.index_cast %17 : i32 to index
    %c0_29 = arith.constant 0 : index
    %54 = vector.load %arg14[%53, %c0_29] : memref<64x128xf32, #tpu.memory_space<vmem>>, vector<8x128xf32>
    tpu.vector_store %arg14[%53, %c0_29], %46 {strides = array<i32>} : memref<64x128xf32, #tpu.memory_space<vmem>>, vector<8x128xf32>,
    %c1_i32 = arith.constant 1 : i32
    %c0_30 = arith.constant 0 : index
    %c0_31 = arith.constant 0 : index
    %c0_32 = arith.constant 0 : index
    %55 = vector.load %arg15[%c0_30, %c0_31, %c0_32] : memref<2x8x128xf32, #tpu.memory_space<vmem>>, vector<1x8x128xf32>
    %56 = vector.shape_cast %55 : vector<1x8x128xf32> to vector<8x128xf32>
    %c0_33 = arith.constant 0 : index
    %c0_34 = arith.constant 0 : index
    %c0_35 = arith.constant 0 : index
    %57 = vector.load %arg16[%c0_33, %c0_34, %c0_35] : memref<2x8x128xf32, #tpu.memory_space<vmem>>, vector<1x8x128xf32>
    %58 = vector.shape_cast %57 : vector<1x8x128xf32> to vector<8x128xf32>
    %c8_i32_36 = arith.constant 8 : i32
    %59 = arith.muli %c1_i32, %c8_i32_36 : i32
    %60 = tpu.assume_multiple %59, 8 : i32
    %61 = arith.index_cast %60 : i32 to index
    %c0_37 = arith.constant 0 : index
    %62 = vector.load %arg13[%61, %c0_37] : memref<64x512xf32, #tpu.memory_space<vmem>>, vector<8x512xf32>
    %cst_38 = arith.constant dense<0.000000e+00> : vector<8x512xf32>
    %63 = tpu.matmul %56, %4, %cst_38 {dimension_numbers = #tpu.dot_dimension_numbers<[1], [0], [0], [1], [0, 0, 1, 1], [], []>} : vector<8x128xf32>, vector<128x512xf32>, vector<8x512xf32> -> vector<8x512xf32>
    %64 = arith.addf %62, %63 : vector<8x512xf32>
    %65 = vector.extract_strided_slice %64 {offsets = [0, 0], sizes = [8, 128], strides = [1, 1]} : vector<8x512xf32> to vector<8x128xf32>
    %66 = arith.negf %65 : vector<8x128xf32>
    %67 = math.exp %66 : vector<8x128xf32>
    %cst_39 = arith.constant 1.000000e+00 : f32
    %68 = vector.broadcast %cst_39 : f32 to vector<8x128xf32>
    %69 = arith.addf %68, %67 : vector<8x128xf32>
    %70 = arith.divf %68, %69 : vector<8x128xf32>
    %71 = vector.extract_strided_slice %64 {offsets = [0, 128], sizes = [8, 128], strides = [1, 1]} : vector<8x512xf32> to vector<8x128xf32>
    %72 = arith.negf %71 : vector<8x128xf32>
    %73 = math.exp %72 : vector<8x128xf32>
    %cst_40 = arith.constant 1.000000e+00 : f32
    %74 = vector.broadcast %cst_40 : f32 to vector<8x128xf32>
    %75 = arith.addf %74, %73 : vector<8x128xf32>
    %76 = arith.divf %74, %75 : vector<8x128xf32>
    %77 = vector.extract_strided_slice %64 {offsets = [0, 256], sizes = [8, 128], strides = [1, 1]} : vector<8x512xf32> to vector<8x128xf32>
    %78 = math.tanh %77 : vector<8x128xf32>
    %79 = vector.extract_strided_slice %64 {offsets = [0, 384], sizes = [8, 128], strides = [1, 1]} : vector<8x512xf32> to vector<8x128xf32>
    %80 = arith.negf %79 : vector<8x128xf32>
    %81 = math.exp %80 : vector<8x128xf32>
    %cst_41 = arith.constant 1.000000e+00 : f32
    %82 = vector.broadcast %cst_41 : f32 to vector<8x128xf32>
    %83 = arith.addf %82, %81 : vector<8x128xf32>
    %84 = arith.divf %82, %83 : vector<8x128xf32>
    %85 = arith.mulf %76, %58 : vector<8x128xf32>
    %86 = arith.mulf %70, %78 : vector<8x128xf32>
    %87 = arith.addf %85, %86 : vector<8x128xf32>
    %88 = math.tanh %87 : vector<8x128xf32>
    %89 = arith.mulf %84, %88 : vector<8x128xf32>
    %c0_42 = arith.constant 0 : index
    %c0_43 = arith.constant 0 : index
    %c0_44 = arith.constant 0 : index
    %90 = vector.load %arg15[%c0_42, %c0_43, %c0_44] : memref<2x8x128xf32, #tpu.memory_space<vmem>>, vector<1x8x128xf32>
    %91 = vector.shape_cast %90 : vector<1x8x128xf32> to vector<8x128xf32>
    %92 = vector.shape_cast %89 : vector<8x128xf32> to vector<1x8x128xf32>
    tpu.vector_store %arg15[%c0_42, %c0_43, %c0_44], %92 {strides = array<i32>} : memref<2x8x128xf32, #tpu.memory_space<vmem>>, vector<1x8x128xf32>,
    %c0_45 = arith.constant 0 : index
    %c0_46 = arith.constant 0 : index
    %c0_47 = arith.constant 0 : index
    %93 = vector.load %arg16[%c0_45, %c0_46, %c0_47] : memref<2x8x128xf32, #tpu.memory_space<vmem>>, vector<1x8x128xf32>
    %94 = vector.shape_cast %93 : vector<1x8x128xf32> to vector<8x128xf32>
    %95 = vector.shape_cast %87 : vector<8x128xf32> to vector<1x8x128xf32>
    tpu.vector_store %arg16[%c0_45, %c0_46, %c0_47], %95 {strides = array<i32>} : memref<2x8x128xf32, #tpu.memory_space<vmem>>, vector<1x8x128xf32>,
    %96 = arith.index_cast %60 : i32 to index
    %c0_48 = arith.constant 0 : index
    %97 = vector.load %arg14[%96, %c0_48] : memref<64x128xf32, #tpu.memory_space<vmem>>, vector<8x128xf32>
    tpu.vector_store %arg14[%96, %c0_48], %89 {strides = array<i32>} : memref<64x128xf32, #tpu.memory_space<vmem>>, vector<8x128xf32>,
    %c2_i32 = arith.constant 2 : i32
    %c0_49 = arith.constant 0 : index
    %c0_50 = arith.constant 0 : index
    %c0_51 = arith.constant 0 : index
    %98 = vector.load %arg15[%c0_49, %c0_50, %c0_51] : memref<2x8x128xf32, #tpu.memory_space<vmem>>, vector<1x8x128xf32>
    %99 = vector.shape_cast %98 : vector<1x8x128xf32> to vector<8x128xf32>
    %c0_52 = arith.constant 0 : index
    %c0_53 = arith.constant 0 : index
    %c0_54 = arith.constant 0 : index
    %100 = vector.load %arg16[%c0_52, %c0_53, %c0_54] : memref<2x8x128xf32, #tpu.memory_space<vmem>>, vector<1x8x128xf32>
    %101 = vector.shape_cast %100 : vector<1x8x128xf32> to vector<8x128xf32>
    %c8_i32_55 = arith.constant 8 : i32
    %102 = arith.muli %c2_i32, %c8_i32_55 : i32
    %103 = tpu.assume_multiple %102, 8 : i32
    %104 = arith.index_cast %103 : i32 to index
    %c0_56 = arith.constant 0 : index
    %105 = vector.load %arg13[%104, %c0_56] : memref<64x512xf32, #tpu.memory_space<vmem>>, vector<8x512xf32>
    %cst_57 = arith.constant dense<0.000000e+00> : vector<8x512xf32>
    %106 = tpu.matmul %99, %4, %cst_57 {dimension_numbers = #tpu.dot_dimension_numbers<[1], [0], [0], [1], [0, 0, 1, 1], [], []>} : vector<8x128xf32>, vector<128x512xf32>, vector<8x512xf32> -> vector<8x512xf32>
    %107 = arith.addf %105, %106 : vector<8x512xf32>
    %108 = vector.extract_strided_slice %107 {offsets = [0, 0], sizes = [8, 128], strides = [1, 1]} : vector<8x512xf32> to vector<8x128xf32>
    %109 = arith.negf %108 : vector<8x128xf32>
    %110 = math.exp %109 : vector<8x128xf32>
    %cst_58 = arith.constant 1.000000e+00 : f32
    %111 = vector.broadcast %cst_58 : f32 to vector<8x128xf32>
    %112 = arith.addf %111, %110 : vector<8x128xf32>
    %113 = arith.divf %111, %112 : vector<8x128xf32>
    %114 = vector.extract_strided_slice %107 {offsets = [0, 128], sizes = [8, 128], strides = [1, 1]} : vector<8x512xf32> to vector<8x128xf32>
    %115 = arith.negf %114 : vector<8x128xf32>
    %116 = math.exp %115 : vector<8x128xf32>
    %cst_59 = arith.constant 1.000000e+00 : f32
    %117 = vector.broadcast %cst_59 : f32 to vector<8x128xf32>
    %118 = arith.addf %117, %116 : vector<8x128xf32>
    %119 = arith.divf %117, %118 : vector<8x128xf32>
    %120 = vector.extract_strided_slice %107 {offsets = [0, 256], sizes = [8, 128], strides = [1, 1]} : vector<8x512xf32> to vector<8x128xf32>
    %121 = math.tanh %120 : vector<8x128xf32>
    %122 = vector.extract_strided_slice %107 {offsets = [0, 384], sizes = [8, 128], strides = [1, 1]} : vector<8x512xf32> to vector<8x128xf32>
    %123 = arith.negf %122 : vector<8x128xf32>
    %124 = math.exp %123 : vector<8x128xf32>
    %cst_60 = arith.constant 1.000000e+00 : f32
    %125 = vector.broadcast %cst_60 : f32 to vector<8x128xf32>
    %126 = arith.addf %125, %124 : vector<8x128xf32>
    %127 = arith.divf %125, %126 : vector<8x128xf32>
    %128 = arith.mulf %119, %101 : vector<8x128xf32>
    %129 = arith.mulf %113, %121 : vector<8x128xf32>
    %130 = arith.addf %128, %129 : vector<8x128xf32>
    %131 = math.tanh %130 : vector<8x128xf32>
    %132 = arith.mulf %127, %131 : vector<8x128xf32>
    %c0_61 = arith.constant 0 : index
    %c0_62 = arith.constant 0 : index
    %c0_63 = arith.constant 0 : index
    %133 = vector.load %arg15[%c0_61, %c0_62, %c0_63] : memref<2x8x128xf32, #tpu.memory_space<vmem>>, vector<1x8x128xf32>
    %134 = vector.shape_cast %133 : vector<1x8x128xf32> to vector<8x128xf32>
    %135 = vector.shape_cast %132 : vector<8x128xf32> to vector<1x8x128xf32>
    tpu.vector_store %arg15[%c0_61, %c0_62, %c0_63], %135 {strides = array<i32>} : memref<2x8x128xf32, #tpu.memory_space<vmem>>, vector<1x8x128xf32>,
    %c0_64 = arith.constant 0 : index
    %c0_65 = arith.constant 0 : index
    %c0_66 = arith.constant 0 : index
    %136 = vector.load %arg16[%c0_64, %c0_65, %c0_66] : memref<2x8x128xf32, #tpu.memory_space<vmem>>, vector<1x8x128xf32>
    %137 = vector.shape_cast %136 : vector<1x8x128xf32> to vector<8x128xf32>
    %138 = vector.shape_cast %130 : vector<8x128xf32> to vector<1x8x128xf32>
    tpu.vector_store %arg16[%c0_64, %c0_65, %c0_66], %138 {strides = array<i32>} : memref<2x8x128xf32, #tpu.memory_space<vmem>>, vector<1x8x128xf32>,
    %139 = arith.index_cast %103 : i32 to index
    %c0_67 = arith.constant 0 : index
    %140 = vector.load %arg14[%139, %c0_67] : memref<64x128xf32, #tpu.memory_space<vmem>>, vector<8x128xf32>
    tpu.vector_store %arg14[%139, %c0_67], %132 {strides = array<i32>} : memref<64x128xf32, #tpu.memory_space<vmem>>, vector<8x128xf32>,
    %c3_i32 = arith.constant 3 : i32
    %c0_68 = arith.constant 0 : index
    %c0_69 = arith.constant 0 : index
    %c0_70 = arith.constant 0 : index
    %141 = vector.load %arg15[%c0_68, %c0_69, %c0_70] : memref<2x8x128xf32, #tpu.memory_space<vmem>>, vector<1x8x128xf32>
    %142 = vector.shape_cast %141 : vector<1x8x128xf32> to vector<8x128xf32>
    %c0_71 = arith.constant 0 : index
    %c0_72 = arith.constant 0 : index
    %c0_73 = arith.constant 0 : index
    %143 = vector.load %arg16[%c0_71, %c0_72, %c0_73] : memref<2x8x128xf32, #tpu.memory_space<vmem>>, vector<1x8x128xf32>
    %144 = vector.shape_cast %143 : vector<1x8x128xf32> to vector<8x128xf32>
    %c8_i32_74 = arith.constant 8 : i32
    %145 = arith.muli %c3_i32, %c8_i32_74 : i32
    %146 = tpu.assume_multiple %145, 8 : i32
    %147 = arith.index_cast %146 : i32 to index
    %c0_75 = arith.constant 0 : index
    %148 = vector.load %arg13[%147, %c0_75] : memref<64x512xf32, #tpu.memory_space<vmem>>, vector<8x512xf32>
    %cst_76 = arith.constant dense<0.000000e+00> : vector<8x512xf32>
    %149 = tpu.matmul %142, %4, %cst_76 {dimension_numbers = #tpu.dot_dimension_numbers<[1], [0], [0], [1], [0, 0, 1, 1], [], []>} : vector<8x128xf32>, vector<128x512xf32>, vector<8x512xf32> -> vector<8x512xf32>
    %150 = arith.addf %148, %149 : vector<8x512xf32>
    %151 = vector.extract_strided_slice %150 {offsets = [0, 0], sizes = [8, 128], strides = [1, 1]} : vector<8x512xf32> to vector<8x128xf32>
    %152 = arith.negf %151 : vector<8x128xf32>
    %153 = math.exp %152 : vector<8x128xf32>
    %cst_77 = arith.constant 1.000000e+00 : f32
    %154 = vector.broadcast %cst_77 : f32 to vector<8x128xf32>
    %155 = arith.addf %154, %153 : vector<8x128xf32>
    %156 = arith.divf %154, %155 : vector<8x128xf32>
    %157 = vector.extract_strided_slice %150 {offsets = [0, 128], sizes = [8, 128], strides = [1, 1]} : vector<8x512xf32> to vector<8x128xf32>
    %158 = arith.negf %157 : vector<8x128xf32>
    %159 = math.exp %158 : vector<8x128xf32>
    %cst_78 = arith.constant 1.000000e+00 : f32
    %160 = vector.broadcast %cst_78 : f32 to vector<8x128xf32>
    %161 = arith.addf %160, %159 : vector<8x128xf32>
    %162 = arith.divf %160, %161 : vector<8x128xf32>
    %163 = vector.extract_strided_slice %150 {offsets = [0, 256], sizes = [8, 128], strides = [1, 1]} : vector<8x512xf32> to vector<8x128xf32>
    %164 = math.tanh %163 : vector<8x128xf32>
    %165 = vector.extract_strided_slice %150 {offsets = [0, 384], sizes = [8, 128], strides = [1, 1]} : vector<8x512xf32> to vector<8x128xf32>
    %166 = arith.negf %165 : vector<8x128xf32>
    %167 = math.exp %166 : vector<8x128xf32>
    %cst_79 = arith.constant 1.000000e+00 : f32
    %168 = vector.broadcast %cst_79 : f32 to vector<8x128xf32>
    %169 = arith.addf %168, %167 : vector<8x128xf32>
    %170 = arith.divf %168, %169 : vector<8x128xf32>
    %171 = arith.mulf %162, %144 : vector<8x128xf32>
    %172 = arith.mulf %156, %164 : vector<8x128xf32>
    %173 = arith.addf %171, %172 : vector<8x128xf32>
    %174 = math.tanh %173 : vector<8x128xf32>
    %175 = arith.mulf %170, %174 : vector<8x128xf32>
    %c0_80 = arith.constant 0 : index
    %c0_81 = arith.constant 0 : index
    %c0_82 = arith.constant 0 : index
    %176 = vector.load %arg15[%c0_80, %c0_81, %c0_82] : memref<2x8x128xf32, #tpu.memory_space<vmem>>, vector<1x8x128xf32>
    %177 = vector.shape_cast %176 : vector<1x8x128xf32> to vector<8x128xf32>
    %178 = vector.shape_cast %175 : vector<8x128xf32> to vector<1x8x128xf32>
    tpu.vector_store %arg15[%c0_80, %c0_81, %c0_82], %178 {strides = array<i32>} : memref<2x8x128xf32, #tpu.memory_space<vmem>>, vector<1x8x128xf32>,
    %c0_83 = arith.constant 0 : index
    %c0_84 = arith.constant 0 : index
    %c0_85 = arith.constant 0 : index
    %179 = vector.load %arg16[%c0_83, %c0_84, %c0_85] : memref<2x8x128xf32, #tpu.memory_space<vmem>>, vector<1x8x128xf32>
    %180 = vector.shape_cast %179 : vector<1x8x128xf32> to vector<8x128xf32>
    %181 = vector.shape_cast %173 : vector<8x128xf32> to vector<1x8x128xf32>
    tpu.vector_store %arg16[%c0_83, %c0_84, %c0_85], %181 {strides = array<i32>} : memref<2x8x128xf32, #tpu.memory_space<vmem>>, vector<1x8x128xf32>,
    %182 = arith.index_cast %146 : i32 to index
    %c0_86 = arith.constant 0 : index
    %183 = vector.load %arg14[%182, %c0_86] : memref<64x128xf32, #tpu.memory_space<vmem>>, vector<8x128xf32>
    tpu.vector_store %arg14[%182, %c0_86], %175 {strides = array<i32>} : memref<64x128xf32, #tpu.memory_space<vmem>>, vector<8x128xf32>,
    %c4_i32 = arith.constant 4 : i32
    %c0_87 = arith.constant 0 : index
    %c0_88 = arith.constant 0 : index
    %c0_89 = arith.constant 0 : index
    %184 = vector.load %arg15[%c0_87, %c0_88, %c0_89] : memref<2x8x128xf32, #tpu.memory_space<vmem>>, vector<1x8x128xf32>
    %185 = vector.shape_cast %184 : vector<1x8x128xf32> to vector<8x128xf32>
    %c0_90 = arith.constant 0 : index
    %c0_91 = arith.constant 0 : index
    %c0_92 = arith.constant 0 : index
    %186 = vector.load %arg16[%c0_90, %c0_91, %c0_92] : memref<2x8x128xf32, #tpu.memory_space<vmem>>, vector<1x8x128xf32>
    %187 = vector.shape_cast %186 : vector<1x8x128xf32> to vector<8x128xf32>
    %c8_i32_93 = arith.constant 8 : i32
    %188 = arith.muli %c4_i32, %c8_i32_93 : i32
    %189 = tpu.assume_multiple %188, 8 : i32
    %190 = arith.index_cast %189 : i32 to index
    %c0_94 = arith.constant 0 : index
    %191 = vector.load %arg13[%190, %c0_94] : memref<64x512xf32, #tpu.memory_space<vmem>>, vector<8x512xf32>
    %cst_95 = arith.constant dense<0.000000e+00> : vector<8x512xf32>
    %192 = tpu.matmul %185, %4, %cst_95 {dimension_numbers = #tpu.dot_dimension_numbers<[1], [0], [0], [1], [0, 0, 1, 1], [], []>} : vector<8x128xf32>, vector<128x512xf32>, vector<8x512xf32> -> vector<8x512xf32>
    %193 = arith.addf %191, %192 : vector<8x512xf32>
    %194 = vector.extract_strided_slice %193 {offsets = [0, 0], sizes = [8, 128], strides = [1, 1]} : vector<8x512xf32> to vector<8x128xf32>
    %195 = arith.negf %194 : vector<8x128xf32>
    %196 = math.exp %195 : vector<8x128xf32>
    %cst_96 = arith.constant 1.000000e+00 : f32
    %197 = vector.broadcast %cst_96 : f32 to vector<8x128xf32>
    %198 = arith.addf %197, %196 : vector<8x128xf32>
    %199 = arith.divf %197, %198 : vector<8x128xf32>
    %200 = vector.extract_strided_slice %193 {offsets = [0, 128], sizes = [8, 128], strides = [1, 1]} : vector<8x512xf32> to vector<8x128xf32>
    %201 = arith.negf %200 : vector<8x128xf32>
    %202 = math.exp %201 : vector<8x128xf32>
    %cst_97 = arith.constant 1.000000e+00 : f32
    %203 = vector.broadcast %cst_97 : f32 to vector<8x128xf32>
    %204 = arith.addf %203, %202 : vector<8x128xf32>
    %205 = arith.divf %203, %204 : vector<8x128xf32>
    %206 = vector.extract_strided_slice %193 {offsets = [0, 256], sizes = [8, 128], strides = [1, 1]} : vector<8x512xf32> to vector<8x128xf32>
    %207 = math.tanh %206 : vector<8x128xf32>
    %208 = vector.extract_strided_slice %193 {offsets = [0, 384], sizes = [8, 128], strides = [1, 1]} : vector<8x512xf32> to vector<8x128xf32>
    %209 = arith.negf %208 : vector<8x128xf32>
    %210 = math.exp %209 : vector<8x128xf32>
    %cst_98 = arith.constant 1.000000e+00 : f32
    %211 = vector.broadcast %cst_98 : f32 to vector<8x128xf32>
    %212 = arith.addf %211, %210 : vector<8x128xf32>
    %213 = arith.divf %211, %212 : vector<8x128xf32>
    %214 = arith.mulf %205, %187 : vector<8x128xf32>
    %215 = arith.mulf %199, %207 : vector<8x128xf32>
    %216 = arith.addf %214, %215 : vector<8x128xf32>
    %217 = math.tanh %216 : vector<8x128xf32>
    %218 = arith.mulf %213, %217 : vector<8x128xf32>
    %c0_99 = arith.constant 0 : index
    %c0_100 = arith.constant 0 : index
    %c0_101 = arith.constant 0 : index
    %219 = vector.load %arg15[%c0_99, %c0_100, %c0_101] : memref<2x8x128xf32, #tpu.memory_space<vmem>>, vector<1x8x128xf32>
    %220 = vector.shape_cast %219 : vector<1x8x128xf32> to vector<8x128xf32>
    %221 = vector.shape_cast %218 : vector<8x128xf32> to vector<1x8x128xf32>
    tpu.vector_store %arg15[%c0_99, %c0_100, %c0_101], %221 {strides = array<i32>} : memref<2x8x128xf32, #tpu.memory_space<vmem>>, vector<1x8x128xf32>,
    %c0_102 = arith.constant 0 : index
    %c0_103 = arith.constant 0 : index
    %c0_104 = arith.constant 0 : index
    %222 = vector.load %arg16[%c0_102, %c0_103, %c0_104] : memref<2x8x128xf32, #tpu.memory_space<vmem>>, vector<1x8x128xf32>
    %223 = vector.shape_cast %222 : vector<1x8x128xf32> to vector<8x128xf32>
    %224 = vector.shape_cast %216 : vector<8x128xf32> to vector<1x8x128xf32>
    tpu.vector_store %arg16[%c0_102, %c0_103, %c0_104], %224 {strides = array<i32>} : memref<2x8x128xf32, #tpu.memory_space<vmem>>, vector<1x8x128xf32>,
    %225 = arith.index_cast %189 : i32 to index
    %c0_105 = arith.constant 0 : index
    %226 = vector.load %arg14[%225, %c0_105] : memref<64x128xf32, #tpu.memory_space<vmem>>, vector<8x128xf32>
    tpu.vector_store %arg14[%225, %c0_105], %218 {strides = array<i32>} : memref<64x128xf32, #tpu.memory_space<vmem>>, vector<8x128xf32>,
    %c5_i32 = arith.constant 5 : i32
    %c0_106 = arith.constant 0 : index
    %c0_107 = arith.constant 0 : index
    %c0_108 = arith.constant 0 : index
    %227 = vector.load %arg15[%c0_106, %c0_107, %c0_108] : memref<2x8x128xf32, #tpu.memory_space<vmem>>, vector<1x8x128xf32>
    %228 = vector.shape_cast %227 : vector<1x8x128xf32> to vector<8x128xf32>
    %c0_109 = arith.constant 0 : index
    %c0_110 = arith.constant 0 : index
    %c0_111 = arith.constant 0 : index
    %229 = vector.load %arg16[%c0_109, %c0_110, %c0_111] : memref<2x8x128xf32, #tpu.memory_space<vmem>>, vector<1x8x128xf32>
    %230 = vector.shape_cast %229 : vector<1x8x128xf32> to vector<8x128xf32>
    %c8_i32_112 = arith.constant 8 : i32
    %231 = arith.muli %c5_i32, %c8_i32_112 : i32
    %232 = tpu.assume_multiple %231, 8 : i32
    %233 = arith.index_cast %232 : i32 to index
    %c0_113 = arith.constant 0 : index
    %234 = vector.load %arg13[%233, %c0_113] : memref<64x512xf32, #tpu.memory_space<vmem>>, vector<8x512xf32>
    %cst_114 = arith.constant dense<0.000000e+00> : vector<8x512xf32>
    %235 = tpu.matmul %228, %4, %cst_114 {dimension_numbers = #tpu.dot_dimension_numbers<[1], [0], [0], [1], [0, 0, 1, 1], [], []>} : vector<8x128xf32>, vector<128x512xf32>, vector<8x512xf32> -> vector<8x512xf32>
    %236 = arith.addf %234, %235 : vector<8x512xf32>
    %237 = vector.extract_strided_slice %236 {offsets = [0, 0], sizes = [8, 128], strides = [1, 1]} : vector<8x512xf32> to vector<8x128xf32>
    %238 = arith.negf %237 : vector<8x128xf32>
    %239 = math.exp %238 : vector<8x128xf32>
    %cst_115 = arith.constant 1.000000e+00 : f32
    %240 = vector.broadcast %cst_115 : f32 to vector<8x128xf32>
    %241 = arith.addf %240, %239 : vector<8x128xf32>
    %242 = arith.divf %240, %241 : vector<8x128xf32>
    %243 = vector.extract_strided_slice %236 {offsets = [0, 128], sizes = [8, 128], strides = [1, 1]} : vector<8x512xf32> to vector<8x128xf32>
    %244 = arith.negf %243 : vector<8x128xf32>
    %245 = math.exp %244 : vector<8x128xf32>
    %cst_116 = arith.constant 1.000000e+00 : f32
    %246 = vector.broadcast %cst_116 : f32 to vector<8x128xf32>
    %247 = arith.addf %246, %245 : vector<8x128xf32>
    %248 = arith.divf %246, %247 : vector<8x128xf32>
    %249 = vector.extract_strided_slice %236 {offsets = [0, 256], sizes = [8, 128], strides = [1, 1]} : vector<8x512xf32> to vector<8x128xf32>
    %250 = math.tanh %249 : vector<8x128xf32>
    %251 = vector.extract_strided_slice %236 {offsets = [0, 384], sizes = [8, 128], strides = [1, 1]} : vector<8x512xf32> to vector<8x128xf32>
    %252 = arith.negf %251 : vector<8x128xf32>
    %253 = math.exp %252 : vector<8x128xf32>
    %cst_117 = arith.constant 1.000000e+00 : f32
    %254 = vector.broadcast %cst_117 : f32 to vector<8x128xf32>
    %255 = arith.addf %254, %253 : vector<8x128xf32>
    %256 = arith.divf %254, %255 : vector<8x128xf32>
    %257 = arith.mulf %248, %230 : vector<8x128xf32>
    %258 = arith.mulf %242, %250 : vector<8x128xf32>
    %259 = arith.addf %257, %258 : vector<8x128xf32>
    %260 = math.tanh %259 : vector<8x128xf32>
    %261 = arith.mulf %256, %260 : vector<8x128xf32>
    %c0_118 = arith.constant 0 : index
    %c0_119 = arith.constant 0 : index
    %c0_120 = arith.constant 0 : index
    %262 = vector.load %arg15[%c0_118, %c0_119, %c0_120] : memref<2x8x128xf32, #tpu.memory_space<vmem>>, vector<1x8x128xf32>
    %263 = vector.shape_cast %262 : vector<1x8x128xf32> to vector<8x128xf32>
    %264 = vector.shape_cast %261 : vector<8x128xf32> to vector<1x8x128xf32>
    tpu.vector_store %arg15[%c0_118, %c0_119, %c0_120], %264 {strides = array<i32>} : memref<2x8x128xf32, #tpu.memory_space<vmem>>, vector<1x8x128xf32>,
    %c0_121 = arith.constant 0 : index
    %c0_122 = arith.constant 0 : index
    %c0_123 = arith.constant 0 : index
    %265 = vector.load %arg16[%c0_121, %c0_122, %c0_123] : memref<2x8x128xf32, #tpu.memory_space<vmem>>, vector<1x8x128xf32>
    %266 = vector.shape_cast %265 : vector<1x8x128xf32> to vector<8x128xf32>
    %267 = vector.shape_cast %259 : vector<8x128xf32> to vector<1x8x128xf32>
    tpu.vector_store %arg16[%c0_121, %c0_122, %c0_123], %267 {strides = array<i32>} : memref<2x8x128xf32, #tpu.memory_space<vmem>>, vector<1x8x128xf32>,
    %268 = arith.index_cast %232 : i32 to index
    %c0_124 = arith.constant 0 : index
    %269 = vector.load %arg14[%268, %c0_124] : memref<64x128xf32, #tpu.memory_space<vmem>>, vector<8x128xf32>
    tpu.vector_store %arg14[%268, %c0_124], %261 {strides = array<i32>} : memref<64x128xf32, #tpu.memory_space<vmem>>, vector<8x128xf32>,
    %c6_i32 = arith.constant 6 : i32
    %c0_125 = arith.constant 0 : index
    %c0_126 = arith.constant 0 : index
    %c0_127 = arith.constant 0 : index
    %270 = vector.load %arg15[%c0_125, %c0_126, %c0_127] : memref<2x8x128xf32, #tpu.memory_space<vmem>>, vector<1x8x128xf32>
    %271 = vector.shape_cast %270 : vector<1x8x128xf32> to vector<8x128xf32>
    %c0_128 = arith.constant 0 : index
    %c0_129 = arith.constant 0 : index
    %c0_130 = arith.constant 0 : index
    %272 = vector.load %arg16[%c0_128, %c0_129, %c0_130] : memref<2x8x128xf32, #tpu.memory_space<vmem>>, vector<1x8x128xf32>
    %273 = vector.shape_cast %272 : vector<1x8x128xf32> to vector<8x128xf32>
    %c8_i32_131 = arith.constant 8 : i32
    %274 = arith.muli %c6_i32, %c8_i32_131 : i32
    %275 = tpu.assume_multiple %274, 8 : i32
    %276 = arith.index_cast %275 : i32 to index
    %c0_132 = arith.constant 0 : index
    %277 = vector.load %arg13[%276, %c0_132] : memref<64x512xf32, #tpu.memory_space<vmem>>, vector<8x512xf32>
    %cst_133 = arith.constant dense<0.000000e+00> : vector<8x512xf32>
    %278 = tpu.matmul %271, %4, %cst_133 {dimension_numbers = #tpu.dot_dimension_numbers<[1], [0], [0], [1], [0, 0, 1, 1], [], []>} : vector<8x128xf32>, vector<128x512xf32>, vector<8x512xf32> -> vector<8x512xf32>
    %279 = arith.addf %277, %278 : vector<8x512xf32>
    %280 = vector.extract_strided_slice %279 {offsets = [0, 0], sizes = [8, 128], strides = [1, 1]} : vector<8x512xf32> to vector<8x128xf32>
    %281 = arith.negf %280 : vector<8x128xf32>
    %282 = math.exp %281 : vector<8x128xf32>
    %cst_134 = arith.constant 1.000000e+00 : f32
    %283 = vector.broadcast %cst_134 : f32 to vector<8x128xf32>
    %284 = arith.addf %283, %282 : vector<8x128xf32>
    %285 = arith.divf %283, %284 : vector<8x128xf32>
    %286 = vector.extract_strided_slice %279 {offsets = [0, 128], sizes = [8, 128], strides = [1, 1]} : vector<8x512xf32> to vector<8x128xf32>
    %287 = arith.negf %286 : vector<8x128xf32>
    %288 = math.exp %287 : vector<8x128xf32>
    %cst_135 = arith.constant 1.000000e+00 : f32
    %289 = vector.broadcast %cst_135 : f32 to vector<8x128xf32>
    %290 = arith.addf %289, %288 : vector<8x128xf32>
    %291 = arith.divf %289, %290 : vector<8x128xf32>
    %292 = vector.extract_strided_slice %279 {offsets = [0, 256], sizes = [8, 128], strides = [1, 1]} : vector<8x512xf32> to vector<8x128xf32>
    %293 = math.tanh %292 : vector<8x128xf32>
    %294 = vector.extract_strided_slice %279 {offsets = [0, 384], sizes = [8, 128], strides = [1, 1]} : vector<8x512xf32> to vector<8x128xf32>
    %295 = arith.negf %294 : vector<8x128xf32>
    %296 = math.exp %295 : vector<8x128xf32>
    %cst_136 = arith.constant 1.000000e+00 : f32
    %297 = vector.broadcast %cst_136 : f32 to vector<8x128xf32>
    %298 = arith.addf %297, %296 : vector<8x128xf32>
    %299 = arith.divf %297, %298 : vector<8x128xf32>
    %300 = arith.mulf %291, %273 : vector<8x128xf32>
    %301 = arith.mulf %285, %293 : vector<8x128xf32>
    %302 = arith.addf %300, %301 : vector<8x128xf32>
    %303 = math.tanh %302 : vector<8x128xf32>
    %304 = arith.mulf %299, %303 : vector<8x128xf32>
    %c0_137 = arith.constant 0 : index
    %c0_138 = arith.constant 0 : index
    %c0_139 = arith.constant 0 : index
    %305 = vector.load %arg15[%c0_137, %c0_138, %c0_139] : memref<2x8x128xf32, #tpu.memory_space<vmem>>, vector<1x8x128xf32>
    %306 = vector.shape_cast %305 : vector<1x8x128xf32> to vector<8x128xf32>
    %307 = vector.shape_cast %304 : vector<8x128xf32> to vector<1x8x128xf32>
    tpu.vector_store %arg15[%c0_137, %c0_138, %c0_139], %307 {strides = array<i32>} : memref<2x8x128xf32, #tpu.memory_space<vmem>>, vector<1x8x128xf32>,
    %c0_140 = arith.constant 0 : index
    %c0_141 = arith.constant 0 : index
    %c0_142 = arith.constant 0 : index
    %308 = vector.load %arg16[%c0_140, %c0_141, %c0_142] : memref<2x8x128xf32, #tpu.memory_space<vmem>>, vector<1x8x128xf32>
    %309 = vector.shape_cast %308 : vector<1x8x128xf32> to vector<8x128xf32>
    %310 = vector.shape_cast %302 : vector<8x128xf32> to vector<1x8x128xf32>
    tpu.vector_store %arg16[%c0_140, %c0_141, %c0_142], %310 {strides = array<i32>} : memref<2x8x128xf32, #tpu.memory_space<vmem>>, vector<1x8x128xf32>,
    %311 = arith.index_cast %275 : i32 to index
    %c0_143 = arith.constant 0 : index
    %312 = vector.load %arg14[%311, %c0_143] : memref<64x128xf32, #tpu.memory_space<vmem>>, vector<8x128xf32>
    tpu.vector_store %arg14[%311, %c0_143], %304 {strides = array<i32>} : memref<64x128xf32, #tpu.memory_space<vmem>>, vector<8x128xf32>,
    %c7_i32 = arith.constant 7 : i32
    %c0_144 = arith.constant 0 : index
    %c0_145 = arith.constant 0 : index
    %c0_146 = arith.constant 0 : index
    %313 = vector.load %arg15[%c0_144, %c0_145, %c0_146] : memref<2x8x128xf32, #tpu.memory_space<vmem>>, vector<1x8x128xf32>
    %314 = vector.shape_cast %313 : vector<1x8x128xf32> to vector<8x128xf32>
    %c0_147 = arith.constant 0 : index
    %c0_148 = arith.constant 0 : index
    %c0_149 = arith.constant 0 : index
    %315 = vector.load %arg16[%c0_147, %c0_148, %c0_149] : memref<2x8x128xf32, #tpu.memory_space<vmem>>, vector<1x8x128xf32>
    %316 = vector.shape_cast %315 : vector<1x8x128xf32> to vector<8x128xf32>
    %c8_i32_150 = arith.constant 8 : i32
    %317 = arith.muli %c7_i32, %c8_i32_150 : i32
    %318 = tpu.assume_multiple %317, 8 : i32
    %319 = arith.index_cast %318 : i32 to index
    %c0_151 = arith.constant 0 : index
    %320 = vector.load %arg13[%319, %c0_151] : memref<64x512xf32, #tpu.memory_space<vmem>>, vector<8x512xf32>
    %cst_152 = arith.constant dense<0.000000e+00> : vector<8x512xf32>
    %321 = tpu.matmul %314, %4, %cst_152 {dimension_numbers = #tpu.dot_dimension_numbers<[1], [0], [0], [1], [0, 0, 1, 1], [], []>} : vector<8x128xf32>, vector<128x512xf32>, vector<8x512xf32> -> vector<8x512xf32>
    %322 = arith.addf %320, %321 : vector<8x512xf32>
    %323 = vector.extract_strided_slice %322 {offsets = [0, 0], sizes = [8, 128], strides = [1, 1]} : vector<8x512xf32> to vector<8x128xf32>
    %324 = arith.negf %323 : vector<8x128xf32>
    %325 = math.exp %324 : vector<8x128xf32>
    %cst_153 = arith.constant 1.000000e+00 : f32
    %326 = vector.broadcast %cst_153 : f32 to vector<8x128xf32>
    %327 = arith.addf %326, %325 : vector<8x128xf32>
    %328 = arith.divf %326, %327 : vector<8x128xf32>
    %329 = vector.extract_strided_slice %322 {offsets = [0, 128], sizes = [8, 128], strides = [1, 1]} : vector<8x512xf32> to vector<8x128xf32>
    %330 = arith.negf %329 : vector<8x128xf32>
    %331 = math.exp %330 : vector<8x128xf32>
    %cst_154 = arith.constant 1.000000e+00 : f32
    %332 = vector.broadcast %cst_154 : f32 to vector<8x128xf32>
    %333 = arith.addf %332, %331 : vector<8x128xf32>
    %334 = arith.divf %332, %333 : vector<8x128xf32>
    %335 = vector.extract_strided_slice %322 {offsets = [0, 256], sizes = [8, 128], strides = [1, 1]} : vector<8x512xf32> to vector<8x128xf32>
    %336 = math.tanh %335 : vector<8x128xf32>
    %337 = vector.extract_strided_slice %322 {offsets = [0, 384], sizes = [8, 128], strides = [1, 1]} : vector<8x512xf32> to vector<8x128xf32>
    %338 = arith.negf %337 : vector<8x128xf32>
    %339 = math.exp %338 : vector<8x128xf32>
    %cst_155 = arith.constant 1.000000e+00 : f32
    %340 = vector.broadcast %cst_155 : f32 to vector<8x128xf32>
    %341 = arith.addf %340, %339 : vector<8x128xf32>
    %342 = arith.divf %340, %341 : vector<8x128xf32>
    %343 = arith.mulf %334, %316 : vector<8x128xf32>
    %344 = arith.mulf %328, %336 : vector<8x128xf32>
    %345 = arith.addf %343, %344 : vector<8x128xf32>
    %346 = math.tanh %345 : vector<8x128xf32>
    %347 = arith.mulf %342, %346 : vector<8x128xf32>
    %c0_156 = arith.constant 0 : index
    %c0_157 = arith.constant 0 : index
    %c0_158 = arith.constant 0 : index
    %348 = vector.load %arg15[%c0_156, %c0_157, %c0_158] : memref<2x8x128xf32, #tpu.memory_space<vmem>>, vector<1x8x128xf32>
    %349 = vector.shape_cast %348 : vector<1x8x128xf32> to vector<8x128xf32>
    %350 = vector.shape_cast %347 : vector<8x128xf32> to vector<1x8x128xf32>
    tpu.vector_store %arg15[%c0_156, %c0_157, %c0_158], %350 {strides = array<i32>} : memref<2x8x128xf32, #tpu.memory_space<vmem>>, vector<1x8x128xf32>,
    %c0_159 = arith.constant 0 : index
    %c0_160 = arith.constant 0 : index
    %c0_161 = arith.constant 0 : index
    %351 = vector.load %arg16[%c0_159, %c0_160, %c0_161] : memref<2x8x128xf32, #tpu.memory_space<vmem>>, vector<1x8x128xf32>
    %352 = vector.shape_cast %351 : vector<1x8x128xf32> to vector<8x128xf32>
    %353 = vector.shape_cast %345 : vector<8x128xf32> to vector<1x8x128xf32>
    tpu.vector_store %arg16[%c0_159, %c0_160, %c0_161], %353 {strides = array<i32>} : memref<2x8x128xf32, #tpu.memory_space<vmem>>, vector<1x8x128xf32>,
    %354 = arith.index_cast %318 : i32 to index
    %c0_162 = arith.constant 0 : index
    %355 = vector.load %arg14[%354, %c0_162] : memref<64x128xf32, #tpu.memory_space<vmem>>, vector<8x128xf32>
    tpu.vector_store %arg14[%354, %c0_162], %347 {strides = array<i32>} : memref<64x128xf32, #tpu.memory_space<vmem>>, vector<8x128xf32>,
    %c8_i32_163 = arith.constant 8 : i32
    %c0_164 = arith.constant 0 : index
    %c0_165 = arith.constant 0 : index
    %356 = vector.load %arg7[%c0_164, %c0_165] : memref<128x512xf32, #tpu.memory_space<vmem>>, vector<128x512xf32>
    %c0_166 = arith.constant 0 : index
    %c0_167 = arith.constant 0 : index
    %357 = vector.load %arg8[%c0_166, %c0_167] : memref<128x512xf32, #tpu.memory_space<vmem>>, vector<128x512xf32>
    %c0_168 = arith.constant 0 : index
    %c0_169 = arith.constant 0 : index
    %358 = vector.load %arg9[%c0_168, %c0_169] : memref<1x512xf32, #tpu.memory_space<vmem>>, vector<1x512xf32>
    %c0_170 = arith.constant 0 : index
    %c0_171 = arith.constant 0 : index
    %359 = vector.load %arg14[%c0_170, %c0_171] : memref<64x128xf32, #tpu.memory_space<vmem>>, vector<64x128xf32>
    %cst_172 = arith.constant dense<0.000000e+00> : vector<64x512xf32>
    %360 = tpu.matmul %359, %356, %cst_172 {dimension_numbers = #tpu.dot_dimension_numbers<[1], [0], [0], [1], [0, 0, 1, 1], [], []>} : vector<64x128xf32>, vector<128x512xf32>, vector<64x512xf32> -> vector<64x512xf32>
    %361 = vector.broadcast %358 : vector<1x512xf32> to vector<64x512xf32>
    %362 = arith.addf %360, %361 : vector<64x512xf32>
    %c0_173 = arith.constant 0 : index
    %c0_174 = arith.constant 0 : index
    %363 = vector.load %arg13[%c0_173, %c0_174] : memref<64x512xf32, #tpu.memory_space<vmem>>, vector<64x512xf32>
    tpu.vector_store %arg13[%c0_173, %c0_174], %362 {strides = array<i32>} : memref<64x512xf32, #tpu.memory_space<vmem>>, vector<64x512xf32>,
    %c0_i32_175 = arith.constant 0 : i32
    %c1 = arith.constant 1 : index
    %c0_176 = arith.constant 0 : index
    %c0_177 = arith.constant 0 : index
    %364 = vector.load %arg15[%c1, %c0_176, %c0_177] : memref<2x8x128xf32, #tpu.memory_space<vmem>>, vector<1x8x128xf32>
    %365 = vector.shape_cast %364 : vector<1x8x128xf32> to vector<8x128xf32>
    %c1_178 = arith.constant 1 : index
    %c0_179 = arith.constant 0 : index
    %c0_180 = arith.constant 0 : index
    %366 = vector.load %arg16[%c1_178, %c0_179, %c0_180] : memref<2x8x128xf32, #tpu.memory_space<vmem>>, vector<1x8x128xf32>
    %367 = vector.shape_cast %366 : vector<1x8x128xf32> to vector<8x128xf32>
    %c8_i32_181 = arith.constant 8 : i32
    %368 = arith.muli %c0_i32_175, %c8_i32_181 : i32
    %369 = tpu.assume_multiple %368, 8 : i32
    %370 = arith.index_cast %369 : i32 to index
    %c0_182 = arith.constant 0 : index
    %371 = vector.load %arg13[%370, %c0_182] : memref<64x512xf32, #tpu.memory_space<vmem>>, vector<8x512xf32>
    %cst_183 = arith.constant dense<0.000000e+00> : vector<8x512xf32>
    %372 = tpu.matmul %365, %357, %cst_183 {dimension_numbers = #tpu.dot_dimension_numbers<[1], [0], [0], [1], [0, 0, 1, 1], [], []>} : vector<8x128xf32>, vector<128x512xf32>, vector<8x512xf32> -> vector<8x512xf32>
    %373 = arith.addf %371, %372 : vector<8x512xf32>
    %374 = vector.extract_strided_slice %373 {offsets = [0, 0], sizes = [8, 128], strides = [1, 1]} : vector<8x512xf32> to vector<8x128xf32>
    %375 = arith.negf %374 : vector<8x128xf32>
    %376 = math.exp %375 : vector<8x128xf32>
    %cst_184 = arith.constant 1.000000e+00 : f32
    %377 = vector.broadcast %cst_184 : f32 to vector<8x128xf32>
    %378 = arith.addf %377, %376 : vector<8x128xf32>
    %379 = arith.divf %377, %378 : vector<8x128xf32>
    %380 = vector.extract_strided_slice %373 {offsets = [0, 128], sizes = [8, 128], strides = [1, 1]} : vector<8x512xf32> to vector<8x128xf32>
    %381 = arith.negf %380 : vector<8x128xf32>
    %382 = math.exp %381 : vector<8x128xf32>
    %cst_185 = arith.constant 1.000000e+00 : f32
    %383 = vector.broadcast %cst_185 : f32 to vector<8x128xf32>
    %384 = arith.addf %383, %382 : vector<8x128xf32>
    %385 = arith.divf %383, %384 : vector<8x128xf32>
    %386 = vector.extract_strided_slice %373 {offsets = [0, 256], sizes = [8, 128], strides = [1, 1]} : vector<8x512xf32> to vector<8x128xf32>
    %387 = math.tanh %386 : vector<8x128xf32>
    %388 = vector.extract_strided_slice %373 {offsets = [0, 384], sizes = [8, 128], strides = [1, 1]} : vector<8x512xf32> to vector<8x128xf32>
    %389 = arith.negf %388 : vector<8x128xf32>
    %390 = math.exp %389 : vector<8x128xf32>
    %cst_186 = arith.constant 1.000000e+00 : f32
    %391 = vector.broadcast %cst_186 : f32 to vector<8x128xf32>
    %392 = arith.addf %391, %390 : vector<8x128xf32>
    %393 = arith.divf %391, %392 : vector<8x128xf32>
    %394 = arith.mulf %385, %367 : vector<8x128xf32>
    %395 = arith.mulf %379, %387 : vector<8x128xf32>
    %396 = arith.addf %394, %395 : vector<8x128xf32>
    %397 = math.tanh %396 : vector<8x128xf32>
    %398 = arith.mulf %393, %397 : vector<8x128xf32>
    %c1_187 = arith.constant 1 : index
    %c0_188 = arith.constant 0 : index
    %c0_189 = arith.constant 0 : index
    %399 = vector.load %arg15[%c1_187, %c0_188, %c0_189] : memref<2x8x128xf32, #tpu.memory_space<vmem>>, vector<1x8x128xf32>
    %400 = vector.shape_cast %399 : vector<1x8x128xf32> to vector<8x128xf32>
    %401 = vector.shape_cast %398 : vector<8x128xf32> to vector<1x8x128xf32>
    tpu.vector_store %arg15[%c1_187, %c0_188, %c0_189], %401 {strides = array<i32>} : memref<2x8x128xf32, #tpu.memory_space<vmem>>, vector<1x8x128xf32>,
    %c1_190 = arith.constant 1 : index
    %c0_191 = arith.constant 0 : index
    %c0_192 = arith.constant 0 : index
    %402 = vector.load %arg16[%c1_190, %c0_191, %c0_192] : memref<2x8x128xf32, #tpu.memory_space<vmem>>, vector<1x8x128xf32>
    %403 = vector.shape_cast %402 : vector<1x8x128xf32> to vector<8x128xf32>
    %404 = vector.shape_cast %396 : vector<8x128xf32> to vector<1x8x128xf32>
    tpu.vector_store %arg16[%c1_190, %c0_191, %c0_192], %404 {strides = array<i32>} : memref<2x8x128xf32, #tpu.memory_space<vmem>>, vector<1x8x128xf32>,
    %c1_i32_193 = arith.constant 1 : i32
    %c1_194 = arith.constant 1 : index
    %c0_195 = arith.constant 0 : index
    %c0_196 = arith.constant 0 : index
    %405 = vector.load %arg15[%c1_194, %c0_195, %c0_196] : memref<2x8x128xf32, #tpu.memory_space<vmem>>, vector<1x8x128xf32>
    %406 = vector.shape_cast %405 : vector<1x8x128xf32> to vector<8x128xf32>
    %c1_197 = arith.constant 1 : index
    %c0_198 = arith.constant 0 : index
    %c0_199 = arith.constant 0 : index
    %407 = vector.load %arg16[%c1_197, %c0_198, %c0_199] : memref<2x8x128xf32, #tpu.memory_space<vmem>>, vector<1x8x128xf32>
    %408 = vector.shape_cast %407 : vector<1x8x128xf32> to vector<8x128xf32>
    %c8_i32_200 = arith.constant 8 : i32
    %409 = arith.muli %c1_i32_193, %c8_i32_200 : i32
    %410 = tpu.assume_multiple %409, 8 : i32
    %411 = arith.index_cast %410 : i32 to index
    %c0_201 = arith.constant 0 : index
    %412 = vector.load %arg13[%411, %c0_201] : memref<64x512xf32, #tpu.memory_space<vmem>>, vector<8x512xf32>
    %cst_202 = arith.constant dense<0.000000e+00> : vector<8x512xf32>
    %413 = tpu.matmul %406, %357, %cst_202 {dimension_numbers = #tpu.dot_dimension_numbers<[1], [0], [0], [1], [0, 0, 1, 1], [], []>} : vector<8x128xf32>, vector<128x512xf32>, vector<8x512xf32> -> vector<8x512xf32>
    %414 = arith.addf %412, %413 : vector<8x512xf32>
    %415 = vector.extract_strided_slice %414 {offsets = [0, 0], sizes = [8, 128], strides = [1, 1]} : vector<8x512xf32> to vector<8x128xf32>
    %416 = arith.negf %415 : vector<8x128xf32>
    %417 = math.exp %416 : vector<8x128xf32>
    %cst_203 = arith.constant 1.000000e+00 : f32
    %418 = vector.broadcast %cst_203 : f32 to vector<8x128xf32>
    %419 = arith.addf %418, %417 : vector<8x128xf32>
    %420 = arith.divf %418, %419 : vector<8x128xf32>
    %421 = vector.extract_strided_slice %414 {offsets = [0, 128], sizes = [8, 128], strides = [1, 1]} : vector<8x512xf32> to vector<8x128xf32>
    %422 = arith.negf %421 : vector<8x128xf32>
    %423 = math.exp %422 : vector<8x128xf32>
    %cst_204 = arith.constant 1.000000e+00 : f32
    %424 = vector.broadcast %cst_204 : f32 to vector<8x128xf32>
    %425 = arith.addf %424, %423 : vector<8x128xf32>
    %426 = arith.divf %424, %425 : vector<8x128xf32>
    %427 = vector.extract_strided_slice %414 {offsets = [0, 256], sizes = [8, 128], strides = [1, 1]} : vector<8x512xf32> to vector<8x128xf32>
    %428 = math.tanh %427 : vector<8x128xf32>
    %429 = vector.extract_strided_slice %414 {offsets = [0, 384], sizes = [8, 128], strides = [1, 1]} : vector<8x512xf32> to vector<8x128xf32>
    %430 = arith.negf %429 : vector<8x128xf32>
    %431 = math.exp %430 : vector<8x128xf32>
    %cst_205 = arith.constant 1.000000e+00 : f32
    %432 = vector.broadcast %cst_205 : f32 to vector<8x128xf32>
    %433 = arith.addf %432, %431 : vector<8x128xf32>
    %434 = arith.divf %432, %433 : vector<8x128xf32>
    %435 = arith.mulf %426, %408 : vector<8x128xf32>
    %436 = arith.mulf %420, %428 : vector<8x128xf32>
    %437 = arith.addf %435, %436 : vector<8x128xf32>
    %438 = math.tanh %437 : vector<8x128xf32>
    %439 = arith.mulf %434, %438 : vector<8x128xf32>
    %c1_206 = arith.constant 1 : index
    %c0_207 = arith.constant 0 : index
    %c0_208 = arith.constant 0 : index
    %440 = vector.load %arg15[%c1_206, %c0_207, %c0_208] : memref<2x8x128xf32, #tpu.memory_space<vmem>>, vector<1x8x128xf32>
    %441 = vector.shape_cast %440 : vector<1x8x128xf32> to vector<8x128xf32>
    %442 = vector.shape_cast %439 : vector<8x128xf32> to vector<1x8x128xf32>
    tpu.vector_store %arg15[%c1_206, %c0_207, %c0_208], %442 {strides = array<i32>} : memref<2x8x128xf32, #tpu.memory_space<vmem>>, vector<1x8x128xf32>,
    %c1_209 = arith.constant 1 : index
    %c0_210 = arith.constant 0 : index
    %c0_211 = arith.constant 0 : index
    %443 = vector.load %arg16[%c1_209, %c0_210, %c0_211] : memref<2x8x128xf32, #tpu.memory_space<vmem>>, vector<1x8x128xf32>
    %444 = vector.shape_cast %443 : vector<1x8x128xf32> to vector<8x128xf32>
    %445 = vector.shape_cast %437 : vector<8x128xf32> to vector<1x8x128xf32>
    tpu.vector_store %arg16[%c1_209, %c0_210, %c0_211], %445 {strides = array<i32>} : memref<2x8x128xf32, #tpu.memory_space<vmem>>, vector<1x8x128xf32>,
    %c2_i32_212 = arith.constant 2 : i32
    %c1_213 = arith.constant 1 : index
    %c0_214 = arith.constant 0 : index
    %c0_215 = arith.constant 0 : index
    %446 = vector.load %arg15[%c1_213, %c0_214, %c0_215] : memref<2x8x128xf32, #tpu.memory_space<vmem>>, vector<1x8x128xf32>
    %447 = vector.shape_cast %446 : vector<1x8x128xf32> to vector<8x128xf32>
    %c1_216 = arith.constant 1 : index
    %c0_217 = arith.constant 0 : index
    %c0_218 = arith.constant 0 : index
    %448 = vector.load %arg16[%c1_216, %c0_217, %c0_218] : memref<2x8x128xf32, #tpu.memory_space<vmem>>, vector<1x8x128xf32>
    %449 = vector.shape_cast %448 : vector<1x8x128xf32> to vector<8x128xf32>
    %c8_i32_219 = arith.constant 8 : i32
    %450 = arith.muli %c2_i32_212, %c8_i32_219 : i32
    %451 = tpu.assume_multiple %450, 8 : i32
    %452 = arith.index_cast %451 : i32 to index
    %c0_220 = arith.constant 0 : index
    %453 = vector.load %arg13[%452, %c0_220] : memref<64x512xf32, #tpu.memory_space<vmem>>, vector<8x512xf32>
    %cst_221 = arith.constant dense<0.000000e+00> : vector<8x512xf32>
    %454 = tpu.matmul %447, %357, %cst_221 {dimension_numbers = #tpu.dot_dimension_numbers<[1], [0], [0], [1], [0, 0, 1, 1], [], []>} : vector<8x128xf32>, vector<128x512xf32>, vector<8x512xf32> -> vector<8x512xf32>
    %455 = arith.addf %453, %454 : vector<8x512xf32>
    %456 = vector.extract_strided_slice %455 {offsets = [0, 0], sizes = [8, 128], strides = [1, 1]} : vector<8x512xf32> to vector<8x128xf32>
    %457 = arith.negf %456 : vector<8x128xf32>
    %458 = math.exp %457 : vector<8x128xf32>
    %cst_222 = arith.constant 1.000000e+00 : f32
    %459 = vector.broadcast %cst_222 : f32 to vector<8x128xf32>
    %460 = arith.addf %459, %458 : vector<8x128xf32>
    %461 = arith.divf %459, %460 : vector<8x128xf32>
    %462 = vector.extract_strided_slice %455 {offsets = [0, 128], sizes = [8, 128], strides = [1, 1]} : vector<8x512xf32> to vector<8x128xf32>
    %463 = arith.negf %462 : vector<8x128xf32>
    %464 = math.exp %463 : vector<8x128xf32>
    %cst_223 = arith.constant 1.000000e+00 : f32
    %465 = vector.broadcast %cst_223 : f32 to vector<8x128xf32>
    %466 = arith.addf %465, %464 : vector<8x128xf32>
    %467 = arith.divf %465, %466 : vector<8x128xf32>
    %468 = vector.extract_strided_slice %455 {offsets = [0, 256], sizes = [8, 128], strides = [1, 1]} : vector<8x512xf32> to vector<8x128xf32>
    %469 = math.tanh %468 : vector<8x128xf32>
    %470 = vector.extract_strided_slice %455 {offsets = [0, 384], sizes = [8, 128], strides = [1, 1]} : vector<8x512xf32> to vector<8x128xf32>
    %471 = arith.negf %470 : vector<8x128xf32>
    %472 = math.exp %471 : vector<8x128xf32>
    %cst_224 = arith.constant 1.000000e+00 : f32
    %473 = vector.broadcast %cst_224 : f32 to vector<8x128xf32>
    %474 = arith.addf %473, %472 : vector<8x128xf32>
    %475 = arith.divf %473, %474 : vector<8x128xf32>
    %476 = arith.mulf %467, %449 : vector<8x128xf32>
    %477 = arith.mulf %461, %469 : vector<8x128xf32>
    %478 = arith.addf %476, %477 : vector<8x128xf32>
    %479 = math.tanh %478 : vector<8x128xf32>
    %480 = arith.mulf %475, %479 : vector<8x128xf32>
    %c1_225 = arith.constant 1 : index
    %c0_226 = arith.constant 0 : index
    %c0_227 = arith.constant 0 : index
    %481 = vector.load %arg15[%c1_225, %c0_226, %c0_227] : memref<2x8x128xf32, #tpu.memory_space<vmem>>, vector<1x8x128xf32>
    %482 = vector.shape_cast %481 : vector<1x8x128xf32> to vector<8x128xf32>
    %483 = vector.shape_cast %480 : vector<8x128xf32> to vector<1x8x128xf32>
    tpu.vector_store %arg15[%c1_225, %c0_226, %c0_227], %483 {strides = array<i32>} : memref<2x8x128xf32, #tpu.memory_space<vmem>>, vector<1x8x128xf32>,
    %c1_228 = arith.constant 1 : index
    %c0_229 = arith.constant 0 : index
    %c0_230 = arith.constant 0 : index
    %484 = vector.load %arg16[%c1_228, %c0_229, %c0_230] : memref<2x8x128xf32, #tpu.memory_space<vmem>>, vector<1x8x128xf32>
    %485 = vector.shape_cast %484 : vector<1x8x128xf32> to vector<8x128xf32>
    %486 = vector.shape_cast %478 : vector<8x128xf32> to vector<1x8x128xf32>
    tpu.vector_store %arg16[%c1_228, %c0_229, %c0_230], %486 {strides = array<i32>} : memref<2x8x128xf32, #tpu.memory_space<vmem>>, vector<1x8x128xf32>,
    %c3_i32_231 = arith.constant 3 : i32
    %c1_232 = arith.constant 1 : index
    %c0_233 = arith.constant 0 : index
    %c0_234 = arith.constant 0 : index
    %487 = vector.load %arg15[%c1_232, %c0_233, %c0_234] : memref<2x8x128xf32, #tpu.memory_space<vmem>>, vector<1x8x128xf32>
    %488 = vector.shape_cast %487 : vector<1x8x128xf32> to vector<8x128xf32>
    %c1_235 = arith.constant 1 : index
    %c0_236 = arith.constant 0 : index
    %c0_237 = arith.constant 0 : index
    %489 = vector.load %arg16[%c1_235, %c0_236, %c0_237] : memref<2x8x128xf32, #tpu.memory_space<vmem>>, vector<1x8x128xf32>
    %490 = vector.shape_cast %489 : vector<1x8x128xf32> to vector<8x128xf32>
    %c8_i32_238 = arith.constant 8 : i32
    %491 = arith.muli %c3_i32_231, %c8_i32_238 : i32
    %492 = tpu.assume_multiple %491, 8 : i32
    %493 = arith.index_cast %492 : i32 to index
    %c0_239 = arith.constant 0 : index
    %494 = vector.load %arg13[%493, %c0_239] : memref<64x512xf32, #tpu.memory_space<vmem>>, vector<8x512xf32>
    %cst_240 = arith.constant dense<0.000000e+00> : vector<8x512xf32>
    %495 = tpu.matmul %488, %357, %cst_240 {dimension_numbers = #tpu.dot_dimension_numbers<[1], [0], [0], [1], [0, 0, 1, 1], [], []>} : vector<8x128xf32>, vector<128x512xf32>, vector<8x512xf32> -> vector<8x512xf32>
    %496 = arith.addf %494, %495 : vector<8x512xf32>
    %497 = vector.extract_strided_slice %496 {offsets = [0, 0], sizes = [8, 128], strides = [1, 1]} : vector<8x512xf32> to vector<8x128xf32>
    %498 = arith.negf %497 : vector<8x128xf32>
    %499 = math.exp %498 : vector<8x128xf32>
    %cst_241 = arith.constant 1.000000e+00 : f32
    %500 = vector.broadcast %cst_241 : f32 to vector<8x128xf32>
    %501 = arith.addf %500, %499 : vector<8x128xf32>
    %502 = arith.divf %500, %501 : vector<8x128xf32>
    %503 = vector.extract_strided_slice %496 {offsets = [0, 128], sizes = [8, 128], strides = [1, 1]} : vector<8x512xf32> to vector<8x128xf32>
    %504 = arith.negf %503 : vector<8x128xf32>
    %505 = math.exp %504 : vector<8x128xf32>
    %cst_242 = arith.constant 1.000000e+00 : f32
    %506 = vector.broadcast %cst_242 : f32 to vector<8x128xf32>
    %507 = arith.addf %506, %505 : vector<8x128xf32>
    %508 = arith.divf %506, %507 : vector<8x128xf32>
    %509 = vector.extract_strided_slice %496 {offsets = [0, 256], sizes = [8, 128], strides = [1, 1]} : vector<8x512xf32> to vector<8x128xf32>
    %510 = math.tanh %509 : vector<8x128xf32>
    %511 = vector.extract_strided_slice %496 {offsets = [0, 384], sizes = [8, 128], strides = [1, 1]} : vector<8x512xf32> to vector<8x128xf32>
    %512 = arith.negf %511 : vector<8x128xf32>
    %513 = math.exp %512 : vector<8x128xf32>
    %cst_243 = arith.constant 1.000000e+00 : f32
    %514 = vector.broadcast %cst_243 : f32 to vector<8x128xf32>
    %515 = arith.addf %514, %513 : vector<8x128xf32>
    %516 = arith.divf %514, %515 : vector<8x128xf32>
    %517 = arith.mulf %508, %490 : vector<8x128xf32>
    %518 = arith.mulf %502, %510 : vector<8x128xf32>
    %519 = arith.addf %517, %518 : vector<8x128xf32>
    %520 = math.tanh %519 : vector<8x128xf32>
    %521 = arith.mulf %516, %520 : vector<8x128xf32>
    %c1_244 = arith.constant 1 : index
    %c0_245 = arith.constant 0 : index
    %c0_246 = arith.constant 0 : index
    %522 = vector.load %arg15[%c1_244, %c0_245, %c0_246] : memref<2x8x128xf32, #tpu.memory_space<vmem>>, vector<1x8x128xf32>
    %523 = vector.shape_cast %522 : vector<1x8x128xf32> to vector<8x128xf32>
    %524 = vector.shape_cast %521 : vector<8x128xf32> to vector<1x8x128xf32>
    tpu.vector_store %arg15[%c1_244, %c0_245, %c0_246], %524 {strides = array<i32>} : memref<2x8x128xf32, #tpu.memory_space<vmem>>, vector<1x8x128xf32>,
    %c1_247 = arith.constant 1 : index
    %c0_248 = arith.constant 0 : index
    %c0_249 = arith.constant 0 : index
    %525 = vector.load %arg16[%c1_247, %c0_248, %c0_249] : memref<2x8x128xf32, #tpu.memory_space<vmem>>, vector<1x8x128xf32>
    %526 = vector.shape_cast %525 : vector<1x8x128xf32> to vector<8x128xf32>
    %527 = vector.shape_cast %519 : vector<8x128xf32> to vector<1x8x128xf32>
    tpu.vector_store %arg16[%c1_247, %c0_248, %c0_249], %527 {strides = array<i32>} : memref<2x8x128xf32, #tpu.memory_space<vmem>>, vector<1x8x128xf32>,
    %c4_i32_250 = arith.constant 4 : i32
    %c1_251 = arith.constant 1 : index
    %c0_252 = arith.constant 0 : index
    %c0_253 = arith.constant 0 : index
    %528 = vector.load %arg15[%c1_251, %c0_252, %c0_253] : memref<2x8x128xf32, #tpu.memory_space<vmem>>, vector<1x8x128xf32>
    %529 = vector.shape_cast %528 : vector<1x8x128xf32> to vector<8x128xf32>
    %c1_254 = arith.constant 1 : index
    %c0_255 = arith.constant 0 : index
    %c0_256 = arith.constant 0 : index
    %530 = vector.load %arg16[%c1_254, %c0_255, %c0_256] : memref<2x8x128xf32, #tpu.memory_space<vmem>>, vector<1x8x128xf32>
    %531 = vector.shape_cast %530 : vector<1x8x128xf32> to vector<8x128xf32>
    %c8_i32_257 = arith.constant 8 : i32
    %532 = arith.muli %c4_i32_250, %c8_i32_257 : i32
    %533 = tpu.assume_multiple %532, 8 : i32
    %534 = arith.index_cast %533 : i32 to index
    %c0_258 = arith.constant 0 : index
    %535 = vector.load %arg13[%534, %c0_258] : memref<64x512xf32, #tpu.memory_space<vmem>>, vector<8x512xf32>
    %cst_259 = arith.constant dense<0.000000e+00> : vector<8x512xf32>
    %536 = tpu.matmul %529, %357, %cst_259 {dimension_numbers = #tpu.dot_dimension_numbers<[1], [0], [0], [1], [0, 0, 1, 1], [], []>} : vector<8x128xf32>, vector<128x512xf32>, vector<8x512xf32> -> vector<8x512xf32>
    %537 = arith.addf %535, %536 : vector<8x512xf32>
    %538 = vector.extract_strided_slice %537 {offsets = [0, 0], sizes = [8, 128], strides = [1, 1]} : vector<8x512xf32> to vector<8x128xf32>
    %539 = arith.negf %538 : vector<8x128xf32>
    %540 = math.exp %539 : vector<8x128xf32>
    %cst_260 = arith.constant 1.000000e+00 : f32
    %541 = vector.broadcast %cst_260 : f32 to vector<8x128xf32>
    %542 = arith.addf %541, %540 : vector<8x128xf32>
    %543 = arith.divf %541, %542 : vector<8x128xf32>
    %544 = vector.extract_strided_slice %537 {offsets = [0, 128], sizes = [8, 128], strides = [1, 1]} : vector<8x512xf32> to vector<8x128xf32>
    %545 = arith.negf %544 : vector<8x128xf32>
    %546 = math.exp %545 : vector<8x128xf32>
    %cst_261 = arith.constant 1.000000e+00 : f32
    %547 = vector.broadcast %cst_261 : f32 to vector<8x128xf32>
    %548 = arith.addf %547, %546 : vector<8x128xf32>
    %549 = arith.divf %547, %548 : vector<8x128xf32>
    %550 = vector.extract_strided_slice %537 {offsets = [0, 256], sizes = [8, 128], strides = [1, 1]} : vector<8x512xf32> to vector<8x128xf32>
    %551 = math.tanh %550 : vector<8x128xf32>
    %552 = vector.extract_strided_slice %537 {offsets = [0, 384], sizes = [8, 128], strides = [1, 1]} : vector<8x512xf32> to vector<8x128xf32>
    %553 = arith.negf %552 : vector<8x128xf32>
    %554 = math.exp %553 : vector<8x128xf32>
    %cst_262 = arith.constant 1.000000e+00 : f32
    %555 = vector.broadcast %cst_262 : f32 to vector<8x128xf32>
    %556 = arith.addf %555, %554 : vector<8x128xf32>
    %557 = arith.divf %555, %556 : vector<8x128xf32>
    %558 = arith.mulf %549, %531 : vector<8x128xf32>
    %559 = arith.mulf %543, %551 : vector<8x128xf32>
    %560 = arith.addf %558, %559 : vector<8x128xf32>
    %561 = math.tanh %560 : vector<8x128xf32>
    %562 = arith.mulf %557, %561 : vector<8x128xf32>
    %c1_263 = arith.constant 1 : index
    %c0_264 = arith.constant 0 : index
    %c0_265 = arith.constant 0 : index
    %563 = vector.load %arg15[%c1_263, %c0_264, %c0_265] : memref<2x8x128xf32, #tpu.memory_space<vmem>>, vector<1x8x128xf32>
    %564 = vector.shape_cast %563 : vector<1x8x128xf32> to vector<8x128xf32>
    %565 = vector.shape_cast %562 : vector<8x128xf32> to vector<1x8x128xf32>
    tpu.vector_store %arg15[%c1_263, %c0_264, %c0_265], %565 {strides = array<i32>} : memref<2x8x128xf32, #tpu.memory_space<vmem>>, vector<1x8x128xf32>,
    %c1_266 = arith.constant 1 : index
    %c0_267 = arith.constant 0 : index
    %c0_268 = arith.constant 0 : index
    %566 = vector.load %arg16[%c1_266, %c0_267, %c0_268] : memref<2x8x128xf32, #tpu.memory_space<vmem>>, vector<1x8x128xf32>
    %567 = vector.shape_cast %566 : vector<1x8x128xf32> to vector<8x128xf32>
    %568 = vector.shape_cast %560 : vector<8x128xf32> to vector<1x8x128xf32>
    tpu.vector_store %arg16[%c1_266, %c0_267, %c0_268], %568 {strides = array<i32>} : memref<2x8x128xf32, #tpu.memory_space<vmem>>, vector<1x8x128xf32>,
    %c5_i32_269 = arith.constant 5 : i32
    %c1_270 = arith.constant 1 : index
    %c0_271 = arith.constant 0 : index
    %c0_272 = arith.constant 0 : index
    %569 = vector.load %arg15[%c1_270, %c0_271, %c0_272] : memref<2x8x128xf32, #tpu.memory_space<vmem>>, vector<1x8x128xf32>
    %570 = vector.shape_cast %569 : vector<1x8x128xf32> to vector<8x128xf32>
    %c1_273 = arith.constant 1 : index
    %c0_274 = arith.constant 0 : index
    %c0_275 = arith.constant 0 : index
    %571 = vector.load %arg16[%c1_273, %c0_274, %c0_275] : memref<2x8x128xf32, #tpu.memory_space<vmem>>, vector<1x8x128xf32>
    %572 = vector.shape_cast %571 : vector<1x8x128xf32> to vector<8x128xf32>
    %c8_i32_276 = arith.constant 8 : i32
    %573 = arith.muli %c5_i32_269, %c8_i32_276 : i32
    %574 = tpu.assume_multiple %573, 8 : i32
    %575 = arith.index_cast %574 : i32 to index
    %c0_277 = arith.constant 0 : index
    %576 = vector.load %arg13[%575, %c0_277] : memref<64x512xf32, #tpu.memory_space<vmem>>, vector<8x512xf32>
    %cst_278 = arith.constant dense<0.000000e+00> : vector<8x512xf32>
    %577 = tpu.matmul %570, %357, %cst_278 {dimension_numbers = #tpu.dot_dimension_numbers<[1], [0], [0], [1], [0, 0, 1, 1], [], []>} : vector<8x128xf32>, vector<128x512xf32>, vector<8x512xf32> -> vector<8x512xf32>
    %578 = arith.addf %576, %577 : vector<8x512xf32>
    %579 = vector.extract_strided_slice %578 {offsets = [0, 0], sizes = [8, 128], strides = [1, 1]} : vector<8x512xf32> to vector<8x128xf32>
    %580 = arith.negf %579 : vector<8x128xf32>
    %581 = math.exp %580 : vector<8x128xf32>
    %cst_279 = arith.constant 1.000000e+00 : f32
    %582 = vector.broadcast %cst_279 : f32 to vector<8x128xf32>
    %583 = arith.addf %582, %581 : vector<8x128xf32>
    %584 = arith.divf %582, %583 : vector<8x128xf32>
    %585 = vector.extract_strided_slice %578 {offsets = [0, 128], sizes = [8, 128], strides = [1, 1]} : vector<8x512xf32> to vector<8x128xf32>
    %586 = arith.negf %585 : vector<8x128xf32>
    %587 = math.exp %586 : vector<8x128xf32>
    %cst_280 = arith.constant 1.000000e+00 : f32
    %588 = vector.broadcast %cst_280 : f32 to vector<8x128xf32>
    %589 = arith.addf %588, %587 : vector<8x128xf32>
    %590 = arith.divf %588, %589 : vector<8x128xf32>
    %591 = vector.extract_strided_slice %578 {offsets = [0, 256], sizes = [8, 128], strides = [1, 1]} : vector<8x512xf32> to vector<8x128xf32>
    %592 = math.tanh %591 : vector<8x128xf32>
    %593 = vector.extract_strided_slice %578 {offsets = [0, 384], sizes = [8, 128], strides = [1, 1]} : vector<8x512xf32> to vector<8x128xf32>
    %594 = arith.negf %593 : vector<8x128xf32>
    %595 = math.exp %594 : vector<8x128xf32>
    %cst_281 = arith.constant 1.000000e+00 : f32
    %596 = vector.broadcast %cst_281 : f32 to vector<8x128xf32>
    %597 = arith.addf %596, %595 : vector<8x128xf32>
    %598 = arith.divf %596, %597 : vector<8x128xf32>
    %599 = arith.mulf %590, %572 : vector<8x128xf32>
    %600 = arith.mulf %584, %592 : vector<8x128xf32>
    %601 = arith.addf %599, %600 : vector<8x128xf32>
    %602 = math.tanh %601 : vector<8x128xf32>
    %603 = arith.mulf %598, %602 : vector<8x128xf32>
    %c1_282 = arith.constant 1 : index
    %c0_283 = arith.constant 0 : index
    %c0_284 = arith.constant 0 : index
    %604 = vector.load %arg15[%c1_282, %c0_283, %c0_284] : memref<2x8x128xf32, #tpu.memory_space<vmem>>, vector<1x8x128xf32>
    %605 = vector.shape_cast %604 : vector<1x8x128xf32> to vector<8x128xf32>
    %606 = vector.shape_cast %603 : vector<8x128xf32> to vector<1x8x128xf32>
    tpu.vector_store %arg15[%c1_282, %c0_283, %c0_284], %606 {strides = array<i32>} : memref<2x8x128xf32, #tpu.memory_space<vmem>>, vector<1x8x128xf32>,
    %c1_285 = arith.constant 1 : index
    %c0_286 = arith.constant 0 : index
    %c0_287 = arith.constant 0 : index
    %607 = vector.load %arg16[%c1_285, %c0_286, %c0_287] : memref<2x8x128xf32, #tpu.memory_space<vmem>>, vector<1x8x128xf32>
    %608 = vector.shape_cast %607 : vector<1x8x128xf32> to vector<8x128xf32>
    %609 = vector.shape_cast %601 : vector<8x128xf32> to vector<1x8x128xf32>
    tpu.vector_store %arg16[%c1_285, %c0_286, %c0_287], %609 {strides = array<i32>} : memref<2x8x128xf32, #tpu.memory_space<vmem>>, vector<1x8x128xf32>,
    %c6_i32_288 = arith.constant 6 : i32
    %c1_289 = arith.constant 1 : index
    %c0_290 = arith.constant 0 : index
    %c0_291 = arith.constant 0 : index
    %610 = vector.load %arg15[%c1_289, %c0_290, %c0_291] : memref<2x8x128xf32, #tpu.memory_space<vmem>>, vector<1x8x128xf32>
    %611 = vector.shape_cast %610 : vector<1x8x128xf32> to vector<8x128xf32>
    %c1_292 = arith.constant 1 : index
    %c0_293 = arith.constant 0 : index
    %c0_294 = arith.constant 0 : index
    %612 = vector.load %arg16[%c1_292, %c0_293, %c0_294] : memref<2x8x128xf32, #tpu.memory_space<vmem>>, vector<1x8x128xf32>
    %613 = vector.shape_cast %612 : vector<1x8x128xf32> to vector<8x128xf32>
    %c8_i32_295 = arith.constant 8 : i32
    %614 = arith.muli %c6_i32_288, %c8_i32_295 : i32
    %615 = tpu.assume_multiple %614, 8 : i32
    %616 = arith.index_cast %615 : i32 to index
    %c0_296 = arith.constant 0 : index
    %617 = vector.load %arg13[%616, %c0_296] : memref<64x512xf32, #tpu.memory_space<vmem>>, vector<8x512xf32>
    %cst_297 = arith.constant dense<0.000000e+00> : vector<8x512xf32>
    %618 = tpu.matmul %611, %357, %cst_297 {dimension_numbers = #tpu.dot_dimension_numbers<[1], [0], [0], [1], [0, 0, 1, 1], [], []>} : vector<8x128xf32>, vector<128x512xf32>, vector<8x512xf32> -> vector<8x512xf32>
    %619 = arith.addf %617, %618 : vector<8x512xf32>
    %620 = vector.extract_strided_slice %619 {offsets = [0, 0], sizes = [8, 128], strides = [1, 1]} : vector<8x512xf32> to vector<8x128xf32>
    %621 = arith.negf %620 : vector<8x128xf32>
    %622 = math.exp %621 : vector<8x128xf32>
    %cst_298 = arith.constant 1.000000e+00 : f32
    %623 = vector.broadcast %cst_298 : f32 to vector<8x128xf32>
    %624 = arith.addf %623, %622 : vector<8x128xf32>
    %625 = arith.divf %623, %624 : vector<8x128xf32>
    %626 = vector.extract_strided_slice %619 {offsets = [0, 128], sizes = [8, 128], strides = [1, 1]} : vector<8x512xf32> to vector<8x128xf32>
    %627 = arith.negf %626 : vector<8x128xf32>
    %628 = math.exp %627 : vector<8x128xf32>
    %cst_299 = arith.constant 1.000000e+00 : f32
    %629 = vector.broadcast %cst_299 : f32 to vector<8x128xf32>
    %630 = arith.addf %629, %628 : vector<8x128xf32>
    %631 = arith.divf %629, %630 : vector<8x128xf32>
    %632 = vector.extract_strided_slice %619 {offsets = [0, 256], sizes = [8, 128], strides = [1, 1]} : vector<8x512xf32> to vector<8x128xf32>
    %633 = math.tanh %632 : vector<8x128xf32>
    %634 = vector.extract_strided_slice %619 {offsets = [0, 384], sizes = [8, 128], strides = [1, 1]} : vector<8x512xf32> to vector<8x128xf32>
    %635 = arith.negf %634 : vector<8x128xf32>
    %636 = math.exp %635 : vector<8x128xf32>
    %cst_300 = arith.constant 1.000000e+00 : f32
    %637 = vector.broadcast %cst_300 : f32 to vector<8x128xf32>
    %638 = arith.addf %637, %636 : vector<8x128xf32>
    %639 = arith.divf %637, %638 : vector<8x128xf32>
    %640 = arith.mulf %631, %613 : vector<8x128xf32>
    %641 = arith.mulf %625, %633 : vector<8x128xf32>
    %642 = arith.addf %640, %641 : vector<8x128xf32>
    %643 = math.tanh %642 : vector<8x128xf32>
    %644 = arith.mulf %639, %643 : vector<8x128xf32>
    %c1_301 = arith.constant 1 : index
    %c0_302 = arith.constant 0 : index
    %c0_303 = arith.constant 0 : index
    %645 = vector.load %arg15[%c1_301, %c0_302, %c0_303] : memref<2x8x128xf32, #tpu.memory_space<vmem>>, vector<1x8x128xf32>
    %646 = vector.shape_cast %645 : vector<1x8x128xf32> to vector<8x128xf32>
    %647 = vector.shape_cast %644 : vector<8x128xf32> to vector<1x8x128xf32>
    tpu.vector_store %arg15[%c1_301, %c0_302, %c0_303], %647 {strides = array<i32>} : memref<2x8x128xf32, #tpu.memory_space<vmem>>, vector<1x8x128xf32>,
    %c1_304 = arith.constant 1 : index
    %c0_305 = arith.constant 0 : index
    %c0_306 = arith.constant 0 : index
    %648 = vector.load %arg16[%c1_304, %c0_305, %c0_306] : memref<2x8x128xf32, #tpu.memory_space<vmem>>, vector<1x8x128xf32>
    %649 = vector.shape_cast %648 : vector<1x8x128xf32> to vector<8x128xf32>
    %650 = vector.shape_cast %642 : vector<8x128xf32> to vector<1x8x128xf32>
    tpu.vector_store %arg16[%c1_304, %c0_305, %c0_306], %650 {strides = array<i32>} : memref<2x8x128xf32, #tpu.memory_space<vmem>>, vector<1x8x128xf32>,
    %c7_i32_307 = arith.constant 7 : i32
    %c1_308 = arith.constant 1 : index
    %c0_309 = arith.constant 0 : index
    %c0_310 = arith.constant 0 : index
    %651 = vector.load %arg15[%c1_308, %c0_309, %c0_310] : memref<2x8x128xf32, #tpu.memory_space<vmem>>, vector<1x8x128xf32>
    %652 = vector.shape_cast %651 : vector<1x8x128xf32> to vector<8x128xf32>
    %c1_311 = arith.constant 1 : index
    %c0_312 = arith.constant 0 : index
    %c0_313 = arith.constant 0 : index
    %653 = vector.load %arg16[%c1_311, %c0_312, %c0_313] : memref<2x8x128xf32, #tpu.memory_space<vmem>>, vector<1x8x128xf32>
    %654 = vector.shape_cast %653 : vector<1x8x128xf32> to vector<8x128xf32>
    %c8_i32_314 = arith.constant 8 : i32
    %655 = arith.muli %c7_i32_307, %c8_i32_314 : i32
    %656 = tpu.assume_multiple %655, 8 : i32
    %657 = arith.index_cast %656 : i32 to index
    %c0_315 = arith.constant 0 : index
    %658 = vector.load %arg13[%657, %c0_315] : memref<64x512xf32, #tpu.memory_space<vmem>>, vector<8x512xf32>
    %cst_316 = arith.constant dense<0.000000e+00> : vector<8x512xf32>
    %659 = tpu.matmul %652, %357, %cst_316 {dimension_numbers = #tpu.dot_dimension_numbers<[1], [0], [0], [1], [0, 0, 1, 1], [], []>} : vector<8x128xf32>, vector<128x512xf32>, vector<8x512xf32> -> vector<8x512xf32>
    %660 = arith.addf %658, %659 : vector<8x512xf32>
    %661 = vector.extract_strided_slice %660 {offsets = [0, 0], sizes = [8, 128], strides = [1, 1]} : vector<8x512xf32> to vector<8x128xf32>
    %662 = arith.negf %661 : vector<8x128xf32>
    %663 = math.exp %662 : vector<8x128xf32>
    %cst_317 = arith.constant 1.000000e+00 : f32
    %664 = vector.broadcast %cst_317 : f32 to vector<8x128xf32>
    %665 = arith.addf %664, %663 : vector<8x128xf32>
    %666 = arith.divf %664, %665 : vector<8x128xf32>
    %667 = vector.extract_strided_slice %660 {offsets = [0, 128], sizes = [8, 128], strides = [1, 1]} : vector<8x512xf32> to vector<8x128xf32>
    %668 = arith.negf %667 : vector<8x128xf32>
    %669 = math.exp %668 : vector<8x128xf32>
    %cst_318 = arith.constant 1.000000e+00 : f32
    %670 = vector.broadcast %cst_318 : f32 to vector<8x128xf32>
    %671 = arith.addf %670, %669 : vector<8x128xf32>
    %672 = arith.divf %670, %671 : vector<8x128xf32>
    %673 = vector.extract_strided_slice %660 {offsets = [0, 256], sizes = [8, 128], strides = [1, 1]} : vector<8x512xf32> to vector<8x128xf32>
    %674 = math.tanh %673 : vector<8x128xf32>
    %675 = vector.extract_strided_slice %660 {offsets = [0, 384], sizes = [8, 128], strides = [1, 1]} : vector<8x512xf32> to vector<8x128xf32>
    %676 = arith.negf %675 : vector<8x128xf32>
    %677 = math.exp %676 : vector<8x128xf32>
    %cst_319 = arith.constant 1.000000e+00 : f32
    %678 = vector.broadcast %cst_319 : f32 to vector<8x128xf32>
    %679 = arith.addf %678, %677 : vector<8x128xf32>
    %680 = arith.divf %678, %679 : vector<8x128xf32>
    %681 = arith.mulf %672, %654 : vector<8x128xf32>
    %682 = arith.mulf %666, %674 : vector<8x128xf32>
    %683 = arith.addf %681, %682 : vector<8x128xf32>
    %684 = math.tanh %683 : vector<8x128xf32>
    %685 = arith.mulf %680, %684 : vector<8x128xf32>
    %c1_320 = arith.constant 1 : index
    %c0_321 = arith.constant 0 : index
    %c0_322 = arith.constant 0 : index
    %686 = vector.load %arg15[%c1_320, %c0_321, %c0_322] : memref<2x8x128xf32, #tpu.memory_space<vmem>>, vector<1x8x128xf32>
    %687 = vector.shape_cast %686 : vector<1x8x128xf32> to vector<8x128xf32>
    %688 = vector.shape_cast %685 : vector<8x128xf32> to vector<1x8x128xf32>
    tpu.vector_store %arg15[%c1_320, %c0_321, %c0_322], %688 {strides = array<i32>} : memref<2x8x128xf32, #tpu.memory_space<vmem>>, vector<1x8x128xf32>,
    %c1_323 = arith.constant 1 : index
    %c0_324 = arith.constant 0 : index
    %c0_325 = arith.constant 0 : index
    %689 = vector.load %arg16[%c1_323, %c0_324, %c0_325] : memref<2x8x128xf32, #tpu.memory_space<vmem>>, vector<1x8x128xf32>
    %690 = vector.shape_cast %689 : vector<1x8x128xf32> to vector<8x128xf32>
    %691 = vector.shape_cast %683 : vector<8x128xf32> to vector<1x8x128xf32>
    tpu.vector_store %arg16[%c1_323, %c0_324, %c0_325], %691 {strides = array<i32>} : memref<2x8x128xf32, #tpu.memory_space<vmem>>, vector<1x8x128xf32>,
    %c8_i32_326 = arith.constant 8 : i32
    %c0_i32_327 = arith.constant 0 : i32
    %692 = arith.cmpi eq, %arg1, %c0_i32_327 : i32
    %693 = arith.extui %692 : i1 to i32
    %c0_i32_328 = arith.constant 0 : i32
    %694 = arith.cmpi ne, %693, %c0_i32_328 : i32
    scf.if %694 {
      %c1_329 = arith.constant 1 : index
      %c0_330 = arith.constant 0 : index
      %c0_331 = arith.constant 0 : index
      %695 = vector.load %arg15[%c1_329, %c0_330, %c0_331] : memref<2x8x128xf32, #tpu.memory_space<vmem>>, vector<1x8x128xf32>
      %696 = vector.shape_cast %695 : vector<1x8x128xf32> to vector<8x128xf32>
      %c0_332 = arith.constant 0 : index
      %c0_333 = arith.constant 0 : index
      %697 = vector.load %arg10[%c0_332, %c0_333] : memref<128x128xf32, #tpu.memory_space<vmem>>, vector<128x128xf32>
      %cst_334 = arith.constant dense<0.000000e+00> : vector<8x128xf32>
      %698 = tpu.matmul %696, %697, %cst_334 {dimension_numbers = #tpu.dot_dimension_numbers<[1], [0], [0], [1], [0, 0, 1, 1], [], []>} : vector<8x128xf32>, vector<128x128xf32>, vector<8x128xf32> -> vector<8x128xf32>
      %c0_335 = arith.constant 0 : index
      %c0_336 = arith.constant 0 : index
      %699 = vector.load %arg11[%c0_335, %c0_336] : memref<1x128xf32, #tpu.memory_space<vmem>>, vector<1x128xf32>
      %700 = vector.broadcast %699 : vector<1x128xf32> to vector<8x128xf32>
      %701 = arith.addf %698, %700 : vector<8x128xf32>
      %cst_337 = arith.constant dense<0xFF800000> : vector<8xf32>
      %702 = vector.multi_reduction <maximumf>, %701, %cst_337 [1] : vector<8x128xf32> to vector<8xf32>
      %703 = vector.shape_cast %702 : vector<8xf32> to vector<8x1xf32>
      %704 = vector.broadcast %703 : vector<8x1xf32> to vector<8x128xf32>
      %705 = arith.subf %701, %704 : vector<8x128xf32>
      %706 = math.exp %705 : vector<8x128xf32>
      %cst_338 = arith.constant dense<0.000000e+00> : vector<8xf32>
      %707 = vector.multi_reduction <add>, %706, %cst_338 [1] : vector<8x128xf32> to vector<8xf32>
      %708 = vector.shape_cast %707 : vector<8xf32> to vector<8x1xf32>
      %709 = math.log %708 : vector<8x1xf32>
      %c0_339 = arith.constant 0 : index
      %c0_340 = arith.constant 0 : index
      %710 = vector.load %arg3[%c0_339, %c0_340] : memref<8x1xi32, #tpu.memory_space<vmem>>, vector<8x1xi32>
      %711 = tpu.iota {dimensions = array<i32: 1>} : vector<8x128xi32>
      %712 = vector.broadcast %710 : vector<8x1xi32> to vector<8x128xi32>
      %713 = arith.cmpi eq, %711, %712 : vector<8x128xi32>
      %cst_341 = arith.constant 0xFF800000 : f32
      %714 = vector.broadcast %cst_341 : f32 to vector<8x128xf32>
      %715 = arith.select %713, %701, %714 : vector<8x128xi1>, vector<8x128xf32>
      %cst_342 = arith.constant dense<0xFF800000> : vector<8xf32>
      %716 = vector.multi_reduction <maximumf>, %715, %cst_342 [1] : vector<8x128xf32> to vector<8xf32>
      %717 = vector.shape_cast %716 : vector<8xf32> to vector<8x1xf32>
      %718 = arith.addf %703, %709 : vector<8x1xf32>
      %719 = arith.subf %718, %717 : vector<8x1xf32>
      %c0_i32_343 = arith.constant 0 : i32
      %720 = vector.broadcast %c0_i32_343 : i32 to vector<8x1xi32>
      %721 = arith.cmpi eq, %710, %720 : vector<8x1xi32>
      %cst_344 = arith.constant 0.000000e+00 : f32
      %722 = vector.broadcast %cst_344 : f32 to vector<8x1xf32>
      %723 = arith.select %721, %722, %719 : vector<8x1xi1>, vector<8x1xf32>
      %c0_345 = arith.constant 0 : index
      %c0_346 = arith.constant 0 : index
      %724 = vector.load %arg12[%c0_345, %c0_346] : memref<8x1xf32, #tpu.memory_space<vmem>>, vector<8x1xf32>
      tpu.vector_store %arg12[%c0_345, %c0_346], %723 {strides = array<i32>} : memref<8x1xf32, #tpu.memory_space<vmem>>, vector<8x1xf32>,
    } else {
    }
    return
  }
  func.func @transform_0(%arg0: i32, %arg1: i32) -> (i32, i32, i32) {
    %c0_i32 = arith.constant 0 : i32
    %c0_i32_0 = arith.constant 0 : i32
    return %arg0, %arg1, %c0_i32 : i32, i32, i32
  }
  func.func @transform_1(%arg0: i32, %arg1: i32) -> (i32, i32) {
    %c0_i32 = arith.constant 0 : i32
    %c0_i32_0 = arith.constant 0 : i32
    return %arg0, %c0_i32 : i32, i32
  }
  func.func @transform_2(%arg0: i32, %arg1: i32) -> (i32, i32) {
    %c0_i32 = arith.constant 0 : i32
    %c0_i32_0 = arith.constant 0 : i32
    %c0_i32_1 = arith.constant 0 : i32
    return %c0_i32, %c0_i32_0 : i32, i32
  }
  func.func @transform_3(%arg0: i32, %arg1: i32) -> (i32, i32) {
    %c0_i32 = arith.constant 0 : i32
    %c0_i32_0 = arith.constant 0 : i32
    %c0_i32_1 = arith.constant 0 : i32
    return %c0_i32, %c0_i32_0 : i32, i32
  }
  func.func @transform_4(%arg0: i32, %arg1: i32) -> (i32, i32) {
    %c0_i32 = arith.constant 0 : i32
    %c0_i32_0 = arith.constant 0 : i32
    %c0_i32_1 = arith.constant 0 : i32
    return %c0_i32, %c0_i32_0 : i32, i32
  }
  func.func @transform_5(%arg0: i32, %arg1: i32) -> (i32, i32) {
    %c0_i32 = arith.constant 0 : i32
    %c0_i32_0 = arith.constant 0 : i32
    %c0_i32_1 = arith.constant 0 : i32
    return %c0_i32, %c0_i32_0 : i32, i32
  }
  func.func @transform_6(%arg0: i32, %arg1: i32) -> (i32, i32) {
    %c0_i32 = arith.constant 0 : i32
    %c0_i32_0 = arith.constant 0 : i32
    %c0_i32_1 = arith.constant 0 : i32
    return %c0_i32, %c0_i32_0 : i32, i32
  }
  func.func @transform_7(%arg0: i32, %arg1: i32) -> (i32, i32) {
    %c0_i32 = arith.constant 0 : i32
    %c0_i32_0 = arith.constant 0 : i32
    %c0_i32_1 = arith.constant 0 : i32
    return %c0_i32, %c0_i32_0 : i32, i32
  }
  func.func @transform_8(%arg0: i32, %arg1: i32) -> (i32, i32) {
    %c0_i32 = arith.constant 0 : i32
    %c0_i32_0 = arith.constant 0 : i32
    %c0_i32_1 = arith.constant 0 : i32
    return %c0_i32, %c0_i32_0 : i32, i32
  }
  func.func @transform_9(%arg0: i32, %arg1: i32) -> (i32, i32) {
    %c0_i32 = arith.constant 0 : i32
    %c0_i32_0 = arith.constant 0 : i32
    %c0_i32_1 = arith.constant 0 : i32
    return %c0_i32, %c0_i32_0 : i32, i32
  }
  func.func @transform_10(%arg0: i32, %arg1: i32) -> (i32, i32) {
    %c0_i32 = arith.constant 0 : i32
    %c0_i32_0 = arith.constant 0 : i32
    return %arg0, %c0_i32 : i32, i32
  }
}

</mosaic_0001>

<bundles_post_ra>
// kernel: tpu_custom_call.1
= control target key start
LH: loop header
LB: loop body
LE: loop exit
PB: predicated region body
PF: predicated region fallthrough
CT: control target
= control target key end

     0   :  { %15 = vsyncpa [#allocation7], 0  ;;  %s6127_s0 = inlined_call_operand.vmem [shape: f32[1,64,32], index: 0, kind: input, shape index: {}]   ;;  %s6128_s1 = inlined_call_operand.vmem [shape: s32[8,1], index: 1, kind: input, shape index: {}]   ;;  %s6129_s2 = inlined_call_operand.hbm [shape: f32[32,512], index: 2, kind: input, shape index: {}]   ;;  %s6130_s3 = inlined_call_operand.hbm [shape: f32[128,512], index: 3, kind: input, shape index: {}]   ;;  %s6131_s4 = inlined_call_operand.vmem [shape: f32[1,512], index: 4, kind: input, shape index: {}]   ;;  %s6132_s5 = inlined_call_operand.hbm [shape: f32[128,512], index: 5, kind: input, shape index: {}]   ;;  %s6133_s6 = inlined_call_operand.hbm [shape: f32[128,512], index: 6, kind: input, shape index: {}]   ;;  %s6134_s7 = inlined_call_operand.vmem [shape: f32[1,512], index: 7, kind: input, shape index: {}]   ;;  %s6135_s8 = inlined_call_operand.hbm [shape: f32[128,128], index: 8, kind: input, shape index: {}]   ;;  %s6136_s9 = inlined_call_operand.vmem [shape: f32[1,128], index: 9, kind: input, shape index: {}]   ;;  %s6137_s10 = inlined_call_operand.vmem [shape: f32[8,1], index: 10, kind: output, shape index: {}]  }
   0x1   :  { %16 = vsyncpa [#allocation9], 0 }
   0x2   :  { %17 = vsyncpa [#allocation12], 0  ;;  %s39_s15 = sshll.u32 %s6130_s3, 4  ;;  %s4005_s16 = smov [#allocation8]   ;;  %s40_s15 = int_to_ptr.hbm [resolvable:$true] %s39_s15 }
   0x3   :  { %s41_s17 = sshll.u32 %s4005_s16, 4  ;;  %s67_s20 = sshll.u32 %s6133_s6, 4  ;;  %s42_s17 = int_to_ptr.vmem [resolvable:$true] %s41_s17  ;;  %s68_s20 = int_to_ptr.hbm [resolvable:$true] %s67_s20 }
   0x4   :  { %s4006_s21 = smov 512   ;;  %s4007_s22 = smov 32  }
   0x5   :  { %47 = dma.hbm_to_vmem [thread:$0]  %s40_s15, 8192, %s42_s17, [#allocation9], %s4006_s21, %s4006_s21, %s4007_s22  }
   0x6   :  { %s4008_s23 = smov [#allocation11]   ;;  %s26_s27 = sshll.u32 %s6129_s2, 4  ;;  %s27_s27 = int_to_ptr.hbm [resolvable:$true] %s26_s27 }
   0x7   :  { %s69_s24 = sshll.u32 %s4008_s23, 4  ;;  %s54_s29 = sshll.u32 %s6132_s5, 4  ;;  %s70_s24 = int_to_ptr.vmem [resolvable:$true] %s69_s24  ;;  %s55_s29 = int_to_ptr.hbm [resolvable:$true] %s54_s29 }
   0x8   :  { %75 = dma.hbm_to_vmem [thread:$0]  %s68_s20, 8192, %s70_s24, [#allocation12], %s4006_s21, %s4006_s21, %s4007_s22  }
   0x9   :  { %s4009_s30 = smov [#allocation6]   ;;  %s4010_s6 = smov [#allocation10]  }
   0xa   :  { %s28_s11 = sshll.u32 %s4009_s30, 4  ;;  %s56_s12 = sshll.u32 %s4010_s6, 4  ;;  %s29_s11 = int_to_ptr.vmem [resolvable:$true] %s28_s11  ;;  %s57_s12 = int_to_ptr.vmem [resolvable:$true] %s56_s12 }
   0xb   :  { %34 = dma.hbm_to_vmem [thread:$0]  %s27_s27, 2048, %s29_s11, [#allocation7], %s4006_s21, %s4006_s21, %s4007_s22  }
   0xc   :  { %s82_s15 = sshll.u32 %s6135_s8, 4  ;;  %s4011_s2 = smov [#allocation13]   ;;  %s83_s15 = int_to_ptr.hbm [resolvable:$true] %s82_s15 }
   0xd   :  { %62 = dma.hbm_to_vmem [thread:$0]  %s55_s29, 8192, %s57_s12, [#allocation9], %s4006_s21, %s4006_s21, %s4007_s22  }
   0xe   :  { %s84_s16 = sshll.u32 %s4011_s2, 4  ;;  %s4012_s17 = smov 128   ;;  %s85_s16 = int_to_ptr.vmem [resolvable:$true] %s84_s16 }
   0xf   :  { %s4013_s18 = smov 8  }
  0x10   :  { %90 = dma.hbm_to_vmem [thread:$0]  %s83_s15, 2048, %s85_s16, [#allocation12], %s4012_s17, %s4012_s17, %s4013_s18  }
  0x11   :  { %3999 = dma.done.wait [#allocation7], 2048  }
  0x12   :  { %4000 = vsyncadd [#allocation7], 4294965248 }
  0x13   :  { %4001 = dma.done.wait [#allocation9], 16384  }
  0x14   :  { %4002 = vsyncadd [#allocation9], 4294950912 }
  0x15   :  { %4003 = dma.done.wait [#allocation12], 10240  }
  0x16   :  { %4004 = vsyncadd [#allocation12], 4294957056  ;;  %v133_v0 = vld [vmem:[#allocation6 + $0x60] sm:$0xff]  ;;  %vm219_vm0 = vcmask 261120   ;;  %v4092_v5 = vld [vmem:[%s6127_s0 + $0x28] sm:$0xff] }
  0x17   :  { %v129_v1 = vld [vmem:[#allocation6 + $0x40] sm:$0xff]  ;;  %256 = vmatpush.msra.mxu0 %v133_v0  ;;  %3466 = vmatpush.msra.mxu1 %v133_v0  ;;  %v4097_v6 = vld [vmem:[%s6127_s0 + $0x30] sm:$0xff]  ;;  %v4102_v7 = vld [vmem:[%s6127_s0 + $0x38] sm:$0xff] }
  0x18   :  { %3467 = vmatpush.msra.mxu2 %v133_v0  ;;  %3468 = vmatpush.msra.mxu3 %v133_v0  ;;  %v125_v2 = vld [vmem:[#allocation6 + $0x20] sm:$0xff]  ;;  %v134_v8 = vld [vmem:[#allocation6 + $0x68] sm:$0xff]  ;;  %v135_v9 = vld [vmem:[#allocation6 + $0x70] sm:$0xff] }
  0x19   :  { %257 = vmatpush.msra.mxu0 %v129_v1  ;;  %3469 = vmatpush.msra.mxu1 %v129_v1  ;;  %v121_v3 = vld [vmem:[#allocation6] sm:$0xff]  ;;  %v136_v10 = vld [vmem:[#allocation6 + $0x78] sm:$0xff]  ;;  %v130_v12 = vld [vmem:[#allocation6 + $0x48] sm:$0xff] }
  0x1a   :  { %3470 = vmatpush.msra.mxu2 %v129_v1  ;;  %3471 = vmatpush.msra.mxu3 %v129_v1  ;;  %v202_v4 = vld [vmem:[%s6127_s0] sm:$0xff]  ;;  %v131_v13 = vld [vmem:[#allocation6 + $0x50] sm:$0xff]  ;;  %v132_v14 = vld [vmem:[#allocation6 + $0x58] sm:$0xff] }
  0x1b   :  { %258 = vmatpush.msra.mxu0 %v125_v2  ;;  %3472 = vmatpush.msra.mxu1 %v125_v2  ;;  %v4107_v11 = vld [vmem:[#allocation8 + $0x1e0] sm:$0xff]  ;;  %v126_v16 = vld [vmem:[#allocation6 + $0x28] sm:$0xff]  ;;  %v127_v17 = vld [vmem:[#allocation6 + $0x30] sm:$0xff] }
  0x1c   :  { %3473 = vmatpush.msra.mxu2 %v125_v2  ;;  %3474 = vmatpush.msra.mxu3 %v125_v2  ;;  %6397 = vst [vmem:[#allocation17_spill] sm:$0xff] %v4107_v11  ;;  %v4113_v15 = vld [vmem:[#allocation8 + $0x1c0] sm:$0xff]  ;;  %v128_v18 = vld [vmem:[#allocation6 + $0x38] sm:$0xff]  ;;  %v122_v20 = vld [vmem:[#allocation6 + $0x8] sm:$0xff] }
  0x1d   :  { %259 = vmatpush.msra.mxu0 %v121_v3  ;;  %3475 = vmatpush.msra.mxu1 %v121_v3  ;;  %v4116_v19 = vld [vmem:[#allocation8 + $0x1a0] sm:$0xff]  ;;  %v123_v21 = vld [vmem:[#allocation6 + $0x10] sm:$0xff]  ;;  %v124_v22 = vld [vmem:[#allocation6 + $0x18] sm:$0xff] }
  0x1e   :  { %3476 = vmatpush.msra.mxu2 %v121_v3  ;;  %3477 = vmatpush.msra.mxu3 %v121_v3  ;;  %v203_v23 = vld [vmem:[%s6127_s0 + $0x8] sm:$0xff]  ;;  %v4126_v25 = vld [vmem:[#allocation8 + $0x1f8] sm:$0xff]  ;;  %v4128_v26 = vld [vmem:[#allocation8 + $0x180] sm:$0xff] }
  0x1f   :  { %3386 = vmatmul.msk.f32.vlgmr.msra.gmra.mxu0 %vm219_vm0, %v202_v4  ;;  %3391 = vmatmul.msk.f32.vlgmr.msra.gmra.mxu1 %vm219_vm0, %v4092_v5  ;;  %v4123_v24 = vld [vmem:[#allocation8 + $0x1e8] sm:$0xff]  ;;  %v4134_v28 = vld [vmem:[#allocation8 + $0x1f0] sm:$0xff]  ;;  %v4138_v29 = vld [vmem:[#allocation8 + $0x160] sm:$0xff] }
  0x20   :  { %3392 = vmatmul.msk.f32.vlgmr.msra.gmra.mxu2 %vm219_vm0, %v4097_v6  ;;  %3393 = vmatmul.msk.f32.vlgmr.msra.gmra.mxu3 %vm219_vm0, %v4102_v7  ;;  %v4132_v27 = vld [vmem:[#allocation8 + $0x1c8] sm:$0xff]  ;;  %v4140_v30 = vld [vmem:[#allocation8 + $0x1d8] sm:$0xff]  ;;  %v4146_v32 = vld [vmem:[#allocation8 + $0x1d0] sm:$0xff] }
  0x21   :  { %297 = vmatpush.msrb.mxu1 %v134_v8  ;;  %338 = vmatpush.msrb.mxu2 %v135_v9  ;;  %v4144_v31 = vld [vmem:[#allocation8 + $0x1a8] sm:$0xff]  ;;  %v4149_v33 = vld [vmem:[#allocation8 + $0x140] sm:$0xff]  ;;  %v4151_v34 = vld [vmem:[#allocation8 + $0x1b8] sm:$0xff] }
  0x22   :  { %379 = vmatpush.msrb.mxu3 %v136_v10  ;;  %449 = vmatpush.msrb.mxu0 %v4107_v11  ;;  %v204_v35 = vld [vmem:[%s6127_s0 + $0x10] sm:$0xff]  ;;  %v4159_v36 = vld [vmem:[#allocation8 + $0x188] sm:$0xff]  ;;  %v4164_v37 = vld [vmem:[#allocation8 + $0x120] sm:$0xff] }
  0x23   :  { %298 = vmatpush.msrb.mxu1 %v130_v12  ;;  %339 = vmatpush.msrb.mxu2 %v131_v13  ;;  %v4169_v38 = vld [vmem:[#allocation8 + $0x168] sm:$0xff]  ;;  %v4171_v39 = vld [vmem:[#allocation8 + $0x198] sm:$0xff]  ;;  %v4175_v40 = vld [vmem:[#allocation8 + $0x100] sm:$0xff] }
  0x24   :  { %380 = vmatpush.msrb.mxu3 %v132_v14  ;;  %450 = vmatpush.msrb.mxu0 %v4113_v15  ;;  %v4177_v41 = vld [vmem:[#allocation8 + $0x1b0] sm:$0xff]  ;;  %v4181_v42 = vld [vmem:[#allocation8 + $0x148] sm:$0xff]  ;;  %v4183_v43 = vld [vmem:[#allocation8 + $0x178] sm:$0xff] }
  0x25   :  { %299 = vmatpush.msrb.mxu1 %v126_v16  ;;  %340 = vmatpush.msrb.mxu2 %v127_v17  ;;  %v4186_v44 = vld [vmem:[#allocation8 + $0xe0] sm:$0xff]  ;;  %v4189_v45 = vld [vmem:[#allocation8 + $0x190] sm:$0xff]  ;;  %v4193_v46 = vld [vmem:[#allocation8 + $0x128] sm:$0xff] }
  0x26   :  { %381 = vmatpush.msrb.mxu3 %v128_v18  ;;  %451 = vmatpush.msrb.mxu0 %v4116_v19  ;;  %v4195_v47 = vld [vmem:[#allocation8 + $0x158] sm:$0xff]  ;;  %v4202_v49 = vld [vmem:[#allocation8 + $0x170] sm:$0xff]  ;;  %v4206_v50 = vld [vmem:[#allocation8 + $0xc0] sm:$0xff] }
  0x27   :  { %300 = vmatpush.msrb.mxu1 %v122_v20  ;;  %341 = vmatpush.msrb.mxu2 %v123_v21  ;;  %v205_v48 = vld [vmem:[%s6127_s0 + $0x18] sm:$0xff]  ;;  %v4211_v51 = vld [vmem:[#allocation8 + $0x108] sm:$0xff]  ;;  %v4218_v53 = vld [vmem:[#allocation8 + $0xa0] sm:$0xff]  ;;  %v6140_v21 = vmov 0.0  }
  0x28   :  { %382 = vmatpush.msrb.mxu3 %v124_v22  ;;  %3387 = vmatmul.msk.f32.gmra.mxu0 %vm219_vm0, %v203_v23  ;;  %v4213_v52 = vld [vmem:[#allocation8 + $0x138] sm:$0xff]  ;;  %6398 = vst [vmem:[#allocation18_spill] sm:$0xff] %v4218_v53  ;;  %v4220_v54 = vld [vmem:[#allocation8 + $0x150] sm:$0xff]  ;;  %v4224_v55 = vld [vmem:[#allocation8 + $0xe8] sm:$0xff] }
  0x29   :  { %3394 = vmatmul.msk.f32.vlgmr.msrb.gmra.mxu1 %vm219_vm0, %v202_v4  ;;  %3402 = vmatmul.msk.f32.vlgmr.msrb.gmra.mxu2 %vm219_vm0, %v202_v4  ;;  %v4226_v56 = vld [vmem:[#allocation8 + $0x118] sm:$0xff]  ;;  %v4228_v57 = vld [vmem:[#allocation8 + $0x80] sm:$0xff]  ;;  %v4232_v58 = vld [vmem:[#allocation8 + $0x130] sm:$0xff] }
  0x2a   :  { %3410 = vmatmul.msk.f32.vlgmr.msrb.gmra.mxu3 %vm219_vm0, %v202_v4  ;;  %469 = vmatpush.msra.mxu1 %v4123_v24  ;;  %6399 = vst [vmem:[#allocation19_spill] sm:$0xff] %v4228_v57  ;;  %v4236_v59 = vld [vmem:[#allocation8 + $0xc8] sm:$0xff]  ;;  %v4238_v60 = vld [vmem:[#allocation8 + $0xf8] sm:$0xff]  ;;  %v206_v61 = vld [vmem:[%s6127_s0 + $0x20] sm:$0xff] }
  0x2b   :  { %509 = vmatpush.msra.mxu3 %v4126_v25  ;;  %452 = vmatpush.msrb.mxu0 %v4128_v26  ;;  %v4245_v62 = vld [vmem:[#allocation8 + $0x110] sm:$0xff]  ;;  %v4249_v63 = vld [vmem:[#allocation8 + $0x60] sm:$0xff]  ;;  %v4254_v0 = vld [vmem:[#allocation8 + $0xa8] sm:$0xff] }
  0x2c   :  { %470 = vmatpush.msra.mxu1 %v4132_v27  ;;  %489 = vmatpush.msra.mxu2 %v4134_v28  ;;  %6400 = vst [vmem:[#allocation20_spill] sm:$0xff] %v4249_v63  ;;  %v4256_v1 = vld [vmem:[#allocation8 + $0xd8] sm:$0xff]  ;;  %v4261_v2 = vld [vmem:[#allocation8 + $0x40] sm:$0xff]  ;;  %v4263_v3 = vld [vmem:[#allocation8 + $0xf0] sm:$0xff] }
  0x2d   :  { %453 = vmatpush.msrb.mxu0 %v4138_v29  ;;  %510 = vmatpush.msra.mxu3 %v4140_v30  ;;  %6401 = vst [vmem:[#allocation21_spill] sm:$0xff] %v4254_v0  ;;  %v4267_v4 = vld [vmem:[#allocation8 + $0x88] sm:$0xff]  ;;  %v4269_v8 = vld [vmem:[#allocation8 + $0xb8] sm:$0xff]  ;;  %v4271_v9 = vld [vmem:[#allocation8 + $0x20] sm:$0xff] }
  0x2e   :  { %471 = vmatpush.msra.mxu1 %v4144_v31  ;;  %490 = vmatpush.msra.mxu2 %v4146_v32  ;;  %6402 = vst [vmem:[#allocation22_spill] sm:$0xff] %v4256_v1  ;;  %v4275_v10 = vld [vmem:[#allocation8 + $0xd0] sm:$0xff]  ;;  %v4279_v12 = vld [vmem:[#allocation8 + $0x68] sm:$0xff]  ;;  %v4281_v13 = vld [vmem:[#allocation8 + $0x98] sm:$0xff] }
  0x2f   :  { %454 = vmatpush.msrb.mxu0 %v4149_v33  ;;  %511 = vmatpush.msra.mxu3 %v4151_v34  ;;  %6403 = vst [vmem:[#allocation23_spill] sm:$0xff] %v4261_v2  ;;  %v4283_v14 = vld [vmem:[#allocation8] sm:$0xff]  ;;  %v4287_v16 = vld [vmem:[#allocation8 + $0xb0] sm:$0xff]  ;;  %v4294_v17 = vld [vmem:[#allocation8 + $0x48] sm:$0xff] }
  0x30   :  { %3388 = vmatmul.msk.f32.gmra.mxu0 %vm219_vm0, %v204_v35  ;;  %472 = vmatpush.msra.mxu1 %v4159_v36  ;;  %6404 = vst [vmem:[#allocation24_spill] sm:$0xff] %v4267_v4  ;;  %v4297_v18 = vld [vmem:[#allocation8 + $0x78] sm:$0xff]  ;;  %v4301_v20 = vld [vmem:[#allocation8 + $0x90] sm:$0xff]  ;;  %v4305_v22 = vld [vmem:[#allocation8 + $0x28] sm:$0xff] }
  0x31   :  { %3395 = vmatmul.msk.f32.gmra.mxu1 %vm219_vm0, %v203_v23  ;;  %3403 = vmatmul.msk.f32.gmra.mxu2 %vm219_vm0, %v203_v23  ;;  %6405 = vst [vmem:[#allocation25_spill] sm:$0xff] %v4269_v8 }
  0x32   :  { %3411 = vmatmul.msk.f32.gmra.mxu3 %vm219_vm0, %v203_v23  ;;  %455 = vmatpush.msrb.mxu0 %v4164_v37  ;;  %6406 = vst [vmem:[#allocation26_spill] sm:$0xff] %v4271_v9  ;;  %v4307_v23 = vld [vmem:[#allocation8 + $0x58] sm:$0xff] }
  0x33   :  { %473 = vmatpush.msra.mxu1 %v4169_v38  ;;  %512 = vmatpush.msra.mxu3 %v4171_v39  ;;  %6407 = vst [vmem:[#allocation27_spill] sm:$0xff] %v4275_v10 }
  0x34   :  { %456 = vmatpush.msrb.mxu0 %v4175_v40  ;;  %491 = vmatpush.msra.mxu2 %v4177_v41  ;;  %6408 = vst [vmem:[#allocation28_spill] sm:$0xff] %v4279_v12 }
  0x35   :  { %474 = vmatpush.msra.mxu1 %v4181_v42  ;;  %513 = vmatpush.msra.mxu3 %v4183_v43  ;;  %6409 = vst [vmem:[#allocation29_spill] sm:$0xff] %v4281_v13 }
  0x36   :  { %457 = vmatpush.msrb.mxu0 %v4186_v44  ;;  %492 = vmatpush.msra.mxu2 %v4189_v45  ;;  %6410 = vst [vmem:[#allocation30_spill] sm:$0xff] %v4283_v14 }
  0x37   :  { %475 = vmatpush.msra.mxu1 %v4193_v46  ;;  %514 = vmatpush.msra.mxu3 %v4195_v47  ;;  %6411 = vst [vmem:[#allocation31_spill] sm:$0xff] %v4287_v16 }
  0x38   :  { %3389 = vmatmul.msk.f32.gmra.mxu0 %vm219_vm0, %v205_v48  ;;  %493 = vmatpush.msra.mxu2 %v4202_v49  ;;  %6412 = vst [vmem:[#allocation32_spill] sm:$0xff] %v4294_v17 }
  0x39   :  { %3396 = vmatmul.msk.f32.gmra.mxu1 %vm219_vm0, %v204_v35  ;;  %3404 = vmatmul.msk.f32.gmra.mxu2 %vm219_vm0, %v204_v35  ;;  %6413 = vst [vmem:[#allocation33_spill] sm:$0xff] %v4297_v18 }
  0x3a   :  { %3412 = vmatmul.msk.f32.gmra.mxu3 %vm219_vm0, %v204_v35  ;;  %458 = vmatpush.msrb.mxu0 %v4206_v50  ;;  %6414 = vst [vmem:[#allocation34_spill] sm:$0xff] %v4301_v20  ;;  %v4311_v35 = vld [vmem:[#allocation8 + $0x70] sm:$0xff] }
  0x3b   :  { %476 = vmatpush.msra.mxu1 %v4211_v51  ;;  %515 = vmatpush.msra.mxu3 %v4213_v52  ;;  %6415 = vst [vmem:[#allocation35_spill] sm:$0xff] %v4305_v22 }
  0x3c   :  { %459 = vmatpush.msrb.mxu0 %v4218_v53  ;;  %494 = vmatpush.msra.mxu2 %v4220_v54  ;;  %6416 = vst [vmem:[#allocation36_spill] sm:$0xff] %v4307_v23 }
  0x3d   :  { %477 = vmatpush.msra.mxu1 %v4224_v55  ;;  %516 = vmatpush.msra.mxu3 %v4226_v56  ;;  %6417 = vst [vmem:[#allocation37_spill] sm:$0xff] %v4311_v35 }
  0x3e   :  { %460 = vmatpush.msrb.mxu0 %v4228_v57  ;;  %495 = vmatpush.msra.mxu2 %v4232_v58 }
  0x3f   :  { %478 = vmatpush.msra.mxu1 %v4236_v59  ;;  %517 = vmatpush.msra.mxu3 %v4238_v60 }
  0x40   :  { %3390 = vmatmul.msk.f32.gmra.mxu0 %vm219_vm0, %v206_v61  ;;  %496 = vmatpush.msra.mxu2 %v4245_v62 }
  0x41   :  { %3397 = vmatmul.msk.f32.gmra.mxu1 %vm219_vm0, %v205_v48  ;;  %3405 = vmatmul.msk.f32.gmra.mxu2 %vm219_vm0, %v205_v48 }
  0x42   :  { %3413 = vmatmul.msk.f32.gmra.mxu3 %vm219_vm0, %v205_v48  ;;  %461 = vmatpush.msrb.mxu0 %v4249_v63  ;;  %v4314_v48 = vld [vmem:[#allocation8 + $0x8] sm:$0xff] }
  0x43   :  { %479 = vmatpush.msra.mxu1 %v4254_v0  ;;  %518 = vmatpush.msra.mxu3 %v4256_v1  ;;  %6418 = vst [vmem:[#allocation38_spill] sm:$0xff] %v4314_v48 }
  0x44   :  { %462 = vmatpush.msrb.mxu0 %v4261_v2  ;;  %497 = vmatpush.msra.mxu2 %v4263_v3 }
  0x45   :  { %480 = vmatpush.msra.mxu1 %v4267_v4  ;;  %519 = vmatpush.msra.mxu3 %v4269_v8 }
  0x46   :  { %463 = vmatpush.msrb.mxu0 %v4271_v9  ;;  %498 = vmatpush.msra.mxu2 %v4275_v10  ;;  %v4330_v9 = vld [vmem:[#allocation8 + $0x18] sm:$0xff] }
  0x47   :  { %481 = vmatpush.msra.mxu1 %v4279_v12  ;;  %520 = vmatpush.msra.mxu3 %v4281_v13  ;;  %6422 = vst [vmem:[#allocation42_spill] sm:$0xff] %v4330_v9 }
  0x48   :  { %464 = vmatpush.msrb.mxu0 %v4283_v14  ;;  %499 = vmatpush.msra.mxu2 %v4287_v16  ;;  %v4316_v14 = vld [vmem:[#allocation8 + $0x38] sm:$0xff] }
  0x49   :  { %3398 = vmatmul.msk.f32.gmra.mxu1 %vm219_vm0, %v206_v61  ;;  %3406 = vmatmul.msk.f32.gmra.mxu2 %vm219_vm0, %v206_v61  ;;  %6419 = vst [vmem:[#allocation39_spill] sm:$0xff] %v4316_v14 }
  0x4a   :  { %3414 = vmatmul.msk.f32.gmra.mxu3 %vm219_vm0, %v206_v61  ;;  %465 = vmatmul.f32.vlgmr.msrb.gmra.mxu0 %v6140_v21  ;;  %v4321_v61 = vld [vmem:[#allocation8 + $0x50] sm:$0xff] }
  0x4b   :  { %482 = vmatpush.msra.mxu1 %v4294_v17  ;;  %521 = vmatpush.msra.mxu3 %v4297_v18  ;;  %6420 = vst [vmem:[#allocation40_spill] sm:$0xff] %v4321_v61  ;;  %v4326_v21 = vld [vmem:[#allocation8 + $0x30] sm:$0xff] }
  0x4c   :  { %500 = vmatpush.msra.mxu2 %v4301_v20  ;;  %608 = vmatpush.msra.mxu0 %v4107_v11  ;;  %6421 = vst [vmem:[#allocation41_spill] sm:$0xff] %v4326_v21  ;;  %v4337_v11 = vld [vmem:[#allocation8 + $0x10] sm:$0xff] }
  0x4d   :  { %483 = vmatpush.msra.mxu1 %v4305_v22  ;;  %522 = vmatpush.msra.mxu3 %v4307_v23  ;;  %6423 = vst [vmem:[#allocation43_spill] sm:$0xff] %v4337_v11 }
  0x4e   :  { %501 = vmatpush.msra.mxu2 %v4311_v35  ;;  %609 = vmatpush.msra.mxu0 %v4113_v15 }
  0x4f   :  { %484 = vmatpush.msra.mxu1 %v4314_v48  ;;  %523 = vmatpush.msra.mxu3 %v4316_v14 }
  0x50   :  { %502 = vmatpush.msra.mxu2 %v4321_v61  ;;  %610 = vmatpush.msra.mxu0 %v4116_v19 }
  0x51   :  { %628 = vmatpush.msrb.mxu1 %v4123_v24  ;;  %3407 = vmatmul.msk.f32.gmra.mxu2 %vm219_vm0, %v4092_v5 }
  0x52   :  { %3399 = vmatmul.msk.f32.gmra.mxu1 %vm219_vm0, %v4092_v5  ;;  %3415 = vmatmul.msk.f32.gmra.mxu3 %vm219_vm0, %v4092_v5  ;;  %v6424_v5 = vmov 0.0  }
  0x53   :  { %503 = vmatpush.msra.mxu2 %v4326_v21  ;;  %524 = vmatpush.msra.mxu3 %v4330_v9 }
  0x54   :  { %629 = vmatpush.msrb.mxu1 %v4132_v27  ;;  %611 = vmatpush.msra.mxu0 %v4128_v26 }
  0x55   :  { %504 = vmatpush.msra.mxu2 %v4337_v11  ;;  %668 = vmatpush.msrb.mxu3 %v4126_v25 }
  0x56   :  { %630 = vmatpush.msrb.mxu1 %v4144_v31  ;;  %612 = vmatpush.msra.mxu0 %v4138_v29 }
  0x57   :  { %648 = vmatpush.msrb.mxu2 %v4134_v28  ;;  %669 = vmatpush.msrb.mxu3 %v4140_v30 }
  0x58   :  { %631 = vmatpush.msrb.mxu1 %v4159_v36  ;;  %613 = vmatpush.msra.mxu0 %v4149_v33 }
  0x59   :  { %649 = vmatpush.msrb.mxu2 %v4146_v32  ;;  %670 = vmatpush.msrb.mxu3 %v4151_v34 }
  0x5a   :  { %3400 = vmatmul.msk.f32.gmra.mxu1 %vm219_vm0, %v4097_v6  ;;  %3408 = vmatmul.msk.f32.gmra.mxu2 %vm219_vm0, %v4097_v6 }
  0x5b   :  { %3416 = vmatmul.msk.f32.gmra.mxu3 %vm219_vm0, %v4097_v6  ;;  %650 = vmatpush.msrb.mxu2 %v4177_v41  ;;  %v6425_v6 = vld [vmem:[#allocation26_spill] sm:$0xff] }
  0x5c   :  { %671 = vmatpush.msrb.mxu3 %v4171_v39  ;;  %632 = vmatpush.msrb.mxu1 %v4169_v38 }
  0x5d   :  { %651 = vmatpush.msrb.mxu2 %v4189_v45  ;;  %614 = vmatpush.msra.mxu0 %v4164_v37 }
  0x5e   :  { %672 = vmatpush.msrb.mxu3 %v4183_v43  ;;  %633 = vmatpush.msrb.mxu1 %v4181_v42 }
  0x5f   :  { %652 = vmatpush.msrb.mxu2 %v4202_v49  ;;  %615 = vmatpush.msra.mxu0 %v4175_v40 }
  0x60   :  { %673 = vmatpush.msrb.mxu3 %v4195_v47  ;;  %634 = vmatpush.msrb.mxu1 %v4193_v46 }
  0x61   :  { %653 = vmatpush.msrb.mxu2 %v4220_v54  ;;  %616 = vmatpush.msra.mxu0 %v4186_v44 }
  0x62   :  { %3401 = vmatmul.msk.f32.gmra.mxu1 %vm219_vm0, %v4102_v7  ;;  %3409 = vmatmul.msk.f32.gmra.mxu2 %vm219_vm0, %v4102_v7 }
  0x63   :  { %3417 = vmatmul.msk.f32.gmra.mxu3 %vm219_vm0, %v4102_v7  ;;  %654 = vmatpush.msrb.mxu2 %v4232_v58  ;;  %v6426_v7 = vld [vmem:[#allocation30_spill] sm:$0xff] }
  0x64   :  { %674 = vmatpush.msrb.mxu3 %v4213_v52  ;;  %635 = vmatpush.msrb.mxu1 %v4211_v51 }
  0x65   :  { %655 = vmatpush.msrb.mxu2 %v4245_v62  ;;  %617 = vmatpush.msra.mxu0 %v4206_v50 }
  0x66   :  { %675 = vmatpush.msrb.mxu3 %v4226_v56  ;;  %636 = vmatpush.msrb.mxu1 %v4224_v55 }
  0x67   :  { %656 = vmatpush.msrb.mxu2 %v4263_v3  ;;  %618 = vmatpush.msra.mxu0 %v4218_v53 }
  0x68   :  { %676 = vmatpush.msrb.mxu3 %v4238_v60  ;;  %637 = vmatpush.msrb.mxu1 %v4236_v59 }
  0x69   :  { %657 = vmatpush.msrb.mxu2 %v4275_v10  ;;  %619 = vmatpush.msra.mxu0 %v4228_v57 }
  0x6a   :  { %485 = vmatmul.f32.vlgmr.msra.gmra.mxu1 %v6424_v5  ;;  %505 = vmatmul.f32.vlgmr.msra.gmra.mxu2 %v6424_v5 }
  0x6b   :  { %525 = vmatmul.f32.vlgmr.msra.gmra.mxu3 %v6424_v5  ;;  %638 = vmatpush.msrb.mxu1 %v4254_v0  ;;  %v6427_v5 = vld [vmem:[#allocation17_spill] sm:$0xff] }
  0x6c   :  { %677 = vmatpush.msrb.mxu3 %v4256_v1  ;;  %658 = vmatpush.msrb.mxu2 %v4287_v16 }
  0x6d   :  { %639 = vmatpush.msrb.mxu1 %v4267_v4  ;;  %620 = vmatpush.msra.mxu0 %v4249_v63 }
  0x6e   :  { %678 = vmatpush.msrb.mxu3 %v4269_v8  ;;  %659 = vmatpush.msrb.mxu2 %v4301_v20 }
  0x6f   :  { %640 = vmatpush.msrb.mxu1 %v4279_v12  ;;  %621 = vmatpush.msra.mxu0 %v4261_v2 }
  0x70   :  { %679 = vmatpush.msrb.mxu3 %v4281_v13  ;;  %660 = vmatpush.msrb.mxu2 %v4311_v35 }
  0x71   :  { %641 = vmatpush.msrb.mxu1 %v4294_v17  ;;  %622 = vmatpush.msra.mxu0 %v6425_v6 }
  0x72   :  { %680 = vmatpush.msrb.mxu3 %v4297_v18  ;;  %661 = vmatpush.msrb.mxu2 %v4321_v61 }
  0x73   :  { %642 = vmatpush.msrb.mxu1 %v4305_v22  ;;  %623 = vmatpush.msra.mxu0 %v6426_v7 }
  0x74   :  { %681 = vmatpush.msrb.mxu3 %v4307_v23  ;;  %662 = vmatpush.msrb.mxu2 %v4326_v21 }
  0x75   :  { %643 = vmatpush.msrb.mxu1 %v4314_v48  ;;  %768 = vmatpush.msrb.mxu0 %v6427_v5 }
  0x76   :  { %682 = vmatpush.msrb.mxu3 %v4316_v14  ;;  %663 = vmatpush.msrb.mxu2 %v4337_v11 }
  0x77   :  { %788 = vmatpush.msra.mxu1 %v4123_v24  ;;  %769 = vmatpush.msrb.mxu0 %v4113_v15 }
  0x78   :  { %683 = vmatpush.msrb.mxu3 %v4330_v9  ;;  %808 = vmatpush.msra.mxu2 %v4134_v28 }
  0x79   :  { %789 = vmatpush.msra.mxu1 %v4132_v27  ;;  %770 = vmatpush.msrb.mxu0 %v4116_v19 }
  0x7a   :  { %828 = vmatpush.msra.mxu3 %v4126_v25  ;;  %809 = vmatpush.msra.mxu2 %v4146_v32 }
  0x7b   :  { %790 = vmatpush.msra.mxu1 %v4144_v31  ;;  %771 = vmatpush.msrb.mxu0 %v4128_v26 }
  0x7c   :  { %829 = vmatpush.msra.mxu3 %v4140_v30  ;;  %810 = vmatpush.msra.mxu2 %v4177_v41 }
  0x7d   :  { %791 = vmatpush.msra.mxu1 %v4159_v36  ;;  %772 = vmatpush.msrb.mxu0 %v4138_v29 }
  0x7e   :  { %830 = vmatpush.msra.mxu3 %v4151_v34  ;;  %811 = vmatpush.msra.mxu2 %v4189_v45 }
  0x7f   :  { %792 = vmatpush.msra.mxu1 %v4169_v38  ;;  %773 = vmatpush.msrb.mxu0 %v4149_v33 }
  0x80   :  { %831 = vmatpush.msra.mxu3 %v4171_v39  ;;  %812 = vmatpush.msra.mxu2 %v4202_v49 }
  0x81   :  { %793 = vmatpush.msra.mxu1 %v4181_v42  ;;  %774 = vmatpush.msrb.mxu0 %v4164_v37 }
  0x82   :  { %832 = vmatpush.msra.mxu3 %v4183_v43  ;;  %813 = vmatpush.msra.mxu2 %v4220_v54 }
  0x83   :  { %794 = vmatpush.msra.mxu1 %v4193_v46  ;;  %775 = vmatpush.msrb.mxu0 %v4175_v40 }
  0x84   :  { %833 = vmatpush.msra.mxu3 %v4195_v47  ;;  %814 = vmatpush.msra.mxu2 %v4232_v58 }
  0x85   :  { %795 = vmatpush.msra.mxu1 %v4211_v51  ;;  %776 = vmatpush.msrb.mxu0 %v4186_v44 }
  0x86   :  { %834 = vmatpush.msra.mxu3 %v4213_v52  ;;  %815 = vmatpush.msra.mxu2 %v4245_v62 }
  0x87   :  { %796 = vmatpush.msra.mxu1 %v4224_v55  ;;  %777 = vmatpush.msrb.mxu0 %v4206_v50 }
  0x88   :  { %835 = vmatpush.msra.mxu3 %v4226_v56  ;;  %816 = vmatpush.msra.mxu2 %v4263_v3 }
  0x89   :  { %797 = vmatpush.msra.mxu1 %v4236_v59  ;;  %778 = vmatpush.msrb.mxu0 %v4218_v53 }
  0x8a   :  { %836 = vmatpush.msra.mxu3 %v4238_v60  ;;  %817 = vmatpush.msra.mxu2 %v4275_v10 }
  0x8b   :  { %798 = vmatpush.msra.mxu1 %v4254_v0  ;;  %779 = vmatpush.msrb.mxu0 %v4228_v57 }
  0x8c   :  { %837 = vmatpush.msra.mxu3 %v4256_v1  ;;  %818 = vmatpush.msra.mxu2 %v4287_v16 }
  0x8d   :  { %799 = vmatpush.msra.mxu1 %v4267_v4  ;;  %780 = vmatpush.msrb.mxu0 %v4249_v63 }
  0x8e   :  { %838 = vmatpush.msra.mxu3 %v4269_v8  ;;  %819 = vmatpush.msra.mxu2 %v4301_v20 }
  0x8f   :  { %800 = vmatpush.msra.mxu1 %v4279_v12  ;;  %781 = vmatpush.msrb.mxu0 %v4261_v2 }
  0x90   :  { %839 = vmatpush.msra.mxu3 %v4281_v13  ;;  %820 = vmatpush.msra.mxu2 %v4311_v35 }
  0x91   :  { %801 = vmatpush.msra.mxu1 %v4294_v17  ;;  %782 = vmatpush.msrb.mxu0 %v6425_v6 }
  0x92   :  { %840 = vmatpush.msra.mxu3 %v4297_v18  ;;  %821 = vmatpush.msra.mxu2 %v4321_v61 }
  0x93   :  { %802 = vmatpush.msra.mxu1 %v4305_v22  ;;  %783 = vmatpush.msrb.mxu0 %v6426_v7 }
  0x94   :  { %841 = vmatpush.msra.mxu3 %v4307_v23  ;;  %822 = vmatpush.msra.mxu2 %v4326_v21 }
  0x95   :  { %803 = vmatpush.msra.mxu1 %v4314_v48 }
  0x96   :  { %842 = vmatpush.msra.mxu3 %v4316_v14  ;;  %823 = vmatpush.msra.mxu2 %v4337_v11 }
  0x98   :  { %843 = vmatpush.msra.mxu3 %v4330_v9 }
  0x9c   :  { %v4484_v17 = vpop.f32.mrf.mxu1  ;;  %v261_v61 = vpop.f32.mrf.mxu0 }
  0x9d   :  { %6428 = vst [vmem:[#allocation17_spill] sm:$0xff] %v4484_v17 }
  0xa3   :  { %v4486_v23 = vpop.f32.mrf.mxu2  ;;  %v4488_v6 = vpop.f32.mrf.mxu3 }
  0xa4   :  { %6429 = vst [vmem:[#allocation44_spill] sm:$0xff] %v4486_v23 }
  0xa5   :  { %6430 = vst [vmem:[#allocation45_spill] sm:$0xff] %v4488_v6  ;;  %v4490_v2 = vpop.f32.mrf.mxu0 }
  0xa6   :  { %v302_v22 = vpop.f32.mrf.mxu1  ;;  %6431 = vst [vmem:[#allocation46_spill] sm:$0xff] %v4490_v2 }
  0xac   :  { %v343_v21 = vpop.f32.mrf.mxu2 }
  0xad   :  { %v384_v14 = vpop.f32.mrf.mxu3  ;;  %v4494_v7 = vpop.f32.mrf.mxu0 }
  0xae   :  { %v4492_v18 = vpop.f32.mrf.mxu1  ;;  %6433 = vst [vmem:[#allocation48_spill] sm:$0xff] %v4494_v7 }
  0xaf   :  { %6432 = vst [vmem:[#allocation47_spill] sm:$0xff] %v4492_v18 }
  0xb4   :  { %v4496_v48 = vpop.f32.mrf.mxu2 }
  0xb5   :  { %6434 = vst [vmem:[#allocation49_spill] sm:$0xff] %v4496_v48  ;;  %v4498_v11 = vpop.f32.mrf.mxu3  ;;  %v4502_v17 = vpop.f32.mrf.mxu0 }
  0xb6   :  { %6435 = vst [vmem:[#allocation50_spill] sm:$0xff] %v4498_v11  ;;  %v4500_v9 = vpop.f32.mrf.mxu1 }
  0xb7   :  { %6436 = vst [vmem:[#allocation51_spill] sm:$0xff] %v4500_v9  ;;  %v201_v9 = vld [vmem:[%s6131_s4] sm:$0xf] }
  0xb8   :  { %6437 = vst [vmem:[#allocation52_spill] sm:$0xff] %v4502_v17 }
  0xbc   :  { %v4504_v23 = vpop.f32.mrf.mxu2 }
  0xbd   :  { %6438 = vst [vmem:[#allocation53_spill] sm:$0xff] %v4504_v23  ;;  %v4506_v6 = vpop.f32.mrf.mxu3  ;;  %v4514_v18 = vpop.f32.mrf.mxu0 }
  0xbe   :  { %6439 = vst [vmem:[#allocation54_spill] sm:$0xff] %v4506_v6  ;;  %v4508_v35 = vpop.f32.mrf.mxu1  ;;  %v4527_v6 = vperm.slane %v201_v9, 0 }
  0xbf   :  { %6440 = vst [vmem:[#allocation55_spill] sm:$0xff] %v4508_v35 }
  0xc0   :  { %6443 = vst [vmem:[#allocation58_spill] sm:$0xff] %v4514_v18 }
  0xc1   :  { %6448 = vst [vmem:[#allocation63_spill] sm:$0xff] %v4527_v6 }
  0xc4   :  { %v4510_v2 = vpop.f32.mrf.mxu2 }
  0xc5   :  { %6441 = vst [vmem:[#allocation56_spill] sm:$0xff] %v4510_v2  ;;  %v4512_v12 = vpop.f32.mrf.mxu3  ;;  %v262_v2 = vadd.f32 %v261_v61, %v4527_v6 }
  0xc6   :  { %6442 = vst [vmem:[#allocation57_spill] sm:$0xff] %v4512_v12  ;;  %v4516_v7 = vpop.f32.mrf.mxu1 }
  0xc7   :  { %6444 = vst [vmem:[#allocation59_spill] sm:$0xff] %v4516_v7  ;;  %v466_v35 = vpop.f32.mrf.mxu0 }
  0xc8   :  { %v529_v12 = vadd.f32 %v466_v35, %v262_v2 }
  0xca   :  { %v3418_v7 = vmul.f32 -1.442695, %v529_v12  ;;  %v4547_v12 = vperm.slane %v201_v9, 3 }
  0xcc   :  { %v4521_v48 = vpop.f32.mrf.mxu2  ;;  %3491 = vpow2.f32 %v3418_v7  ;;  %6457 = vst [vmem:[#allocation72_spill] sm:$0xff] %v4547_v12 }
  0xcd   :  { %6445 = vst [vmem:[#allocation60_spill] sm:$0xff] %v4521_v48  ;;  %v4523_v17 = vpop.f32.mrf.mxu3 }
  0xce   :  { %6446 = vst [vmem:[#allocation61_spill] sm:$0xff] %v4523_v17 }
  0xcf   :  { %v4525_v23 = vpop.f32.mrf.mxu1 }
  0xd0   :  { %6447 = vst [vmem:[#allocation62_spill] sm:$0xff] %v4525_v23  ;;  %v4540_v23 = vperm.slane %v201_v9, 1 }
  0xd2   :  { %v3492_v17 = vpop.eup %3491  ;;  %6454 = vst [vmem:[#allocation69_spill] sm:$0xff] %v4540_v23  ;;  %v303_v2 = vadd.f32 %v302_v22, %v4540_v23  ;;  %v4552_v22 = vperm.slane %v201_v9, 2 }
  0xd3   :  { %v536_v4 = vadd.f32 1.0, %v3492_v17 }
  0xd4   :  { %v4534_v63 = vpop.f32.mrf.mxu2  ;;  %6459 = vst [vmem:[#allocation74_spill] sm:$0xff] %v4552_v22 }
  0xd5   :  { %v4530_v11 = vpop.f32.mrf.mxu3  ;;  %6451 = vst [vmem:[#allocation66_spill] sm:$0xff] %v4534_v63  ;;  %3493 = vrcp.f32 %v536_v4  ;;  %vm542_vm2 = vweird.f32 %v536_v4 }
  0xd6   :  { %6449 = vst [vmem:[#allocation64_spill] sm:$0xff] %v4530_v11 }
  0xd7   :  { %v4532_v18 = vpop.f32.mrf.mxu1 }
  0xd8   :  { %6450 = vst [vmem:[#allocation65_spill] sm:$0xff] %v4532_v18 }
  0xdb   :  { %v3494_v11 = vpop.eup %3493 }
  0xdc   :  { %v538_v57 = vmul.f32 %v3494_v11, %v536_v4  ;;  %vm543_vm1 = vweird.f32 %v3494_v11 }
  0xdd   :  { %v4542_v20 = vpop.f32.mrf.mxu2  ;;  %vm544_vm4 = vmor %vm542_vm2, %vm543_vm1 }
  0xde   :  { %v4536_v13 = vpop.f32.mrf.mxu3  ;;  %6455 = vst [vmem:[#allocation70_spill] sm:$0xff] %v4542_v20 }
  0xdf   :  { %6452 = vst [vmem:[#allocation67_spill] sm:$0xff] %v4536_v13  ;;  %v4538_v48 = vpop.f32.mrf.mxu1 }
  0xe0   :  { %6453 = vst [vmem:[#allocation68_spill] sm:$0xff] %v4538_v48  ;;  %v385_v48 = vadd.f32 %v384_v14, %v4547_v12 }
  0xe5   :  { %v4549_v63 = vpop.f32.mrf.mxu2 }
  0xe6   :  { %v4545_v35 = vpop.f32.mrf.mxu3  ;;  %6458 = vst [vmem:[#allocation73_spill] sm:$0xff] %v4549_v63 }
  0xe7   :  { %6456 = vst [vmem:[#allocation71_spill] sm:$0xff] %v4545_v35  ;;  %v486_v61 = vpop.f32.mrf.mxu1 }
  0xe8   :  { %v530_v18 = vadd.f32 %v486_v61, %v303_v2  ;;  %v539_v2 = vsub.f32 1.0, %v538_v57 }
  0xea   :  { %v3419_v7 = vmul.f32 -1.442695, %v530_v18  ;;  %v344_v18 = vadd.f32 %v343_v21, %v4552_v22 }
  0xec   :  { %3495 = vpow2.f32 %v3419_v7  ;;  %v540_v7 = vmul.f32 %v3494_v11, %v539_v2 }
  0xed   :  { %v506_v61 = vpop.f32.mrf.mxu2 }
  0xee   :  { %v526_v13 = vpop.f32.mrf.mxu3  ;;  %v531_v63 = vadd.f32 %v506_v61, %v344_v18 }
  0xef   :  { %v532_v6 = vadd.f32 %v526_v13, %v385_v48  ;;  %v541_v48 = vadd.f32 %v3494_v11, %v540_v7 }
  0xf1   :  { %v3420_v20 = vmul.f32 -1.442695, %v532_v6  ;;  %v548_v6 = vand.u32 2147483648, %v536_v4  ;;  %v545_v61 = vsel %vm544_vm4, %v3494_v11, %v541_v48 }
  0xf2   :  { %v3496_v17 = vpop.eup %3495 }
  0xf3   :  { %v555_v35 = vadd.f32 1.0, %v3496_v17  ;;  %3497 = vpow2.f32 %v3420_v20  ;;  %v546_v17 = vand.u32 2147483647, %v536_v4  ;;  %v549_v22 = vor.u32 1.1754944e-38, %v548_v6 }
  0xf5   :  { %3499 = vrcp.f32 %v555_v35  ;;  %v567_v9 = vand.u32 2147483648, %v555_v35  ;;  %v565_v57 = vand.u32 2147483647, %v555_v35  ;;  %vm561_vm5 = vweird.f32 %v555_v35 }
  0xf6   :  { %vm547_vm7 = vcmp.eq.f32.partialorder %v546_v17, 8.507059e+37 }
  0xf7   :  { %v568_v18 = vor.u32 1.1754944e-38, %v567_v9  ;;  %vm566_vm8 = vcmp.eq.f32.partialorder %v565_v57, 8.507059e+37  ;;  %v550_v7 = vsel %vm547_vm7, %v549_v22, %v545_v61  ;;  %v6491_v57 = vld [vmem:[#allocation72_spill] sm:$0xff] }
  0xf9   :  { %v3498_v23 = vpop.eup %3497 }
  0xfa   :  { %v575_v8 = vadd.f32 1.0, %v3498_v23 }
  0xfb   :  { %v3500_v14 = vpop.eup %3499 }
  0xfc   :  { %v557_v12 = vmul.f32 %v3500_v14, %v555_v35  ;;  %3501 = vrcp.f32 %v575_v8  ;;  %vm562_vm3 = vweird.f32 %v3500_v14  ;;  %v587_v11 = vand.u32 2147483648, %v575_v8 }
  0xfd   :  { %3503 = vtanh.f32 %v531_v63  ;;  %vm563_vm6 = vmor %vm561_vm5, %vm562_vm3  ;;  %vm581_vm10 = vweird.f32 %v575_v8  ;;  %v585_v35 = vand.u32 2147483647, %v575_v8 }
  0xfe   :  { %v558_v13 = vsub.f32 1.0, %v557_v12  ;;  %v588_v9 = vor.u32 1.1754944e-38, %v587_v11 }
  0xff   :  { %vm586_vm12 = vcmp.eq.f32.partialorder %v585_v35, 8.507059e+37  ;;  %v6493_v35 = vld [vmem:[#allocation74_spill] sm:$0xff] }
 0x100   :  { %v559_v20 = vmul.f32 %v3500_v14, %v558_v13 }
 0x102   :  { %v3502_v21 = vpop.eup %3501  ;;  %v560_v2 = vadd.f32 %v3500_v14, %v559_v20 }
 0x103   :  { %v3504_v23 = vpop.eup %3503  ;;  %v577_v63 = vmul.f32 %v3502_v21, %v575_v8  ;;  %vm582_vm9 = vweird.f32 %v3502_v21 }
 0x104   :  { %v564_v12 = vsel %vm563_vm6, %v3500_v14, %v560_v2  ;;  %v592_v4 = vmul.f32 %v3504_v23, %v550_v7  ;;  %vm583_vm11 = vmor %vm581_vm10, %vm582_vm9 }
 0x105   :  { %v569_v16 = vsel %vm566_vm8, %v568_v18, %v564_v12  ;;  %v578_v0 = vsub.f32 1.0, %v577_v63 }
 0x106   :  { %v591_v13 = vmul.f32 0.0, %v569_v16 }
 0x107   :  { %v579_v53 = vmul.f32 %v3502_v21, %v578_v0 }
 0x108   :  { %v4555_v1 = vadd.f32 %v592_v4, %v591_v13 }
 0x109   :  { %v580_v10 = vadd.f32 %v3502_v21, %v579_v53  ;;  %v6489_v53 = vld [vmem:[#allocation69_spill] sm:$0xff] }
 0x10a   :  { %3505 = vtanh.f32 %v4555_v1 }
 0x10b   :  { %v584_v48 = vsel %vm583_vm11, %v3502_v21, %v580_v10  ;;  %v6492_v21 = vld [vmem:[#allocation50_spill] sm:$0xff] }
 0x10c   :  { %v589_v22 = vsel %vm586_vm12, %v588_v9, %v584_v48  ;;  %v388_v61 = vadd.f32 %v6492_v21, %v6491_v57  ;;  %v6494_v48 = vld [vmem:[#allocation49_spill] sm:$0xff] }
 0x10d   :  { %v347_v9 = vadd.f32 %v6494_v48, %v6493_v35 }
 0x110   :  { %v3506_v14 = vpop.eup %3505 }
 0x111   :  { %v4558_v6 = vmul.f32 %v3506_v14, %v589_v22 }
 0x113   :  { %6460 = vst [vmem:[#allocation75_spill] sm:$0xff] %v4558_v6  ;;  %624 = vmatmul.f32.vlgmr.msra.gmra.mxu0 %v4558_v6  ;;  %644 = vmatmul.f32.vlgmr.msrb.gmra.mxu1 %v4558_v6 }
 0x114   :  { %664 = vmatmul.f32.vlgmr.msrb.gmra.mxu2 %v4558_v6  ;;  %684 = vmatmul.f32.vlgmr.msrb.gmra.mxu3 %v4558_v6  ;;  %v4742_v6 = vld [vmem:[#allocation8 + $0xc0] sm:$0xff] }
 0x115   :  { %928 = vmatpush.msra.mxu0 %v6427_v5  ;;  %948 = vmatpush.msrb.mxu1 %v4123_v24  ;;  %v6463_v24 = vld [vmem:[#allocation18_spill] sm:$0xff] }
 0x116   :  { %968 = vmatpush.msrb.mxu2 %v4134_v28  ;;  %988 = vmatpush.msrb.mxu3 %v4126_v25  ;;  %v6464_v25 = vld [vmem:[#allocation21_spill] sm:$0xff]  ;;  %v6467_v28 = vld [vmem:[#allocation19_spill] sm:$0xff] }
 0x117   :  { %929 = vmatpush.msra.mxu0 %v4113_v15  ;;  %949 = vmatpush.msrb.mxu1 %v4132_v27  ;;  %v6461_v15 = vld [vmem:[#allocation27_spill] sm:$0xff]  ;;  %v6466_v27 = vld [vmem:[#allocation25_spill] sm:$0xff] }
 0x118   :  { %969 = vmatpush.msrb.mxu2 %v4146_v32  ;;  %989 = vmatpush.msrb.mxu3 %v4140_v30  ;;  %v6469_v30 = vld [vmem:[#allocation34_spill] sm:$0xff]  ;;  %v6471_v32 = vld [vmem:[#allocation20_spill] sm:$0xff] }
 0x119   :  { %930 = vmatpush.msra.mxu0 %v4116_v19  ;;  %950 = vmatpush.msrb.mxu1 %v4144_v31  ;;  %v6462_v19 = vld [vmem:[#allocation22_spill] sm:$0xff]  ;;  %v6470_v31 = vld [vmem:[#allocation29_spill] sm:$0xff] }
 0x11a   :  { %970 = vmatpush.msrb.mxu2 %v4177_v41  ;;  %990 = vmatpush.msrb.mxu3 %v4151_v34  ;;  %v6473_v34 = vld [vmem:[#allocation37_spill] sm:$0xff]  ;;  %v6479_v41 = vld [vmem:[#allocation26_spill] sm:$0xff] }
 0x11b   :  { %931 = vmatpush.msra.mxu0 %v4128_v26  ;;  %951 = vmatpush.msrb.mxu1 %v4159_v36  ;;  %v6465_v26 = vld [vmem:[#allocation31_spill] sm:$0xff]  ;;  %v6474_v36 = vld [vmem:[#allocation33_spill] sm:$0xff] }
 0x11c   :  { %971 = vmatpush.msrb.mxu2 %v4189_v45  ;;  %991 = vmatpush.msrb.mxu3 %v4171_v39  ;;  %v6477_v39 = vld [vmem:[#allocation40_spill] sm:$0xff]  ;;  %v6483_v45 = vld [vmem:[#allocation30_spill] sm:$0xff] }
 0x11d   :  { %932 = vmatpush.msra.mxu0 %v4138_v29  ;;  %952 = vmatpush.msrb.mxu1 %v4169_v38  ;;  %v6468_v29 = vld [vmem:[#allocation24_spill] sm:$0xff] }
 0x11e   :  { %972 = vmatpush.msrb.mxu2 %v4202_v49  ;;  %992 = vmatpush.msrb.mxu3 %v4183_v43  ;;  %v6476_v38 = vld [vmem:[#allocation32_spill] sm:$0xff]  ;;  %v6481_v43 = vld [vmem:[#allocation41_spill] sm:$0xff]  ;;  %v6486_v49 = vld [vmem:[#allocation42_spill] sm:$0xff] }
 0x11f   :  { %933 = vmatpush.msra.mxu0 %v4149_v33  ;;  %953 = vmatpush.msrb.mxu1 %v4181_v42  ;;  %v6472_v33 = vld [vmem:[#allocation28_spill] sm:$0xff]  ;;  %v6480_v42 = vld [vmem:[#allocation35_spill] sm:$0xff] }
 0x120   :  { %973 = vmatpush.msrb.mxu2 %v4220_v54  ;;  %993 = vmatpush.msrb.mxu3 %v4195_v47  ;;  %v6485_v47 = vld [vmem:[#allocation43_spill] sm:$0xff] }
 0x121   :  { %934 = vmatpush.msra.mxu0 %v4164_v37  ;;  %954 = vmatpush.msrb.mxu1 %v4193_v46  ;;  %v6475_v37 = vld [vmem:[#allocation23_spill] sm:$0xff]  ;;  %v6484_v46 = vld [vmem:[#allocation38_spill] sm:$0xff] }
 0x122   :  { %974 = vmatpush.msrb.mxu2 %v4232_v58  ;;  %994 = vmatpush.msrb.mxu3 %v4213_v52 }
 0x123   :  { %935 = vmatpush.msra.mxu0 %v4175_v40  ;;  %955 = vmatpush.msrb.mxu1 %v4211_v51  ;;  %v6478_v40 = vld [vmem:[#allocation36_spill] sm:$0xff]  ;;  %v6488_v51 = vld [vmem:[#allocation46_spill] sm:$0xff] }
 0x124   :  { %975 = vmatpush.msrb.mxu2 %v4245_v62  ;;  %995 = vmatpush.msrb.mxu3 %v4226_v56 }
 0x125   :  { %936 = vmatpush.msra.mxu0 %v4186_v44  ;;  %956 = vmatpush.msrb.mxu1 %v4224_v55  ;;  %v6482_v44 = vld [vmem:[#allocation39_spill] sm:$0xff] }
 0x126   :  { %976 = vmatpush.msrb.mxu2 %v4263_v3  ;;  %996 = vmatpush.msrb.mxu3 %v4238_v60  ;;  %v6490_v55 = vld [vmem:[#allocation47_spill] sm:$0xff] }
 0x127   :  { %937 = vmatpush.msra.mxu0 %v4206_v50  ;;  %957 = vmatpush.msrb.mxu1 %v4236_v59  ;;  %v6487_v50 = vld [vmem:[#allocation63_spill] sm:$0xff]  ;;  %v306_v0 = vadd.f32 %v6490_v55, %v6489_v53 }
 0x128   :  { %977 = vmatpush.msrb.mxu2 %v6461_v15  ;;  %997 = vmatpush.msrb.mxu3 %v6462_v19  ;;  %v265_v52 = vadd.f32 %v6488_v51, %v6487_v50 }
 0x129   :  { %938 = vmatpush.msra.mxu0 %v6463_v24  ;;  %958 = vmatpush.msrb.mxu1 %v6464_v25 }
 0x12a   :  { %978 = vmatpush.msrb.mxu2 %v6465_v26  ;;  %998 = vmatpush.msrb.mxu3 %v6466_v27 }
 0x12b   :  { %939 = vmatpush.msra.mxu0 %v6467_v28  ;;  %959 = vmatpush.msrb.mxu1 %v6468_v29 }
 0x12c   :  { %979 = vmatpush.msrb.mxu2 %v6469_v30  ;;  %999 = vmatpush.msrb.mxu3 %v6470_v31 }
 0x12d   :  { %940 = vmatpush.msra.mxu0 %v6471_v32  ;;  %960 = vmatpush.msrb.mxu1 %v6472_v33 }
 0x12e   :  { %980 = vmatpush.msrb.mxu2 %v6473_v34  ;;  %1000 = vmatpush.msrb.mxu3 %v6474_v36 }
 0x12f   :  { %941 = vmatpush.msra.mxu0 %v6475_v37  ;;  %961 = vmatpush.msrb.mxu1 %v6476_v38 }
 0x130   :  { %981 = vmatpush.msrb.mxu2 %v6477_v39  ;;  %1001 = vmatpush.msrb.mxu3 %v6478_v40 }
 0x131   :  { %942 = vmatpush.msra.mxu0 %v6479_v41  ;;  %962 = vmatpush.msrb.mxu1 %v6480_v42 }
 0x132   :  { %982 = vmatpush.msrb.mxu2 %v6481_v43  ;;  %1002 = vmatpush.msrb.mxu3 %v6482_v44 }
 0x133   :  { %943 = vmatpush.msra.mxu0 %v6483_v45  ;;  %963 = vmatpush.msrb.mxu1 %v6484_v46 }
 0x134   :  { %983 = vmatpush.msrb.mxu2 %v6485_v47  ;;  %1003 = vmatpush.msrb.mxu3 %v6486_v49 }
 0x190   :  { %v625_v8 = vpop.f32.mrf.mxu0  ;;  %v645_v10 = vpop.f32.mrf.mxu1 }
 0x191   :  { %v688_v16 = vadd.f32 %v625_v8, %v265_v52  ;;  %v689_v5 = vadd.f32 %v645_v10, %v306_v0 }
 0x193   :  { %v3421_v20 = vmul.f32 -1.442695, %v688_v16  ;;  %v3422_v17 = vmul.f32 -1.442695, %v689_v5 }
 0x195   :  { %3507 = vpow2.f32 %v3421_v20 }
 0x196   :  { %3509 = vpow2.f32 %v3422_v17 }
 0x197   :  { %v685_v2 = vpop.f32.mrf.mxu3  ;;  %v665_v4 = vpop.f32.mrf.mxu2 }
 0x198   :  { %v691_v23 = vadd.f32 %v685_v2, %v388_v61  ;;  %v690_v24 = vadd.f32 %v665_v4, %v347_v9 }
 0x19a   :  { %v3423_v18 = vmul.f32 -1.442695, %v691_v23 }
 0x19b   :  { %v3508_v63 = vpop.eup %3507 }
 0x19c   :  { %v3510_v12 = vpop.eup %3509  ;;  %v695_v7 = vadd.f32 1.0, %v3508_v63  ;;  %3511 = vpow2.f32 %v3423_v18 }
 0x19d   :  { %v714_v13 = vadd.f32 1.0, %v3510_v12 }
 0x19e   :  { %3513 = vrcp.f32 %v695_v7  ;;  %v707_v0 = vand.u32 2147483648, %v695_v7  ;;  %v705_v16 = vand.u32 2147483647, %v695_v7  ;;  %vm701_vm15 = vweird.f32 %v695_v7 }
 0x19f   :  { %3515 = vrcp.f32 %v714_v13  ;;  %v726_v8 = vand.u32 2147483648, %v714_v13  ;;  %v724_v20 = vand.u32 2147483647, %v714_v13  ;;  %vm720_vm0 = vweird.f32 %v714_v13 }
 0x1a0   :  { %v708_v61 = vor.u32 1.1754944e-38, %v707_v0  ;;  %vm706_vm3 = vcmp.eq.f32.partialorder %v705_v16, 8.507059e+37  ;;  %v4652_v16 = vld [vmem:[#allocation8 + $0x1f0] sm:$0xff] }
 0x1a1   :  { %v727_v18 = vor.u32 1.1754944e-38, %v726_v8  ;;  %vm725_vm4 = vcmp.eq.f32.partialorder %v724_v20, 8.507059e+37  ;;  %v4658_v20 = vld [vmem:[#allocation8 + $0x1c0] sm:$0xff] }
 0x1a2   :  { %v3512_v11 = vpop.eup %3511 }
 0x1a3   :  { %v734_v14 = vadd.f32 1.0, %v3512_v11 }
 0x1a4   :  { %v3514_v22 = vpop.eup %3513 }
 0x1a5   :  { %v3516_v28 = vpop.eup %3515  ;;  %v697_v32 = vmul.f32 %v3514_v22, %v695_v7  ;;  %3517 = vrcp.f32 %v734_v14  ;;  %vm702_vm13 = vweird.f32 %v3514_v22  ;;  %vm740_vm6 = vweird.f32 %v734_v14 }
 0x1a6   :  { %v716_v51 = vmul.f32 %v3516_v28, %v714_v13  ;;  %3519 = vtanh.f32 %v690_v24  ;;  %vm721_vm14 = vweird.f32 %v3516_v28  ;;  %vm703_vm1 = vmor %vm701_vm15, %vm702_vm13 }
 0x1a7   :  { %v698_v52 = vsub.f32 1.0, %v697_v32  ;;  %vm722_vm2 = vmor %vm720_vm0, %vm721_vm14 }
 0x1a8   :  { %v717_v55 = vsub.f32 1.0, %v716_v51 }
 0x1a9   :  { %v699_v10 = vmul.f32 %v3514_v22, %v698_v52  ;;  %v746_v52 = vand.u32 2147483648, %v734_v14 }
 0x1aa   :  { %v718_v5 = vmul.f32 %v3516_v28, %v717_v55 }
 0x1ab   :  { %v3518_v17 = vpop.eup %3517  ;;  %v700_v21 = vadd.f32 %v3514_v22, %v699_v10  ;;  %v747_v0 = vor.u32 1.1754944e-38, %v746_v52  ;;  %v4709_v52 = vld [vmem:[#allocation8 + $0x148] sm:$0xff] }
 0x1ac   :  { %v719_v2 = vadd.f32 %v3516_v28, %v718_v5  ;;  %v736_v23 = vmul.f32 %v3518_v17, %v734_v14  ;;  %v3520_v12 = vpop.eup %3519  ;;  %vm741_vm5 = vweird.f32 %v3518_v17  ;;  %v4655_v5 = vld [vmem:[#allocation8 + $0x1f8] sm:$0xff] }
 0x1ad   :  { %v704_v63 = vsel %vm703_vm1, %v3514_v22, %v700_v21  ;;  %v744_v22 = vand.u32 2147483647, %v734_v14  ;;  %vm742_vm7 = vmor %vm740_vm6, %vm741_vm5  ;;  %v4649_v14 = vld [vmem:[#allocation8 + $0x1e8] sm:$0xff]  ;;  %v4664_v21 = vld [vmem:[#allocation8 + $0x1d0] sm:$0xff] }
 0x1ae   :  { %v709_v4 = vsel %vm706_vm3, %v708_v61, %v704_v63  ;;  %v723_v11 = vsel %vm722_vm2, %v3516_v28, %v719_v2  ;;  %v737_v48 = vsub.f32 1.0, %v736_v23  ;;  %v4667_v61 = vld [vmem:[#allocation8 + $0x1d8] sm:$0xff]  ;;  %v4670_v2 = vld [vmem:[#allocation8 + $0x1a0] sm:$0xff]  ;;  %v4673_v23 = vld [vmem:[#allocation8 + $0x1a8] sm:$0xff] }
 0x1af   :  { %v728_v9 = vsel %vm725_vm4, %v727_v18, %v723_v11  ;;  %v751_v24 = vmul.f32 %v3520_v12, %v709_v4  ;;  %vm745_vm8 = vcmp.eq.f32.partialorder %v744_v22, 8.507059e+37  ;;  %v4676_v18 = vld [vmem:[#allocation8 + $0x1b0] sm:$0xff]  ;;  %v4679_v63 = vld [vmem:[#allocation8 + $0x1b8] sm:$0xff]  ;;  %v4682_v12 = vld [vmem:[#allocation8 + $0x180] sm:$0xff] }
 0x1b0   :  { %v750_v32 = vmul.f32 %v728_v9, %v4555_v1  ;;  %v738_v51 = vmul.f32 %v3518_v17, %v737_v48  ;;  %v4646_v1 = vld [vmem:[#allocation8 + $0x1e0] sm:$0xff]  ;;  %v4685_v4 = vld [vmem:[#allocation8 + $0x188] sm:$0xff]  ;;  %v4688_v11 = vld [vmem:[#allocation8 + $0x190] sm:$0xff] }
 0x1b1   :  { %v4691_v48 = vld [vmem:[#allocation8 + $0x198] sm:$0xff]  ;;  %v4694_v9 = vld [vmem:[#allocation8 + $0x160] sm:$0xff] }
 0x1b2   :  { %v4637_v7 = vadd.f32 %v751_v24, %v750_v32  ;;  %v739_v13 = vadd.f32 %v3518_v17, %v738_v51  ;;  %v4697_v24 = vld [vmem:[#allocation8 + $0x168] sm:$0xff]  ;;  %v4700_v32 = vld [vmem:[#allocation8 + $0x170] sm:$0xff]  ;;  %v4703_v51 = vld [vmem:[#allocation8 + $0x178] sm:$0xff] }
 0x1b3   :  { %v4713_v22 = vld [vmem:[#allocation8 + $0x158] sm:$0xff] }
 0x1b4   :  { %3521 = vtanh.f32 %v4637_v7  ;;  %v743_v55 = vsel %vm742_vm7, %v3518_v17, %v739_v13  ;;  %v4661_v17 = vld [vmem:[#allocation8 + $0x1c8] sm:$0xff]  ;;  %v4706_v13 = vld [vmem:[#allocation8 + $0x140] sm:$0xff] }
 0x1b5   :  { %v748_v8 = vsel %vm745_vm8, %v747_v0, %v743_v55  ;;  %v4716_v55 = vld [vmem:[#allocation8 + $0x120] sm:$0xff]  ;;  %v4719_v0 = vld [vmem:[#allocation8 + $0x128] sm:$0xff] }
 0x1ba   :  { %v3522_v28 = vpop.eup %3521 }
 0x1bb   :  { %v4640_v10 = vmul.f32 %v3522_v28, %v748_v8  ;;  %v4723_v28 = vld [vmem:[#allocation8 + $0x138] sm:$0xff]  ;;  %v4726_v8 = vld [vmem:[#allocation8 + $0x100] sm:$0xff] }
 0x1bd   :  { %6495 = vst [vmem:[#allocation27_spill] sm:$0xff] %v4640_v10  ;;  %784 = vmatmul.f32.vlgmr.msrb.gmra.mxu0 %v4640_v10  ;;  %804 = vmatmul.f32.vlgmr.msra.gmra.mxu1 %v4640_v10 }
 0x1be   :  { %824 = vmatmul.f32.vlgmr.msra.gmra.mxu2 %v4640_v10  ;;  %844 = vmatmul.f32.vlgmr.msra.gmra.mxu3 %v4640_v10  ;;  %v4734_v10 = vld [vmem:[#allocation8 + $0xe0] sm:$0xff] }
 0x1bf   :  { %1088 = vmatpush.msrb.mxu0 %v4646_v1  ;;  %1108 = vmatpush.msra.mxu1 %v4649_v14 }
 0x1c0   :  { %1128 = vmatpush.msra.mxu2 %v4652_v16  ;;  %1148 = vmatpush.msra.mxu3 %v4655_v5 }
 0x1c1   :  { %1089 = vmatpush.msrb.mxu0 %v4658_v20  ;;  %1109 = vmatpush.msra.mxu1 %v4661_v17 }
 0x1c2   :  { %1129 = vmatpush.msra.mxu2 %v4664_v21  ;;  %1149 = vmatpush.msra.mxu3 %v4667_v61 }
 0x1c3   :  { %1090 = vmatpush.msrb.mxu0 %v4670_v2  ;;  %1110 = vmatpush.msra.mxu1 %v4673_v23 }
 0x1c4   :  { %1130 = vmatpush.msra.mxu2 %v4676_v18  ;;  %1150 = vmatpush.msra.mxu3 %v4679_v63 }
 0x1c5   :  { %1091 = vmatpush.msrb.mxu0 %v4682_v12  ;;  %1111 = vmatpush.msra.mxu1 %v4685_v4 }
 0x1c6   :  { %1131 = vmatpush.msra.mxu2 %v4688_v11  ;;  %1151 = vmatpush.msra.mxu3 %v4691_v48 }
 0x1c7   :  { %1092 = vmatpush.msrb.mxu0 %v4694_v9  ;;  %1112 = vmatpush.msra.mxu1 %v4697_v24 }
 0x1c8   :  { %1132 = vmatpush.msra.mxu2 %v4700_v32  ;;  %1152 = vmatpush.msra.mxu3 %v4703_v51 }
 0x1c9   :  { %1093 = vmatpush.msrb.mxu0 %v4706_v13  ;;  %1113 = vmatpush.msra.mxu1 %v4709_v52 }
 0x1ca   :  { %1133 = vmatpush.msra.mxu2 %v4220_v54  ;;  %1153 = vmatpush.msra.mxu3 %v4713_v22  ;;  %v4729_v54 = vld [vmem:[#allocation8 + $0x108] sm:$0xff] }
 0x1cb   :  { %1094 = vmatpush.msrb.mxu0 %v4716_v55  ;;  %1114 = vmatpush.msra.mxu1 %v4719_v0 }
 0x1cc   :  { %1134 = vmatpush.msra.mxu2 %v4232_v58  ;;  %1154 = vmatpush.msra.mxu3 %v4723_v28  ;;  %v4737_v58 = vld [vmem:[#allocation8 + $0xe8] sm:$0xff] }
 0x1cd   :  { %1095 = vmatpush.msrb.mxu0 %v4726_v8  ;;  %1115 = vmatpush.msra.mxu1 %v4729_v54 }
 0x1ce   :  { %1135 = vmatpush.msra.mxu2 %v4245_v62  ;;  %1155 = vmatpush.msra.mxu3 %v4226_v56  ;;  %v4748_v56 = vld [vmem:[#allocation8 + $0xa0] sm:$0xff]  ;;  %v6499_v62 = vld [vmem:[#allocation48_spill] sm:$0xff] }
 0x1cf   :  { %1096 = vmatpush.msrb.mxu0 %v4734_v10  ;;  %1116 = vmatpush.msra.mxu1 %v4737_v58  ;;  %6496 = vst [vmem:[#allocation22_spill] sm:$0xff] %v4748_v56 }
 0x1d0   :  { %1136 = vmatpush.msra.mxu2 %v4263_v3  ;;  %1156 = vmatpush.msra.mxu3 %v4238_v60  ;;  %v4754_v60 = vld [vmem:[#allocation8 + $0x80] sm:$0xff]  ;;  %v268_v3 = vadd.f32 %v6499_v62, %v6487_v50 }
 0x1d1   :  { %1097 = vmatpush.msrb.mxu0 %v4742_v6  ;;  %1117 = vmatpush.msra.mxu1 %v4236_v59  ;;  %6497 = vst [vmem:[#allocation18_spill] sm:$0xff] %v4754_v60  ;;  %v4760_v59 = vld [vmem:[#allocation8 + $0x60] sm:$0xff] }
 0x1d2   :  { %1137 = vmatpush.msra.mxu2 %v6461_v15  ;;  %1157 = vmatpush.msra.mxu3 %v6462_v19  ;;  %6498 = vst [vmem:[#allocation21_spill] sm:$0xff] %v4760_v59  ;;  %v6500_v15 = vld [vmem:[#allocation51_spill] sm:$0xff] }
 0x1d3   :  { %1098 = vmatpush.msrb.mxu0 %v4748_v56  ;;  %1118 = vmatpush.msra.mxu1 %v6464_v25  ;;  %v309_v19 = vadd.f32 %v6500_v15, %v6489_v53 }
 0x1d4   :  { %1138 = vmatpush.msra.mxu2 %v6465_v26  ;;  %1158 = vmatpush.msra.mxu3 %v6466_v27 }
 0x1d5   :  { %1099 = vmatpush.msrb.mxu0 %v4754_v60  ;;  %1119 = vmatpush.msra.mxu1 %v6468_v29 }
 0x1d6   :  { %1139 = vmatpush.msra.mxu2 %v6469_v30  ;;  %1159 = vmatpush.msra.mxu3 %v6470_v31 }
 0x1d7   :  { %1100 = vmatpush.msrb.mxu0 %v4760_v59  ;;  %1120 = vmatpush.msra.mxu1 %v6472_v33  ;;  %v6501_v33 = vld [vmem:[#allocation54_spill] sm:$0xff] }
 0x1d8   :  { %1140 = vmatpush.msra.mxu2 %v6473_v34  ;;  %1160 = vmatpush.msra.mxu3 %v6474_v36  ;;  %v391_v34 = vadd.f32 %v6501_v33, %v6491_v57 }
 0x1d9   :  { %1101 = vmatpush.msrb.mxu0 %v6475_v37  ;;  %1121 = vmatpush.msra.mxu1 %v6476_v38 }
 0x1da   :  { %1141 = vmatpush.msra.mxu2 %v6477_v39  ;;  %1161 = vmatpush.msra.mxu3 %v6478_v40 }
 0x1db   :  { %1102 = vmatpush.msrb.mxu0 %v6479_v41  ;;  %1122 = vmatpush.msra.mxu1 %v6480_v42 }
 0x1dc   :  { %1142 = vmatpush.msra.mxu2 %v6481_v43  ;;  %1162 = vmatpush.msra.mxu3 %v6482_v44 }
 0x1dd   :  { %1103 = vmatpush.msrb.mxu0 %v6483_v45  ;;  %1123 = vmatpush.msra.mxu1 %v6484_v46  ;;  %v6502_v45 = vld [vmem:[#allocation53_spill] sm:$0xff] }
 0x1de   :  { %1143 = vmatpush.msra.mxu2 %v6485_v47  ;;  %1163 = vmatpush.msra.mxu3 %v6486_v49  ;;  %v350_v46 = vadd.f32 %v6502_v45, %v6493_v35 }
 0x23a   :  { %v785_v25 = vpop.f32.mrf.mxu0  ;;  %v805_v26 = vpop.f32.mrf.mxu1 }
 0x23b   :  { %v848_v27 = vadd.f32 %v785_v25, %v268_v3  ;;  %v849_v29 = vadd.f32 %v805_v26, %v309_v19 }
 0x23d   :  { %v3424_v30 = vmul.f32 -1.442695, %v848_v27  ;;  %v3425_v31 = vmul.f32 -1.442695, %v849_v29 }
 0x23f   :  { %3523 = vpow2.f32 %v3424_v30 }
 0x240   :  { %3525 = vpow2.f32 %v3425_v31 }
 0x241   :  { %v845_v36 = vpop.f32.mrf.mxu3  ;;  %v825_v43 = vpop.f32.mrf.mxu2 }
 0x242   :  { %v851_v37 = vadd.f32 %v845_v36, %v391_v34  ;;  %v850_v62 = vadd.f32 %v825_v43, %v350_v46 }
 0x244   :  { %v3426_v38 = vmul.f32 -1.442695, %v851_v37 }
 0x245   :  { %v3524_v39 = vpop.eup %3523 }
 0x246   :  { %v3526_v40 = vpop.eup %3525  ;;  %v855_v41 = vadd.f32 1.0, %v3524_v39  ;;  %3527 = vpow2.f32 %v3426_v38 }
 0x247   :  { %v874_v42 = vadd.f32 1.0, %v3526_v40 }
 0x248   :  { %3529 = vrcp.f32 %v855_v41  ;;  %v867_v27 = vand.u32 2147483648, %v855_v41  ;;  %v865_v31 = vand.u32 2147483647, %v855_v41  ;;  %vm861_vm11 = vweird.f32 %v855_v41 }
 0x249   :  { %3531 = vrcp.f32 %v874_v42  ;;  %v886_v29 = vand.u32 2147483648, %v874_v42  ;;  %v884_v34 = vand.u32 2147483647, %v874_v42  ;;  %vm880_vm12 = vweird.f32 %v874_v42 }
 0x24a   :  { %v868_v38 = vor.u32 1.1754944e-38, %v867_v27  ;;  %vm866_vm15 = vcmp.eq.f32.partialorder %v865_v31, 8.507059e+37 }
 0x24b   :  { %v887_v43 = vor.u32 1.1754944e-38, %v886_v29  ;;  %vm885_vm0 = vcmp.eq.f32.partialorder %v884_v34, 8.507059e+37 }
 0x24c   :  { %v3528_v44 = vpop.eup %3527 }
 0x24d   :  { %v894_v47 = vadd.f32 1.0, %v3528_v44 }
 0x24e   :  { %v3530_v49 = vpop.eup %3529 }
 0x24f   :  { %v3532_v3 = vpop.eup %3531  ;;  %v857_v15 = vmul.f32 %v3530_v49, %v855_v41  ;;  %3533 = vrcp.f32 %v894_v47  ;;  %vm862_vm9 = vweird.f32 %v3530_v49  ;;  %v906_v27 = vand.u32 2147483648, %v894_v47 }
 0x250   :  { %v876_v19 = vmul.f32 %v3532_v3, %v874_v42  ;;  %3535 = vtanh.f32 %v850_v62  ;;  %vm881_vm10 = vweird.f32 %v3532_v3  ;;  %vm863_vm13 = vmor %vm861_vm11, %vm862_vm9  ;;  %vm900_vm2 = vweird.f32 %v894_v47 }
 0x251   :  { %v858_v25 = vsub.f32 1.0, %v857_v15  ;;  %vm882_vm14 = vmor %vm880_vm12, %vm881_vm10  ;;  %v907_v31 = vor.u32 1.1754944e-38, %v906_v27  ;;  %v4884_v27 = vld [vmem:[#allocation8 + $0x40] sm:$0xff] }
 0x252   :  { %v877_v26 = vsub.f32 1.0, %v876_v19  ;;  %6515 = vst [vmem:[#allocation40_spill] sm:$0xff] %v4884_v27 }
 0x253   :  { %v859_v30 = vmul.f32 %v3530_v49, %v858_v25 }
 0x254   :  { %v878_v33 = vmul.f32 %v3532_v3, %v877_v26 }
 0x255   :  { %v3534_v36 = vpop.eup %3533  ;;  %v860_v37 = vadd.f32 %v3530_v49, %v859_v30 }
 0x256   :  { %v879_v39 = vadd.f32 %v3532_v3, %v878_v33  ;;  %v896_v40 = vmul.f32 %v3534_v36, %v894_v47  ;;  %v3536_v45 = vpop.eup %3535  ;;  %vm901_vm1 = vweird.f32 %v3534_v36 }
 0x257   :  { %v864_v44 = vsel %vm863_vm13, %v3530_v49, %v860_v37  ;;  %v904_v49 = vand.u32 2147483647, %v894_v47  ;;  %vm902_vm3 = vmor %vm900_vm2, %vm901_vm1  ;;  %v4824_v47 = vld [vmem:[#allocation8 + $0x130] sm:$0xff]  ;;  %v4833_v37 = vld [vmem:[#allocation8 + $0x118] sm:$0xff] }
 0x258   :  { %v869_v46 = vsel %vm866_vm15, %v868_v38, %v864_v44  ;;  %v883_v62 = vsel %vm882_vm14, %v3532_v3, %v879_v39  ;;  %v897_v15 = vsub.f32 1.0, %v896_v40  ;;  %v4838_v38 = vld [vmem:[#allocation8 + $0xf0] sm:$0xff]  ;;  %v4841_v39 = vld [vmem:[#allocation8 + $0xf8] sm:$0xff]  ;;  %v4845_v40 = vld [vmem:[#allocation8 + $0xc8] sm:$0xff] }
 0x259   :  { %v888_v19 = vsel %vm885_vm0, %v887_v43, %v883_v62  ;;  %v911_v25 = vmul.f32 %v3536_v45, %v869_v46  ;;  %vm905_vm4 = vcmp.eq.f32.partialorder %v904_v49, 8.507059e+37  ;;  %v4848_v43 = vld [vmem:[#allocation8 + $0xd0] sm:$0xff]  ;;  %v4851_v44 = vld [vmem:[#allocation8 + $0xd8] sm:$0xff]  ;;  %v4855_v45 = vld [vmem:[#allocation8 + $0xa8] sm:$0xff] }
 0x25a   :  { %v910_v26 = vmul.f32 %v888_v19, %v4637_v7  ;;  %v898_v30 = vmul.f32 %v3534_v36, %v897_v15  ;;  %v4818_v7 = vld [vmem:[#allocation8 + $0x150] sm:$0xff]  ;;  %6504 = vst [vmem:[#allocation25_spill] sm:$0xff] %v4848_v43  ;;  %v4861_v62 = vld [vmem:[#allocation8 + $0xb8] sm:$0xff]  ;;  %v4865_v15 = vld [vmem:[#allocation8 + $0x88] sm:$0xff] }
 0x25b   :  { %6505 = vst [vmem:[#allocation19_spill] sm:$0xff] %v4851_v44  ;;  %v4858_v46 = vld [vmem:[#allocation8 + $0xb0] sm:$0xff]  ;;  %v4887_v49 = vld [vmem:[#allocation8 + $0x48] sm:$0xff] }
 0x25c   :  { %v4787_v41 = vadd.f32 %v911_v25, %v910_v26  ;;  %v899_v42 = vadd.f32 %v3534_v36, %v898_v30  ;;  %6506 = vst [vmem:[#allocation24_spill] sm:$0xff] %v4855_v45  ;;  %v4868_v19 = vld [vmem:[#allocation8 + $0x90] sm:$0xff]  ;;  %v4871_v25 = vld [vmem:[#allocation8 + $0x98] sm:$0xff]  ;;  %v4875_v26 = vld [vmem:[#allocation8 + $0x68] sm:$0xff] }
 0x25d   :  { %6507 = vst [vmem:[#allocation34_spill] sm:$0xff] %v4858_v46  ;;  %v4878_v30 = vld [vmem:[#allocation8 + $0x70] sm:$0xff] }
 0x25e   :  { %3537 = vtanh.f32 %v4787_v41  ;;  %v903_v29 = vsel %vm902_vm3, %v3534_v36, %v899_v42  ;;  %v4830_v36 = vld [vmem:[#allocation8 + $0x110] sm:$0xff]  ;;  %6508 = vst [vmem:[#allocation29_spill] sm:$0xff] %v4861_v62  ;;  %v4881_v42 = vld [vmem:[#allocation8 + $0x78] sm:$0xff] }
 0x25f   :  { %v908_v33 = vsel %vm905_vm4, %v907_v31, %v903_v29  ;;  %6509 = vst [vmem:[#allocation20_spill] sm:$0xff] %v4865_v15  ;;  %v4890_v29 = vld [vmem:[#allocation8 + $0x50] sm:$0xff]  ;;  %v4893_v31 = vld [vmem:[#allocation8 + $0x58] sm:$0xff] }
 0x260   :  { %6510 = vst [vmem:[#allocation28_spill] sm:$0xff] %v4868_v19 }
 0x261   :  { %6511 = vst [vmem:[#allocation37_spill] sm:$0xff] %v4871_v25 }
 0x262   :  { %6512 = vst [vmem:[#allocation33_spill] sm:$0xff] %v4875_v26 }
 0x263   :  { %6513 = vst [vmem:[#allocation23_spill] sm:$0xff] %v4878_v30 }
 0x264   :  { %v3538_v3 = vpop.eup %3537  ;;  %6514 = vst [vmem:[#allocation32_spill] sm:$0xff] %v4881_v42 }
 0x265   :  { %v4790_v34 = vmul.f32 %v3538_v3, %v908_v33  ;;  %6516 = vst [vmem:[#allocation36_spill] sm:$0xff] %v4887_v49  ;;  %v4896_v3 = vld [vmem:[#allocation8 + $0x20] sm:$0xff]  ;;  %v4899_v33 = vld [vmem:[#allocation8 + $0x28] sm:$0xff] }
 0x266   :  { %6517 = vst [vmem:[#allocation26_spill] sm:$0xff] %v4890_v29 }
 0x267   :  { %6503 = vst [vmem:[#allocation31_spill] sm:$0xff] %v4790_v34  ;;  %944 = vmatmul.f32.vlgmr.msra.gmra.mxu0 %v4790_v34  ;;  %964 = vmatmul.f32.vlgmr.msrb.gmra.mxu1 %v4790_v34 }
 0x268   :  { %984 = vmatmul.f32.vlgmr.msrb.gmra.mxu2 %v4790_v34  ;;  %1004 = vmatmul.f32.vlgmr.msrb.gmra.mxu3 %v4790_v34  ;;  %6518 = vst [vmem:[#allocation35_spill] sm:$0xff] %v4893_v31  ;;  %v4902_v34 = vld [vmem:[#allocation8 + $0x30] sm:$0xff] }
 0x269   :  { %1248 = vmatpush.msra.mxu0 %v4646_v1  ;;  %1268 = vmatpush.msrb.mxu1 %v4649_v14  ;;  %6519 = vst [vmem:[#allocation41_spill] sm:$0xff] %v4896_v3 }
 0x26a   :  { %1288 = vmatpush.msrb.mxu2 %v4652_v16  ;;  %1308 = vmatpush.msrb.mxu3 %v4655_v5  ;;  %6520 = vst [vmem:[#allocation39_spill] sm:$0xff] %v4899_v33 }
 0x26b   :  { %1249 = vmatpush.msra.mxu0 %v4658_v20  ;;  %1269 = vmatpush.msrb.mxu1 %v4661_v17  ;;  %6521 = vst [vmem:[#allocation30_spill] sm:$0xff] %v4902_v34 }
 0x26c   :  { %1289 = vmatpush.msrb.mxu2 %v4664_v21  ;;  %1309 = vmatpush.msrb.mxu3 %v4667_v61 }
 0x26d   :  { %1250 = vmatpush.msra.mxu0 %v4670_v2  ;;  %1270 = vmatpush.msrb.mxu1 %v4673_v23 }
 0x26e   :  { %1290 = vmatpush.msrb.mxu2 %v4676_v18  ;;  %1310 = vmatpush.msrb.mxu3 %v4679_v63 }
 0x26f   :  { %1251 = vmatpush.msra.mxu0 %v4682_v12  ;;  %1271 = vmatpush.msrb.mxu1 %v4685_v4 }
 0x270   :  { %1291 = vmatpush.msrb.mxu2 %v4688_v11  ;;  %1311 = vmatpush.msrb.mxu3 %v4691_v48 }
 0x271   :  { %1252 = vmatpush.msra.mxu0 %v4694_v9  ;;  %1272 = vmatpush.msrb.mxu1 %v4697_v24 }
 0x272   :  { %1292 = vmatpush.msrb.mxu2 %v4700_v32  ;;  %1312 = vmatpush.msrb.mxu3 %v4703_v51 }
 0x273   :  { %1253 = vmatpush.msra.mxu0 %v4706_v13  ;;  %1273 = vmatpush.msrb.mxu1 %v4709_v52 }
 0x274   :  { %1293 = vmatpush.msrb.mxu2 %v4818_v7  ;;  %1313 = vmatpush.msrb.mxu3 %v4713_v22 }
 0x275   :  { %1254 = vmatpush.msra.mxu0 %v4716_v55  ;;  %1274 = vmatpush.msrb.mxu1 %v4719_v0 }
 0x276   :  { %1294 = vmatpush.msrb.mxu2 %v4824_v47  ;;  %1314 = vmatpush.msrb.mxu3 %v4723_v28 }
 0x277   :  { %1255 = vmatpush.msra.mxu0 %v4726_v8  ;;  %1275 = vmatpush.msrb.mxu1 %v4729_v54 }
 0x278   :  { %1295 = vmatpush.msrb.mxu2 %v4830_v36  ;;  %1315 = vmatpush.msrb.mxu3 %v4833_v37 }
 0x279   :  { %1256 = vmatpush.msra.mxu0 %v4734_v10  ;;  %1276 = vmatpush.msrb.mxu1 %v4737_v58 }
 0x27a   :  { %1296 = vmatpush.msrb.mxu2 %v4838_v38  ;;  %1316 = vmatpush.msrb.mxu3 %v4841_v39 }
 0x27b   :  { %1257 = vmatpush.msra.mxu0 %v4742_v6  ;;  %1277 = vmatpush.msrb.mxu1 %v4845_v40 }
 0x27c   :  { %1297 = vmatpush.msrb.mxu2 %v4848_v43  ;;  %1317 = vmatpush.msrb.mxu3 %v4851_v44 }
 0x27d   :  { %1258 = vmatpush.msra.mxu0 %v4748_v56  ;;  %1278 = vmatpush.msrb.mxu1 %v4855_v45 }
 0x27e   :  { %1298 = vmatpush.msrb.mxu2 %v4858_v46  ;;  %1318 = vmatpush.msrb.mxu3 %v4861_v62 }
 0x27f   :  { %1259 = vmatpush.msra.mxu0 %v4754_v60  ;;  %1279 = vmatpush.msrb.mxu1 %v4865_v15 }
 0x280   :  { %1299 = vmatpush.msrb.mxu2 %v4868_v19  ;;  %1319 = vmatpush.msrb.mxu3 %v4871_v25  ;;  %v6529_v19 = vld [vmem:[#allocation57_spill] sm:$0xff] }
 0x281   :  { %1260 = vmatpush.msra.mxu0 %v4760_v59  ;;  %1280 = vmatpush.msrb.mxu1 %v4875_v26 }
 0x282   :  { %1300 = vmatpush.msrb.mxu2 %v4878_v30  ;;  %1320 = vmatpush.msrb.mxu3 %v4881_v42 }
 0x283   :  { %1261 = vmatpush.msra.mxu0 %v4884_v27  ;;  %1281 = vmatpush.msrb.mxu1 %v4887_v49  ;;  %v4905_v49 = vld [vmem:[#allocation8 + $0x38] sm:$0xff] }
 0x284   :  { %1301 = vmatpush.msrb.mxu2 %v4890_v29  ;;  %1321 = vmatpush.msrb.mxu3 %v4893_v31  ;;  %6522 = vst [vmem:[#allocation38_spill] sm:$0xff] %v4905_v49  ;;  %v4908_v29 = vld [vmem:[#allocation8] sm:$0xff]  ;;  %v4911_v31 = vld [vmem:[#allocation8 + $0x8] sm:$0xff] }
 0x285   :  { %1262 = vmatpush.msra.mxu0 %v4896_v3  ;;  %1282 = vmatpush.msrb.mxu1 %v4899_v33  ;;  %6523 = vst [vmem:[#allocation43_spill] sm:$0xff] %v4908_v29  ;;  %v4914_v3 = vld [vmem:[#allocation8 + $0x10] sm:$0xff]  ;;  %v4917_v33 = vld [vmem:[#allocation8 + $0x18] sm:$0xff] }
 0x286   :  { %1302 = vmatpush.msrb.mxu2 %v4902_v34  ;;  %1322 = vmatpush.msrb.mxu3 %v4905_v49  ;;  %6524 = vst [vmem:[#allocation42_spill] sm:$0xff] %v4911_v31  ;;  %v6527_v34 = vld [vmem:[#allocation52_spill] sm:$0xff]  ;;  %v6528_v49 = vld [vmem:[#allocation55_spill] sm:$0xff] }
 0x287   :  { %1263 = vmatpush.msra.mxu0 %v4908_v29  ;;  %1283 = vmatpush.msrb.mxu1 %v4911_v31  ;;  %6525 = vst [vmem:[#allocation46_spill] sm:$0xff] %v4914_v3  ;;  %v271_v27 = vadd.f32 %v6527_v34, %v6487_v50  ;;  %v312_v42 = vadd.f32 %v6528_v49, %v6489_v53 }
 0x288   :  { %1303 = vmatpush.msrb.mxu2 %v4914_v3  ;;  %6526 = vst [vmem:[#allocation47_spill] sm:$0xff] %v4917_v33  ;;  %1323 = vmatpush.msrb.mxu3 %v4917_v33  ;;  %v394_v3 = vadd.f32 %v6529_v19, %v6491_v57 }
 0x2e4   :  { %v945_v30 = vpop.f32.mrf.mxu0  ;;  %v965_v29 = vpop.f32.mrf.mxu1 }
 0x2e5   :  { %v1008_v26 = vadd.f32 %v945_v30, %v271_v27  ;;  %v1009_v59 = vadd.f32 %v965_v29, %v312_v42 }
 0x2e7   :  { %v3427_v25 = vmul.f32 -1.442695, %v1008_v26  ;;  %v3428_v31 = vmul.f32 -1.442695, %v1009_v59  ;;  %v6530_v26 = vld [vmem:[#allocation56_spill] sm:$0xff] }
 0x2e8   :  { %v353_v59 = vadd.f32 %v6530_v26, %v6493_v35 }
 0x2e9   :  { %3539 = vpow2.f32 %v3427_v25 }
 0x2ea   :  { %3541 = vpow2.f32 %v3428_v31 }
 0x2eb   :  { %v1005_v15 = vpop.f32.mrf.mxu3  ;;  %v985_v49 = vpop.f32.mrf.mxu2 }
 0x2ec   :  { %v1011_v60 = vadd.f32 %v1005_v15, %v394_v3  ;;  %v1010_v27 = vadd.f32 %v985_v49, %v353_v59 }
 0x2ee   :  { %v3429_v33 = vmul.f32 -1.442695, %v1011_v60 }
 0x2ef   :  { %v3540_v62 = vpop.eup %3539 }
 0x2f0   :  { %v3542_v46 = vpop.eup %3541  ;;  %v1015_v34 = vadd.f32 1.0, %v3540_v62  ;;  %3543 = vpow2.f32 %v3429_v33 }
 0x2f1   :  { %v1034_v50 = vadd.f32 1.0, %v3542_v46 }
 0x2f2   :  { %3545 = vrcp.f32 %v1015_v34  ;;  %v1027_v3 = vand.u32 2147483648, %v1015_v34  ;;  %v1025_v33 = vand.u32 2147483647, %v1015_v34  ;;  %vm1021_vm7 = vweird.f32 %v1015_v34 }
 0x2f3   :  { %3547 = vrcp.f32 %v1034_v50  ;;  %v1046_v62 = vand.u32 2147483648, %v1034_v50  ;;  %v1044_v53 = vand.u32 2147483647, %v1034_v50  ;;  %vm1040_vm8 = vweird.f32 %v1034_v50 }
 0x2f4   :  { %v1028_v49 = vor.u32 1.1754944e-38, %v1027_v3  ;;  %vm1026_vm11 = vcmp.eq.f32.partialorder %v1025_v33, 8.507059e+37 }
 0x2f5   :  { %vm1045_vm12 = vcmp.eq.f32.partialorder %v1044_v53, 8.507059e+37 }
 0x2f6   :  { %v3544_v30 = vpop.eup %3543 }
 0x2f7   :  { %v1054_v25 = vadd.f32 1.0, %v3544_v30 }
 0x2f8   :  { %v3546_v42 = vpop.eup %3545 }
 0x2f9   :  { %v3548_v19 = vpop.eup %3547  ;;  %v1017_v29 = vmul.f32 %v3546_v42, %v1015_v34  ;;  %3549 = vrcp.f32 %v1054_v25  ;;  %vm1022_vm5 = vweird.f32 %v3546_v42  ;;  %vm1060_vm14 = vweird.f32 %v1054_v25 }
 0x2fa   :  { %v1036_v15 = vmul.f32 %v3548_v19, %v1034_v50  ;;  %3551 = vtanh.f32 %v1010_v27  ;;  %vm1041_vm6 = vweird.f32 %v3548_v19  ;;  %vm1023_vm9 = vmor %vm1021_vm7, %vm1022_vm5 }
 0x2fb   :  { %v1018_v60 = vsub.f32 1.0, %v1017_v29  ;;  %vm1042_vm10 = vmor %vm1040_vm8, %vm1041_vm6  ;;  %v1047_v29 = vor.u32 1.1754944e-38, %v1046_v62 }
 0x2fc   :  { %v1037_v31 = vsub.f32 1.0, %v1036_v15 }
 0x2fd   :  { %v1019_v46 = vmul.f32 %v3546_v42, %v1018_v60 }
 0x2fe   :  { %v1038_v57 = vmul.f32 %v3548_v19, %v1037_v31 }
 0x2ff   :  { %v3550_v45 = vpop.eup %3549  ;;  %v1020_v26 = vadd.f32 %v3546_v42, %v1019_v46 }
 0x300   :  { %v1039_v30 = vadd.f32 %v3548_v19, %v1038_v57  ;;  %v1056_v59 = vmul.f32 %v3550_v45, %v1054_v25  ;;  %v3552_v27 = vpop.eup %3551  ;;  %vm1061_vm13 = vweird.f32 %v3550_v45  ;;  %v1066_v57 = vand.u32 2147483648, %v1054_v25 }
 0x301   :  { %v1024_v15 = vsel %vm1023_vm9, %v3546_v42, %v1020_v26  ;;  %v1064_v42 = vand.u32 2147483647, %v1054_v25  ;;  %vm1062_vm15 = vmor %vm1060_vm14, %vm1061_vm13  ;;  %v6538_v25 = vld [vmem:[#allocation18_spill] sm:$0xff]  ;;  %v6539_v26 = vld [vmem:[#allocation20_spill] sm:$0xff] }
 0x302   :  { %v1029_v35 = vsel %vm1026_vm11, %v1028_v49, %v1024_v15  ;;  %v1043_v60 = vsel %vm1042_vm10, %v3548_v19, %v1039_v30  ;;  %v1057_v56 = vsub.f32 1.0, %v1056_v59  ;;  %v1067_v62 = vor.u32 1.1754944e-38, %v1066_v57  ;;  %v6540_v49 = vld [vmem:[#allocation28_spill] sm:$0xff]  ;;  %v6541_v30 = vld [vmem:[#allocation37_spill] sm:$0xff]  ;;  %v6544_v15 = vld [vmem:[#allocation23_spill] sm:$0xff] }
 0x303   :  { %v1048_v31 = vsel %vm1045_vm12, %v1047_v29, %v1043_v60  ;;  %v1071_v44 = vmul.f32 %v3552_v27, %v1029_v35  ;;  %vm1065_vm0 = vcmp.eq.f32.partialorder %v1064_v42, 8.507059e+37  ;;  %v6532_v35 = vld [vmem:[#allocation25_spill] sm:$0xff]  ;;  %v6545_v27 = vld [vmem:[#allocation32_spill] sm:$0xff]  ;;  %v6551_v42 = vld [vmem:[#allocation39_spill] sm:$0xff] }
 0x304   :  { %v1070_v43 = vmul.f32 %v1048_v31, %v4787_v41  ;;  %v1058_v46 = vmul.f32 %v3550_v45, %v1057_v56  ;;  %v6533_v56 = vld [vmem:[#allocation19_spill] sm:$0xff]  ;;  %v6534_v41 = vld [vmem:[#allocation22_spill] sm:$0xff]  ;;  %v6542_v59 = vld [vmem:[#allocation21_spill] sm:$0xff] }
 0x305   :  { %v6543_v29 = vld [vmem:[#allocation33_spill] sm:$0xff]  ;;  %v6546_v60 = vld [vmem:[#allocation40_spill] sm:$0xff] }
 0x306   :  { %v4929_v34 = vadd.f32 %v1071_v44, %v1070_v43  ;;  %v1059_v50 = vadd.f32 %v3550_v45, %v1058_v46  ;;  %v6535_v43 = vld [vmem:[#allocation24_spill] sm:$0xff]  ;;  %v6536_v44 = vld [vmem:[#allocation34_spill] sm:$0xff]  ;;  %v6550_v57 = vld [vmem:[#allocation41_spill] sm:$0xff] }
 0x307   :  { %v6547_v31 = vld [vmem:[#allocation36_spill] sm:$0xff]  ;;  %v6548_v46 = vld [vmem:[#allocation26_spill] sm:$0xff] }
 0x308   :  { %3553 = vtanh.f32 %v4929_v34  ;;  %v1063_v3 = vsel %vm1062_vm15, %v3550_v45, %v1059_v50  ;;  %v6537_v45 = vld [vmem:[#allocation29_spill] sm:$0xff]  ;;  %v6549_v50 = vld [vmem:[#allocation35_spill] sm:$0xff] }
 0x309   :  { %v1068_v19 = vsel %vm1065_vm0, %v1067_v62, %v1063_v3  ;;  %v6552_v3 = vld [vmem:[#allocation30_spill] sm:$0xff] }
 0x30a   :  { %v6553_v62 = vld [vmem:[#allocation38_spill] sm:$0xff] }
 0x30e   :  { %v3554_v53 = vpop.eup %3553 }
 0x30f   :  { %v4932_v33 = vmul.f32 %v3554_v53, %v1068_v19  ;;  %v6554_v53 = vld [vmem:[#allocation43_spill] sm:$0xff]  ;;  %v6555_v19 = vld [vmem:[#allocation42_spill] sm:$0xff] }
 0x311   :  { %6531 = vst [vmem:[#allocation50_spill] sm:$0xff] %v4932_v33  ;;  %1104 = vmatmul.f32.vlgmr.msrb.gmra.mxu0 %v4932_v33  ;;  %1124 = vmatmul.f32.vlgmr.msra.gmra.mxu1 %v4932_v33 }
 0x312   :  { %1144 = vmatmul.f32.vlgmr.msra.gmra.mxu2 %v4932_v33  ;;  %1164 = vmatmul.f32.vlgmr.msra.gmra.mxu3 %v4932_v33  ;;  %v6556_v33 = vld [vmem:[#allocation46_spill] sm:$0xff] }
 0x313   :  { %1408 = vmatpush.msrb.mxu0 %v4646_v1  ;;  %1428 = vmatpush.msra.mxu1 %v4649_v14 }
 0x314   :  { %1448 = vmatpush.msra.mxu2 %v4652_v16  ;;  %1468 = vmatpush.msra.mxu3 %v4655_v5 }
 0x315   :  { %1409 = vmatpush.msrb.mxu0 %v4658_v20  ;;  %1429 = vmatpush.msra.mxu1 %v4661_v17 }
 0x316   :  { %1449 = vmatpush.msra.mxu2 %v4664_v21  ;;  %1469 = vmatpush.msra.mxu3 %v4667_v61 }
 0x317   :  { %1410 = vmatpush.msrb.mxu0 %v4670_v2  ;;  %1430 = vmatpush.msra.mxu1 %v4673_v23 }
 0x318   :  { %1450 = vmatpush.msra.mxu2 %v4676_v18  ;;  %1470 = vmatpush.msra.mxu3 %v4679_v63 }
 0x319   :  { %1411 = vmatpush.msrb.mxu0 %v4682_v12  ;;  %1431 = vmatpush.msra.mxu1 %v4685_v4 }
 0x31a   :  { %1451 = vmatpush.msra.mxu2 %v4688_v11  ;;  %1471 = vmatpush.msra.mxu3 %v4691_v48 }
 0x31b   :  { %1412 = vmatpush.msrb.mxu0 %v4694_v9  ;;  %1432 = vmatpush.msra.mxu1 %v4697_v24 }
 0x31c   :  { %1452 = vmatpush.msra.mxu2 %v4700_v32  ;;  %1472 = vmatpush.msra.mxu3 %v4703_v51 }
 0x31d   :  { %1413 = vmatpush.msrb.mxu0 %v4706_v13  ;;  %1433 = vmatpush.msra.mxu1 %v4709_v52 }
 0x31e   :  { %1453 = vmatpush.msra.mxu2 %v4818_v7  ;;  %1473 = vmatpush.msra.mxu3 %v4713_v22 }
 0x31f   :  { %1414 = vmatpush.msrb.mxu0 %v4716_v55  ;;  %1434 = vmatpush.msra.mxu1 %v4719_v0 }
 0x320   :  { %1454 = vmatpush.msra.mxu2 %v4824_v47  ;;  %1474 = vmatpush.msra.mxu3 %v4723_v28 }
 0x321   :  { %1415 = vmatpush.msrb.mxu0 %v4726_v8  ;;  %1435 = vmatpush.msra.mxu1 %v4729_v54 }
 0x322   :  { %1455 = vmatpush.msra.mxu2 %v4830_v36  ;;  %1475 = vmatpush.msra.mxu3 %v4833_v37 }
 0x323   :  { %1416 = vmatpush.msrb.mxu0 %v4734_v10  ;;  %1436 = vmatpush.msra.mxu1 %v4737_v58 }
 0x324   :  { %1456 = vmatpush.msra.mxu2 %v4838_v38  ;;  %1476 = vmatpush.msra.mxu3 %v4841_v39 }
 0x325   :  { %1417 = vmatpush.msrb.mxu0 %v4742_v6  ;;  %1437 = vmatpush.msra.mxu1 %v4845_v40 }
 0x326   :  { %1457 = vmatpush.msra.mxu2 %v6532_v35  ;;  %1477 = vmatpush.msra.mxu3 %v6533_v56 }
 0x327   :  { %1418 = vmatpush.msrb.mxu0 %v6534_v41  ;;  %1438 = vmatpush.msra.mxu1 %v6535_v43 }
 0x328   :  { %1458 = vmatpush.msra.mxu2 %v6536_v44  ;;  %1478 = vmatpush.msra.mxu3 %v6537_v45 }
 0x329   :  { %1419 = vmatpush.msrb.mxu0 %v6538_v25  ;;  %1439 = vmatpush.msra.mxu1 %v6539_v26 }
 0x32a   :  { %1459 = vmatpush.msra.mxu2 %v6540_v49  ;;  %1479 = vmatpush.msra.mxu3 %v6541_v30  ;;  %v6563_v49 = vld [vmem:[#allocation61_spill] sm:$0xff] }
 0x32b   :  { %1420 = vmatpush.msrb.mxu0 %v6542_v59  ;;  %1440 = vmatpush.msra.mxu1 %v6543_v29 }
 0x32c   :  { %1460 = vmatpush.msra.mxu2 %v6544_v15  ;;  %1480 = vmatpush.msra.mxu3 %v6545_v27  ;;  %v6561_v15 = vld [vmem:[#allocation59_spill] sm:$0xff] }
 0x32d   :  { %1421 = vmatpush.msrb.mxu0 %v6546_v60  ;;  %1441 = vmatpush.msra.mxu1 %v6547_v31  ;;  %v6557_v60 = vld [vmem:[#allocation47_spill] sm:$0xff] }
 0x32e   :  { %1461 = vmatpush.msra.mxu2 %v6548_v46  ;;  %1481 = vmatpush.msra.mxu3 %v6549_v50  ;;  %v6558_v31 = vld [vmem:[#allocation63_spill] sm:$0xff]  ;;  %v6559_v46 = vld [vmem:[#allocation58_spill] sm:$0xff]  ;;  %v6560_v50 = vld [vmem:[#allocation69_spill] sm:$0xff] }
 0x32f   :  { %1422 = vmatpush.msrb.mxu0 %v6550_v57  ;;  %1442 = vmatpush.msra.mxu1 %v6551_v42  ;;  %v274_v27 = vadd.f32 %v6559_v46, %v6558_v31  ;;  %v315_v57 = vadd.f32 %v6561_v15, %v6560_v50 }
 0x330   :  { %1462 = vmatpush.msra.mxu2 %v6552_v3  ;;  %1482 = vmatpush.msra.mxu3 %v6553_v62 }
 0x331   :  { %1423 = vmatpush.msrb.mxu0 %v6554_v53  ;;  %1443 = vmatpush.msra.mxu1 %v6555_v19  ;;  %v6562_v53 = vld [vmem:[#allocation72_spill] sm:$0xff] }
 0x332   :  { %1463 = vmatpush.msra.mxu2 %v6556_v33  ;;  %1483 = vmatpush.msra.mxu3 %v6557_v60  ;;  %v397_v19 = vadd.f32 %v6563_v49, %v6562_v53 }
 0x38e   :  { %v1105_v29 = vpop.f32.mrf.mxu0  ;;  %v1125_v42 = vpop.f32.mrf.mxu1 }
 0x38f   :  { %v1168_v59 = vadd.f32 %v1105_v29, %v274_v27  ;;  %v1169_v3 = vadd.f32 %v1125_v42, %v315_v57  ;;  %v6564_v27 = vld [vmem:[#allocation74_spill] sm:$0xff] }
 0x391   :  { %v3430_v30 = vmul.f32 -1.442695, %v1168_v59  ;;  %v3431_v62 = vmul.f32 -1.442695, %v1169_v3  ;;  %v6565_v59 = vld [vmem:[#allocation60_spill] sm:$0xff] }
 0x392   :  { %v356_v57 = vadd.f32 %v6565_v59, %v6564_v27 }
 0x393   :  { %3555 = vpow2.f32 %v3430_v30 }
 0x394   :  { %3557 = vpow2.f32 %v3431_v62 }
 0x395   :  { %v1165_v33 = vpop.f32.mrf.mxu3  ;;  %v1145_v15 = vpop.f32.mrf.mxu2 }
 0x396   :  { %v1171_v26 = vadd.f32 %v1165_v33, %v397_v19  ;;  %v1170_v3 = vadd.f32 %v1145_v15, %v356_v57 }
 0x398   :  { %v3432_v60 = vmul.f32 -1.442695, %v1171_v26 }
 0x399   :  { %v3556_v25 = vpop.eup %3555 }
 0x39a   :  { %v3558_v45 = vpop.eup %3557  ;;  %v1175_v46 = vadd.f32 1.0, %v3556_v25  ;;  %3559 = vpow2.f32 %v3432_v60 }
 0x39b   :  { %v1194_v31 = vadd.f32 1.0, %v3558_v45 }
 0x39c   :  { %3561 = vrcp.f32 %v1175_v46  ;;  %v1187_v53 = vand.u32 2147483648, %v1175_v46  ;;  %v1185_v60 = vand.u32 2147483647, %v1175_v46  ;;  %vm1181_vm3 = vweird.f32 %v1175_v46 }
 0x39d   :  { %3563 = vrcp.f32 %v1194_v31  ;;  %v1206_v25 = vand.u32 2147483648, %v1194_v31  ;;  %v1204_v44 = vand.u32 2147483647, %v1194_v31  ;;  %vm1200_vm4 = vweird.f32 %v1194_v31 }
 0x39e   :  { %v1188_v15 = vor.u32 1.1754944e-38, %v1187_v53  ;;  %vm1186_vm7 = vcmp.eq.f32.partialorder %v1185_v60, 8.507059e+37 }
 0x39f   :  { %vm1205_vm8 = vcmp.eq.f32.partialorder %v1204_v44, 8.507059e+37 }
 0x3a0   :  { %v3560_v29 = vpop.eup %3559 }
 0x3a1   :  { %v1214_v30 = vadd.f32 1.0, %v3560_v29 }
 0x3a2   :  { %v3562_v42 = vpop.eup %3561 }
 0x3a3   :  { %v3564_v49 = vpop.eup %3563  ;;  %v1177_v62 = vmul.f32 %v3562_v42, %v1175_v46  ;;  %3565 = vrcp.f32 %v1214_v30  ;;  %vm1182_vm1 = vweird.f32 %v3562_v42  ;;  %vm1220_vm10 = vweird.f32 %v1214_v30 }
 0x3a4   :  { %v1196_v33 = vmul.f32 %v3564_v49, %v1194_v31  ;;  %3567 = vtanh.f32 %v1170_v3  ;;  %vm1201_vm2 = vweird.f32 %v3564_v49  ;;  %vm1183_vm5 = vmor %vm1181_vm3, %vm1182_vm1  ;;  %v1224_v53 = vand.u32 2147483647, %v1214_v30 }
 0x3a5   :  { %v1178_v26 = vsub.f32 1.0, %v1177_v62  ;;  %vm1202_vm6 = vmor %vm1200_vm4, %vm1201_vm2  ;;  %v1207_v62 = vor.u32 1.1754944e-38, %v1206_v25 }
 0x3a6   :  { %v1197_v19 = vsub.f32 1.0, %v1196_v33  ;;  %vm1225_vm12 = vcmp.eq.f32.partialorder %v1224_v53, 8.507059e+37 }
 0x3a7   :  { %v1179_v45 = vmul.f32 %v3562_v42, %v1178_v26 }
 0x3a8   :  { %v1198_v50 = vmul.f32 %v3564_v49, %v1197_v19 }
 0x3a9   :  { %v3566_v43 = vpop.eup %3565  ;;  %v1180_v59 = vadd.f32 %v3562_v42, %v1179_v45 }
 0x3aa   :  { %v1199_v29 = vadd.f32 %v3564_v49, %v1198_v50  ;;  %v1216_v57 = vmul.f32 %v3566_v43, %v1214_v30  ;;  %v3568_v3 = vpop.eup %3567  ;;  %vm1221_vm9 = vweird.f32 %v3566_v43  ;;  %v1226_v50 = vand.u32 2147483648, %v1214_v30 }
 0x3ab   :  { %v1184_v33 = vsel %vm1183_vm5, %v3562_v42, %v1180_v59  ;;  %vm1222_vm11 = vmor %vm1220_vm10, %vm1221_vm9 }
 0x3ac   :  { %v1189_v27 = vsel %vm1186_vm7, %v1188_v15, %v1184_v33  ;;  %v1203_v26 = vsel %vm1202_vm6, %v3564_v49, %v1199_v29  ;;  %v1217_v41 = vsub.f32 1.0, %v1216_v57  ;;  %v1227_v25 = vor.u32 1.1754944e-38, %v1226_v50  ;;  %v6598_v33 = vld [vmem:[#allocation74_spill] sm:$0xff] }
 0x3ad   :  { %v1208_v19 = vsel %vm1205_vm8, %v1207_v62, %v1203_v26  ;;  %v1231_v56 = vmul.f32 %v3568_v3, %v1189_v27  ;;  %v6599_v3 = vld [vmem:[#allocation66_spill] sm:$0xff] }
 0x3ae   :  { %v1230_v35 = vmul.f32 %v1208_v19, %v4929_v34  ;;  %v1218_v45 = vmul.f32 %v3566_v43, %v1217_v41  ;;  %v6596_v34 = vld [vmem:[#allocation72_spill] sm:$0xff]  ;;  %v359_v26 = vadd.f32 %v6599_v3, %v6598_v33 }
 0x3af   :  { %v6600_v3 = vld [vmem:[#allocation44_spill] sm:$0xff] }
 0x3b0   :  { %v5011_v46 = vadd.f32 %v1231_v56, %v1230_v35  ;;  %v1219_v31 = vadd.f32 %v3566_v43, %v1218_v45  ;;  %v6597_v35 = vld [vmem:[#allocation64_spill] sm:$0xff] }
 0x3b1   :  { %v400_v56 = vadd.f32 %v6597_v35, %v6596_v34  ;;  %v1771_v35 = vld [vmem:[#allocation10 + $0x1a0] sm:$0xff] }
 0x3b2   :  { %3569 = vtanh.f32 %v5011_v46  ;;  %v1223_v42 = vsel %vm1222_vm11, %v3566_v43, %v1219_v31 }
 0x3b3   :  { %v1228_v49 = vsel %vm1225_vm12, %v1227_v25, %v1223_v42 }
 0x3b8   :  { %v3570_v44 = vpop.eup %3569 }
 0x3b9   :  { %v5014_v60 = vmul.f32 %v3570_v44, %v1228_v49 }
 0x3bb   :  { %1264 = vmatmul.f32.vlgmr.msra.gmra.mxu0 %v5014_v60  ;;  %1284 = vmatmul.f32.vlgmr.msrb.gmra.mxu1 %v5014_v60 }
 0x3bc   :  { %1304 = vmatmul.f32.vlgmr.msrb.gmra.mxu2 %v5014_v60  ;;  %1324 = vmatmul.f32.vlgmr.msrb.gmra.mxu3 %v5014_v60 }
 0x3bd   :  { %1568 = vmatpush.msra.mxu0 %v4646_v1  ;;  %1588 = vmatpush.msrb.mxu1 %v4649_v14  ;;  %v6566_v1 = vld [vmem:[#allocation25_spill] sm:$0xff]  ;;  %v6567_v14 = vld [vmem:[#allocation19_spill] sm:$0xff] }
 0x3be   :  { %1608 = vmatpush.msrb.mxu2 %v4652_v16  ;;  %1628 = vmatpush.msrb.mxu3 %v4655_v5  ;;  %v6568_v16 = vld [vmem:[#allocation22_spill] sm:$0xff]  ;;  %v6569_v5 = vld [vmem:[#allocation24_spill] sm:$0xff] }
 0x3bf   :  { %1569 = vmatpush.msra.mxu0 %v4658_v20  ;;  %1589 = vmatpush.msrb.mxu1 %v4661_v17  ;;  %v6570_v20 = vld [vmem:[#allocation34_spill] sm:$0xff] }
 0x3c0   :  { %1609 = vmatpush.msrb.mxu2 %v4664_v21  ;;  %1629 = vmatpush.msrb.mxu3 %v4667_v61  ;;  %v6572_v17 = vld [vmem:[#allocation18_spill] sm:$0xff]  ;;  %v6573_v21 = vld [vmem:[#allocation20_spill] sm:$0xff] }
 0x3c1   :  { %1570 = vmatpush.msra.mxu0 %v4670_v2  ;;  %1590 = vmatpush.msrb.mxu1 %v4673_v23  ;;  %v6574_v61 = vld [vmem:[#allocation28_spill] sm:$0xff]  ;;  %v6576_v2 = vld [vmem:[#allocation21_spill] sm:$0xff] }
 0x3c2   :  { %1610 = vmatpush.msrb.mxu2 %v4676_v18  ;;  %1630 = vmatpush.msrb.mxu3 %v4679_v63  ;;  %v6577_v23 = vld [vmem:[#allocation33_spill] sm:$0xff]  ;;  %v6578_v18 = vld [vmem:[#allocation23_spill] sm:$0xff]  ;;  %v6579_v63 = vld [vmem:[#allocation32_spill] sm:$0xff] }
 0x3c3   :  { %1571 = vmatpush.msra.mxu0 %v4682_v12  ;;  %1591 = vmatpush.msrb.mxu1 %v4685_v4  ;;  %v6580_v12 = vld [vmem:[#allocation40_spill] sm:$0xff] }
 0x3c4   :  { %1611 = vmatpush.msrb.mxu2 %v4688_v11  ;;  %1631 = vmatpush.msrb.mxu3 %v4691_v48  ;;  %v6581_v4 = vld [vmem:[#allocation36_spill] sm:$0xff]  ;;  %v6582_v11 = vld [vmem:[#allocation26_spill] sm:$0xff]  ;;  %v6583_v48 = vld [vmem:[#allocation35_spill] sm:$0xff] }
 0x3c5   :  { %1572 = vmatpush.msra.mxu0 %v4694_v9  ;;  %1592 = vmatpush.msrb.mxu1 %v4697_v24  ;;  %v6584_v9 = vld [vmem:[#allocation41_spill] sm:$0xff]  ;;  %v6585_v24 = vld [vmem:[#allocation39_spill] sm:$0xff] }
 0x3c6   :  { %1612 = vmatpush.msrb.mxu2 %v4700_v32  ;;  %1632 = vmatpush.msrb.mxu3 %v4703_v51  ;;  %v6586_v32 = vld [vmem:[#allocation30_spill] sm:$0xff] }
 0x3c7   :  { %1573 = vmatpush.msra.mxu0 %v4706_v13  ;;  %1593 = vmatpush.msrb.mxu1 %v4709_v52  ;;  %v6587_v51 = vld [vmem:[#allocation38_spill] sm:$0xff]  ;;  %v6588_v13 = vld [vmem:[#allocation43_spill] sm:$0xff] }
 0x3c8   :  { %1613 = vmatpush.msrb.mxu2 %v4818_v7  ;;  %1633 = vmatpush.msrb.mxu3 %v4713_v22  ;;  %v6589_v52 = vld [vmem:[#allocation42_spill] sm:$0xff] }
 0x3c9   :  { %1574 = vmatpush.msra.mxu0 %v4716_v55  ;;  %1594 = vmatpush.msrb.mxu1 %v4719_v0  ;;  %v6590_v22 = vld [vmem:[#allocation46_spill] sm:$0xff]  ;;  %v6591_v55 = vld [vmem:[#allocation47_spill] sm:$0xff] }
 0x3ca   :  { %1614 = vmatpush.msrb.mxu2 %v4824_v47  ;;  %1634 = vmatpush.msrb.mxu3 %v4723_v28  ;;  %v6592_v0 = vld [vmem:[#allocation63_spill] sm:$0xff]  ;;  %v6593_v28 = vld [vmem:[#allocation17_spill] sm:$0xff] }
 0x3cb   :  { %1575 = vmatpush.msra.mxu0 %v4726_v8  ;;  %1595 = vmatpush.msrb.mxu1 %v4729_v54  ;;  %v277_v8 = vadd.f32 %v6593_v28, %v6592_v0  ;;  %v6594_v54 = vld [vmem:[#allocation69_spill] sm:$0xff] }
 0x3cc   :  { %1615 = vmatpush.msrb.mxu2 %v4830_v36  ;;  %1635 = vmatpush.msrb.mxu3 %v4833_v37 }
 0x3cd   :  { %1576 = vmatpush.msra.mxu0 %v4734_v10  ;;  %1596 = vmatpush.msrb.mxu1 %v4737_v58  ;;  %v6571_v10 = vld [vmem:[#allocation29_spill] sm:$0xff]  ;;  %v6595_v58 = vld [vmem:[#allocation62_spill] sm:$0xff] }
 0x3ce   :  { %1616 = vmatpush.msrb.mxu2 %v4838_v38  ;;  %1636 = vmatpush.msrb.mxu3 %v4841_v39  ;;  %v318_v7 = vadd.f32 %v6595_v58, %v6594_v54 }
 0x3cf   :  { %1577 = vmatpush.msra.mxu0 %v4742_v6  ;;  %1597 = vmatpush.msrb.mxu1 %v4845_v40  ;;  %v6575_v6 = vld [vmem:[#allocation37_spill] sm:$0xff] }
 0x3d0   :  { %1617 = vmatpush.msrb.mxu2 %v6566_v1  ;;  %1637 = vmatpush.msrb.mxu3 %v6567_v14 }
 0x3d1   :  { %1578 = vmatpush.msra.mxu0 %v6568_v16  ;;  %1598 = vmatpush.msrb.mxu1 %v6569_v5 }
 0x3d2   :  { %1618 = vmatpush.msrb.mxu2 %v6570_v20  ;;  %1638 = vmatpush.msrb.mxu3 %v6571_v10 }
 0x3d3   :  { %1579 = vmatpush.msra.mxu0 %v6572_v17  ;;  %1599 = vmatpush.msrb.mxu1 %v6573_v21 }
 0x3d4   :  { %1619 = vmatpush.msrb.mxu2 %v6574_v61  ;;  %1639 = vmatpush.msrb.mxu3 %v6575_v6 }
 0x3d5   :  { %1580 = vmatpush.msra.mxu0 %v6576_v2  ;;  %1600 = vmatpush.msrb.mxu1 %v6577_v23 }
 0x3d6   :  { %1620 = vmatpush.msrb.mxu2 %v6578_v18  ;;  %1640 = vmatpush.msrb.mxu3 %v6579_v63 }
 0x3d7   :  { %1581 = vmatpush.msra.mxu0 %v6580_v12  ;;  %1601 = vmatpush.msrb.mxu1 %v6581_v4 }
 0x3d8   :  { %1621 = vmatpush.msrb.mxu2 %v6582_v11  ;;  %1641 = vmatpush.msrb.mxu3 %v6583_v48 }
 0x3d9   :  { %1582 = vmatpush.msra.mxu0 %v6584_v9  ;;  %1602 = vmatpush.msrb.mxu1 %v6585_v24 }
 0x3da   :  { %1622 = vmatpush.msrb.mxu2 %v6586_v32  ;;  %1642 = vmatpush.msrb.mxu3 %v6587_v51 }
 0x3db   :  { %1583 = vmatpush.msra.mxu0 %v6588_v13  ;;  %1603 = vmatpush.msrb.mxu1 %v6589_v52 }
 0x3dc   :  { %1623 = vmatpush.msrb.mxu2 %v6590_v22  ;;  %1643 = vmatpush.msrb.mxu3 %v6591_v55 }
 0x438   :  { %v1265_v47 = vpop.f32.mrf.mxu0  ;;  %v1285_v36 = vpop.f32.mrf.mxu1 }
 0x439   :  { %v1328_v37 = vadd.f32 %v1265_v47, %v277_v8  ;;  %v1329_v38 = vadd.f32 %v1285_v36, %v318_v7  ;;  %v1780_v7 = vld [vmem:[#allocation10 + $0x1e8] sm:$0xff]  ;;  %v1781_v47 = vld [vmem:[#allocation10 + $0x1f0] sm:$0xff]  ;;  %v1782_v36 = vld [vmem:[#allocation10 + $0x1f8] sm:$0xff] }
 0x43b   :  { %v3433_v39 = vmul.f32 -1.442695, %v1328_v37  ;;  %v3434_v40 = vmul.f32 -1.442695, %v1329_v38  ;;  %v1775_v37 = vld [vmem:[#allocation10 + $0x1c0] sm:$0xff]  ;;  %v1776_v38 = vld [vmem:[#allocation10 + $0x1c8] sm:$0xff] }
 0x43d   :  { %3571 = vpow2.f32 %v3433_v39  ;;  %v1777_v39 = vld [vmem:[#allocation10 + $0x1d0] sm:$0xff] }
 0x43e   :  { %3573 = vpow2.f32 %v3434_v40  ;;  %v1778_v40 = vld [vmem:[#allocation10 + $0x1d8] sm:$0xff] }
 0x43f   :  { %v1325_v41 = vpop.f32.mrf.mxu3  ;;  %v1305_v57 = vpop.f32.mrf.mxu2 }
 0x440   :  { %v1331_v43 = vadd.f32 %v1325_v41, %v400_v56  ;;  %v1330_v31 = vadd.f32 %v1305_v57, %v359_v26  ;;  %v1772_v56 = vld [vmem:[#allocation10 + $0x1a8] sm:$0xff]  ;;  %v1773_v41 = vld [vmem:[#allocation10 + $0x1b0] sm:$0xff]  ;;  %v280_v26 = vadd.f32 %v6600_v3, %v6592_v0 }
 0x441   :  { %v1764_v57 = vld [vmem:[#allocation10 + $0x168] sm:$0xff] }
 0x442   :  { %v3435_v27 = vmul.f32 -1.442695, %v1331_v43  ;;  %v1774_v43 = vld [vmem:[#allocation10 + $0x1b8] sm:$0xff] }
 0x443   :  { %v3572_v30 = vpop.eup %3571 }
 0x444   :  { %v3574_v59 = vpop.eup %3573  ;;  %v1335_v15 = vadd.f32 1.0, %v3572_v30  ;;  %3575 = vpow2.f32 %v3435_v27  ;;  %v1767_v27 = vld [vmem:[#allocation10 + $0x180] sm:$0xff]  ;;  %v1768_v30 = vld [vmem:[#allocation10 + $0x188] sm:$0xff] }
 0x445   :  { %v1354_v29 = vadd.f32 1.0, %v3574_v59  ;;  %v1769_v59 = vld [vmem:[#allocation10 + $0x190] sm:$0xff] }
 0x446   :  { %3577 = vrcp.f32 %v1335_v15  ;;  %v1347_v49 = vand.u32 2147483648, %v1335_v15  ;;  %v1345_v16 = vand.u32 2147483647, %v1335_v15  ;;  %vm1341_vm15 = vweird.f32 %v1335_v15 }
 0x447   :  { %3579 = vrcp.f32 %v1354_v29  ;;  %v1366_v1 = vand.u32 2147483648, %v1354_v29  ;;  %v1364_v20 = vand.u32 2147483647, %v1354_v29  ;;  %vm1360_vm0 = vweird.f32 %v1354_v29 }
 0x448   :  { %v1348_v21 = vor.u32 1.1754944e-38, %v1347_v49  ;;  %vm1346_vm3 = vcmp.eq.f32.partialorder %v1345_v16, 8.507059e+37  ;;  %v1755_v16 = vld [vmem:[#allocation10 + $0x120] sm:$0xff] }
 0x449   :  { %v1367_v2 = vor.u32 1.1754944e-38, %v1366_v1  ;;  %vm1365_vm4 = vcmp.eq.f32.partialorder %v1364_v20, 8.507059e+37  ;;  %v1757_v20 = vld [vmem:[#allocation10 + $0x130] sm:$0xff] }
 0x44a   :  { %v3576_v62 = vpop.eup %3575 }
 0x44b   :  { %v1374_v19 = vadd.f32 1.0, %v3576_v62  ;;  %v1765_v62 = vld [vmem:[#allocation10 + $0x170] sm:$0xff] }
 0x44c   :  { %v3578_v45 = vpop.eup %3577 }
 0x44d   :  { %v3580_v50 = vpop.eup %3579  ;;  %v1337_v53 = vmul.f32 %v3578_v45, %v1335_v15  ;;  %3581 = vrcp.f32 %v1374_v19  ;;  %vm1342_vm13 = vweird.f32 %v3578_v45  ;;  %v1386_v13 = vand.u32 2147483648, %v1374_v19  ;;  %v1770_v15 = vld [vmem:[#allocation10 + $0x198] sm:$0xff] }
 0x44e   :  { %v1356_v42 = vmul.f32 %v3580_v50, %v1354_v29  ;;  %3583 = vtanh.f32 %v1330_v31  ;;  %vm1361_vm14 = vweird.f32 %v3580_v50  ;;  %vm1343_vm1 = vmor %vm1341_vm15, %vm1342_vm13  ;;  %vm1380_vm6 = vweird.f32 %v1374_v19  ;;  %v1763_v29 = vld [vmem:[#allocation10 + $0x160] sm:$0xff]  ;;  %v1766_v31 = vld [vmem:[#allocation10 + $0x178] sm:$0xff] }
 0x44f   :  { %v1338_v25 = vsub.f32 1.0, %v1337_v53  ;;  %vm1362_vm2 = vmor %vm1360_vm0, %vm1361_vm14  ;;  %v1384_v52 = vand.u32 2147483647, %v1374_v19  ;;  %v1387_v55 = vor.u32 1.1754944e-38, %v1386_v13  ;;  %v1744_v13 = vld [vmem:[#allocation10 + $0xc8] sm:$0xff] }
 0x450   :  { %v1357_v44 = vsub.f32 1.0, %v1356_v42  ;;  %v1759_v42 = vld [vmem:[#allocation10 + $0x140] sm:$0xff] }
 0x451   :  { %v1339_v14 = vmul.f32 %v3578_v45, %v1338_v25  ;;  %vm1385_vm8 = vcmp.eq.f32.partialorder %v1384_v52, 8.507059e+37  ;;  %v1760_v25 = vld [vmem:[#allocation10 + $0x148] sm:$0xff]  ;;  %v1745_v52 = vld [vmem:[#allocation10 + $0xd0] sm:$0xff] }
 0x452   :  { %v1358_v5 = vmul.f32 %v3580_v50, %v1357_v44  ;;  %v1761_v44 = vld [vmem:[#allocation10 + $0x150] sm:$0xff] }
 0x453   :  { %v3582_v10 = vpop.eup %3581  ;;  %v1340_v17 = vadd.f32 %v3578_v45, %v1339_v14  ;;  %v1762_v14 = vld [vmem:[#allocation10 + $0x158] sm:$0xff] }
 0x454   :  { %v1359_v61 = vadd.f32 %v3580_v50, %v1358_v5  ;;  %v1376_v6 = vmul.f32 %v3582_v10, %v1374_v19  ;;  %v3584_v18 = vpop.eup %3583  ;;  %vm1381_vm5 = vweird.f32 %v3582_v10  ;;  %v6601_v19 = vld [vmem:[#allocation65_spill] sm:$0xff]  ;;  %v1756_v5 = vld [vmem:[#allocation10 + $0x128] sm:$0xff] }
 0x455   :  { %v1344_v23 = vsel %vm1343_vm1, %v3578_v45, %v1340_v17  ;;  %vm1382_vm7 = vmor %vm1380_vm6, %vm1381_vm5  ;;  %v321_v45 = vadd.f32 %v6601_v19, %v6594_v54  ;;  %v1725_v19 = vld [vmem:[#allocation10 + $0x30] sm:$0xff] }
 0x456   :  { %v1349_v63 = vsel %vm1346_vm3, %v1348_v21, %v1344_v23  ;;  %v1363_v12 = vsel %vm1362_vm2, %v3580_v50, %v1359_v61  ;;  %v1377_v4 = vsub.f32 1.0, %v1376_v6  ;;  %v1758_v21 = vld [vmem:[#allocation10 + $0x138] sm:$0xff]  ;;  %v1751_v61 = vld [vmem:[#allocation10 + $0x100] sm:$0xff]  ;;  %v1752_v6 = vld [vmem:[#allocation10 + $0x108] sm:$0xff] }
 0x457   :  { %v1368_v11 = vsel %vm1365_vm4, %v1367_v2, %v1363_v12  ;;  %v1391_v48 = vmul.f32 %v3584_v18, %v1349_v63  ;;  %v1753_v2 = vld [vmem:[#allocation10 + $0x110] sm:$0xff]  ;;  %v1754_v23 = vld [vmem:[#allocation10 + $0x118] sm:$0xff]  ;;  %v1747_v12 = vld [vmem:[#allocation10 + $0xe0] sm:$0xff] }
 0x458   :  { %v1390_v9 = vmul.f32 %v1368_v11, %v5011_v46  ;;  %v1378_v24 = vmul.f32 %v3582_v10, %v1377_v4  ;;  %v1779_v46 = vld [vmem:[#allocation10 + $0x1e0] sm:$0xff]  ;;  %v6602_v18 = vld [vmem:[#allocation67_spill] sm:$0xff]  ;;  %v1748_v4 = vld [vmem:[#allocation10 + $0xe8] sm:$0xff] }
 0x459   :  { %v403_v63 = vadd.f32 %v6602_v18, %v6596_v34  ;;  %v1749_v11 = vld [vmem:[#allocation10 + $0xf0] sm:$0xff] }
 0x45a   :  { %v5093_v32 = vadd.f32 %v1391_v48, %v1390_v9  ;;  %v1379_v51 = vadd.f32 %v3582_v10, %v1378_v24  ;;  %v1750_v9 = vld [vmem:[#allocation10 + $0xf8] sm:$0xff] }
 0x45c   :  { %3585 = vtanh.f32 %v5093_v32  ;;  %v1383_v22 = vsel %vm1382_vm7, %v3582_v10, %v1379_v51  ;;  %v1743_v51 = vld [vmem:[#allocation10 + $0xc0] sm:$0xff] }
 0x45d   :  { %v1388_v8 = vsel %vm1385_vm8, %v1387_v55, %v1383_v22  ;;  %v1746_v22 = vld [vmem:[#allocation10 + $0xd8] sm:$0xff] }
 0x462   :  { %v3586_v28 = vpop.eup %3585 }
 0x463   :  { %v5096_v58 = vmul.f32 %v3586_v28, %v1388_v8  ;;  %v1739_v28 = vld [vmem:[#allocation10 + $0xa0] sm:$0xff]  ;;  %v1740_v8 = vld [vmem:[#allocation10 + $0xa8] sm:$0xff] }
 0x465   :  { %1424 = vmatmul.f32.vlgmr.msrb.gmra.mxu0 %v5096_v58  ;;  %1444 = vmatmul.f32.vlgmr.msra.gmra.mxu1 %v5096_v58 }
 0x466   :  { %1464 = vmatmul.f32.vlgmr.msra.gmra.mxu2 %v5096_v58  ;;  %1484 = vmatmul.f32.vlgmr.msra.gmra.mxu3 %v5096_v58 }
 0x467   :  { %1865 = vmatpush.msrb.mxu0 %v1779_v46  ;;  %1906 = vmatpush.msra.mxu1 %v1780_v7  ;;  %v1741_v46 = vld [vmem:[#allocation10 + $0xb0] sm:$0xff] }
 0x468   :  { %1947 = vmatpush.msra.mxu2 %v1781_v47  ;;  %1988 = vmatpush.msra.mxu3 %v1782_v36  ;;  %v1742_v47 = vld [vmem:[#allocation10 + $0xb8] sm:$0xff]  ;;  %v1735_v36 = vld [vmem:[#allocation10 + $0x80] sm:$0xff] }
 0x469   :  { %1866 = vmatpush.msrb.mxu0 %v1775_v37  ;;  %1907 = vmatpush.msra.mxu1 %v1776_v38  ;;  %v1736_v37 = vld [vmem:[#allocation10 + $0x88] sm:$0xff] }
 0x46a   :  { %1948 = vmatpush.msra.mxu2 %v1777_v39  ;;  %1989 = vmatpush.msra.mxu3 %v1778_v40  ;;  %v1737_v40 = vld [vmem:[#allocation10 + $0x90] sm:$0xff] }
 0x46b   :  { %1867 = vmatpush.msrb.mxu0 %v1771_v35  ;;  %1908 = vmatpush.msra.mxu1 %v1772_v56  ;;  %v1738_v35 = vld [vmem:[#allocation10 + $0x98] sm:$0xff] }
 0x46c   :  { %1949 = vmatpush.msra.mxu2 %v1773_v41  ;;  %1990 = vmatpush.msra.mxu3 %v1774_v43  ;;  %v1731_v41 = vld [vmem:[#allocation10 + $0x60] sm:$0xff]  ;;  %v1732_v43 = vld [vmem:[#allocation10 + $0x68] sm:$0xff] }
 0x46d   :  { %1868 = vmatpush.msrb.mxu0 %v1767_v27  ;;  %1909 = vmatpush.msra.mxu1 %v1768_v30  ;;  %v1733_v27 = vld [vmem:[#allocation10 + $0x70] sm:$0xff]  ;;  %v1734_v30 = vld [vmem:[#allocation10 + $0x78] sm:$0xff] }
 0x46e   :  { %1950 = vmatpush.msra.mxu2 %v1769_v59  ;;  %1991 = vmatpush.msra.mxu3 %v1770_v15  ;;  %v1727_v59 = vld [vmem:[#allocation10 + $0x40] sm:$0xff]  ;;  %v1728_v15 = vld [vmem:[#allocation10 + $0x48] sm:$0xff] }
 0x46f   :  { %1869 = vmatpush.msrb.mxu0 %v1763_v29  ;;  %1910 = vmatpush.msra.mxu1 %v1764_v57  ;;  %v1729_v29 = vld [vmem:[#allocation10 + $0x50] sm:$0xff]  ;;  %v1730_v57 = vld [vmem:[#allocation10 + $0x58] sm:$0xff] }
 0x470   :  { %1951 = vmatpush.msra.mxu2 %v1765_v62  ;;  %1992 = vmatpush.msra.mxu3 %v1766_v31  ;;  %v1723_v62 = vld [vmem:[#allocation10 + $0x20] sm:$0xff] }
 0x471   :  { %1870 = vmatpush.msrb.mxu0 %v1759_v42  ;;  %1911 = vmatpush.msra.mxu1 %v1760_v25  ;;  %v1719_v42 = vld [vmem:[#allocation10] sm:$0xff]  ;;  %v1720_v25 = vld [vmem:[#allocation10 + $0x8] sm:$0xff] }
 0x472   :  { %1952 = vmatpush.msra.mxu2 %v1761_v44  ;;  %1993 = vmatpush.msra.mxu3 %v1762_v14 }
 0x473   :  { %1871 = vmatpush.msrb.mxu0 %v1755_v16  ;;  %1912 = vmatpush.msra.mxu1 %v1756_v5 }
 0x474   :  { %1953 = vmatpush.msra.mxu2 %v1757_v20  ;;  %1994 = vmatpush.msra.mxu3 %v1758_v21 }
 0x475   :  { %1872 = vmatpush.msrb.mxu0 %v1751_v61  ;;  %1913 = vmatpush.msra.mxu1 %v1752_v6 }
 0x476   :  { %1954 = vmatpush.msra.mxu2 %v1753_v2  ;;  %1995 = vmatpush.msra.mxu3 %v1754_v23 }
 0x477   :  { %1873 = vmatpush.msrb.mxu0 %v1747_v12  ;;  %1914 = vmatpush.msra.mxu1 %v1748_v4 }
 0x478   :  { %1955 = vmatpush.msra.mxu2 %v1749_v11  ;;  %1996 = vmatpush.msra.mxu3 %v1750_v9 }
 0x479   :  { %1874 = vmatpush.msrb.mxu0 %v1743_v51  ;;  %1915 = vmatpush.msra.mxu1 %v1744_v13 }
 0x47a   :  { %1956 = vmatpush.msra.mxu2 %v1745_v52  ;;  %1997 = vmatpush.msra.mxu3 %v1746_v22 }
 0x47b   :  { %1875 = vmatpush.msrb.mxu0 %v1739_v28  ;;  %1916 = vmatpush.msra.mxu1 %v1740_v8 }
 0x47c   :  { %1957 = vmatpush.msra.mxu2 %v1741_v46  ;;  %1998 = vmatpush.msra.mxu3 %v1742_v47 }
 0x47d   :  { %1876 = vmatpush.msrb.mxu0 %v1735_v36  ;;  %1917 = vmatpush.msra.mxu1 %v1736_v37 }
 0x47e   :  { %1958 = vmatpush.msra.mxu2 %v1737_v40  ;;  %1999 = vmatpush.msra.mxu3 %v1738_v35 }
 0x47f   :  { %1877 = vmatpush.msrb.mxu0 %v1731_v41  ;;  %1918 = vmatpush.msra.mxu1 %v1732_v43  ;;  %v6605_v43 = vld [vmem:[#allocation27_spill] sm:$0xff] }
 0x480   :  { %1959 = vmatpush.msra.mxu2 %v1733_v27  ;;  %2000 = vmatpush.msra.mxu3 %v1734_v30  ;;  %v6606_v27 = vld [vmem:[#allocation31_spill] sm:$0xff]  ;;  %v5140_v30 = vld [vmem:[#allocation11 + $0x1e0] sm:$0xff] }
 0x481   :  { %1878 = vmatpush.msrb.mxu0 %v1727_v59  ;;  %1919 = vmatpush.msra.mxu1 %v1728_v15  ;;  %6607 = vst [vmem:[#allocation49_spill] sm:$0xff] %v5140_v30  ;;  %v5142_v59 = vld [vmem:[#allocation11 + $0x1e8] sm:$0xff]  ;;  %v5144_v15 = vld [vmem:[#allocation11 + $0x1c0] sm:$0xff] }
 0x482   :  { %1960 = vmatpush.msra.mxu2 %v1729_v29  ;;  %2001 = vmatpush.msra.mxu3 %v1730_v57  ;;  %v5148_v29 = vld [vmem:[#allocation11 + $0x1c8] sm:$0xff]  ;;  %v5150_v57 = vld [vmem:[#allocation11 + $0x1f8] sm:$0xff] }
 0x483   :  { %1879 = vmatpush.msrb.mxu0 %v1723_v62  ;;  %6608 = vst [vmem:[#allocation48_spill] sm:$0xff] %v5148_v29  ;;  %v5153_v62 = vld [vmem:[#allocation11 + $0x1a0] sm:$0xff] }
 0x484   :  { %1961 = vmatpush.msra.mxu2 %v1725_v19  ;;  %v6611_v19 = vld [vmem:[#allocation50_spill] sm:$0xff] }
 0x485   :  { %1880 = vmatpush.msrb.mxu0 %v1719_v42  ;;  %v5188_v42 = vld [vmem:[#allocation11 + $0x188] sm:$0xff] }
 0x4e2   :  { %v1425_v50 = vpop.f32.mrf.mxu0  ;;  %v1445_v53 = vpop.f32.mrf.mxu1 }
 0x4e3   :  { %v1488_v49 = vadd.f32 %v1425_v50, %v280_v26  ;;  %v1489_v1 = vadd.f32 %v1445_v53, %v321_v45  ;;  %v1724_v26 = vld [vmem:[#allocation10 + $0x28] sm:$0xff]  ;;  %v1726_v45 = vld [vmem:[#allocation10 + $0x38] sm:$0xff] }
 0x4e4   :  { %v6603_v50 = vld [vmem:[#allocation70_spill] sm:$0xff]  ;;  %1920 = vmatpush.msra.mxu1 %v1724_v26  ;;  %2002 = vmatpush.msra.mxu3 %v1726_v45  ;;  %v5157_v26 = vld [vmem:[#allocation11 + $0x1d8] sm:$0xff]  ;;  %v5176_v45 = vld [vmem:[#allocation11 + $0x1f0] sm:$0xff] }
 0x4e5   :  { %v3436_v10 = vmul.f32 -1.442695, %v1488_v49  ;;  %v3437_v17 = vmul.f32 -1.442695, %v1489_v1  ;;  %v362_v53 = vadd.f32 %v6603_v50, %v6598_v33  ;;  %v1721_v49 = vld [vmem:[#allocation10 + $0x10] sm:$0xff]  ;;  %v1722_v1 = vld [vmem:[#allocation10 + $0x18] sm:$0xff] }
 0x4e6   :  { %1921 = vmatpush.msra.mxu1 %v1720_v25  ;;  %1962 = vmatpush.msra.mxu2 %v1721_v49  ;;  %6610 = vst [vmem:[#allocation54_spill] sm:$0xff] %v5157_v26  ;;  %v5184_v50 = vld [vmem:[#allocation11 + $0x1b0] sm:$0xff]  ;;  %v5196_v25 = vld [vmem:[#allocation11 + $0x168] sm:$0xff] }
 0x4e7   :  { %3587 = vpow2.f32 %v3436_v10  ;;  %2003 = vmatpush.msra.mxu3 %v1722_v1  ;;  %v5200_v49 = vld [vmem:[#allocation11 + $0x190] sm:$0xff]  ;;  %v5206_v1 = vld [vmem:[#allocation11 + $0x178] sm:$0xff] }
 0x4e8   :  { %3589 = vpow2.f32 %v3437_v17 }
 0x4e9   :  { %v1485_v48 = vpop.f32.mrf.mxu3  ;;  %v1465_v3 = vpop.f32.mrf.mxu2 }
 0x4ea   :  { %v1491_v24 = vadd.f32 %v1485_v48, %v403_v63  ;;  %v1490_v16 = vadd.f32 %v1465_v3, %v362_v53  ;;  %v5155_v3 = vld [vmem:[#allocation11 + $0x1a8] sm:$0xff]  ;;  %v5186_v53 = vld [vmem:[#allocation11 + $0x180] sm:$0xff] }
 0x4eb   :  { %6609 = vst [vmem:[#allocation51_spill] sm:$0xff] %v5155_v3 }
 0x4ec   :  { %v3438_v55 = vmul.f32 -1.442695, %v1491_v24  ;;  %6613 = vst [vmem:[#allocation52_spill] sm:$0xff] %v5186_v53 }
 0x4ed   :  { %v3588_v7 = vpop.eup %3587 }
 0x4ee   :  { %v3590_v38 = vpop.eup %3589  ;;  %v5108_v39 = vadd.f32 1.0, %v3588_v7  ;;  %3591 = vpow2.f32 %v3438_v55 }
 0x4ef   :  { %v5110_v56 = vadd.f32 1.0, %v3590_v38 }
 0x4f0   :  { %3593 = vrcp.f32 %v5108_v39  ;;  %v1507_v61 = vand.u32 2147483648, %v5108_v39  ;;  %v1505_v23 = vand.u32 2147483647, %v5108_v39  ;;  %vm1501_vm11 = vweird.f32 %v5108_v39 }
 0x4f1   :  { %3595 = vrcp.f32 %v5110_v56  ;;  %v1526_v6 = vand.u32 2147483648, %v5110_v56  ;;  %v1524_v63 = vand.u32 2147483647, %v5110_v56  ;;  %vm1520_vm12 = vweird.f32 %v5110_v56 }
 0x4f2   :  { %v1508_v11 = vor.u32 1.1754944e-38, %v1507_v61  ;;  %vm1506_vm15 = vcmp.eq.f32.partialorder %v1505_v23, 8.507059e+37  ;;  %v5220_v61 = vld [vmem:[#allocation11 + $0x158] sm:$0xff]  ;;  %v5224_v23 = vld [vmem:[#allocation11 + $0x150] sm:$0xff] }
 0x4f3   :  { %v1527_v24 = vor.u32 1.1754944e-38, %v1526_v6  ;;  %vm1525_vm0 = vcmp.eq.f32.partialorder %v1524_v63, 8.507059e+37 }
 0x4f4   :  { %v3592_v31 = vpop.eup %3591 }
 0x4f5   :  { %v1534_v44 = vadd.f32 1.0, %v3592_v31  ;;  %v5179_v31 = vld [vmem:[#allocation11 + $0x1d0] sm:$0xff] }
 0x4f6   :  { %v3594_v14 = vpop.eup %3593 }
 0x4f7   :  { %v3596_v5 = vpop.eup %3595  ;;  %v1497_v20 = vmul.f32 %v3594_v14, %v5108_v39  ;;  %3597 = vrcp.f32 %v1534_v44  ;;  %vm1502_vm9 = vweird.f32 %v3594_v14  ;;  %v1546_v37 = vand.u32 2147483648, %v1534_v44 }
 0x4f8   :  { %v1516_v10 = vmul.f32 %v3596_v5, %v5110_v56  ;;  %3599 = vtanh.f32 %v1490_v16  ;;  %vm1521_vm10 = vweird.f32 %v3596_v5  ;;  %vm1503_vm13 = vmor %vm1501_vm11, %vm1502_vm9  ;;  %vm1540_vm2 = vweird.f32 %v1534_v44  ;;  %v6614_v16 = vld [vmem:[#allocation45_spill] sm:$0xff] }
 0x4f9   :  { %v1498_v17 = vsub.f32 1.0, %v1497_v20  ;;  %vm1522_vm14 = vmor %vm1520_vm12, %vm1521_vm10  ;;  %v1544_v38 = vand.u32 2147483647, %v1534_v44  ;;  %v1547_v40 = vor.u32 1.1754944e-38, %v1546_v37  ;;  %v6615_v20 = vld [vmem:[#allocation68_spill] sm:$0xff]  ;;  %v5266_v37 = vld [vmem:[#allocation11 + $0xa0] sm:$0xff] }
 0x4fa   :  { %v1517_v21 = vsub.f32 1.0, %v1516_v10  ;;  %v324_v10 = vadd.f32 %v6615_v20, %v6594_v54  ;;  %v5231_v54 = vld [vmem:[#allocation11 + $0x138] sm:$0xff]  ;;  %6618 = vst [vmem:[#allocation57_spill] sm:$0xff] %v5266_v37 }
 0x4fb   :  { %v1499_v2 = vmul.f32 %v3594_v14, %v1498_v17  ;;  %vm1545_vm4 = vcmp.eq.f32.partialorder %v1544_v38, 8.507059e+37  ;;  %v5216_v17 = vld [vmem:[#allocation11 + $0x140] sm:$0xff]  ;;  %v5268_v38 = vld [vmem:[#allocation11 + $0xa8] sm:$0xff] }
 0x4fc   :  { %v1518_v18 = vmul.f32 %v3596_v5, %v1517_v21  ;;  %v5218_v21 = vld [vmem:[#allocation11 + $0x148] sm:$0xff]  ;;  %6619 = vst [vmem:[#allocation56_spill] sm:$0xff] %v5268_v38 }
 0x4fd   :  { %v3598_v12 = vpop.eup %3597  ;;  %v1500_v4 = vadd.f32 %v3594_v14, %v1499_v2 }
 0x4fe   :  { %v1519_v48 = vadd.f32 %v3596_v5, %v1518_v18  ;;  %v1536_v9 = vmul.f32 %v3598_v12, %v1534_v44  ;;  %v3600_v13 = vpop.eup %3599  ;;  %vm1541_vm1 = vweird.f32 %v3598_v12  ;;  %v5198_v44 = vld [vmem:[#allocation11 + $0x198] sm:$0xff] }
 0x4ff   :  { %v1504_v51 = vsel %vm1503_vm13, %v3594_v14, %v1500_v4  ;;  %vm1542_vm3 = vmor %vm1540_vm2, %vm1541_vm1  ;;  %v5208_v14 = vld [vmem:[#allocation11 + $0x170] sm:$0xff] }
 0x500   :  { %v1509_v52 = vsel %vm1506_vm15, %v1508_v11, %v1504_v51  ;;  %v1523_v22 = vsel %vm1522_vm14, %v3596_v5, %v1519_v48  ;;  %v1537_v55 = vsub.f32 1.0, %v1536_v9  ;;  %v283_v5 = vadd.f32 %v6614_v16, %v6592_v0  ;;  %v5226_v0 = vld [vmem:[#allocation11 + $0x120] sm:$0xff]  ;;  %v5236_v4 = vld [vmem:[#allocation11 + $0x130] sm:$0xff] }
 0x501   :  { %v1528_v28 = vsel %vm1525_vm0, %v1527_v24, %v1523_v22  ;;  %v1551_v8 = vmul.f32 %v3600_v13, %v1509_v52  ;;  %v5238_v9 = vld [vmem:[#allocation11 + $0x100] sm:$0xff]  ;;  %v5240_v24 = vld [vmem:[#allocation11 + $0x108] sm:$0xff]  ;;  %v5250_v52 = vld [vmem:[#allocation11 + $0x118] sm:$0xff] }
 0x502   :  { %v1550_v46 = vmul.f32 %v1528_v28, %v5093_v32  ;;  %v1538_v7 = vmul.f32 %v3598_v12, %v1537_v55  ;;  %v6604_v32 = vld [vmem:[#allocation75_spill] sm:$0xff]  ;;  %v5246_v51 = vld [vmem:[#allocation11 + $0xe0] sm:$0xff]  ;;  %v5248_v13 = vld [vmem:[#allocation11 + $0xe8] sm:$0xff] }
 0x503   :  { %v5253_v22 = vld [vmem:[#allocation11 + $0xc0] sm:$0xff]  ;;  %v5255_v55 = vld [vmem:[#allocation11 + $0xc8] sm:$0xff]  ;;  %v5257_v28 = vld [vmem:[#allocation11 + $0xf8] sm:$0xff] }
 0x504   :  { %v5125_v47 = vadd.f32 %v1551_v8, %v1550_v46  ;;  %v1539_v36 = vadd.f32 %v3598_v12, %v1538_v7  ;;  %v6616_v8 = vld [vmem:[#allocation71_spill] sm:$0xff]  ;;  %v5263_v7 = vld [vmem:[#allocation11 + $0xd8] sm:$0xff]  ;;  %v5292_v16 = vld [vmem:[#allocation11 + $0x60] sm:$0xff] }
 0x505   :  { %v406_v46 = vadd.f32 %v6616_v8, %v6596_v34  ;;  %6617 = vst [vmem:[#allocation55_spill] sm:$0xff] %v5263_v7  ;;  %v5274_v34 = vld [vmem:[#allocation11 + $0xb8] sm:$0xff]  ;;  %v5320_v8 = vld [vmem:[#allocation11 + $0x20] sm:$0xff] }
 0x506   :  { %3601 = vtanh.f32 %v5125_v47  ;;  %v1543_v39 = vsel %vm1542_vm3, %v3598_v12, %v1539_v36  ;;  %v5228_v12 = vld [vmem:[#allocation11 + $0x128] sm:$0xff]  ;;  %6620 = vst [vmem:[#allocation58_spill] sm:$0xff] %v5274_v34 }
 0x507   :  { %v1548_v56 = vsel %vm1545_vm4, %v1547_v40, %v1543_v39  ;;  %v5270_v39 = vld [vmem:[#allocation11 + $0x110] sm:$0xff]  ;;  %6625 = vst [vmem:[#allocation19_spill] sm:$0xff] %v5292_v16 }
 0x508   :  { %6632 = vst [vmem:[#allocation28_spill] sm:$0xff] %v5320_v8 }
 0x50c   :  { %v3602_v35 = vpop.eup %3601 }
 0x50d   :  { %v1554_v41 = vmul.f32 %v3602_v35, %v1548_v56  ;;  %v5276_v35 = vld [vmem:[#allocation11 + $0xf0] sm:$0xff]  ;;  %v5280_v56 = vld [vmem:[#allocation11 + $0x80] sm:$0xff] }
 0x50e   :  { %6621 = vst [vmem:[#allocation59_spill] sm:$0xff] %v5280_v56 }
 0x50f   :  { %1584 = vmatmul.f32.vlgmr.msra.gmra.mxu0 %v1554_v41  ;;  %1604 = vmatmul.f32.vlgmr.msrb.gmra.mxu1 %v1554_v41 }
 0x510   :  { %1624 = vmatmul.f32.vlgmr.msrb.gmra.mxu2 %v1554_v41  ;;  %1644 = vmatmul.f32.vlgmr.msrb.gmra.mxu3 %v1554_v41 }
 0x511   :  { %2069 = vmatpush.msra.mxu0 %v5140_v30  ;;  %2089 = vmatpush.msrb.mxu1 %v5142_v59 }
 0x512   :  { %2129 = vmatpush.msrb.mxu3 %v5150_v57  ;;  %2109 = vmatpush.msrb.mxu2 %v5176_v45 }
 0x513   :  { %2070 = vmatpush.msra.mxu0 %v5144_v15  ;;  %2090 = vmatpush.msrb.mxu1 %v5148_v29 }
 0x514   :  { %2130 = vmatpush.msrb.mxu3 %v5157_v26  ;;  %2110 = vmatpush.msrb.mxu2 %v5179_v31 }
 0x515   :  { %2071 = vmatpush.msra.mxu0 %v5153_v62  ;;  %2091 = vmatpush.msrb.mxu1 %v5155_v3 }
 0x516   :  { %2111 = vmatpush.msrb.mxu2 %v5184_v50 }
 0x517   :  { %1881 = vmatmul.f32.vlgmr.msrb.gmra.mxu0 %v6604_v32  ;;  %1922 = vmatmul.f32.vlgmr.msra.gmra.mxu1 %v6604_v32 }
 0x518   :  { %1963 = vmatmul.f32.vlgmr.msra.gmra.mxu2 %v6604_v32  ;;  %2004 = vmatmul.f32.vlgmr.msra.gmra.mxu3 %v6604_v32 }
 0x519   :  { %2072 = vmatpush.msra.mxu0 %v5186_v53  ;;  %2092 = vmatpush.msrb.mxu1 %v5188_v42 }
 0x51a   :  { %2112 = vmatpush.msrb.mxu2 %v5200_v49 }
 0x51b   :  { %2093 = vmatpush.msrb.mxu1 %v5196_v25 }
 0x51c   :  { %2113 = vmatpush.msrb.mxu2 %v5208_v14 }
 0x51d   :  { %2094 = vmatpush.msrb.mxu1 %v5218_v21 }
 0x51e   :  { %2114 = vmatpush.msrb.mxu2 %v5224_v23 }
 0x51f   :  { %1884 = vmatmul.f32.gmra.mxu0 %v6605_v43  ;;  %1925 = vmatmul.f32.gmra.mxu1 %v6605_v43 }
 0x520   :  { %1966 = vmatmul.f32.gmra.mxu2 %v6605_v43  ;;  %2007 = vmatmul.f32.gmra.mxu3 %v6605_v43  ;;  %v5286_v43 = vld [vmem:[#allocation11 + $0x98] sm:$0xff] }
 0x521   :  { %2095 = vmatpush.msrb.mxu1 %v5228_v12  ;;  %2115 = vmatpush.msrb.mxu2 %v5236_v4  ;;  %6623 = vst [vmem:[#allocation60_spill] sm:$0xff] %v5286_v43 }
 0x523   :  { %2096 = vmatpush.msrb.mxu1 %v5240_v24  ;;  %2116 = vmatpush.msrb.mxu2 %v5270_v39 }
 0x525   :  { %2097 = vmatpush.msrb.mxu1 %v5248_v13  ;;  %2117 = vmatpush.msrb.mxu2 %v5276_v35 }
 0x527   :  { %1887 = vmatmul.f32.gmra.mxu0 %v6606_v27  ;;  %1928 = vmatmul.f32.gmra.mxu1 %v6606_v27 }
 0x528   :  { %1969 = vmatmul.f32.gmra.mxu2 %v6606_v27  ;;  %2010 = vmatmul.f32.gmra.mxu3 %v6606_v27  ;;  %v5288_v27 = vld [vmem:[#allocation11 + $0xd0] sm:$0xff] }
 0x529   :  { %2098 = vmatpush.msrb.mxu1 %v5255_v55  ;;  %6624 = vst [vmem:[#allocation25_spill] sm:$0xff] %v5288_v27  ;;  %2118 = vmatpush.msrb.mxu2 %v5288_v27 }
 0x52b   :  { %2099 = vmatpush.msrb.mxu1 %v5268_v38 }
 0x52f   :  { %1890 = vmatmul.f32.gmra.mxu0 %v6611_v19  ;;  %1931 = vmatmul.f32.gmra.mxu1 %v6611_v19 }
 0x530   :  { %1972 = vmatmul.f32.gmra.mxu2 %v6611_v19  ;;  %2013 = vmatmul.f32.gmra.mxu3 %v6611_v19 }
 0x537   :  { %1893 = vmatmul.f32.gmra.mxu0 %v5014_v60  ;;  %1934 = vmatmul.f32.gmra.mxu1 %v5014_v60 }
 0x538   :  { %1975 = vmatmul.f32.gmra.mxu2 %v5014_v60  ;;  %2016 = vmatmul.f32.gmra.mxu3 %v5014_v60  ;;  %v5182_v60 = vld [vmem:[#allocation11 + $0x1b8] sm:$0xff] }
 0x539   :  { %6612 = vst [vmem:[#allocation53_spill] sm:$0xff] %v5182_v60  ;;  %2131 = vmatpush.msrb.mxu3 %v5182_v60 }
 0x53b   :  { %2132 = vmatpush.msrb.mxu3 %v5198_v44 }
 0x53d   :  { %2133 = vmatpush.msrb.mxu3 %v5206_v1 }
 0x53f   :  { %1896 = vmatmul.f32.gmra.mxu0 %v5096_v58  ;;  %1937 = vmatmul.f32.gmra.mxu1 %v5096_v58 }
 0x540   :  { %1978 = vmatmul.f32.gmra.mxu2 %v5096_v58  ;;  %2019 = vmatmul.f32.gmra.mxu3 %v5096_v58  ;;  %v5191_v58 = vld [vmem:[#allocation11 + $0x160] sm:$0xff] }
 0x541   :  { %2073 = vmatpush.msra.mxu0 %v5191_v58  ;;  %2134 = vmatpush.msrb.mxu3 %v5220_v61 }
 0x543   :  { %2074 = vmatpush.msra.mxu0 %v5216_v17  ;;  %2135 = vmatpush.msrb.mxu3 %v5231_v54 }
 0x545   :  { %2075 = vmatpush.msra.mxu0 %v5226_v0  ;;  %2136 = vmatpush.msrb.mxu3 %v5250_v52 }
 0x547   :  { %1899 = vmatmul.f32.gmra.mxu0 %v1554_v41  ;;  %1940 = vmatmul.f32.gmra.mxu1 %v1554_v41 }
 0x548   :  { %1981 = vmatmul.f32.gmra.mxu2 %v1554_v41  ;;  %2022 = vmatmul.f32.gmra.mxu3 %v1554_v41  ;;  %v5282_v41 = vld [vmem:[#allocation11 + $0x88] sm:$0xff] }
 0x549   :  { %2076 = vmatpush.msra.mxu0 %v5238_v9  ;;  %2137 = vmatpush.msrb.mxu3 %v5257_v28  ;;  %6622 = vst [vmem:[#allocation61_spill] sm:$0xff] %v5282_v41 }
 0x54a   :  { %2100 = vmatpush.msrb.mxu1 %v5282_v41 }
 0x54b   :  { %2077 = vmatpush.msra.mxu0 %v5246_v51  ;;  %2138 = vmatpush.msrb.mxu3 %v5263_v7 }
 0x54d   :  { %2078 = vmatpush.msra.mxu0 %v5253_v22  ;;  %2139 = vmatpush.msrb.mxu3 %v5274_v34 }
 0x54f   :  { %2079 = vmatpush.msra.mxu0 %v5266_v37  ;;  %2140 = vmatpush.msrb.mxu3 %v5286_v43  ;;  %v5344_v43 = vld [vmem:[#allocation11 + $0x18] sm:$0xff] }
 0x550   :  { %6641 = vst [vmem:[#allocation26_spill] sm:$0xff] %v5344_v43 }
 0x551   :  { %2080 = vmatpush.msra.mxu0 %v5280_v56 }
 0x553   :  { %2081 = vmatpush.msra.mxu0 %v5292_v16 }
 0x58c   :  { %v1585_v6 = vpop.f32.mrf.mxu0  ;;  %v1605_v2 = vpop.f32.mrf.mxu1 }
 0x58d   :  { %v1648_v18 = vadd.f32 %v1585_v6, %v283_v5  ;;  %v1649_v63 = vadd.f32 %v1605_v2, %v324_v10  ;;  %v5294_v5 = vld [vmem:[#allocation11 + $0x68] sm:$0xff]  ;;  %v5300_v6 = vld [vmem:[#allocation11 + $0xb0] sm:$0xff]  ;;  %v5302_v2 = vld [vmem:[#allocation11 + $0x78] sm:$0xff] }
 0x58e   :  { %6626 = vst [vmem:[#allocation22_spill] sm:$0xff] %v5294_v5  ;;  %2101 = vmatpush.msrb.mxu1 %v5294_v5  ;;  %2119 = vmatpush.msrb.mxu2 %v5300_v6  ;;  %v6638_v5 = vld [vmem:[#allocation73_spill] sm:$0xff] }
 0x58f   :  { %v3439_v11 = vmul.f32 -1.442695, %v1648_v18  ;;  %v3440_v48 = vmul.f32 -1.442695, %v1649_v63  ;;  %6627 = vst [vmem:[#allocation24_spill] sm:$0xff] %v5300_v6  ;;  %v5308_v63 = vld [vmem:[#allocation11 + $0x40] sm:$0xff]  ;;  %2141 = vmatpush.msrb.mxu3 %v5302_v2  ;;  %v365_v16 = vadd.f32 %v6638_v5, %v6598_v33 }
 0x590   :  { %6628 = vst [vmem:[#allocation34_spill] sm:$0xff] %v5302_v2  ;;  %2082 = vmatpush.msra.mxu0 %v5308_v63  ;;  %v5352_v33 = vld [vmem:[#allocation11 + $0x30] sm:$0xff] }
 0x591   :  { %3603 = vpow2.f32 %v3439_v11  ;;  %6629 = vst [vmem:[#allocation29_spill] sm:$0xff] %v5308_v63  ;;  %v5310_v11 = vld [vmem:[#allocation11 + $0x48] sm:$0xff]  ;;  %v5342_v63 = vld [vmem:[#allocation11 + $0x38] sm:$0xff] }
 0x592   :  { %3605 = vpow2.f32 %v3440_v48  ;;  %6630 = vst [vmem:[#allocation18_spill] sm:$0xff] %v5310_v11  ;;  %v5315_v48 = vld [vmem:[#allocation11 + $0x90] sm:$0xff]  ;;  %2102 = vmatpush.msrb.mxu1 %v5310_v11  ;;  %2083 = vmatpush.msra.mxu0 %v5320_v8 }
 0x593   :  { %v1645_v36 = vpop.f32.mrf.mxu3  ;;  %6631 = vst [vmem:[#allocation20_spill] sm:$0xff] %v5315_v48  ;;  %2120 = vmatpush.msrb.mxu2 %v5315_v48  ;;  %v5340_v11 = vld [vmem:[#allocation11 + $0x50] sm:$0xff] }
 0x594   :  { %v1651_v40 = vadd.f32 %v1645_v36, %v406_v46  ;;  %v5322_v46 = vld [vmem:[#allocation11 + $0x28] sm:$0xff]  ;;  %v5324_v36 = vld [vmem:[#allocation11 + $0x58] sm:$0xff]  ;;  %6639 = vst [vmem:[#allocation40_spill] sm:$0xff] %v5340_v11 }
 0x595   :  { %6633 = vst [vmem:[#allocation37_spill] sm:$0xff] %v5322_v46  ;;  %2142 = vmatpush.msrb.mxu3 %v5324_v36  ;;  %2103 = vmatpush.msrb.mxu1 %v5322_v46 }
 0x596   :  { %v3441_v32 = vmul.f32 -1.442695, %v1651_v40  ;;  %6634 = vst [vmem:[#allocation21_spill] sm:$0xff] %v5324_v36  ;;  %v5328_v40 = vld [vmem:[#allocation11 + $0x70] sm:$0xff] }
 0x597   :  { %v3604_v19 = vpop.eup %3603  ;;  %6635 = vst [vmem:[#allocation33_spill] sm:$0xff] %v5328_v40  ;;  %2121 = vmatpush.msrb.mxu2 %v5328_v40  ;;  %2143 = vmatpush.msrb.mxu3 %v5342_v63 }
 0x598   :  { %v3606_v20 = vpop.eup %3605  ;;  %v5296_v10 = vadd.f32 1.0, %v3604_v19  ;;  %3607 = vpow2.f32 %v3441_v32  ;;  %v1625_v32 = vpop.f32.mrf.mxu2  ;;  %v5332_v19 = vld [vmem:[#allocation11] sm:$0xff]  ;;  %6640 = vst [vmem:[#allocation36_spill] sm:$0xff] %v5342_v63  ;;  %v5359_v63 = vld [vmem:[#allocation11 + $0x10] sm:$0xff] }
 0x599   :  { %v5304_v18 = vadd.f32 1.0, %v3606_v20  ;;  %6636 = vst [vmem:[#allocation23_spill] sm:$0xff] %v5332_v19  ;;  %v5334_v20 = vld [vmem:[#allocation11 + $0x8] sm:$0xff]  ;;  %v1650_v41 = vadd.f32 %v1625_v32, %v365_v16  ;;  %2084 = vmatpush.msra.mxu0 %v5332_v19  ;;  %2122 = vmatpush.msrb.mxu2 %v5340_v11 }
 0x59a   :  { %3609 = vrcp.f32 %v5296_v10  ;;  %6637 = vst [vmem:[#allocation32_spill] sm:$0xff] %v5334_v20  ;;  %2104 = vmatpush.msrb.mxu1 %v5334_v20  ;;  %2144 = vmatpush.msrb.mxu3 %v5344_v43  ;;  %v1667_v20 = vand.u32 2147483648, %v5296_v10  ;;  %vm1661_vm7 = vweird.f32 %v5296_v10 }
 0x59b   :  { %3611 = vrcp.f32 %v5304_v18  ;;  %6642 = vst [vmem:[#allocation35_spill] sm:$0xff] %v5352_v33  ;;  %2224 = vmatpush.msrb.mxu0 %v5140_v30  ;;  %2123 = vmatpush.msrb.mxu2 %v5352_v33  ;;  %v1686_v43 = vand.u32 2147483648, %v5304_v18  ;;  %v1665_v30 = vand.u32 2147483647, %v5296_v10  ;;  %vm1680_vm8 = vweird.f32 %v5304_v18 }
 0x59c   :  { %6643 = vst [vmem:[#allocation41_spill] sm:$0xff] %v5359_v63  ;;  %2244 = vmatpush.msra.mxu1 %v5142_v59  ;;  %2284 = vmatpush.msra.mxu3 %v5150_v57 }
 0x59d   :  { %2225 = vmatpush.msrb.mxu0 %v5144_v15  ;;  %2124 = vmatpush.msrb.mxu2 %v5359_v63  ;;  %vm1666_vm11 = vcmp.eq.f32.partialorder %v1665_v30, 8.507059e+37 }
 0x59e   :  { %v3608_v2 = vpop.eup %3607  ;;  %2245 = vmatpush.msra.mxu1 %v5148_v29  ;;  %2285 = vmatpush.msra.mxu3 %v5157_v26 }
 0x59f   :  { %v5346_v48 = vadd.f32 1.0, %v3608_v2  ;;  %2264 = vmatpush.msra.mxu2 %v5176_v45  ;;  %2226 = vmatpush.msrb.mxu0 %v5153_v62 }
 0x5a0   :  { %v3610_v36 = vpop.eup %3609  ;;  %2246 = vmatpush.msra.mxu1 %v5155_v3  ;;  %2286 = vmatpush.msra.mxu3 %v5182_v60 }
 0x5a1   :  { %v3612_v5 = vpop.eup %3611  ;;  %v1657_v46 = vmul.f32 %v3610_v36, %v5296_v10  ;;  %3613 = vrcp.f32 %v5346_v48  ;;  %vm1662_vm5 = vweird.f32 %v3610_v36  ;;  %2265 = vmatpush.msra.mxu2 %v5179_v31  ;;  %2227 = vmatpush.msrb.mxu0 %v5186_v53  ;;  %v1687_v10 = vor.u32 1.1754944e-38, %v1686_v43 }
 0x5a2   :  { %v1676_v2 = vmul.f32 %v3612_v5, %v5304_v18  ;;  %3615 = vtanh.f32 %v1650_v41  ;;  %vm1681_vm6 = vweird.f32 %v3612_v5  ;;  %vm1663_vm9 = vmor %vm1661_vm7, %vm1662_vm5  ;;  %2247 = vmatpush.msra.mxu1 %v5188_v42  ;;  %2287 = vmatpush.msra.mxu3 %v5198_v44  ;;  %vm1700_vm14 = vweird.f32 %v5346_v48 }
 0x5a3   :  { %v1658_v16 = vsub.f32 1.0, %v1657_v46  ;;  %vm1682_vm10 = vmor %vm1680_vm8, %vm1681_vm6  ;;  %2266 = vmatpush.msra.mxu2 %v5184_v50  ;;  %2228 = vmatpush.msrb.mxu0 %v5191_v58 }
 0x5a4   :  { %v1677_v32 = vsub.f32 1.0, %v1676_v2  ;;  %v1684_v2 = vand.u32 2147483647, %v5304_v18  ;;  %2248 = vmatpush.msra.mxu1 %v5196_v25  ;;  %2288 = vmatpush.msra.mxu3 %v5206_v1 }
 0x5a5   :  { %v1659_v19 = vmul.f32 %v3610_v36, %v1658_v16  ;;  %v1668_v16 = vor.u32 1.1754944e-38, %v1667_v20  ;;  %2267 = vmatpush.msra.mxu2 %v5200_v49  ;;  %2229 = vmatpush.msrb.mxu0 %v5216_v17 }
 0x5a6   :  { %v1678_v46 = vmul.f32 %v3612_v5, %v1677_v32  ;;  %vm1685_vm12 = vcmp.eq.f32.partialorder %v1684_v2, 8.507059e+37  ;;  %2249 = vmatpush.msra.mxu1 %v5218_v21  ;;  %2289 = vmatpush.msra.mxu3 %v5220_v61  ;;  %v6644_v2 = vld [vmem:[#allocation61_spill] sm:$0xff] }
 0x5a7   :  { %v5375_v41 = vpop.eup %3613  ;;  %v1660_v29 = vadd.f32 %v3610_v36, %v1659_v19  ;;  %2268 = vmatpush.msra.mxu2 %v5208_v14  ;;  %2230 = vmatpush.msrb.mxu0 %v5226_v0 }
 0x5a8   :  { %v1679_v32 = vadd.f32 %v3612_v5, %v1678_v46  ;;  %v1696_v26 = vmul.f32 %v5375_v41, %v5346_v48  ;;  %v3616_v18 = vpop.eup %3615  ;;  %vm1701_vm13 = vweird.f32 %v5375_v41  ;;  %2250 = vmatpush.msra.mxu1 %v5228_v12  ;;  %2290 = vmatpush.msra.mxu3 %v5231_v54 }
 0x5a9   :  { %v1664_v19 = vsel %vm1663_vm9, %v3610_v36, %v1660_v29  ;;  %2269 = vmatpush.msra.mxu2 %v5224_v23  ;;  %2231 = vmatpush.msrb.mxu0 %v5238_v9  ;;  %vm1702_vm15 = vmor %vm1700_vm14, %vm1701_vm13 }
 0x5aa   :  { %v1669_v60 = vsel %vm1666_vm11, %v1668_v16, %v1664_v19  ;;  %v1683_v20 = vsel %vm1682_vm10, %v3612_v5, %v1679_v32  ;;  %v1697_v46 = vsub.f32 1.0, %v1696_v26  ;;  %2251 = vmatpush.msra.mxu1 %v5240_v24  ;;  %2291 = vmatpush.msra.mxu3 %v5250_v52  ;;  %v6646_v16 = vld [vmem:[#allocation20_spill] sm:$0xff]  ;;  %v6647_v32 = vld [vmem:[#allocation19_spill] sm:$0xff]  ;;  %v6649_v19 = vld [vmem:[#allocation34_spill] sm:$0xff] }
 0x5ab   :  { %v1688_v3 = vsel %vm1685_vm12, %v1687_v10, %v1683_v20  ;;  %v1711_v53 = vmul.f32 %v3616_v18, %v1669_v60  ;;  %2270 = vmatpush.msra.mxu2 %v5236_v4  ;;  %2232 = vmatpush.msrb.mxu0 %v5246_v51  ;;  %v6648_v10 = vld [vmem:[#allocation22_spill] sm:$0xff]  ;;  %v6650_v18 = vld [vmem:[#allocation29_spill] sm:$0xff] }
 0x5ac   :  { %v1710_v30 = vmul.f32 %v1688_v3, %v5125_v47  ;;  %v1698_v29 = vmul.f32 %v5375_v41, %v1697_v46  ;;  %v1706_v47 = vand.u32 2147483648, %v5346_v48  ;;  %v1704_v3 = vand.u32 2147483647, %v5346_v48  ;;  %2252 = vmatpush.msra.mxu1 %v5248_v13  ;;  %2292 = vmatpush.msra.mxu3 %v5257_v28  ;;  %v6651_v20 = vld [vmem:[#allocation18_spill] sm:$0xff]  ;;  %v6652_v46 = vld [vmem:[#allocation21_spill] sm:$0xff] }
 0x5ad   :  { %2271 = vmatpush.msra.mxu2 %v5270_v39  ;;  %2233 = vmatpush.msrb.mxu0 %v5253_v22 }
 0x5ae   :  { %v1712_v26 = vadd.f32 %v1711_v53, %v1710_v30  ;;  %v1699_v60 = vadd.f32 %v5375_v41, %v1698_v29  ;;  %v1707_v43 = vor.u32 1.1754944e-38, %v1706_v47  ;;  %vm1705_vm0 = vcmp.eq.f32.partialorder %v1704_v3, 8.507059e+37  ;;  %2253 = vmatpush.msra.mxu1 %v5255_v55  ;;  %2293 = vmatpush.msra.mxu3 %v5263_v7  ;;  %v6654_v29 = vld [vmem:[#allocation37_spill] sm:$0xff]  ;;  %v6657_v47 = vld [vmem:[#allocation32_spill] sm:$0xff]  ;;  %v6658_v3 = vld [vmem:[#allocation26_spill] sm:$0xff] }
 0x5af   :  { %2272 = vmatpush.msra.mxu2 %v5276_v35  ;;  %2234 = vmatpush.msrb.mxu0 %v5266_v37  ;;  %v6653_v30 = vmov 0.0  }
 0x5b0   :  { %3617 = vtanh.f32 %v1712_v26  ;;  %v1703_v53 = vsel %vm1702_vm15, %v5375_v41, %v1699_v60  ;;  %2254 = vmatpush.msra.mxu1 %v5268_v38  ;;  %2294 = vmatpush.msra.mxu3 %v5274_v34  ;;  %v6645_v41 = vld [vmem:[#allocation60_spill] sm:$0xff]  ;;  %v6656_v60 = vld [vmem:[#allocation23_spill] sm:$0xff] }
 0x5b1   :  { %v1708_v36 = vsel %vm1705_vm0, %v1707_v43, %v1703_v53  ;;  %2273 = vmatpush.msra.mxu2 %v5288_v27  ;;  %2235 = vmatpush.msrb.mxu0 %v5280_v56  ;;  %v6655_v26 = vld [vmem:[#allocation36_spill] sm:$0xff]  ;;  %v6659_v53 = vld [vmem:[#allocation49_spill] sm:$0xff] }
 0x5b2   :  { %2255 = vmatpush.msra.mxu1 %v6644_v2  ;;  %2295 = vmatpush.msra.mxu3 %v6645_v41  ;;  %v6660_v43 = vld [vmem:[#allocation48_spill] sm:$0xff] }
 0x5b3   :  { %2274 = vmatpush.msra.mxu2 %v5300_v6  ;;  %2236 = vmatpush.msrb.mxu0 %v6647_v32 }
 0x5b4   :  { %2256 = vmatpush.msra.mxu1 %v6648_v10  ;;  %2296 = vmatpush.msra.mxu3 %v6649_v19 }
 0x5b5   :  { %2275 = vmatpush.msra.mxu2 %v6646_v16  ;;  %2237 = vmatpush.msrb.mxu0 %v6650_v18 }
 0x5b6   :  { %v3618_v48 = vpop.eup %3617  ;;  %2257 = vmatpush.msra.mxu1 %v6651_v20  ;;  %2297 = vmatpush.msra.mxu3 %v6652_v46 }
 0x5b7   :  { %v1714_v5 = vmul.f32 %v3618_v48, %v1708_v36  ;;  %2276 = vmatpush.msra.mxu2 %v5328_v40  ;;  %2238 = vmatpush.msrb.mxu0 %v5320_v8  ;;  %v6661_v48 = vld [vmem:[#allocation54_spill] sm:$0xff]  ;;  %v6662_v36 = vld [vmem:[#allocation51_spill] sm:$0xff] }
 0x5b8   :  { %2258 = vmatpush.msra.mxu1 %v6654_v29  ;;  %2298 = vmatpush.msra.mxu3 %v6655_v26 }
 0x5b9   :  { %1902 = vmatmul.f32.gmra.mxu0 %v1714_v5  ;;  %1943 = vmatmul.f32.gmra.mxu1 %v1714_v5 }
 0x5ba   :  { %1984 = vmatmul.f32.gmra.mxu2 %v1714_v5  ;;  %2025 = vmatmul.f32.gmra.mxu3 %v1714_v5  ;;  %v6663_v5 = vld [vmem:[#allocation53_spill] sm:$0xff] }
 0x5bb   :  { %2277 = vmatpush.msra.mxu2 %v5340_v11  ;;  %2239 = vmatpush.msrb.mxu0 %v6656_v60 }
 0x5bc   :  { %2259 = vmatpush.msra.mxu1 %v6657_v47  ;;  %2299 = vmatpush.msra.mxu3 %v6658_v3 }
 0x5bd   :  { %2278 = vmatpush.msra.mxu2 %v5352_v33 }
 0x5bf   :  { %2279 = vmatpush.msra.mxu2 %v5359_v63 }
 0x5c1   :  { %2085 = vmatmul.f32.vlgmr.msra.gmra.mxu0 %v6653_v30  ;;  %2105 = vmatmul.f32.vlgmr.msrb.gmra.mxu1 %v6653_v30 }
 0x5c2   :  { %2125 = vmatmul.f32.vlgmr.msrb.gmra.mxu2 %v6653_v30  ;;  %2145 = vmatmul.f32.vlgmr.msrb.gmra.mxu3 %v6653_v30  ;;  %v6664_v30 = vld [vmem:[#allocation52_spill] sm:$0xff] }
 0x5c3   :  { %2379 = vmatpush.msra.mxu0 %v6659_v53  ;;  %2399 = vmatpush.msrb.mxu1 %v5142_v59 }
 0x5c4   :  { %2419 = vmatpush.msrb.mxu2 %v5176_v45  ;;  %2439 = vmatpush.msrb.mxu3 %v5150_v57 }
 0x5c5   :  { %2380 = vmatpush.msra.mxu0 %v5144_v15  ;;  %2400 = vmatpush.msrb.mxu1 %v6660_v43 }
 0x5c6   :  { %2420 = vmatpush.msrb.mxu2 %v5179_v31  ;;  %2440 = vmatpush.msrb.mxu3 %v6661_v48 }
 0x5c7   :  { %2381 = vmatpush.msra.mxu0 %v5153_v62  ;;  %2401 = vmatpush.msrb.mxu1 %v6662_v36 }
 0x5c8   :  { %2421 = vmatpush.msrb.mxu2 %v5184_v50  ;;  %2441 = vmatpush.msrb.mxu3 %v6663_v5 }
 0x5c9   :  { %2382 = vmatpush.msra.mxu0 %v6664_v30  ;;  %2402 = vmatpush.msrb.mxu1 %v5188_v42 }
 0x5ca   :  { %2422 = vmatpush.msrb.mxu2 %v5200_v49  ;;  %2442 = vmatpush.msrb.mxu3 %v5198_v44 }
 0x5cb   :  { %2383 = vmatpush.msra.mxu0 %v5191_v58  ;;  %2403 = vmatpush.msrb.mxu1 %v5196_v25 }
 0x5cc   :  { %2423 = vmatpush.msrb.mxu2 %v5208_v14  ;;  %2443 = vmatpush.msrb.mxu3 %v5206_v1 }
 0x5cd   :  { %2384 = vmatpush.msra.mxu0 %v5216_v17  ;;  %2404 = vmatpush.msrb.mxu1 %v5218_v21 }
 0x5ce   :  { %2424 = vmatpush.msrb.mxu2 %v5224_v23  ;;  %2444 = vmatpush.msrb.mxu3 %v5220_v61 }
 0x5cf   :  { %2385 = vmatpush.msra.mxu0 %v5226_v0  ;;  %2405 = vmatpush.msrb.mxu1 %v5228_v12 }
 0x5d0   :  { %2425 = vmatpush.msrb.mxu2 %v5236_v4  ;;  %2445 = vmatpush.msrb.mxu3 %v5231_v54 }
 0x5d1   :  { %2386 = vmatpush.msra.mxu0 %v5238_v9  ;;  %2406 = vmatpush.msrb.mxu1 %v5240_v24 }
 0x5d2   :  { %2426 = vmatpush.msrb.mxu2 %v5270_v39  ;;  %2446 = vmatpush.msrb.mxu3 %v5250_v52 }
 0x5d3   :  { %2387 = vmatpush.msra.mxu0 %v5246_v51  ;;  %2407 = vmatpush.msrb.mxu1 %v5248_v13 }
 0x5d4   :  { %2427 = vmatpush.msrb.mxu2 %v5276_v35  ;;  %2447 = vmatpush.msrb.mxu3 %v5257_v28 }
 0x5d5   :  { %2388 = vmatpush.msra.mxu0 %v5253_v22  ;;  %2408 = vmatpush.msrb.mxu1 %v5255_v55 }
 0x5d6   :  { %2428 = vmatpush.msrb.mxu2 %v5288_v27  ;;  %2448 = vmatpush.msrb.mxu3 %v5263_v7 }
 0x5d7   :  { %2389 = vmatpush.msra.mxu0 %v5266_v37  ;;  %2409 = vmatpush.msrb.mxu1 %v5268_v38 }
 0x5d8   :  { %2429 = vmatpush.msrb.mxu2 %v5300_v6  ;;  %2449 = vmatpush.msrb.mxu3 %v5274_v34 }
 0x5d9   :  { %2390 = vmatpush.msra.mxu0 %v5280_v56  ;;  %2410 = vmatpush.msrb.mxu1 %v6644_v2 }
 0x5da   :  { %2430 = vmatpush.msrb.mxu2 %v6646_v16  ;;  %2450 = vmatpush.msrb.mxu3 %v6645_v41 }
 0x5db   :  { %2391 = vmatpush.msra.mxu0 %v6647_v32  ;;  %2411 = vmatpush.msrb.mxu1 %v6648_v10 }
 0x5dc   :  { %2431 = vmatpush.msrb.mxu2 %v5328_v40  ;;  %2451 = vmatpush.msrb.mxu3 %v6649_v19 }
 0x5dd   :  { %2392 = vmatpush.msra.mxu0 %v6650_v18  ;;  %2412 = vmatpush.msrb.mxu1 %v6651_v20  ;;  %v1882_v20 = vpop.f32.mrf.mxu0  ;;  %v2005_v18 = vpop.f32.mrf.mxu3 }
 0x5de   :  { %2432 = vmatpush.msrb.mxu2 %v5340_v11  ;;  %2452 = vmatpush.msrb.mxu3 %v6652_v46  ;;  %v1923_v11 = vpop.f32.mrf.mxu1 }
 0x5df   :  { %2393 = vmatpush.msra.mxu0 %v5320_v8  ;;  %2413 = vmatpush.msrb.mxu1 %v6654_v29  ;;  %v1964_v29 = vpop.f32.mrf.mxu2 }
 0x5e0   :  { %2433 = vmatpush.msrb.mxu2 %v5352_v33  ;;  %2453 = vmatpush.msrb.mxu3 %v6655_v26 }
 0x5e1   :  { %2394 = vmatpush.msra.mxu0 %v6656_v60  ;;  %2414 = vmatpush.msrb.mxu1 %v6657_v47 }
 0x5e2   :  { %2434 = vmatpush.msrb.mxu2 %v5359_v63  ;;  %2454 = vmatpush.msrb.mxu3 %v6658_v3 }
 0x5e5   :  { %v5515_v46 = vpop.f32.mrf.mxu0  ;;  %v5519_v19 = vpop.f32.mrf.mxu3 }
 0x5e6   :  { %6665 = vst [vmem:[#allocation39_spill] sm:$0xff] %v5515_v46  ;;  %v5517_v8 = vpop.f32.mrf.mxu1 }
 0x5e7   :  { %6666 = vst [vmem:[#allocation30_spill] sm:$0xff] %v5517_v8  ;;  %v5525_v60 = vpop.f32.mrf.mxu2 }
 0x5e8   :  { %6667 = vst [vmem:[#allocation38_spill] sm:$0xff] %v5519_v19 }
 0x5e9   :  { %6670 = vst [vmem:[#allocation46_spill] sm:$0xff] %v5525_v60 }
 0x5ed   :  { %v5521_v33 = vpop.f32.mrf.mxu0  ;;  %v5527_v47 = vpop.f32.mrf.mxu3 }
 0x5ee   :  { %6668 = vst [vmem:[#allocation43_spill] sm:$0xff] %v5521_v33  ;;  %v5523_v26 = vpop.f32.mrf.mxu1 }
 0x5ef   :  { %6669 = vst [vmem:[#allocation42_spill] sm:$0xff] %v5523_v26  ;;  %v5533_v40 = vpop.f32.mrf.mxu2 }
 0x5f0   :  { %6671 = vst [vmem:[#allocation47_spill] sm:$0xff] %v5527_v47 }
 0x5f1   :  { %6674 = vst [vmem:[#allocation69_spill] sm:$0xff] %v5533_v40 }
 0x5f5   :  { %v5529_v63 = vpop.f32.mrf.mxu0  ;;  %v5535_v46 = vpop.f32.mrf.mxu3 }
 0x5f6   :  { %6672 = vst [vmem:[#allocation63_spill] sm:$0xff] %v5529_v63  ;;  %v5531_v3 = vpop.f32.mrf.mxu1 }
 0x5f7   :  { %6673 = vst [vmem:[#allocation17_spill] sm:$0xff] %v5531_v3  ;;  %v5541_v19 = vpop.f32.mrf.mxu2 }
 0x5f8   :  { %6675 = vst [vmem:[#allocation62_spill] sm:$0xff] %v5535_v46 }
 0x5f9   :  { %6678 = vst [vmem:[#allocation74_spill] sm:$0xff] %v5541_v19 }
 0x5fd   :  { %v5537_v8 = vpop.f32.mrf.mxu0  ;;  %v5543_v33 = vpop.f32.mrf.mxu3 }
 0x5fe   :  { %6676 = vst [vmem:[#allocation72_spill] sm:$0xff] %v5537_v8  ;;  %v5539_v10 = vpop.f32.mrf.mxu1 }
 0x5ff   :  { %6677 = vst [vmem:[#allocation64_spill] sm:$0xff] %v5539_v10  ;;  %v5549_v47 = vpop.f32.mrf.mxu2 }
 0x600   :  { %6679 = vst [vmem:[#allocation66_spill] sm:$0xff] %v5543_v33  ;;  %v1847_v33 = vld [vmem:[%s6134_s7] sm:$0xf] }
 0x601   :  { %6682 = vst [vmem:[#allocation67_spill] sm:$0xff] %v5549_v47  ;;  %v5570_v47 = vperm.slane %v1847_v33, 1  ;;  %v5578_v16 = vperm.slane %v1847_v33, 3 }
 0x603   :  { %6691 = vst [vmem:[#allocation73_spill] sm:$0xff] %v5570_v47  ;;  %v2006_v2 = vadd.f32 %v2005_v18, %v5578_v16 }
 0x604   :  { %6694 = vst [vmem:[#allocation54_spill] sm:$0xff] %v5578_v16 }
 0x605   :  { %v5545_v26 = vpop.f32.mrf.mxu0  ;;  %v5551_v63 = vpop.f32.mrf.mxu3 }
 0x606   :  { %6680 = vst [vmem:[#allocation44_spill] sm:$0xff] %v5545_v26  ;;  %v5547_v60 = vpop.f32.mrf.mxu1 }
 0x607   :  { %6681 = vst [vmem:[#allocation65_spill] sm:$0xff] %v5547_v60  ;;  %v5557_v46 = vpop.f32.mrf.mxu2  ;;  %v5568_v60 = vperm.slane %v1847_v33, 0 }
 0x608   :  { %6683 = vst [vmem:[#allocation70_spill] sm:$0xff] %v5551_v63 }
 0x609   :  { %6686 = vst [vmem:[#allocation31_spill] sm:$0xff] %v5557_v46 }
 0x60a   :  { %6690 = vst [vmem:[#allocation71_spill] sm:$0xff] %v5568_v60 }
 0x60d   :  { %v5553_v3 = vpop.f32.mrf.mxu0  ;;  %v5559_v8 = vpop.f32.mrf.mxu3 }
 0x60e   :  { %6684 = vst [vmem:[#allocation75_spill] sm:$0xff] %v5553_v3  ;;  %v5555_v40 = vpop.f32.mrf.mxu1  ;;  %v1883_v3 = vadd.f32 %v1882_v20, %v5568_v60 }
 0x60f   :  { %6685 = vst [vmem:[#allocation27_spill] sm:$0xff] %v5555_v40  ;;  %v1924_v40 = vadd.f32 %v1923_v11, %v5570_v47  ;;  %v5574_v63 = vpop.f32.mrf.mxu2 }
 0x610   :  { %6687 = vst [vmem:[#allocation50_spill] sm:$0xff] %v5559_v8 }
 0x611   :  { %6692 = vst [vmem:[#allocation49_spill] sm:$0xff] %v5574_v63 }
 0x636   :  { %v5564_v10 = vpop.f32.mrf.mxu0  ;;  %v5566_v26 = vpop.f32.mrf.mxu1 }
 0x637   :  { %6688 = vst [vmem:[#allocation45_spill] sm:$0xff] %v5564_v10 }
 0x638   :  { %6689 = vst [vmem:[#allocation68_spill] sm:$0xff] %v5566_v26 }
 0x63d   :  { %v5576_v46 = vpop.f32.mrf.mxu3  ;;  %v5581_v56 = vpop.f32.mrf.mxu2 }
 0x63e   :  { %6693 = vst [vmem:[#allocation48_spill] sm:$0xff] %v5576_v46  ;;  %v2086_v8 = vpop.f32.mrf.mxu0  ;;  %v2106_v19 = vpop.f32.mrf.mxu1 }
 0x63f   :  { %v2149_v32 = vadd.f32 %v2086_v8, %v1883_v3  ;;  %v2150_v41 = vadd.f32 %v2106_v19, %v1924_v40  ;;  %6695 = vst [vmem:[#allocation51_spill] sm:$0xff] %v5581_v56  ;;  %v5583_v8 = vperm.slane %v1847_v33, 2 }
 0x641   :  { %v3442_v10 = vmul.f32 -1.442695, %v2149_v32  ;;  %v3443_v26 = vmul.f32 -1.442695, %v2150_v41  ;;  %6696 = vst [vmem:[#allocation53_spill] sm:$0xff] %v5583_v8  ;;  %v1965_v32 = vadd.f32 %v1964_v29, %v5583_v8 }
 0x643   :  { %3619 = vpow2.f32 %v3442_v10 }
 0x644   :  { %3621 = vpow2.f32 %v3443_v26 }
 0x645   :  { %v2146_v20 = vpop.f32.mrf.mxu3  ;;  %v2126_v40 = vpop.f32.mrf.mxu2 }
 0x646   :  { %v2152_v11 = vadd.f32 %v2146_v20, %v2006_v2  ;;  %v2151_v18 = vadd.f32 %v2126_v40, %v1965_v32 }
 0x648   :  { %v3444_v47 = vmul.f32 -1.442695, %v2152_v11 }
 0x649   :  { %v3620_v63 = vpop.eup %3619 }
 0x64a   :  { %v3622_v60 = vpop.eup %3621  ;;  %v2156_v46 = vadd.f32 1.0, %v3620_v63  ;;  %3623 = vpow2.f32 %v3444_v47 }
 0x64b   :  { %v2175_v34 = vadd.f32 1.0, %v3622_v60 }
 0x64c   :  { %3625 = vrcp.f32 %v2156_v46  ;;  %v2168_v63 = vand.u32 2147483648, %v2156_v46  ;;  %v2166_v47 = vand.u32 2147483647, %v2156_v46  ;;  %vm2162_vm3 = vweird.f32 %v2156_v46 }
 0x64d   :  { %3627 = vrcp.f32 %v2175_v34  ;;  %v2187_v60 = vand.u32 2147483648, %v2175_v34  ;;  %v2185_v16 = vand.u32 2147483647, %v2175_v34  ;;  %vm2181_vm4 = vweird.f32 %v2175_v34 }
 0x64e   :  { %v2169_v40 = vor.u32 1.1754944e-38, %v2168_v63  ;;  %vm2167_vm6 = vcmp.eq.f32.partialorder %v2166_v47, 8.507059e+37 }
 0x64f   :  { %v2188_v8 = vor.u32 1.1754944e-38, %v2187_v60  ;;  %vm2186_vm8 = vcmp.eq.f32.partialorder %v2185_v16, 8.507059e+37 }
 0x650   :  { %v3624_v41 = vpop.eup %3623 }
 0x651   :  { %v2195_v10 = vadd.f32 1.0, %v3624_v41 }
 0x652   :  { %v3626_v19 = vpop.eup %3625 }
 0x653   :  { %v3628_v26 = vpop.eup %3627  ;;  %v2158_v3 = vmul.f32 %v3626_v19, %v2156_v46  ;;  %3629 = vrcp.f32 %v2195_v10  ;;  %vm2163_vm1 = vweird.f32 %v3626_v19  ;;  %vm2201_vm10 = vweird.f32 %v2195_v10 }
 0x654   :  { %v2177_v2 = vmul.f32 %v3628_v26, %v2175_v34  ;;  %3631 = vtanh.f32 %v2151_v18  ;;  %vm2182_vm2 = vweird.f32 %v3628_v26  ;;  %vm2164_vm5 = vmor %vm2162_vm3, %vm2163_vm1  ;;  %v2205_v46 = vand.u32 2147483647, %v2195_v10 }
 0x655   :  { %v2159_v20 = vsub.f32 1.0, %v2158_v3  ;;  %vm2183_vm7 = vmor %vm2181_vm4, %vm2182_vm2 }
 0x656   :  { %v2178_v11 = vsub.f32 1.0, %v2177_v2  ;;  %vm2206_vm12 = vcmp.eq.f32.partialorder %v2205_v46, 8.507059e+37 }
 0x657   :  { %v2160_v33 = vmul.f32 %v3626_v19, %v2159_v20 }
 0x658   :  { %v2179_v56 = vmul.f32 %v3628_v26, %v2178_v11 }
 0x659   :  { %v3630_v6 = vpop.eup %3629  ;;  %v2161_v29 = vadd.f32 %v3626_v19, %v2160_v33 }
 0x65a   :  { %v2180_v41 = vadd.f32 %v3628_v26, %v2179_v56  ;;  %v2197_v32 = vmul.f32 %v3630_v6, %v2195_v10  ;;  %v3632_v18 = vpop.eup %3631  ;;  %vm2202_vm9 = vweird.f32 %v3630_v6  ;;  %v2207_v56 = vand.u32 2147483648, %v2195_v10 }
 0x65b   :  { %v2165_v3 = vsel %vm2164_vm5, %v3626_v19, %v2161_v29  ;;  %vm2203_vm11 = vmor %vm2201_vm10, %vm2202_vm9 }
 0x65c   :  { %v2170_v2 = vsel %vm2167_vm6, %v2169_v40, %v2165_v3  ;;  %v2184_v20 = vsel %vm2183_vm7, %v3628_v26, %v2180_v41  ;;  %v2198_v38 = vsub.f32 1.0, %v2197_v32  ;;  %v2208_v63 = vor.u32 1.1754944e-38, %v2207_v56  ;;  %v6729_v3 = vld [vmem:[#allocation53_spill] sm:$0xff] }
 0x65d   :  { %v2189_v11 = vsel %vm2186_vm8, %v2188_v8, %v2184_v20  ;;  %v2212_v37 = vmul.f32 %v3632_v18, %v2170_v2  ;;  %v6730_v18 = vld [vmem:[#allocation46_spill] sm:$0xff] }
 0x65e   :  { %v2211_v7 = vmul.f32 0.0, %v2189_v11  ;;  %v2199_v27 = vmul.f32 %v3630_v6, %v2198_v38  ;;  %v1968_v2 = vadd.f32 %v6730_v18, %v6729_v3  ;;  %v5722_v18 = vld [vmem:[#allocation11 + $0x178] sm:$0xff] }
 0x660   :  { %v5586_v33 = vadd.f32 %v2212_v37, %v2211_v7  ;;  %v2200_v34 = vadd.f32 %v3630_v6, %v2199_v27  ;;  %v6726_v7 = vld [vmem:[#allocation30_spill] sm:$0xff] }
 0x662   :  { %3633 = vtanh.f32 %v5586_v33  ;;  %v2204_v19 = vsel %vm2203_vm11, %v3630_v6, %v2200_v34 }
 0x663   :  { %v2209_v16 = vsel %vm2206_vm12, %v2208_v63, %v2204_v19 }
 0x668   :  { %v3634_v26 = vpop.eup %3633 }
 0x669   :  { %v2215_v60 = vmul.f32 %v3634_v26, %v2209_v16 }
 0x66b   :  { %2240 = vmatmul.f32.vlgmr.msrb.gmra.mxu0 %v2215_v60  ;;  %2260 = vmatmul.f32.vlgmr.msra.gmra.mxu1 %v2215_v60 }
 0x66c   :  { %2280 = vmatmul.f32.vlgmr.msra.gmra.mxu2 %v2215_v60  ;;  %2300 = vmatmul.f32.vlgmr.msra.gmra.mxu3 %v2215_v60 }
 0x66d   :  { %2534 = vmatpush.msrb.mxu0 %v6659_v53  ;;  %2554 = vmatpush.msra.mxu1 %v5142_v59  ;;  %v6697_v59 = vld [vmem:[#allocation25_spill] sm:$0xff] }
 0x66e   :  { %2574 = vmatpush.msra.mxu2 %v5176_v45  ;;  %2594 = vmatpush.msra.mxu3 %v5150_v57  ;;  %v6699_v57 = vld [vmem:[#allocation57_spill] sm:$0xff]  ;;  %v6701_v45 = vld [vmem:[#allocation24_spill] sm:$0xff] }
 0x66f   :  { %2535 = vmatpush.msrb.mxu0 %v5144_v15  ;;  %2555 = vmatpush.msra.mxu1 %v6660_v43  ;;  %v6698_v15 = vld [vmem:[#allocation55_spill] sm:$0xff]  ;;  %v6727_v43 = vld [vmem:[#allocation54_spill] sm:$0xff] }
 0x670   :  { %2575 = vmatpush.msra.mxu2 %v5179_v31  ;;  %2595 = vmatpush.msra.mxu3 %v6661_v48  ;;  %v6702_v31 = vld [vmem:[#allocation58_spill] sm:$0xff] }
 0x671   :  { %2536 = vmatpush.msrb.mxu0 %v5153_v62  ;;  %2556 = vmatpush.msra.mxu1 %v6662_v36  ;;  %v6700_v62 = vld [vmem:[#allocation56_spill] sm:$0xff]  ;;  %v6728_v48 = vld [vmem:[#allocation38_spill] sm:$0xff] }
 0x672   :  { %2576 = vmatpush.msra.mxu2 %v5184_v50  ;;  %2596 = vmatpush.msra.mxu3 %v6663_v5  ;;  %v6703_v50 = vld [vmem:[#allocation59_spill] sm:$0xff]  ;;  %v2009_v36 = vadd.f32 %v6728_v48, %v6727_v43  ;;  %v5689_v48 = vld [vmem:[#allocation11 + $0x1a0] sm:$0xff] }
 0x673   :  { %2537 = vmatpush.msrb.mxu0 %v6664_v30  ;;  %2557 = vmatpush.msra.mxu1 %v5188_v42  ;;  %v6704_v42 = vld [vmem:[#allocation61_spill] sm:$0xff] }
 0x674   :  { %2577 = vmatpush.msra.mxu2 %v5200_v49  ;;  %2597 = vmatpush.msra.mxu3 %v5198_v44  ;;  %v6707_v44 = vld [vmem:[#allocation19_spill] sm:$0xff]  ;;  %v6708_v49 = vld [vmem:[#allocation22_spill] sm:$0xff] }
 0x675   :  { %2538 = vmatpush.msrb.mxu0 %v5191_v58  ;;  %2558 = vmatpush.msra.mxu1 %v5196_v25  ;;  %v6705_v58 = vld [vmem:[#allocation20_spill] sm:$0xff] }
 0x676   :  { %2578 = vmatpush.msra.mxu2 %v5208_v14  ;;  %2598 = vmatpush.msra.mxu3 %v5206_v1  ;;  %v6706_v25 = vld [vmem:[#allocation60_spill] sm:$0xff]  ;;  %v6709_v1 = vld [vmem:[#allocation33_spill] sm:$0xff]  ;;  %v6710_v14 = vld [vmem:[#allocation34_spill] sm:$0xff] }
 0x677   :  { %2539 = vmatpush.msrb.mxu0 %v5216_v17  ;;  %2559 = vmatpush.msra.mxu1 %v5218_v21  ;;  %v6711_v17 = vld [vmem:[#allocation29_spill] sm:$0xff]  ;;  %v6712_v21 = vld [vmem:[#allocation18_spill] sm:$0xff] }
 0x678   :  { %2579 = vmatpush.msra.mxu2 %v5224_v23  ;;  %2599 = vmatpush.msra.mxu3 %v5220_v61  ;;  %v6713_v61 = vld [vmem:[#allocation40_spill] sm:$0xff]  ;;  %v6714_v23 = vld [vmem:[#allocation21_spill] sm:$0xff] }
 0x679   :  { %2540 = vmatpush.msrb.mxu0 %v5226_v0  ;;  %2560 = vmatpush.msra.mxu1 %v5228_v12  ;;  %v6715_v0 = vld [vmem:[#allocation28_spill] sm:$0xff]  ;;  %v6716_v12 = vld [vmem:[#allocation37_spill] sm:$0xff] }
 0x67a   :  { %2580 = vmatpush.msra.mxu2 %v5236_v4  ;;  %2600 = vmatpush.msra.mxu3 %v5231_v54  ;;  %v6717_v54 = vld [vmem:[#allocation35_spill] sm:$0xff]  ;;  %v6718_v4 = vld [vmem:[#allocation36_spill] sm:$0xff] }
 0x67b   :  { %2541 = vmatpush.msrb.mxu0 %v5238_v9  ;;  %2561 = vmatpush.msra.mxu1 %v5240_v24  ;;  %v6719_v9 = vld [vmem:[#allocation23_spill] sm:$0xff]  ;;  %v6720_v24 = vld [vmem:[#allocation32_spill] sm:$0xff] }
 0x67c   :  { %2581 = vmatpush.msra.mxu2 %v5270_v39  ;;  %2601 = vmatpush.msra.mxu3 %v5250_v52  ;;  %v6723_v52 = vld [vmem:[#allocation71_spill] sm:$0xff] }
 0x67d   :  { %2542 = vmatpush.msrb.mxu0 %v5246_v51  ;;  %2562 = vmatpush.msra.mxu1 %v5248_v13  ;;  %v6721_v51 = vld [vmem:[#allocation41_spill] sm:$0xff]  ;;  %v6722_v13 = vld [vmem:[#allocation26_spill] sm:$0xff] }
 0x67e   :  { %2582 = vmatpush.msra.mxu2 %v5276_v35  ;;  %2602 = vmatpush.msra.mxu3 %v5257_v28  ;;  %v6725_v28 = vld [vmem:[#allocation73_spill] sm:$0xff] }
 0x67f   :  { %2543 = vmatpush.msrb.mxu0 %v5253_v22  ;;  %2563 = vmatpush.msra.mxu1 %v5255_v55  ;;  %v6724_v22 = vld [vmem:[#allocation39_spill] sm:$0xff]  ;;  %v1927_v37 = vadd.f32 %v6726_v7, %v6725_v28 }
 0x680   :  { %2583 = vmatpush.msra.mxu2 %v6697_v59  ;;  %2603 = vmatpush.msra.mxu3 %v6698_v15  ;;  %v1886_v55 = vadd.f32 %v6724_v22, %v6723_v52 }
 0x681   :  { %2544 = vmatpush.msrb.mxu0 %v6699_v57  ;;  %2564 = vmatpush.msra.mxu1 %v6700_v62 }
 0x682   :  { %2584 = vmatpush.msra.mxu2 %v6701_v45  ;;  %2604 = vmatpush.msra.mxu3 %v6702_v31 }
 0x683   :  { %2545 = vmatpush.msrb.mxu0 %v6703_v50  ;;  %2565 = vmatpush.msra.mxu1 %v6704_v42 }
 0x684   :  { %2585 = vmatpush.msra.mxu2 %v6705_v58  ;;  %2605 = vmatpush.msra.mxu3 %v6706_v25 }
 0x685   :  { %2546 = vmatpush.msrb.mxu0 %v6707_v44  ;;  %2566 = vmatpush.msra.mxu1 %v6708_v49 }
 0x686   :  { %2586 = vmatpush.msra.mxu2 %v6709_v1  ;;  %2606 = vmatpush.msra.mxu3 %v6710_v14 }
 0x687   :  { %2547 = vmatpush.msrb.mxu0 %v6711_v17  ;;  %2567 = vmatpush.msra.mxu1 %v6712_v21 }
 0x688   :  { %2587 = vmatpush.msra.mxu2 %v6713_v61  ;;  %2607 = vmatpush.msra.mxu3 %v6714_v23 }
 0x689   :  { %2548 = vmatpush.msrb.mxu0 %v6715_v0  ;;  %2568 = vmatpush.msra.mxu1 %v6716_v12 }
 0x68a   :  { %2588 = vmatpush.msra.mxu2 %v6717_v54  ;;  %2608 = vmatpush.msra.mxu3 %v6718_v4 }
 0x68b   :  { %2549 = vmatpush.msrb.mxu0 %v6719_v9  ;;  %2569 = vmatpush.msra.mxu1 %v6720_v24 }
 0x68c   :  { %2589 = vmatpush.msra.mxu2 %v6721_v51  ;;  %2609 = vmatpush.msra.mxu3 %v6722_v13 }
 0x6e8   :  { %v2241_v38 = vpop.f32.mrf.mxu0  ;;  %v2261_v39 = vpop.f32.mrf.mxu1 }
 0x6e9   :  { %v2304_v35 = vadd.f32 %v2241_v38, %v1886_v55  ;;  %v2305_v27 = vadd.f32 %v2261_v39, %v1927_v37  ;;  %v5668_v37 = vld [vmem:[#allocation11 + $0x1e8] sm:$0xff]  ;;  %v5671_v38 = vld [vmem:[#allocation11 + $0x1f0] sm:$0xff]  ;;  %v5674_v39 = vld [vmem:[#allocation11 + $0x1f8] sm:$0xff] }
 0x6eb   :  { %v3445_v6 = vmul.f32 -1.442695, %v2304_v35  ;;  %v3446_v53 = vmul.f32 -1.442695, %v2305_v27  ;;  %v5677_v35 = vld [vmem:[#allocation11 + $0x1c0] sm:$0xff]  ;;  %v5680_v27 = vld [vmem:[#allocation11 + $0x1c8] sm:$0xff] }
 0x6ed   :  { %3635 = vpow2.f32 %v3445_v6  ;;  %v5683_v6 = vld [vmem:[#allocation11 + $0x1d0] sm:$0xff] }
 0x6ee   :  { %3637 = vpow2.f32 %v3446_v53  ;;  %v5686_v53 = vld [vmem:[#allocation11 + $0x1d8] sm:$0xff] }
 0x6ef   :  { %v2301_v5 = vpop.f32.mrf.mxu3  ;;  %v2281_v41 = vpop.f32.mrf.mxu2 }
 0x6f0   :  { %v2307_v30 = vadd.f32 %v2301_v5, %v2009_v36  ;;  %v2306_v34 = vadd.f32 %v2281_v41, %v1968_v2  ;;  %v5692_v36 = vld [vmem:[#allocation11 + $0x1a8] sm:$0xff]  ;;  %v5695_v5 = vld [vmem:[#allocation11 + $0x1b0] sm:$0xff]  ;;  %v5725_v2 = vld [vmem:[#allocation11 + $0x140] sm:$0xff] }
 0x6f1   :  { %v5716_v41 = vld [vmem:[#allocation11 + $0x168] sm:$0xff] }
 0x6f2   :  { %v3447_v8 = vmul.f32 -1.442695, %v2307_v30  ;;  %v5698_v30 = vld [vmem:[#allocation11 + $0x1b8] sm:$0xff] }
 0x6f3   :  { %v3636_v10 = vpop.eup %3635 }
 0x6f4   :  { %v3638_v47 = vpop.eup %3637  ;;  %v2311_v29 = vadd.f32 1.0, %v3636_v10  ;;  %3639 = vpow2.f32 %v3447_v8  ;;  %v5701_v8 = vld [vmem:[#allocation11 + $0x180] sm:$0xff]  ;;  %v5704_v10 = vld [vmem:[#allocation11 + $0x188] sm:$0xff] }
 0x6f5   :  { %v2330_v40 = vadd.f32 1.0, %v3638_v47  ;;  %v5707_v47 = vld [vmem:[#allocation11 + $0x190] sm:$0xff] }
 0x6f6   :  { %3641 = vrcp.f32 %v2311_v29  ;;  %v2323_v16 = vand.u32 2147483648, %v2311_v29  ;;  %v2321_v15 = vand.u32 2147483647, %v2311_v29  ;;  %vm2317_vm15 = vweird.f32 %v2311_v29 }
 0x6f7   :  { %3643 = vrcp.f32 %v2330_v40  ;;  %v2342_v60 = vand.u32 2147483648, %v2330_v40  ;;  %v2340_v62 = vand.u32 2147483647, %v2330_v40  ;;  %vm2336_vm0 = vweird.f32 %v2330_v40 }
 0x6f8   :  { %v2324_v50 = vor.u32 1.1754944e-38, %v2323_v16  ;;  %vm2322_vm3 = vcmp.eq.f32.partialorder %v2321_v15, 8.507059e+37  ;;  %v5752_v16 = vld [vmem:[#allocation11 + $0x108] sm:$0xff]  ;;  %v5761_v15 = vld [vmem:[#allocation11 + $0xe0] sm:$0xff] }
 0x6f9   :  { %v2343_v25 = vor.u32 1.1754944e-38, %v2342_v60  ;;  %vm2341_vm4 = vcmp.eq.f32.partialorder %v2340_v62, 8.507059e+37  ;;  %v5755_v60 = vld [vmem:[#allocation11 + $0x110] sm:$0xff] }
 0x6fa   :  { %v3640_v32 = vpop.eup %3639  ;;  %v5767_v62 = vld [vmem:[#allocation11 + $0xf0] sm:$0xff] }
 0x6fb   :  { %v2350_v20 = vadd.f32 1.0, %v3640_v32  ;;  %v5719_v32 = vld [vmem:[#allocation11 + $0x170] sm:$0xff] }
 0x6fc   :  { %v3642_v11 = vpop.eup %3641 }
 0x6fd   :  { %v3644_v56 = vpop.eup %3643  ;;  %v2313_v46 = vmul.f32 %v3642_v11, %v2311_v29  ;;  %3645 = vrcp.f32 %v2350_v20  ;;  %vm2318_vm13 = vweird.f32 %v3642_v11  ;;  %v2362_v4 = vand.u32 2147483648, %v2350_v20  ;;  %v5710_v29 = vld [vmem:[#allocation11 + $0x198] sm:$0xff] }
 0x6fe   :  { %v2332_v19 = vmul.f32 %v3644_v56, %v2330_v40  ;;  %3647 = vtanh.f32 %v2306_v34  ;;  %vm2337_vm14 = vweird.f32 %v3644_v56  ;;  %vm2319_vm1 = vmor %vm2317_vm15, %vm2318_vm13  ;;  %vm2356_vm6 = vweird.f32 %v2350_v20  ;;  %v5713_v40 = vld [vmem:[#allocation11 + $0x160] sm:$0xff]  ;;  %v5734_v34 = vld [vmem:[#allocation11 + $0x158] sm:$0xff] }
 0x6ff   :  { %v2314_v63 = vsub.f32 1.0, %v2313_v46  ;;  %vm2338_vm2 = vmor %vm2336_vm0, %vm2337_vm14  ;;  %v2360_v9 = vand.u32 2147483647, %v2350_v20  ;;  %v2363_v13 = vor.u32 1.1754944e-38, %v2362_v4  ;;  %v5740_v46 = vld [vmem:[#allocation11 + $0x128] sm:$0xff]  ;;  %v5818_v4 = vld [vmem:[#allocation11 + $0x78] sm:$0xff] }
 0x700   :  { %v2333_v26 = vsub.f32 1.0, %v2332_v19  ;;  %v5743_v19 = vld [vmem:[#allocation11 + $0x130] sm:$0xff]  ;;  %6744 = vst [vmem:[#allocation33_spill] sm:$0xff] %v5818_v4 }
 0x701   :  { %v2315_v59 = vmul.f32 %v3642_v11, %v2314_v63  ;;  %vm2361_vm8 = vcmp.eq.f32.partialorder %v2360_v9, 8.507059e+37  ;;  %v5746_v63 = vld [vmem:[#allocation11 + $0x138] sm:$0xff]  ;;  %v5821_v9 = vld [vmem:[#allocation11 + $0x40] sm:$0xff] }
 0x702   :  { %v2334_v57 = vmul.f32 %v3644_v56, %v2333_v26  ;;  %v5749_v26 = vld [vmem:[#allocation11 + $0x100] sm:$0xff]  ;;  %6745 = vst [vmem:[#allocation34_spill] sm:$0xff] %v5821_v9 }
 0x703   :  { %v3646_v45 = vpop.eup %3645  ;;  %v2316_v31 = vadd.f32 %v3642_v11, %v2315_v59  ;;  %v5758_v59 = vld [vmem:[#allocation11 + $0x118] sm:$0xff] }
 0x704   :  { %v2335_v42 = vadd.f32 %v3644_v56, %v2334_v57  ;;  %v2352_v58 = vmul.f32 %v3646_v45, %v2350_v20  ;;  %v3648_v49 = vpop.eup %3647  ;;  %vm2357_vm5 = vweird.f32 %v3646_v45  ;;  %v5728_v20 = vld [vmem:[#allocation11 + $0x148] sm:$0xff] }
 0x705   :  { %v2320_v44 = vsel %vm2319_vm1, %v3642_v11, %v2316_v31  ;;  %vm2358_vm7 = vmor %vm2356_vm6, %vm2357_vm5  ;;  %v5731_v11 = vld [vmem:[#allocation11 + $0x150] sm:$0xff]  ;;  %v5764_v57 = vld [vmem:[#allocation11 + $0xe8] sm:$0xff] }
 0x706   :  { %v2325_v1 = vsel %vm2322_vm3, %v2324_v50, %v2320_v44  ;;  %v2339_v14 = vsel %vm2338_vm2, %v3644_v56, %v2335_v42  ;;  %v2353_v17 = vsub.f32 1.0, %v2352_v58  ;;  %v5737_v56 = vld [vmem:[#allocation11 + $0x120] sm:$0xff]  ;;  %v5776_v50 = vld [vmem:[#allocation11 + $0xc8] sm:$0xff]  ;;  %v5779_v42 = vld [vmem:[#allocation11 + $0xd0] sm:$0xff] }
 0x707   :  { %v2344_v21 = vsel %vm2341_vm4, %v2343_v25, %v2339_v14  ;;  %v2367_v61 = vmul.f32 %v3648_v49, %v2325_v1  ;;  %v5773_v31 = vld [vmem:[#allocation11 + $0xc0] sm:$0xff]  ;;  %6731 = vst [vmem:[#allocation52_spill] sm:$0xff] %v5779_v42  ;;  %v5782_v58 = vld [vmem:[#allocation11 + $0xd8] sm:$0xff]  ;;  %v5788_v44 = vld [vmem:[#allocation11 + $0xa8] sm:$0xff] }
 0x708   :  { %v2366_v23 = vmul.f32 %v2344_v21, %v5586_v33  ;;  %v2354_v0 = vmul.f32 %v3646_v45, %v2353_v17  ;;  %v5665_v33 = vld [vmem:[#allocation11 + $0x1e0] sm:$0xff]  ;;  %6732 = vst [vmem:[#allocation25_spill] sm:$0xff] %v5782_v58  ;;  %v5791_v49 = vld [vmem:[#allocation11 + $0xb0] sm:$0xff]  ;;  %v5794_v1 = vld [vmem:[#allocation11 + $0xb8] sm:$0xff] }
 0x709   :  { %v5785_v25 = vld [vmem:[#allocation11 + $0xa0] sm:$0xff]  ;;  %6734 = vst [vmem:[#allocation57_spill] sm:$0xff] %v5788_v44  ;;  %v5800_v17 = vld [vmem:[#allocation11 + $0x88] sm:$0xff]  ;;  %v5803_v21 = vld [vmem:[#allocation11 + $0x90] sm:$0xff] }
 0x70a   :  { %v5662_v12 = vadd.f32 %v2367_v61, %v2366_v23  ;;  %v2355_v54 = vadd.f32 %v3646_v45, %v2354_v0  ;;  %6733 = vst [vmem:[#allocation55_spill] sm:$0xff] %v5785_v25  ;;  %v5797_v14 = vld [vmem:[#allocation11 + $0x80] sm:$0xff]  ;;  %v5806_v61 = vld [vmem:[#allocation11 + $0x98] sm:$0xff]  ;;  %v5812_v0 = vld [vmem:[#allocation11 + $0x68] sm:$0xff] }
 0x70b   :  { %6735 = vst [vmem:[#allocation56_spill] sm:$0xff] %v5791_v49  ;;  %v5809_v23 = vld [vmem:[#allocation11 + $0x60] sm:$0xff] }
 0x70c   :  { %3649 = vtanh.f32 %v5662_v12  ;;  %v2359_v24 = vsel %vm2358_vm7, %v3646_v45, %v2355_v54  ;;  %v5770_v45 = vld [vmem:[#allocation11 + $0xf8] sm:$0xff]  ;;  %6736 = vst [vmem:[#allocation24_spill] sm:$0xff] %v5794_v1  ;;  %v5815_v54 = vld [vmem:[#allocation11 + $0x70] sm:$0xff] }
 0x70d   :  { %v2364_v55 = vsel %vm2361_vm8, %v2363_v13, %v2359_v24  ;;  %6737 = vst [vmem:[#allocation58_spill] sm:$0xff] %v5797_v14  ;;  %v5824_v24 = vld [vmem:[#allocation11 + $0x48] sm:$0xff]  ;;  %v5827_v13 = vld [vmem:[#allocation11 + $0x50] sm:$0xff] }
 0x70e   :  { %6738 = vst [vmem:[#allocation59_spill] sm:$0xff] %v5800_v17 }
 0x70f   :  { %6739 = vst [vmem:[#allocation61_spill] sm:$0xff] %v5803_v21 }
 0x710   :  { %6740 = vst [vmem:[#allocation20_spill] sm:$0xff] %v5806_v61 }
 0x711   :  { %6741 = vst [vmem:[#allocation60_spill] sm:$0xff] %v5809_v23 }
 0x712   :  { %v3650_v22 = vpop.eup %3649  ;;  %6742 = vst [vmem:[#allocation19_spill] sm:$0xff] %v5812_v0 }
 0x713   :  { %v2370_v7 = vmul.f32 %v3650_v22, %v2364_v55  ;;  %6743 = vst [vmem:[#allocation22_spill] sm:$0xff] %v5815_v54  ;;  %v5830_v22 = vld [vmem:[#allocation11 + $0x58] sm:$0xff]  ;;  %v5833_v55 = vld [vmem:[#allocation11 + $0x20] sm:$0xff] }
 0x714   :  { %6746 = vst [vmem:[#allocation29_spill] sm:$0xff] %v5824_v24 }
 0x715   :  { %2395 = vmatmul.f32.vlgmr.msra.gmra.mxu0 %v2370_v7  ;;  %2415 = vmatmul.f32.vlgmr.msrb.gmra.mxu1 %v2370_v7  ;;  %6747 = vst [vmem:[#allocation18_spill] sm:$0xff] %v5827_v13 }
 0x716   :  { %2435 = vmatmul.f32.vlgmr.msrb.gmra.mxu2 %v2370_v7  ;;  %2455 = vmatmul.f32.vlgmr.msrb.gmra.mxu3 %v2370_v7  ;;  %6748 = vst [vmem:[#allocation40_spill] sm:$0xff] %v5830_v22  ;;  %v5836_v7 = vld [vmem:[#allocation11 + $0x28] sm:$0xff] }
 0x717   :  { %2689 = vmatpush.msra.mxu0 %v5665_v33  ;;  %2709 = vmatpush.msrb.mxu1 %v5668_v37  ;;  %6749 = vst [vmem:[#allocation21_spill] sm:$0xff] %v5833_v55 }
 0x718   :  { %2729 = vmatpush.msrb.mxu2 %v5671_v38  ;;  %2749 = vmatpush.msrb.mxu3 %v5674_v39  ;;  %6750 = vst [vmem:[#allocation28_spill] sm:$0xff] %v5836_v7 }
 0x719   :  { %2690 = vmatpush.msra.mxu0 %v5677_v35  ;;  %2710 = vmatpush.msrb.mxu1 %v5680_v27 }
 0x71a   :  { %2730 = vmatpush.msrb.mxu2 %v5683_v6  ;;  %2750 = vmatpush.msrb.mxu3 %v5686_v53 }
 0x71b   :  { %2691 = vmatpush.msra.mxu0 %v5689_v48  ;;  %2711 = vmatpush.msrb.mxu1 %v5692_v36 }
 0x71c   :  { %2731 = vmatpush.msrb.mxu2 %v5695_v5  ;;  %2751 = vmatpush.msrb.mxu3 %v5698_v30 }
 0x71d   :  { %2692 = vmatpush.msra.mxu0 %v5701_v8  ;;  %2712 = vmatpush.msrb.mxu1 %v5704_v10 }
 0x71e   :  { %2732 = vmatpush.msrb.mxu2 %v5707_v47  ;;  %2752 = vmatpush.msrb.mxu3 %v5710_v29 }
 0x71f   :  { %2693 = vmatpush.msra.mxu0 %v5713_v40  ;;  %2713 = vmatpush.msrb.mxu1 %v5716_v41 }
 0x720   :  { %2733 = vmatpush.msrb.mxu2 %v5719_v32  ;;  %2753 = vmatpush.msrb.mxu3 %v5722_v18 }
 0x721   :  { %2694 = vmatpush.msra.mxu0 %v5725_v2  ;;  %2714 = vmatpush.msrb.mxu1 %v5728_v20 }
 0x722   :  { %2734 = vmatpush.msrb.mxu2 %v5731_v11  ;;  %2754 = vmatpush.msrb.mxu3 %v5734_v34 }
 0x723   :  { %2695 = vmatpush.msra.mxu0 %v5737_v56  ;;  %2715 = vmatpush.msrb.mxu1 %v5740_v46 }
 0x724   :  { %2735 = vmatpush.msrb.mxu2 %v5743_v19  ;;  %2755 = vmatpush.msrb.mxu3 %v5746_v63 }
 0x725   :  { %2696 = vmatpush.msra.mxu0 %v5749_v26  ;;  %2716 = vmatpush.msrb.mxu1 %v5752_v16 }
 0x726   :  { %2736 = vmatpush.msrb.mxu2 %v5755_v60  ;;  %2756 = vmatpush.msrb.mxu3 %v5758_v59 }
 0x727   :  { %2697 = vmatpush.msra.mxu0 %v5761_v15  ;;  %2717 = vmatpush.msrb.mxu1 %v5764_v57 }
 0x728   :  { %2737 = vmatpush.msrb.mxu2 %v5767_v62  ;;  %2757 = vmatpush.msrb.mxu3 %v5770_v45 }
 0x729   :  { %2698 = vmatpush.msra.mxu0 %v5773_v31  ;;  %2718 = vmatpush.msrb.mxu1 %v5776_v50 }
 0x72a   :  { %2738 = vmatpush.msrb.mxu2 %v5779_v42  ;;  %2758 = vmatpush.msrb.mxu3 %v5782_v58 }
 0x72b   :  { %2699 = vmatpush.msra.mxu0 %v5785_v25  ;;  %2719 = vmatpush.msrb.mxu1 %v5788_v44 }
 0x72c   :  { %2739 = vmatpush.msrb.mxu2 %v5791_v49  ;;  %2759 = vmatpush.msrb.mxu3 %v5794_v1 }
 0x72d   :  { %2700 = vmatpush.msra.mxu0 %v5797_v14  ;;  %2720 = vmatpush.msrb.mxu1 %v5800_v17 }
 0x72e   :  { %2740 = vmatpush.msrb.mxu2 %v5803_v21  ;;  %2760 = vmatpush.msrb.mxu3 %v5806_v61 }
 0x72f   :  { %2701 = vmatpush.msra.mxu0 %v5809_v23  ;;  %2721 = vmatpush.msrb.mxu1 %v5812_v0 }
 0x730   :  { %2741 = vmatpush.msrb.mxu2 %v5815_v54  ;;  %2761 = vmatpush.msrb.mxu3 %v5818_v4  ;;  %v6757_v4 = vld [vmem:[#allocation42_spill] sm:$0xff] }
 0x731   :  { %2702 = vmatpush.msra.mxu0 %v5821_v9  ;;  %2722 = vmatpush.msrb.mxu1 %v5824_v24  ;;  %v5839_v9 = vld [vmem:[#allocation11 + $0x30] sm:$0xff]  ;;  %v5842_v24 = vld [vmem:[#allocation11 + $0x38] sm:$0xff] }
 0x732   :  { %2742 = vmatpush.msrb.mxu2 %v5827_v13  ;;  %2762 = vmatpush.msrb.mxu3 %v5830_v22  ;;  %6751 = vst [vmem:[#allocation37_spill] sm:$0xff] %v5839_v9  ;;  %v5845_v13 = vld [vmem:[#allocation11] sm:$0xff]  ;;  %v5848_v22 = vld [vmem:[#allocation11 + $0x8] sm:$0xff] }
 0x733   :  { %2703 = vmatpush.msra.mxu0 %v5833_v55  ;;  %2723 = vmatpush.msrb.mxu1 %v5836_v7  ;;  %6752 = vst [vmem:[#allocation35_spill] sm:$0xff] %v5842_v24  ;;  %v5852_v55 = vld [vmem:[#allocation11 + $0x18] sm:$0xff] }
 0x734   :  { %2743 = vmatpush.msrb.mxu2 %v5839_v9  ;;  %2763 = vmatpush.msrb.mxu3 %v5842_v24  ;;  %6753 = vst [vmem:[#allocation36_spill] sm:$0xff] %v5845_v13  ;;  %v6756_v9 = vld [vmem:[#allocation43_spill] sm:$0xff]  ;;  %v1930_v24 = vadd.f32 %v6757_v4, %v6725_v28 }
 0x735   :  { %2704 = vmatpush.msra.mxu0 %v5845_v13  ;;  %6754 = vst [vmem:[#allocation23_spill] sm:$0xff] %v5848_v22  ;;  %2724 = vmatpush.msrb.mxu1 %v5848_v22  ;;  %v1889_v7 = vadd.f32 %v6756_v9, %v6723_v52  ;;  %v6758_v22 = vld [vmem:[#allocation47_spill] sm:$0xff] }
 0x736   :  { %2744 = vmatpush.msrb.mxu2 %v6721_v51  ;;  %6755 = vst [vmem:[#allocation32_spill] sm:$0xff] %v5852_v55  ;;  %2764 = vmatpush.msrb.mxu3 %v5852_v55  ;;  %v2012_v51 = vadd.f32 %v6758_v22, %v6727_v43 }
 0x792   :  { %v2396_v54 = vpop.f32.mrf.mxu0  ;;  %v2416_v0 = vpop.f32.mrf.mxu1 }
 0x793   :  { %v2459_v23 = vadd.f32 %v2396_v54, %v1889_v7  ;;  %v2460_v13 = vadd.f32 %v2416_v0, %v1930_v24 }
 0x795   :  { %v3448_v61 = vmul.f32 -1.442695, %v2459_v23  ;;  %v3449_v21 = vmul.f32 -1.442695, %v2460_v13  ;;  %v6759_v23 = vld [vmem:[#allocation69_spill] sm:$0xff] }
 0x796   :  { %v1971_v0 = vadd.f32 %v6759_v23, %v6729_v3 }
 0x797   :  { %3651 = vpow2.f32 %v3448_v61 }
 0x798   :  { %3653 = vpow2.f32 %v3449_v21 }
 0x799   :  { %v2456_v17 = vpop.f32.mrf.mxu3  ;;  %v2436_v4 = vpop.f32.mrf.mxu2 }
 0x79a   :  { %v2462_v14 = vadd.f32 %v2456_v17, %v2012_v51  ;;  %v2461_v13 = vadd.f32 %v2436_v4, %v1971_v0 }
 0x79c   :  { %v3450_v55 = vmul.f32 -1.442695, %v2462_v14 }
 0x79d   :  { %v3652_v1 = vpop.eup %3651 }
 0x79e   :  { %v3654_v49 = vpop.eup %3653  ;;  %v2466_v9 = vadd.f32 1.0, %v3652_v1  ;;  %3655 = vpow2.f32 %v3450_v55 }
 0x79f   :  { %v2485_v52 = vadd.f32 1.0, %v3654_v49 }
 0x7a0   :  { %3657 = vrcp.f32 %v2466_v9  ;;  %v2478_v51 = vand.u32 2147483648, %v2466_v9  ;;  %v2476_v55 = vand.u32 2147483647, %v2466_v9  ;;  %vm2472_vm11 = vweird.f32 %v2466_v9 }
 0x7a1   :  { %3659 = vrcp.f32 %v2485_v52  ;;  %v2497_v1 = vand.u32 2147483648, %v2485_v52  ;;  %v2495_v28 = vand.u32 2147483647, %v2485_v52  ;;  %vm2491_vm12 = vweird.f32 %v2485_v52 }
 0x7a2   :  { %v2479_v4 = vor.u32 1.1754944e-38, %v2478_v51  ;;  %vm2477_vm15 = vcmp.eq.f32.partialorder %v2476_v55, 8.507059e+37 }
 0x7a3   :  { %vm2496_vm0 = vcmp.eq.f32.partialorder %v2495_v28, 8.507059e+37 }
 0x7a4   :  { %v3656_v54 = vpop.eup %3655 }
 0x7a5   :  { %v2505_v61 = vadd.f32 1.0, %v3656_v54 }
 0x7a6   :  { %v3658_v24 = vpop.eup %3657 }
 0x7a7   :  { %v3660_v22 = vpop.eup %3659  ;;  %v2468_v21 = vmul.f32 %v3658_v24, %v2466_v9  ;;  %3661 = vrcp.f32 %v2505_v61  ;;  %vm2473_vm9 = vweird.f32 %v3658_v24  ;;  %vm2511_vm2 = vweird.f32 %v2505_v61 }
 0x7a8   :  { %v2487_v17 = vmul.f32 %v3660_v22, %v2485_v52  ;;  %3663 = vtanh.f32 %v2461_v13  ;;  %vm2492_vm10 = vweird.f32 %v3660_v22  ;;  %vm2474_vm13 = vmor %vm2472_vm11, %vm2473_vm9 }
 0x7a9   :  { %v2469_v14 = vsub.f32 1.0, %v2468_v21  ;;  %vm2493_vm14 = vmor %vm2491_vm12, %vm2492_vm10  ;;  %v2498_v21 = vor.u32 1.1754944e-38, %v2497_v1 }
 0x7aa   :  { %v2488_v7 = vsub.f32 1.0, %v2487_v17 }
 0x7ab   :  { %v2470_v49 = vmul.f32 %v3658_v24, %v2469_v14 }
 0x7ac   :  { %v2489_v43 = vmul.f32 %v3660_v22, %v2488_v7 }
 0x7ad   :  { %v3662_v44 = vpop.eup %3661  ;;  %v2471_v23 = vadd.f32 %v3658_v24, %v2470_v49 }
 0x7ae   :  { %v2490_v54 = vadd.f32 %v3660_v22, %v2489_v43  ;;  %v2507_v0 = vmul.f32 %v3662_v44, %v2505_v61  ;;  %v3664_v13 = vpop.eup %3663  ;;  %vm2512_vm1 = vweird.f32 %v3662_v44  ;;  %v2517_v43 = vand.u32 2147483648, %v2505_v61 }
 0x7af   :  { %v2475_v17 = vsel %vm2474_vm13, %v3658_v24, %v2471_v23  ;;  %v2515_v24 = vand.u32 2147483647, %v2505_v61  ;;  %vm2513_vm3 = vmor %vm2511_vm2, %vm2512_vm1  ;;  %v6766_v61 = vld [vmem:[#allocation58_spill] sm:$0xff]  ;;  %v6767_v23 = vld [vmem:[#allocation59_spill] sm:$0xff] }
 0x7b0   :  { %v2480_v3 = vsel %vm2477_vm15, %v2479_v4, %v2475_v17  ;;  %v2494_v14 = vsel %vm2493_vm14, %v3660_v22, %v2490_v54  ;;  %v2508_v25 = vsub.f32 1.0, %v2507_v0  ;;  %v2518_v1 = vor.u32 1.1754944e-38, %v2517_v43  ;;  %v6768_v4 = vld [vmem:[#allocation61_spill] sm:$0xff]  ;;  %v6769_v54 = vld [vmem:[#allocation20_spill] sm:$0xff]  ;;  %v6772_v17 = vld [vmem:[#allocation22_spill] sm:$0xff] }
 0x7b1   :  { %v2499_v7 = vsel %vm2496_vm0, %v2498_v21, %v2494_v14  ;;  %v2522_v58 = vmul.f32 %v3664_v13, %v2480_v3  ;;  %vm2516_vm4 = vcmp.eq.f32.partialorder %v2515_v24, 8.507059e+37  ;;  %v6760_v3 = vld [vmem:[#allocation52_spill] sm:$0xff]  ;;  %v6771_v21 = vld [vmem:[#allocation19_spill] sm:$0xff]  ;;  %v6773_v13 = vld [vmem:[#allocation33_spill] sm:$0xff] }
 0x7b2   :  { %v2521_v42 = vmul.f32 %v2499_v7, %v5662_v12  ;;  %v2509_v49 = vmul.f32 %v3662_v44, %v2508_v25  ;;  %v6761_v12 = vld [vmem:[#allocation25_spill] sm:$0xff]  ;;  %v6764_v25 = vld [vmem:[#allocation56_spill] sm:$0xff]  ;;  %v6774_v14 = vld [vmem:[#allocation34_spill] sm:$0xff] }
 0x7b3   :  { %v6770_v0 = vld [vmem:[#allocation60_spill] sm:$0xff]  ;;  %v6775_v7 = vld [vmem:[#allocation29_spill] sm:$0xff] }
 0x7b4   :  { %v5864_v9 = vadd.f32 %v2522_v58, %v2521_v42  ;;  %v2510_v52 = vadd.f32 %v3662_v44, %v2509_v49  ;;  %v6762_v42 = vld [vmem:[#allocation55_spill] sm:$0xff]  ;;  %v6763_v58 = vld [vmem:[#allocation57_spill] sm:$0xff]  ;;  %v6776_v49 = vld [vmem:[#allocation18_spill] sm:$0xff] }
 0x7b5   :  { %v6778_v43 = vld [vmem:[#allocation21_spill] sm:$0xff]  ;;  %v6779_v24 = vld [vmem:[#allocation28_spill] sm:$0xff] }
 0x7b6   :  { %3665 = vtanh.f32 %v5864_v9  ;;  %v2514_v51 = vsel %vm2513_vm3, %v3662_v44, %v2510_v52  ;;  %v6765_v44 = vld [vmem:[#allocation24_spill] sm:$0xff] }
 0x7b7   :  { %v2519_v22 = vsel %vm2516_vm4, %v2518_v1, %v2514_v51  ;;  %v6777_v52 = vld [vmem:[#allocation40_spill] sm:$0xff]  ;;  %v6780_v51 = vld [vmem:[#allocation37_spill] sm:$0xff]  ;;  %v6781_v1 = vld [vmem:[#allocation35_spill] sm:$0xff] }
 0x7bc   :  { %v3666_v28 = vpop.eup %3665 }
 0x7bd   :  { %v2525_v55 = vmul.f32 %v3666_v28, %v2519_v22  ;;  %v6782_v28 = vld [vmem:[#allocation36_spill] sm:$0xff]  ;;  %v6783_v22 = vld [vmem:[#allocation23_spill] sm:$0xff] }
 0x7bf   :  { %2550 = vmatmul.f32.vlgmr.msrb.gmra.mxu0 %v2525_v55  ;;  %2570 = vmatmul.f32.vlgmr.msra.gmra.mxu1 %v2525_v55 }
 0x7c0   :  { %2590 = vmatmul.f32.vlgmr.msra.gmra.mxu2 %v2525_v55  ;;  %2610 = vmatmul.f32.vlgmr.msra.gmra.mxu3 %v2525_v55  ;;  %v5929_v55 = vld [vmem:[#allocation11 + $0x10] sm:$0xff] }
 0x7c1   :  { %2844 = vmatpush.msrb.mxu0 %v5665_v33  ;;  %2864 = vmatpush.msra.mxu1 %v5668_v37  ;;  %6784 = vst [vmem:[#allocation41_spill] sm:$0xff] %v5929_v55 }
 0x7c2   :  { %2884 = vmatpush.msra.mxu2 %v5671_v38  ;;  %2904 = vmatpush.msra.mxu3 %v5674_v39 }
 0x7c3   :  { %2845 = vmatpush.msrb.mxu0 %v5677_v35  ;;  %2865 = vmatpush.msra.mxu1 %v5680_v27 }
 0x7c4   :  { %2885 = vmatpush.msra.mxu2 %v5683_v6  ;;  %2905 = vmatpush.msra.mxu3 %v5686_v53 }
 0x7c5   :  { %2846 = vmatpush.msrb.mxu0 %v5689_v48  ;;  %2866 = vmatpush.msra.mxu1 %v5692_v36 }
 0x7c6   :  { %2886 = vmatpush.msra.mxu2 %v5695_v5  ;;  %2906 = vmatpush.msra.mxu3 %v5698_v30 }
 0x7c7   :  { %2847 = vmatpush.msrb.mxu0 %v5701_v8  ;;  %2867 = vmatpush.msra.mxu1 %v5704_v10 }
 0x7c8   :  { %2887 = vmatpush.msra.mxu2 %v5707_v47  ;;  %2907 = vmatpush.msra.mxu3 %v5710_v29 }
 0x7c9   :  { %2848 = vmatpush.msrb.mxu0 %v5713_v40  ;;  %2868 = vmatpush.msra.mxu1 %v5716_v41 }
 0x7ca   :  { %2888 = vmatpush.msra.mxu2 %v5719_v32  ;;  %2908 = vmatpush.msra.mxu3 %v5722_v18 }
 0x7cb   :  { %2849 = vmatpush.msrb.mxu0 %v5725_v2  ;;  %2869 = vmatpush.msra.mxu1 %v5728_v20 }
 0x7cc   :  { %2889 = vmatpush.msra.mxu2 %v5731_v11  ;;  %2909 = vmatpush.msra.mxu3 %v5734_v34 }
 0x7cd   :  { %2850 = vmatpush.msrb.mxu0 %v5737_v56  ;;  %2870 = vmatpush.msra.mxu1 %v5740_v46 }
 0x7ce   :  { %2890 = vmatpush.msra.mxu2 %v5743_v19  ;;  %2910 = vmatpush.msra.mxu3 %v5746_v63 }
 0x7cf   :  { %2851 = vmatpush.msrb.mxu0 %v5749_v26  ;;  %2871 = vmatpush.msra.mxu1 %v5752_v16 }
 0x7d0   :  { %2891 = vmatpush.msra.mxu2 %v5755_v60  ;;  %2911 = vmatpush.msra.mxu3 %v5758_v59 }
 0x7d1   :  { %2852 = vmatpush.msrb.mxu0 %v5761_v15  ;;  %2872 = vmatpush.msra.mxu1 %v5764_v57 }
 0x7d2   :  { %2892 = vmatpush.msra.mxu2 %v5767_v62  ;;  %2912 = vmatpush.msra.mxu3 %v5770_v45 }
 0x7d3   :  { %2853 = vmatpush.msrb.mxu0 %v5773_v31  ;;  %2873 = vmatpush.msra.mxu1 %v5776_v50 }
 0x7d4   :  { %2893 = vmatpush.msra.mxu2 %v6760_v3  ;;  %2913 = vmatpush.msra.mxu3 %v6761_v12 }
 0x7d5   :  { %2854 = vmatpush.msrb.mxu0 %v6762_v42  ;;  %2874 = vmatpush.msra.mxu1 %v6763_v58 }
 0x7d6   :  { %2894 = vmatpush.msra.mxu2 %v6764_v25  ;;  %2914 = vmatpush.msra.mxu3 %v6765_v44 }
 0x7d7   :  { %2855 = vmatpush.msrb.mxu0 %v6766_v61  ;;  %2875 = vmatpush.msra.mxu1 %v6767_v23 }
 0x7d8   :  { %2895 = vmatpush.msra.mxu2 %v6768_v4  ;;  %2915 = vmatpush.msra.mxu3 %v6769_v54  ;;  %v6791_v54 = vld [vmem:[#allocation62_spill] sm:$0xff] }
 0x7d9   :  { %2856 = vmatpush.msrb.mxu0 %v6770_v0  ;;  %2876 = vmatpush.msra.mxu1 %v6771_v21 }
 0x7da   :  { %2896 = vmatpush.msra.mxu2 %v6772_v17  ;;  %2916 = vmatpush.msra.mxu3 %v6773_v13  ;;  %v6789_v13 = vld [vmem:[#allocation17_spill] sm:$0xff] }
 0x7db   :  { %2857 = vmatpush.msrb.mxu0 %v6774_v14  ;;  %2877 = vmatpush.msra.mxu1 %v6775_v7  ;;  %v6785_v7 = vld [vmem:[#allocation32_spill] sm:$0xff] }
 0x7dc   :  { %2897 = vmatpush.msra.mxu2 %v6776_v49  ;;  %2917 = vmatpush.msra.mxu3 %v6777_v52  ;;  %v6786_v49 = vld [vmem:[#allocation71_spill] sm:$0xff] }
 0x7dd   :  { %2858 = vmatpush.msrb.mxu0 %v6778_v43  ;;  %2878 = vmatpush.msra.mxu1 %v6779_v24  ;;  %v6787_v52 = vld [vmem:[#allocation63_spill] sm:$0xff]  ;;  %v6788_v43 = vld [vmem:[#allocation73_spill] sm:$0xff] }
 0x7de   :  { %2898 = vmatpush.msra.mxu2 %v6780_v51  ;;  %2918 = vmatpush.msra.mxu3 %v6781_v1  ;;  %v1892_v14 = vadd.f32 %v6787_v52, %v6786_v49  ;;  %v1933_v24 = vadd.f32 %v6789_v13, %v6788_v43 }
 0x7df   :  { %2859 = vmatpush.msrb.mxu0 %v6782_v28  ;;  %2879 = vmatpush.msra.mxu1 %v6783_v22  ;;  %v6790_v22 = vld [vmem:[#allocation54_spill] sm:$0xff] }
 0x7e0   :  { %2899 = vmatpush.msra.mxu2 %v5929_v55  ;;  %2919 = vmatpush.msra.mxu3 %v6785_v7  ;;  %v2015_v4 = vadd.f32 %v6791_v54, %v6790_v22 }
 0x83c   :  { %v2551_v17 = vpop.f32.mrf.mxu0  ;;  %v2571_v51 = vpop.f32.mrf.mxu1 }
 0x83d   :  { %v2614_v21 = vadd.f32 %v2551_v17, %v1892_v14  ;;  %v2615_v1 = vadd.f32 %v2571_v51, %v1933_v24  ;;  %v6792_v14 = vld [vmem:[#allocation53_spill] sm:$0xff] }
 0x83f   :  { %v3451_v0 = vmul.f32 -1.442695, %v2614_v21  ;;  %v3452_v28 = vmul.f32 -1.442695, %v2615_v1  ;;  %v6793_v21 = vld [vmem:[#allocation74_spill] sm:$0xff] }
 0x840   :  { %v1974_v24 = vadd.f32 %v6793_v21, %v6792_v14 }
 0x841   :  { %3667 = vpow2.f32 %v3451_v0 }
 0x842   :  { %3669 = vpow2.f32 %v3452_v28 }
 0x843   :  { %v2611_v55 = vpop.f32.mrf.mxu3  ;;  %v2591_v13 = vpop.f32.mrf.mxu2 }
 0x844   :  { %v2617_v23 = vadd.f32 %v2611_v55, %v2015_v4  ;;  %v2616_v1 = vadd.f32 %v2591_v13, %v1974_v24 }
 0x846   :  { %v3453_v7 = vmul.f32 -1.442695, %v2617_v23 }
 0x847   :  { %v3668_v61 = vpop.eup %3667 }
 0x848   :  { %v3670_v44 = vpop.eup %3669  ;;  %v2621_v52 = vadd.f32 1.0, %v3668_v61  ;;  %3671 = vpow2.f32 %v3453_v7 }
 0x849   :  { %v2640_v49 = vadd.f32 1.0, %v3670_v44 }
 0x84a   :  { %3673 = vrcp.f32 %v2621_v52  ;;  %v2633_v22 = vand.u32 2147483648, %v2621_v52  ;;  %v2631_v7 = vand.u32 2147483647, %v2621_v52  ;;  %vm2627_vm7 = vweird.f32 %v2621_v52 }
 0x84b   :  { %3675 = vrcp.f32 %v2640_v49  ;;  %v2652_v61 = vand.u32 2147483648, %v2640_v49  ;;  %v2650_v25 = vand.u32 2147483647, %v2640_v49  ;;  %vm2646_vm8 = vweird.f32 %v2640_v49 }
 0x84c   :  { %v2634_v13 = vor.u32 1.1754944e-38, %v2633_v22  ;;  %vm2632_vm11 = vcmp.eq.f32.partialorder %v2631_v7, 8.507059e+37 }
 0x84d   :  { %vm2651_vm12 = vcmp.eq.f32.partialorder %v2650_v25, 8.507059e+37 }
 0x84e   :  { %v3672_v17 = vpop.eup %3671 }
 0x84f   :  { %v2660_v0 = vadd.f32 1.0, %v3672_v17 }
 0x850   :  { %v3674_v51 = vpop.eup %3673 }
 0x851   :  { %v3676_v54 = vpop.eup %3675  ;;  %v2623_v28 = vmul.f32 %v3674_v51, %v2621_v52  ;;  %3677 = vrcp.f32 %v2660_v0  ;;  %vm2628_vm5 = vweird.f32 %v3674_v51  ;;  %vm2666_vm14 = vweird.f32 %v2660_v0 }
 0x852   :  { %v2642_v4 = vmul.f32 %v3676_v54, %v2640_v49  ;;  %3679 = vtanh.f32 %v2616_v1  ;;  %vm2647_vm6 = vweird.f32 %v3676_v54  ;;  %vm2629_vm9 = vmor %vm2627_vm7, %vm2628_vm5  ;;  %v2670_v22 = vand.u32 2147483647, %v2660_v0 }
 0x853   :  { %v2624_v23 = vsub.f32 1.0, %v2623_v28  ;;  %vm2648_vm10 = vmor %vm2646_vm8, %vm2647_vm6  ;;  %v2653_v28 = vor.u32 1.1754944e-38, %v2652_v61 }
 0x854   :  { %v2643_v55 = vsub.f32 1.0, %v2642_v4  ;;  %vm2671_vm0 = vcmp.eq.f32.partialorder %v2670_v22, 8.507059e+37  ;;  %v6813_v22 = vld [vmem:[#allocation28_spill] sm:$0xff] }
 0x855   :  { %v2625_v44 = vmul.f32 %v3674_v51, %v2624_v23 }
 0x856   :  { %v2644_v43 = vmul.f32 %v3676_v54, %v2643_v55 }
 0x857   :  { %v3678_v58 = vpop.eup %3677  ;;  %v2626_v21 = vadd.f32 %v3674_v51, %v2625_v44 }
 0x858   :  { %v2645_v17 = vadd.f32 %v3676_v54, %v2644_v43  ;;  %v2662_v24 = vmul.f32 %v3678_v58, %v2660_v0  ;;  %v3680_v1 = vpop.eup %3679  ;;  %vm2667_vm13 = vweird.f32 %v3678_v58  ;;  %v2672_v43 = vand.u32 2147483648, %v2660_v0  ;;  %v6800_v0 = vld [vmem:[#allocation58_spill] sm:$0xff] }
 0x859   :  { %v2630_v4 = vsel %vm2629_vm9, %v3674_v51, %v2626_v21  ;;  %vm2668_vm15 = vmor %vm2666_vm14, %vm2667_vm13  ;;  %v6801_v21 = vld [vmem:[#allocation59_spill] sm:$0xff] }
 0x85a   :  { %v2635_v14 = vsel %vm2632_vm11, %v2634_v13, %v2630_v4  ;;  %v2649_v23 = vsel %vm2648_vm10, %v3676_v54, %v2645_v17  ;;  %v2663_v42 = vsub.f32 1.0, %v2662_v24  ;;  %v2673_v61 = vor.u32 1.1754944e-38, %v2672_v43  ;;  %v6802_v13 = vld [vmem:[#allocation61_spill] sm:$0xff]  ;;  %v6803_v17 = vld [vmem:[#allocation20_spill] sm:$0xff]  ;;  %v6806_v4 = vld [vmem:[#allocation22_spill] sm:$0xff] }
 0x85b   :  { %v2654_v55 = vsel %vm2651_vm12, %v2653_v28, %v2649_v23  ;;  %v2677_v12 = vmul.f32 %v3680_v1, %v2635_v14  ;;  %v6799_v14 = vld [vmem:[#allocation24_spill] sm:$0xff]  ;;  %v6805_v28 = vld [vmem:[#allocation19_spill] sm:$0xff]  ;;  %v6807_v1 = vld [vmem:[#allocation33_spill] sm:$0xff] }
 0x85c   :  { %v2676_v3 = vmul.f32 %v2654_v55, %v5864_v9  ;;  %v2664_v44 = vmul.f32 %v3678_v58, %v2663_v42  ;;  %v6794_v9 = vld [vmem:[#allocation52_spill] sm:$0xff]  ;;  %v6797_v42 = vld [vmem:[#allocation57_spill] sm:$0xff]  ;;  %v6808_v23 = vld [vmem:[#allocation34_spill] sm:$0xff] }
 0x85d   :  { %v6804_v24 = vld [vmem:[#allocation60_spill] sm:$0xff]  ;;  %v6809_v55 = vld [vmem:[#allocation29_spill] sm:$0xff] }
 0x85e   :  { %v5942_v52 = vadd.f32 %v2677_v12, %v2676_v3  ;;  %v2665_v49 = vadd.f32 %v3678_v58, %v2664_v44  ;;  %v6795_v3 = vld [vmem:[#allocation25_spill] sm:$0xff]  ;;  %v6796_v12 = vld [vmem:[#allocation55_spill] sm:$0xff]  ;;  %v6810_v44 = vld [vmem:[#allocation18_spill] sm:$0xff] }
 0x85f   :  { %v6812_v43 = vld [vmem:[#allocation21_spill] sm:$0xff] }
 0x860   :  { %3681 = vtanh.f32 %v5942_v52  ;;  %v2669_v51 = vsel %vm2668_vm15, %v3678_v58, %v2665_v49  ;;  %v6798_v58 = vld [vmem:[#allocation56_spill] sm:$0xff] }
 0x861   :  { %v2674_v54 = vsel %vm2671_vm0, %v2673_v61, %v2669_v51  ;;  %v6811_v49 = vld [vmem:[#allocation40_spill] sm:$0xff]  ;;  %v6814_v51 = vld [vmem:[#allocation37_spill] sm:$0xff]  ;;  %v6815_v61 = vld [vmem:[#allocation35_spill] sm:$0xff] }
 0x866   :  { %v3682_v25 = vpop.eup %3681 }
 0x867   :  { %v2680_v7 = vmul.f32 %v3682_v25, %v2674_v54  ;;  %v6816_v25 = vld [vmem:[#allocation36_spill] sm:$0xff]  ;;  %v6817_v54 = vld [vmem:[#allocation23_spill] sm:$0xff] }
 0x869   :  { %2705 = vmatmul.f32.vlgmr.msra.gmra.mxu0 %v2680_v7  ;;  %2725 = vmatmul.f32.vlgmr.msrb.gmra.mxu1 %v2680_v7 }
 0x86a   :  { %2745 = vmatmul.f32.vlgmr.msrb.gmra.mxu2 %v2680_v7  ;;  %2765 = vmatmul.f32.vlgmr.msrb.gmra.mxu3 %v2680_v7  ;;  %v6818_v7 = vld [vmem:[#allocation41_spill] sm:$0xff] }
 0x86b   :  { %2999 = vmatpush.msra.mxu0 %v5665_v33  ;;  %3019 = vmatpush.msrb.mxu1 %v5668_v37 }
 0x86c   :  { %3039 = vmatpush.msrb.mxu2 %v5671_v38  ;;  %3059 = vmatpush.msrb.mxu3 %v5674_v39 }
 0x86d   :  { %3000 = vmatpush.msra.mxu0 %v5677_v35  ;;  %3020 = vmatpush.msrb.mxu1 %v5680_v27 }
 0x86e   :  { %3040 = vmatpush.msrb.mxu2 %v5683_v6  ;;  %3060 = vmatpush.msrb.mxu3 %v5686_v53 }
 0x86f   :  { %3001 = vmatpush.msra.mxu0 %v5689_v48  ;;  %3021 = vmatpush.msrb.mxu1 %v5692_v36 }
 0x870   :  { %3041 = vmatpush.msrb.mxu2 %v5695_v5  ;;  %3061 = vmatpush.msrb.mxu3 %v5698_v30 }
 0x871   :  { %3002 = vmatpush.msra.mxu0 %v5701_v8  ;;  %3022 = vmatpush.msrb.mxu1 %v5704_v10 }
 0x872   :  { %3042 = vmatpush.msrb.mxu2 %v5707_v47  ;;  %3062 = vmatpush.msrb.mxu3 %v5710_v29 }
 0x873   :  { %3003 = vmatpush.msra.mxu0 %v5713_v40  ;;  %3023 = vmatpush.msrb.mxu1 %v5716_v41 }
 0x874   :  { %3043 = vmatpush.msrb.mxu2 %v5719_v32  ;;  %3063 = vmatpush.msrb.mxu3 %v5722_v18 }
 0x875   :  { %3004 = vmatpush.msra.mxu0 %v5725_v2  ;;  %3024 = vmatpush.msrb.mxu1 %v5728_v20 }
 0x876   :  { %3044 = vmatpush.msrb.mxu2 %v5731_v11  ;;  %3064 = vmatpush.msrb.mxu3 %v5734_v34 }
 0x877   :  { %3005 = vmatpush.msra.mxu0 %v5737_v56  ;;  %3025 = vmatpush.msrb.mxu1 %v5740_v46 }
 0x878   :  { %3045 = vmatpush.msrb.mxu2 %v5743_v19  ;;  %3065 = vmatpush.msrb.mxu3 %v5746_v63 }
 0x879   :  { %3006 = vmatpush.msra.mxu0 %v5749_v26  ;;  %3026 = vmatpush.msrb.mxu1 %v5752_v16 }
 0x87a   :  { %3046 = vmatpush.msrb.mxu2 %v5755_v60  ;;  %3066 = vmatpush.msrb.mxu3 %v5758_v59 }
 0x87b   :  { %3007 = vmatpush.msra.mxu0 %v5761_v15  ;;  %3027 = vmatpush.msrb.mxu1 %v5764_v57 }
 0x87c   :  { %3047 = vmatpush.msrb.mxu2 %v5767_v62  ;;  %3067 = vmatpush.msrb.mxu3 %v5770_v45 }
 0x87d   :  { %3008 = vmatpush.msra.mxu0 %v5773_v31  ;;  %3028 = vmatpush.msrb.mxu1 %v5776_v50 }
 0x87e   :  { %3048 = vmatpush.msrb.mxu2 %v6794_v9  ;;  %3068 = vmatpush.msrb.mxu3 %v6795_v3 }
 0x87f   :  { %3009 = vmatpush.msra.mxu0 %v6796_v12  ;;  %3029 = vmatpush.msrb.mxu1 %v6797_v42 }
 0x880   :  { %3049 = vmatpush.msrb.mxu2 %v6798_v58  ;;  %3069 = vmatpush.msrb.mxu3 %v6799_v14 }
 0x881   :  { %3010 = vmatpush.msra.mxu0 %v6800_v0  ;;  %3030 = vmatpush.msrb.mxu1 %v6801_v21 }
 0x882   :  { %3050 = vmatpush.msrb.mxu2 %v6802_v13  ;;  %3070 = vmatpush.msrb.mxu3 %v6803_v17  ;;  %v6825_v13 = vld [vmem:[#allocation66_spill] sm:$0xff] }
 0x883   :  { %3011 = vmatpush.msra.mxu0 %v6804_v24  ;;  %3031 = vmatpush.msrb.mxu1 %v6805_v28 }
 0x884   :  { %3051 = vmatpush.msrb.mxu2 %v6806_v4  ;;  %3071 = vmatpush.msrb.mxu3 %v6807_v1  ;;  %v6823_v4 = vld [vmem:[#allocation64_spill] sm:$0xff] }
 0x885   :  { %3012 = vmatpush.msra.mxu0 %v6808_v23  ;;  %3032 = vmatpush.msrb.mxu1 %v6809_v55  ;;  %v6819_v23 = vld [vmem:[#allocation32_spill] sm:$0xff]  ;;  %v6820_v55 = vld [vmem:[#allocation71_spill] sm:$0xff] }
 0x886   :  { %3052 = vmatpush.msrb.mxu2 %v6810_v44  ;;  %3072 = vmatpush.msrb.mxu3 %v6811_v49  ;;  %v6821_v44 = vld [vmem:[#allocation72_spill] sm:$0xff]  ;;  %v6822_v49 = vld [vmem:[#allocation73_spill] sm:$0xff] }
 0x887   :  { %3013 = vmatpush.msra.mxu0 %v6812_v43  ;;  %3033 = vmatpush.msrb.mxu1 %v6813_v22  ;;  %v1895_v1 = vadd.f32 %v6821_v44, %v6820_v55  ;;  %v1936_v43 = vadd.f32 %v6823_v4, %v6822_v49 }
 0x888   :  { %3053 = vmatpush.msrb.mxu2 %v6814_v51  ;;  %3073 = vmatpush.msrb.mxu3 %v6815_v61 }
 0x889   :  { %3014 = vmatpush.msra.mxu0 %v6816_v25  ;;  %3034 = vmatpush.msrb.mxu1 %v6817_v54  ;;  %v6824_v25 = vld [vmem:[#allocation54_spill] sm:$0xff] }
 0x88a   :  { %3054 = vmatpush.msrb.mxu2 %v6818_v7  ;;  %3074 = vmatpush.msrb.mxu3 %v6819_v23  ;;  %v2018_v54 = vadd.f32 %v6825_v13, %v6824_v25 }
 0x8e6   :  { %v2706_v28 = vpop.f32.mrf.mxu0  ;;  %v2726_v22 = vpop.f32.mrf.mxu1 }
 0x8e7   :  { %v2769_v24 = vadd.f32 %v2706_v28, %v1895_v1  ;;  %v2770_v51 = vadd.f32 %v2726_v22, %v1936_v43  ;;  %v6826_v1 = vld [vmem:[#allocation53_spill] sm:$0xff] }
 0x8e9   :  { %v3454_v17 = vmul.f32 -1.442695, %v2769_v24  ;;  %v3455_v61 = vmul.f32 -1.442695, %v2770_v51  ;;  %v6827_v24 = vld [vmem:[#allocation67_spill] sm:$0xff] }
 0x8ea   :  { %v1977_v43 = vadd.f32 %v6827_v24, %v6826_v1 }
 0x8eb   :  { %3683 = vpow2.f32 %v3454_v17 }
 0x8ec   :  { %3685 = vpow2.f32 %v3455_v61 }
 0x8ed   :  { %v2766_v7 = vpop.f32.mrf.mxu3  ;;  %v2746_v4 = vpop.f32.mrf.mxu2 }
 0x8ee   :  { %v2772_v21 = vadd.f32 %v2766_v7, %v2018_v54  ;;  %v2771_v51 = vadd.f32 %v2746_v4, %v1977_v43 }
 0x8f0   :  { %v3456_v23 = vmul.f32 -1.442695, %v2772_v21 }
 0x8f1   :  { %v3684_v0 = vpop.eup %3683 }
 0x8f2   :  { %v3686_v14 = vpop.eup %3685  ;;  %v2776_v44 = vadd.f32 1.0, %v3684_v0  ;;  %3687 = vpow2.f32 %v3456_v23 }
 0x8f3   :  { %v2795_v55 = vadd.f32 1.0, %v3686_v14 }
 0x8f4   :  { %3689 = vrcp.f32 %v2776_v44  ;;  %v2788_v25 = vand.u32 2147483648, %v2776_v44  ;;  %v2786_v23 = vand.u32 2147483647, %v2776_v44  ;;  %vm2782_vm3 = vweird.f32 %v2776_v44 }
 0x8f5   :  { %3691 = vrcp.f32 %v2795_v55  ;;  %v2807_v0 = vand.u32 2147483648, %v2795_v55  ;;  %v2805_v58 = vand.u32 2147483647, %v2795_v55  ;;  %vm2801_vm4 = vweird.f32 %v2795_v55 }
 0x8f6   :  { %v2789_v4 = vor.u32 1.1754944e-38, %v2788_v25  ;;  %vm2787_vm7 = vcmp.eq.f32.partialorder %v2786_v23, 8.507059e+37 }
 0x8f7   :  { %vm2806_vm8 = vcmp.eq.f32.partialorder %v2805_v58, 8.507059e+37 }
 0x8f8   :  { %v3688_v28 = vpop.eup %3687 }
 0x8f9   :  { %v2815_v17 = vadd.f32 1.0, %v3688_v28 }
 0x8fa   :  { %v3690_v22 = vpop.eup %3689 }
 0x8fb   :  { %v3692_v13 = vpop.eup %3691  ;;  %v2778_v61 = vmul.f32 %v3690_v22, %v2776_v44  ;;  %3693 = vrcp.f32 %v2815_v17  ;;  %vm2783_vm1 = vweird.f32 %v3690_v22  ;;  %vm2821_vm10 = vweird.f32 %v2815_v17 }
 0x8fc   :  { %v2797_v54 = vmul.f32 %v3692_v13, %v2795_v55  ;;  %3695 = vtanh.f32 %v2771_v51  ;;  %vm2802_vm2 = vweird.f32 %v3692_v13  ;;  %vm2784_vm5 = vmor %vm2782_vm3, %vm2783_vm1  ;;  %v2825_v25 = vand.u32 2147483647, %v2815_v17 }
 0x8fd   :  { %v2779_v21 = vsub.f32 1.0, %v2778_v61  ;;  %vm2803_vm6 = vmor %vm2801_vm4, %vm2802_vm2  ;;  %v2808_v61 = vor.u32 1.1754944e-38, %v2807_v0 }
 0x8fe   :  { %v2798_v7 = vsub.f32 1.0, %v2797_v54  ;;  %vm2826_vm12 = vcmp.eq.f32.partialorder %v2825_v25, 8.507059e+37 }
 0x8ff   :  { %v2780_v14 = vmul.f32 %v3690_v22, %v2779_v21 }
 0x900   :  { %v2799_v49 = vmul.f32 %v3692_v13, %v2798_v7 }
 0x901   :  { %v3694_v42 = vpop.eup %3693  ;;  %v2781_v24 = vadd.f32 %v3690_v22, %v2780_v14 }
 0x902   :  { %v2800_v28 = vadd.f32 %v3692_v13, %v2799_v49  ;;  %v2817_v43 = vmul.f32 %v3694_v42, %v2815_v17  ;;  %v3696_v51 = vpop.eup %3695  ;;  %vm2822_vm9 = vweird.f32 %v3694_v42  ;;  %v2827_v49 = vand.u32 2147483648, %v2815_v17 }
 0x903   :  { %v2785_v54 = vsel %vm2784_vm5, %v3690_v22, %v2781_v24  ;;  %vm2823_vm11 = vmor %vm2821_vm10, %vm2822_vm9 }
 0x904   :  { %v2790_v1 = vsel %vm2787_vm7, %v2789_v4, %v2785_v54  ;;  %v2804_v21 = vsel %vm2803_vm6, %v3692_v13, %v2800_v28  ;;  %v2818_v12 = vsub.f32 1.0, %v2817_v43  ;;  %v2828_v0 = vor.u32 1.1754944e-38, %v2827_v49  ;;  %v6860_v54 = vld [vmem:[#allocation53_spill] sm:$0xff] }
 0x905   :  { %v2809_v7 = vsel %vm2806_vm8, %v2808_v61, %v2804_v21  ;;  %v2832_v3 = vmul.f32 %v3696_v51, %v2790_v1  ;;  %v6861_v51 = vld [vmem:[#allocation31_spill] sm:$0xff] }
 0x906   :  { %v2831_v9 = vmul.f32 %v2809_v7, %v5942_v52  ;;  %v2819_v14 = vmul.f32 %v3694_v42, %v2818_v12  ;;  %v6858_v52 = vld [vmem:[#allocation54_spill] sm:$0xff]  ;;  %v1980_v21 = vadd.f32 %v6861_v51, %v6860_v54 }
 0x908   :  { %v6018_v44 = vadd.f32 %v2832_v3, %v2831_v9  ;;  %v2820_v55 = vadd.f32 %v3694_v42, %v2819_v14  ;;  %v6859_v9 = vld [vmem:[#allocation70_spill] sm:$0xff] }
 0x909   :  { %v2021_v3 = vadd.f32 %v6859_v9, %v6858_v52 }
 0x90a   :  { %3697 = vtanh.f32 %v6018_v44  ;;  %v2824_v22 = vsel %vm2823_vm11, %v3694_v42, %v2820_v55 }
 0x90b   :  { %v2829_v13 = vsel %vm2826_vm12, %v2828_v0, %v2824_v22 }
 0x910   :  { %v3698_v58 = vpop.eup %3697 }
 0x911   :  { %v2835_v23 = vmul.f32 %v3698_v58, %v2829_v13 }
 0x913   :  { %2860 = vmatmul.f32.vlgmr.msrb.gmra.mxu0 %v2835_v23  ;;  %2880 = vmatmul.f32.vlgmr.msra.gmra.mxu1 %v2835_v23 }
 0x914   :  { %2900 = vmatmul.f32.vlgmr.msra.gmra.mxu2 %v2835_v23  ;;  %2920 = vmatmul.f32.vlgmr.msra.gmra.mxu3 %v2835_v23 }
 0x915   :  { %3154 = vmatpush.msrb.mxu0 %v5665_v33  ;;  %3174 = vmatpush.msra.mxu1 %v5668_v37  ;;  %v6828_v33 = vld [vmem:[#allocation52_spill] sm:$0xff]  ;;  %v6829_v37 = vld [vmem:[#allocation25_spill] sm:$0xff] }
 0x916   :  { %3194 = vmatpush.msra.mxu2 %v5671_v38  ;;  %3214 = vmatpush.msra.mxu3 %v5674_v39  ;;  %v6830_v38 = vld [vmem:[#allocation55_spill] sm:$0xff]  ;;  %v6831_v39 = vld [vmem:[#allocation57_spill] sm:$0xff] }
 0x917   :  { %3155 = vmatpush.msrb.mxu0 %v5677_v35  ;;  %3175 = vmatpush.msra.mxu1 %v5680_v27  ;;  %v6832_v35 = vld [vmem:[#allocation56_spill] sm:$0xff] }
 0x918   :  { %3195 = vmatpush.msra.mxu2 %v5683_v6  ;;  %3215 = vmatpush.msra.mxu3 %v5686_v53  ;;  %v6833_v27 = vld [vmem:[#allocation24_spill] sm:$0xff]  ;;  %v6834_v6 = vld [vmem:[#allocation58_spill] sm:$0xff]  ;;  %v6835_v53 = vld [vmem:[#allocation59_spill] sm:$0xff] }
 0x919   :  { %3156 = vmatpush.msrb.mxu0 %v5689_v48  ;;  %3176 = vmatpush.msra.mxu1 %v5692_v36  ;;  %v6836_v48 = vld [vmem:[#allocation61_spill] sm:$0xff]  ;;  %v6837_v36 = vld [vmem:[#allocation20_spill] sm:$0xff] }
 0x91a   :  { %3196 = vmatpush.msra.mxu2 %v5695_v5  ;;  %3216 = vmatpush.msra.mxu3 %v5698_v30  ;;  %v6838_v5 = vld [vmem:[#allocation60_spill] sm:$0xff]  ;;  %v6839_v30 = vld [vmem:[#allocation19_spill] sm:$0xff] }
 0x91b   :  { %3157 = vmatpush.msrb.mxu0 %v5701_v8  ;;  %3177 = vmatpush.msra.mxu1 %v5704_v10  ;;  %v6840_v8 = vld [vmem:[#allocation22_spill] sm:$0xff]  ;;  %v6841_v10 = vld [vmem:[#allocation33_spill] sm:$0xff] }
 0x91c   :  { %3197 = vmatpush.msra.mxu2 %v5707_v47  ;;  %3217 = vmatpush.msra.mxu3 %v5710_v29  ;;  %v6842_v47 = vld [vmem:[#allocation34_spill] sm:$0xff]  ;;  %v6843_v29 = vld [vmem:[#allocation29_spill] sm:$0xff] }
 0x91d   :  { %3158 = vmatpush.msrb.mxu0 %v5713_v40  ;;  %3178 = vmatpush.msra.mxu1 %v5716_v41  ;;  %v6844_v40 = vld [vmem:[#allocation18_spill] sm:$0xff]  ;;  %v6845_v41 = vld [vmem:[#allocation40_spill] sm:$0xff] }
 0x91e   :  { %3198 = vmatpush.msra.mxu2 %v5719_v32  ;;  %3218 = vmatpush.msra.mxu3 %v5722_v18  ;;  %v6846_v32 = vld [vmem:[#allocation21_spill] sm:$0xff]  ;;  %v6847_v18 = vld [vmem:[#allocation28_spill] sm:$0xff] }
 0x91f   :  { %3159 = vmatpush.msrb.mxu0 %v5725_v2  ;;  %3179 = vmatpush.msra.mxu1 %v5728_v20  ;;  %v6848_v2 = vld [vmem:[#allocation37_spill] sm:$0xff]  ;;  %v6849_v20 = vld [vmem:[#allocation35_spill] sm:$0xff] }
 0x920   :  { %3199 = vmatpush.msra.mxu2 %v5731_v11  ;;  %3219 = vmatpush.msra.mxu3 %v5734_v34  ;;  %v6850_v11 = vld [vmem:[#allocation36_spill] sm:$0xff]  ;;  %v6851_v34 = vld [vmem:[#allocation23_spill] sm:$0xff] }
 0x921   :  { %3160 = vmatpush.msrb.mxu0 %v5737_v56  ;;  %3180 = vmatpush.msra.mxu1 %v5740_v46  ;;  %v6852_v56 = vld [vmem:[#allocation41_spill] sm:$0xff]  ;;  %v6853_v46 = vld [vmem:[#allocation32_spill] sm:$0xff] }
 0x922   :  { %3200 = vmatpush.msra.mxu2 %v5743_v19  ;;  %3220 = vmatpush.msra.mxu3 %v5746_v63  ;;  %v6854_v19 = vld [vmem:[#allocation71_spill] sm:$0xff]  ;;  %v6855_v63 = vld [vmem:[#allocation44_spill] sm:$0xff] }
 0x923   :  { %3161 = vmatpush.msrb.mxu0 %v5749_v26  ;;  %3181 = vmatpush.msra.mxu1 %v5752_v16  ;;  %v1898_v26 = vadd.f32 %v6855_v63, %v6854_v19  ;;  %v6856_v16 = vld [vmem:[#allocation73_spill] sm:$0xff] }
 0x924   :  { %3201 = vmatpush.msra.mxu2 %v5755_v60  ;;  %3221 = vmatpush.msra.mxu3 %v5758_v59  ;;  %v6857_v60 = vld [vmem:[#allocation65_spill] sm:$0xff] }
 0x925   :  { %3162 = vmatpush.msrb.mxu0 %v5761_v15  ;;  %3182 = vmatpush.msra.mxu1 %v5764_v57  ;;  %v1939_v59 = vadd.f32 %v6857_v60, %v6856_v16 }
 0x926   :  { %3202 = vmatpush.msra.mxu2 %v5767_v62  ;;  %3222 = vmatpush.msra.mxu3 %v5770_v45 }
 0x927   :  { %3163 = vmatpush.msrb.mxu0 %v5773_v31  ;;  %3183 = vmatpush.msra.mxu1 %v5776_v50 }
 0x928   :  { %3203 = vmatpush.msra.mxu2 %v6828_v33  ;;  %3223 = vmatpush.msra.mxu3 %v6829_v37 }
 0x929   :  { %3164 = vmatpush.msrb.mxu0 %v6830_v38  ;;  %3184 = vmatpush.msra.mxu1 %v6831_v39 }
 0x92a   :  { %3204 = vmatpush.msra.mxu2 %v6832_v35  ;;  %3224 = vmatpush.msra.mxu3 %v6833_v27 }
 0x92b   :  { %3165 = vmatpush.msrb.mxu0 %v6834_v6  ;;  %3185 = vmatpush.msra.mxu1 %v6835_v53 }
 0x92c   :  { %3205 = vmatpush.msra.mxu2 %v6836_v48  ;;  %3225 = vmatpush.msra.mxu3 %v6837_v36 }
 0x92d   :  { %3166 = vmatpush.msrb.mxu0 %v6838_v5  ;;  %3186 = vmatpush.msra.mxu1 %v6839_v30 }
 0x92e   :  { %3206 = vmatpush.msra.mxu2 %v6840_v8  ;;  %3226 = vmatpush.msra.mxu3 %v6841_v10 }
 0x92f   :  { %3167 = vmatpush.msrb.mxu0 %v6842_v47  ;;  %3187 = vmatpush.msra.mxu1 %v6843_v29 }
 0x930   :  { %3207 = vmatpush.msra.mxu2 %v6844_v40  ;;  %3227 = vmatpush.msra.mxu3 %v6845_v41 }
 0x931   :  { %3168 = vmatpush.msrb.mxu0 %v6846_v32  ;;  %3188 = vmatpush.msra.mxu1 %v6847_v18 }
 0x932   :  { %3208 = vmatpush.msra.mxu2 %v6848_v2  ;;  %3228 = vmatpush.msra.mxu3 %v6849_v20 }
 0x933   :  { %3169 = vmatpush.msrb.mxu0 %v6850_v11  ;;  %3189 = vmatpush.msra.mxu1 %v6851_v34 }
 0x934   :  { %3209 = vmatpush.msra.mxu2 %v6852_v56  ;;  %3229 = vmatpush.msra.mxu3 %v6853_v46 }
 0x990   :  { %v2861_v15 = vpop.f32.mrf.mxu0  ;;  %v2881_v57 = vpop.f32.mrf.mxu1 }
 0x991   :  { %v2924_v62 = vadd.f32 %v2861_v15, %v1898_v26  ;;  %v2925_v45 = vadd.f32 %v2881_v57, %v1939_v59  ;;  %v6863_v59 = vld [vmem:[#allocation27_spill] sm:$0xff] }
 0x992   :  { %v1942_v15 = vadd.f32 %v6863_v59, %v6856_v16  ;;  %v3321_v59 = vld [vmem:[#allocation13 + $0x70] sm:$0xff] }
 0x993   :  { %v3457_v31 = vmul.f32 -1.442695, %v2924_v62  ;;  %v3458_v50 = vmul.f32 -1.442695, %v2925_v45 }
 0x995   :  { %3699 = vpow2.f32 %v3457_v31 }
 0x996   :  { %3701 = vpow2.f32 %v3458_v50 }
 0x997   :  { %v2921_v12 = vpop.f32.mrf.mxu3  ;;  %v2901_v43 = vpop.f32.mrf.mxu2 }
 0x998   :  { %v2927_v42 = vadd.f32 %v2921_v12, %v2021_v3  ;;  %v2926_v55 = vadd.f32 %v2901_v43, %v1980_v21  ;;  %v6864_v3 = vld [vmem:[#allocation50_spill] sm:$0xff]  ;;  %v6865_v21 = vld [vmem:[#allocation49_spill] sm:$0xff] }
 0x999   :  { %v2024_v12 = vadd.f32 %v6864_v3, %v6858_v52  ;;  %v6866_v3 = vld [vmem:[#allocation45_spill] sm:$0xff] }
 0x99a   :  { %v3459_v1 = vmul.f32 -1.442695, %v2927_v42 }
 0x99b   :  { %v3700_v17 = vpop.eup %3699 }
 0x99c   :  { %v3702_v24 = vpop.eup %3701  ;;  %v2931_v4 = vadd.f32 1.0, %v3700_v17  ;;  %3703 = vpow2.f32 %v3459_v1 }
 0x99d   :  { %v2950_v28 = vadd.f32 1.0, %v3702_v24 }
 0x99e   :  { %3705 = vrcp.f32 %v2931_v4  ;;  %v2943_v13 = vand.u32 2147483648, %v2931_v4  ;;  %v2941_v37 = vand.u32 2147483647, %v2931_v4  ;;  %vm2937_vm15 = vweird.f32 %v2931_v4 }
 0x99f   :  { %3707 = vrcp.f32 %v2950_v28  ;;  %v2962_v23 = vand.u32 2147483648, %v2950_v28  ;;  %v2960_v39 = vand.u32 2147483647, %v2950_v28  ;;  %vm2956_vm0 = vweird.f32 %v2950_v28 }
 0x9a0   :  { %v2944_v6 = vor.u32 1.1754944e-38, %v2943_v13  ;;  %vm2942_vm3 = vcmp.eq.f32.partialorder %v2941_v37, 8.507059e+37 }
 0x9a1   :  { %v2963_v36 = vor.u32 1.1754944e-38, %v2962_v23  ;;  %vm2961_vm4 = vcmp.eq.f32.partialorder %v2960_v39, 8.507059e+37 }
 0x9a2   :  { %v3704_v61 = vpop.eup %3703 }
 0x9a3   :  { %v2970_v7 = vadd.f32 1.0, %v3704_v61 }
 0x9a4   :  { %v3706_v14 = vpop.eup %3705 }
 0x9a5   :  { %v3708_v49 = vpop.eup %3707  ;;  %v2933_v25 = vmul.f32 %v3706_v14, %v2931_v4  ;;  %3709 = vrcp.f32 %v2970_v7  ;;  %vm2938_vm13 = vweird.f32 %v3706_v14  ;;  %v2982_v20 = vand.u32 2147483648, %v2970_v7 }
 0x9a6   :  { %v2952_v22 = vmul.f32 %v3708_v49, %v2950_v28  ;;  %3711 = vtanh.f32 %v2926_v55  ;;  %vm2957_vm14 = vweird.f32 %v3708_v49  ;;  %vm2939_vm1 = vmor %vm2937_vm15, %vm2938_vm13  ;;  %vm2976_vm6 = vweird.f32 %v2970_v7 }
 0x9a7   :  { %v2934_v0 = vsub.f32 1.0, %v2933_v25  ;;  %vm2958_vm2 = vmor %vm2956_vm0, %vm2957_vm14  ;;  %v2980_v11 = vand.u32 2147483647, %v2970_v7  ;;  %v2983_v56 = vor.u32 1.1754944e-38, %v2982_v20 }
 0x9a8   :  { %v2953_v58 = vsub.f32 1.0, %v2952_v22 }
 0x9a9   :  { %v2935_v33 = vmul.f32 %v3706_v14, %v2934_v0  ;;  %vm2981_vm8 = vcmp.eq.f32.partialorder %v2980_v11, 8.507059e+37 }
 0x9aa   :  { %v2954_v38 = vmul.f32 %v3708_v49, %v2953_v58 }
 0x9ab   :  { %v3710_v35 = vpop.eup %3709  ;;  %v2936_v27 = vadd.f32 %v3706_v14, %v2935_v33 }
 0x9ac   :  { %v2955_v53 = vadd.f32 %v3708_v49, %v2954_v38  ;;  %v2972_v48 = vmul.f32 %v3710_v35, %v2970_v7  ;;  %v3712_v30 = vpop.eup %3711  ;;  %vm2977_vm5 = vweird.f32 %v3710_v35  ;;  %v1983_v7 = vadd.f32 %v6865_v21, %v6860_v54 }
 0x9ad   :  { %v2940_v5 = vsel %vm2939_vm1, %v3706_v14, %v2936_v27  ;;  %vm2978_vm7 = vmor %vm2976_vm6, %vm2977_vm5 }
 0x9ae   :  { %v2945_v8 = vsel %vm2942_vm3, %v2944_v6, %v2940_v5  ;;  %v2959_v10 = vsel %vm2958_vm2, %v3708_v49, %v2955_v53  ;;  %v2973_v47 = vsub.f32 1.0, %v2972_v48 }
 0x9af   :  { %v2964_v29 = vsel %vm2961_vm4, %v2963_v36, %v2959_v10  ;;  %v2987_v40 = vmul.f32 %v3712_v30, %v2945_v8 }
 0x9b0   :  { %v2986_v41 = vmul.f32 %v2964_v29, %v6018_v44  ;;  %v2974_v32 = vmul.f32 %v3710_v35, %v2973_v47  ;;  %v6862_v44 = vld [vmem:[#allocation75_spill] sm:$0xff] }
 0x9b1   :  { %v1901_v60 = vadd.f32 %v6862_v44, %v6854_v19 }
 0x9b2   :  { %v6094_v18 = vadd.f32 %v2987_v40, %v2986_v41  ;;  %v2975_v2 = vadd.f32 %v3710_v35, %v2974_v32 }
 0x9b4   :  { %3713 = vtanh.f32 %v6094_v18  ;;  %v2979_v34 = vsel %vm2978_vm7, %v3710_v35, %v2975_v2 }
 0x9b5   :  { %v2984_v63 = vsel %vm2981_vm8, %v2983_v56, %v2979_v34 }
 0x9ba   :  { %v3714_v46 = vpop.eup %3713 }
 0x9bb   :  { %v2990_v26 = vmul.f32 %v3714_v46, %v2984_v63 }
 0x9bd   :  { %3015 = vmatmul.f32.vlgmr.msra.gmra.mxu0 %v2990_v26  ;;  %3035 = vmatmul.f32.vlgmr.msrb.gmra.mxu1 %v2990_v26 }
 0x9be   :  { %3055 = vmatmul.f32.vlgmr.msrb.gmra.mxu2 %v2990_v26  ;;  %3075 = vmatmul.f32.vlgmr.msrb.gmra.mxu3 %v2990_v26 }
 0xa3a   :  { %v3016_v57 = vpop.f32.mrf.mxu0  ;;  %v3036_v62 = vpop.f32.mrf.mxu1 }
 0xa3b   :  { %v3079_v45 = vadd.f32 %v3016_v57, %v1901_v60  ;;  %v3080_v31 = vadd.f32 %v3036_v62, %v1942_v15  ;;  %v3320_v15 = vld [vmem:[#allocation13 + $0x68] sm:$0xff]  ;;  %v3319_v57 = vld [vmem:[#allocation13 + $0x60] sm:$0xff]  ;;  %v3318_v62 = vld [vmem:[#allocation13 + $0x58] sm:$0xff] }
 0xa3d   :  { %v3460_v50 = vmul.f32 -1.442695, %v3079_v45  ;;  %v3461_v9 = vmul.f32 -1.442695, %v3080_v31  ;;  %v3317_v45 = vld [vmem:[#allocation13 + $0x50] sm:$0xff]  ;;  %v3316_v31 = vld [vmem:[#allocation13 + $0x48] sm:$0xff] }
 0xa3f   :  { %3715 = vpow2.f32 %v3460_v50  ;;  %v3315_v50 = vld [vmem:[#allocation13 + $0x40] sm:$0xff] }
 0xa40   :  { %3717 = vpow2.f32 %v3461_v9  ;;  %v3314_v9 = vld [vmem:[#allocation13 + $0x38] sm:$0xff] }
 0xa41   :  { %v3076_v42 = vpop.f32.mrf.mxu3  ;;  %v3056_v61 = vpop.f32.mrf.mxu2 }
 0xa42   :  { %v3082_v1 = vadd.f32 %v3076_v42, %v2024_v12  ;;  %v3081_v49 = vadd.f32 %v3056_v61, %v1983_v7  ;;  %v1904_v12 = vadd.f32 %v6866_v3, %v6854_v19  ;;  %v6867_v42 = vld [vmem:[#allocation68_spill] sm:$0xff]  ;;  %v3312_v61 = vld [vmem:[#allocation13 + $0x28] sm:$0xff]  ;;  %v3311_v7 = vld [vmem:[#allocation13 + $0x20] sm:$0xff] }
 0xa43   :  { %v6868_v19 = vld [vmem:[#allocation48_spill] sm:$0xff] }
 0xa44   :  { %v3462_v17 = vmul.f32 -1.442695, %v3082_v1  ;;  %v1945_v1 = vadd.f32 %v6867_v42, %v6856_v16  ;;  %v3309_v16 = vld [vmem:[#allocation13 + $0x10] sm:$0xff] }
 0xa45   :  { %v3716_v24 = vpop.eup %3715 }
 0xa46   :  { %v3718_v4 = vpop.eup %3717  ;;  %v3086_v28 = vadd.f32 1.0, %v3716_v24  ;;  %3719 = vpow2.f32 %v3462_v17 }
 0xa47   :  { %v3105_v43 = vadd.f32 1.0, %v3718_v4  ;;  %v3313_v4 = vld [vmem:[#allocation13 + $0x30] sm:$0xff] }
 0xa48   :  { %3721 = vrcp.f32 %v3086_v28  ;;  %v3098_v23 = vand.u32 2147483648, %v3086_v28  ;;  %v3096_v38 = vand.u32 2147483647, %v3086_v28  ;;  %vm3092_vm11 = vweird.f32 %v3086_v28 }
 0xa49   :  { %3723 = vrcp.f32 %v3105_v43  ;;  %v3117_v33 = vand.u32 2147483648, %v3105_v43  ;;  %v3115_v35 = vand.u32 2147483647, %v3105_v43  ;;  %vm3111_vm12 = vweird.f32 %v3105_v43 }
 0xa4a   :  { %v3099_v53 = vor.u32 1.1754944e-38, %v3098_v23  ;;  %vm3097_vm15 = vcmp.eq.f32.partialorder %v3096_v38, 8.507059e+37 }
 0xa4b   :  { %v3118_v5 = vor.u32 1.1754944e-38, %v3117_v33  ;;  %vm3116_vm0 = vcmp.eq.f32.partialorder %v3115_v35, 8.507059e+37 }
 0xa4c   :  { %v3720_v51 = vpop.eup %3719 }
 0xa4d   :  { %v3125_v14 = vadd.f32 1.0, %v3720_v51 }
 0xa4e   :  { %v3722_v55 = vpop.eup %3721 }
 0xa4f   :  { %v3724_v25 = vpop.eup %3723  ;;  %v3088_v22 = vmul.f32 %v3722_v55, %v3086_v28  ;;  %3725 = vrcp.f32 %v3125_v14  ;;  %vm3093_vm9 = vweird.f32 %v3722_v55  ;;  %v3137_v34 = vand.u32 2147483648, %v3125_v14 }
 0xa50   :  { %v3107_v0 = vmul.f32 %v3724_v25, %v3105_v43  ;;  %3727 = vtanh.f32 %v3081_v49  ;;  %vm3112_vm10 = vweird.f32 %v3724_v25  ;;  %vm3094_vm13 = vmor %vm3092_vm11, %vm3093_vm9  ;;  %vm3131_vm2 = vweird.f32 %v3125_v14 }
 0xa51   :  { %v3089_v58 = vsub.f32 1.0, %v3088_v22  ;;  %vm3113_vm14 = vmor %vm3111_vm12, %vm3112_vm10  ;;  %v3135_v56 = vand.u32 2147483647, %v3125_v14  ;;  %v3138_v63 = vor.u32 1.1754944e-38, %v3137_v34  ;;  %v3308_v22 = vld [vmem:[#allocation13 + $0x8] sm:$0xff] }
 0xa52   :  { %v3108_v13 = vsub.f32 1.0, %v3107_v0 }
 0xa53   :  { %v3090_v37 = vmul.f32 %v3722_v55, %v3089_v58  ;;  %vm3136_vm4 = vcmp.eq.f32.partialorder %v3135_v56, 8.507059e+37  ;;  %v3307_v58 = vld [vmem:[#allocation13] sm:$0xff] }
 0xa54   :  { %v3109_v39 = vmul.f32 %v3724_v25, %v3108_v13 }
 0xa55   :  { %v3726_v27 = vpop.eup %3725  ;;  %v3091_v6 = vadd.f32 %v3722_v55, %v3090_v37 }
 0xa56   :  { %v3110_v48 = vadd.f32 %v3724_v25, %v3109_v39  ;;  %v3127_v36 = vmul.f32 %v3726_v27, %v3125_v14  ;;  %v3728_v8 = vpop.eup %3727  ;;  %vm3132_vm1 = vweird.f32 %v3726_v27  ;;  %v3310_v14 = vld [vmem:[#allocation13 + $0x18] sm:$0xff]  ;;  %v6869_v39 = vld [vmem:[#allocation51_spill] sm:$0xff] }
 0xa57   :  { %v3095_v30 = vsel %vm3094_vm13, %v3722_v55, %v3091_v6  ;;  %vm3133_vm3 = vmor %vm3131_vm2, %vm3132_vm1  ;;  %v2027_v55 = vadd.f32 %v6868_v19, %v6858_v52  ;;  %v1986_v35 = vadd.f32 %v6869_v39, %v6860_v54 }
 0xa58   :  { %v3100_v10 = vsel %vm3097_vm15, %v3099_v53, %v3095_v30  ;;  %v3114_v47 = vsel %vm3113_vm14, %v3724_v25, %v3110_v48  ;;  %v3128_v29 = vsub.f32 1.0, %v3127_v36 }
 0xa59   :  { %v3119_v40 = vsel %vm3116_vm0, %v3118_v5, %v3114_v47  ;;  %v3142_v41 = vmul.f32 %v3728_v8, %v3100_v10 }
 0xa5a   :  { %v3141_v32 = vmul.f32 %v3119_v40, %v6094_v18  ;;  %v3129_v2 = vmul.f32 %v3726_v27, %v3128_v29  ;;  %v3322_v18 = vld [vmem:[#allocation13 + $0x78] sm:$0xff] }
 0xa5b   :  { %3327 = vmatpush.msra.mxu0 %v3322_v18 }
 0xa5c   :  { %v6106_v20 = vadd.f32 %v3142_v41, %v3141_v32  ;;  %v3130_v11 = vadd.f32 %v3726_v27, %v3129_v2 }
 0xa5d   :  { %3328 = vmatpush.msra.mxu0 %v3321_v59 }
 0xa5e   :  { %3729 = vtanh.f32 %v6106_v20  ;;  %v3134_v46 = vsel %vm3133_vm3, %v3726_v27, %v3130_v11  ;;  %vm3370_vm3 = vcmask 7168  }
 0xa5f   :  { %v3139_v44 = vsel %vm3136_vm4, %v3138_v63, %v3134_v46  ;;  %3329 = vmatpush.msra.mxu0 %v3320_v15 }
 0xa61   :  { %3330 = vmatpush.msra.mxu0 %v3319_v57 }
 0xa63   :  { %3331 = vmatpush.msra.mxu0 %v3318_v62 }
 0xa64   :  { %v3730_v26 = vpop.eup %3729 }
 0xa65   :  { %v3145_v60 = vmul.f32 %v3730_v26, %v3139_v44  ;;  %3332 = vmatpush.msra.mxu0 %v3317_v45 }
 0xa67   :  { %3170 = vmatmul.f32.vlgmr.msrb.gmra.mxu0 %v3145_v60  ;;  %3190 = vmatmul.f32.vlgmr.msra.gmra.mxu1 %v3145_v60 }
 0xa68   :  { %3210 = vmatmul.f32.vlgmr.msra.gmra.mxu2 %v3145_v60  ;;  %3230 = vmatmul.f32.vlgmr.msra.gmra.mxu3 %v3145_v60 }
 0xa69   :  { %3333 = vmatpush.msra.mxu0 %v3316_v31 }
 0xa6b   :  { %3334 = vmatpush.msra.mxu0 %v3315_v50 }
 0xa6d   :  { %3335 = vmatpush.msra.mxu0 %v3314_v9 }
 0xa6f   :  { %3336 = vmatpush.msra.mxu0 %v3313_v4 }
 0xa71   :  { %3337 = vmatpush.msra.mxu0 %v3312_v61 }
 0xa73   :  { %3338 = vmatpush.msra.mxu0 %v3311_v7 }
 0xa75   :  { %3339 = vmatpush.msra.mxu0 %v3310_v14  ;;  %v3357_v14 = vlaneseq }
 0xa77   :  { %3340 = vmatpush.msra.mxu0 %v3309_v16  ;;  %v3358_v19 = vand.u32 127, %v3357_v14 }
 0xa79   :  { %3341 = vmatpush.msra.mxu0 %v3308_v22 }
 0xa7b   :  { %3342 = vmatpush.msra.mxu0 %v3307_v58 }
 0xae4   :  { %v3171_v17 = vpop.f32.mrf.mxu0  ;;  %v3191_v24 = vpop.f32.mrf.mxu1 }
 0xae5   :  { %v3234_v28 = vadd.f32 %v3171_v17, %v1904_v12  ;;  %v3235_v43 = vadd.f32 %v3191_v24, %v1945_v1  ;;  %v4015_v24 = vmov 0  }
 0xae6   :  { %3489 = vset.pattern.permute.xlu0 %v4015_v24 }
 0xae7   :  { %v3463_v51 = vmul.f32 -1.442695, %v3234_v28  ;;  %v3464_v21 = vmul.f32 -1.442695, %v3235_v43  ;;  %v3356_v43 = vld [vmem:[%s6128_s1] sm:$0xff] }
 0xae8   :  { %vm3368_vm2 = vcmp.eq.s32.totalorder %v3356_v43, 0 }
 0xae9   :  { %3731 = vpow2.f32 %v3463_v51 }
 0xaea   :  { %3733 = vpow2.f32 %v3464_v21 }
 0xaeb   :  { %v3231_v49 = vpop.f32.mrf.mxu3  ;;  %v3211_v38 = vpop.f32.mrf.mxu2 }
 0xaec   :  { %v3237_v25 = vadd.f32 %v3231_v49, %v2027_v55  ;;  %v3236_v53 = vadd.f32 %v3211_v38, %v1986_v35 }
 0xaee   :  { %v3465_v0 = vmul.f32 -1.442695, %v3237_v25 }
 0xaef   :  { %v3732_v13 = vpop.eup %3731 }
 0xaf0   :  { %v3734_v23 = vpop.eup %3733  ;;  %v3241_v33 = vadd.f32 1.0, %v3732_v13  ;;  %3735 = vpow2.f32 %v3465_v0 }
 0xaf1   :  { %v3260_v37 = vadd.f32 1.0, %v3734_v23 }
 0xaf2   :  { %3737 = vrcp.f32 %v3241_v33  ;;  %v3253_v10 = vand.u32 2147483648, %v3241_v33  ;;  %v3251_v40 = vand.u32 2147483647, %v3241_v33  ;;  %vm3247_vm7 = vweird.f32 %v3241_v33 }
 0xaf3   :  { %3739 = vrcp.f32 %v3260_v37  ;;  %v3272_v47 = vand.u32 2147483648, %v3260_v37  ;;  %v3270_v32 = vand.u32 2147483647, %v3260_v37  ;;  %vm3266_vm8 = vweird.f32 %v3260_v37 }
 0xaf4   :  { %v3254_v11 = vor.u32 1.1754944e-38, %v3253_v10  ;;  %vm3252_vm11 = vcmp.eq.f32.partialorder %v3251_v40, 8.507059e+37 }
 0xaf5   :  { %v3273_v46 = vor.u32 1.1754944e-38, %v3272_v47  ;;  %vm3271_vm12 = vcmp.eq.f32.partialorder %v3270_v32, 8.507059e+37 }
 0xaf6   :  { %v3736_v52 = vpop.eup %3735 }
 0xaf7   :  { %v3280_v27 = vadd.f32 1.0, %v3736_v52 }
 0xaf8   :  { %v3738_v6 = vpop.eup %3737 }
 0xaf9   :  { %v3740_v48 = vpop.eup %3739  ;;  %v3243_v36 = vmul.f32 %v3738_v6, %v3241_v33  ;;  %3741 = vrcp.f32 %v3280_v27  ;;  %vm3248_vm5 = vweird.f32 %v3738_v6  ;;  %v3292_v50 = vand.u32 2147483648, %v3280_v27 }
 0xafa   :  { %v3262_v5 = vmul.f32 %v3740_v48, %v3260_v37  ;;  %3743 = vtanh.f32 %v3236_v53  ;;  %vm3267_vm6 = vweird.f32 %v3740_v48  ;;  %vm3249_vm9 = vmor %vm3247_vm7, %vm3248_vm5  ;;  %vm3286_vm14 = vweird.f32 %v3280_v27 }
 0xafb   :  { %v3244_v30 = vsub.f32 1.0, %v3243_v36  ;;  %vm3268_vm10 = vmor %vm3266_vm8, %vm3267_vm6  ;;  %v3290_v9 = vand.u32 2147483647, %v3280_v27  ;;  %v3293_v12 = vor.u32 1.1754944e-38, %v3292_v50 }
 0xafc   :  { %v3263_v8 = vsub.f32 1.0, %v3262_v5 }
 0xafd   :  { %v3245_v29 = vmul.f32 %v3738_v6, %v3244_v30  ;;  %vm3291_vm0 = vcmp.eq.f32.partialorder %v3290_v9, 8.507059e+37 }
 0xafe   :  { %v3264_v41 = vmul.f32 %v3740_v48, %v3263_v8 }
 0xaff   :  { %v3742_v2 = vpop.eup %3741  ;;  %v3246_v54 = vadd.f32 %v3738_v6, %v3245_v29 }
 0xb00   :  { %v3265_v34 = vadd.f32 %v3740_v48, %v3264_v41  ;;  %v3282_v56 = vmul.f32 %v3742_v2, %v3280_v27  ;;  %v3744_v26 = vpop.eup %3743  ;;  %vm3287_vm13 = vweird.f32 %v3742_v2 }
 0xb01   :  { %v3250_v63 = vsel %vm3249_vm9, %v3738_v6, %v3246_v54  ;;  %vm3288_vm15 = vmor %vm3286_vm14, %vm3287_vm13 }
 0xb02   :  { %v3255_v44 = vsel %vm3252_vm11, %v3254_v11, %v3250_v63  ;;  %v3269_v60 = vsel %vm3268_vm10, %v3740_v48, %v3265_v34  ;;  %v3283_v18 = vsub.f32 1.0, %v3282_v56 }
 0xb03   :  { %v3274_v59 = vsel %vm3271_vm12, %v3273_v46, %v3269_v60  ;;  %v3297_v15 = vmul.f32 %v3744_v26, %v3255_v44 }
 0xb04   :  { %v3296_v57 = vmul.f32 %v3274_v59, %v6106_v20  ;;  %v3284_v62 = vmul.f32 %v3742_v2, %v3283_v18  ;;  %v3490_v20 = vld [vmem:[%s6136_s9] ss:$0 sm:$0xff] }
 0xb06   :  { %v3298_v45 = vadd.f32 %v3297_v15, %v3296_v57  ;;  %v3285_v31 = vadd.f32 %v3742_v2, %v3284_v62 }
 0xb08   :  { %3745 = vtanh.f32 %v3298_v45  ;;  %v3289_v3 = vsel %vm3288_vm15, %v3742_v2, %v3285_v31 }
 0xb09   :  { %v3294_v1 = vsel %vm3291_vm0, %v3293_v12, %v3289_v3 }
 0xb0e   :  { %v3746_v42 = vpop.eup %3745 }
 0xb0f   :  { %v3300_v17 = vmul.f32 %v3746_v42, %v3294_v1 }
 0xb11   :  { %3343 = vmatmul.f32.vlgmr.msra.gmra.mxu0 %v3300_v17 }
 0xb8e   :  { %v3344_v4 = vpop.f32.mrf.mxu0 }
 0xb8f   :  { %v3345_v28 = vadd.f32 %v3490_v20, %v3344_v4 }
 0xb91   :  { %3347 = vmax.xlane.f32.xlu0 %v3345_v28 }
 0xba5   :  { %3360 = vperm.xlu0 %3489, %v3356_v43  }
 0xc04   :  { %v3348_v61 = vpop.xlane.xlu0 %3347 }
 0xc05   :  { %v3349_v51 = vsub.f32 %v3345_v28, %v3348_v61 }
 0xc07   :  { %v3350_v21 = vmul.f32 1.442695, %v3349_v51 }
 0xc09   :  { %3747 = vpow2.f32 %v3350_v21 }
 0xc0f   :  { %v3748_v7 = vpop.eup %3747 }
 0xc10   :  { %3352 = vadd.xlane.f32.xlu1 %v3748_v7 }
 0xc17   :  { %v3361_v55 = vpop.permute.xlu0 %3360 }
 0xc18   :  { %vm3362_vm1 = vcmp.eq.s32.totalorder %v3358_v19, %v3361_v55 }
 0xc19   :  { %v3363_v16 = vsel %vm3362_vm1, %v3345_v28, -inf }
 0xc1a   :  { %3364 = vmax.xlane.f32.xlu1 %v3363_v16 }
 0xc83   :  { %v3353_v49 = vpop.xlane.xlu1 %3352 }
 0xc84   :  { %3749 = vlog2.f32 %v3353_v49 }
 0xc8a   :  { %v3750_v25 = vpop.eup %3749 }
 0xc8b   :  { %v3355_v22 = vmul.f32 0.6931472, %v3750_v25 }
 0xc8d   :  { %v3366_v0 = vadd.f32 %v3355_v22, %v3348_v61  ;;  %v3365_v58 = vpop.xlane.xlu1 %3364 }
 0xc8f   :  { %v3367_v13 = vsub.f32 %v3366_v0, %v3365_v58 }
 0xc91   :  { %v3369_v23 = vsel %vm3368_vm2, 0.0, %v3367_v13 }
 0xc92   :  { %3371 = vst.msk [vmem:[%s6137_s10] sm:$0xff] %vm3370_vm3, %v3369_v23 }
 0xc93   :  { %3376 = vsyncpa [#allocation7], 1 }
 0xc94   :  { %3377 = vsyncpa [#allocation9], 1 }
 0xc95   :  { %3378 = vsyncpa [#allocation12], 1 }

</bundles_post_ra>
